<compile_context>
chip_gen: v6e
topology: v6e:2x2x1
jax: 0.10.0
libtpu: 0.0.40
codegen_flags: <defaults>
</compile_context>

<pallas_src>
import numpy as np

import jax
import jax.numpy as jnp
from jax.experimental import pallas as pl
from jax.experimental.pallas import tpu as pltpu

NUM_CLASSES = 10  # args.num_classes for CIFAR-10

# Static geometry fixed by the PyTorch module (input must be 3x32x32).
H1, C1_IN, C1_OUT, K = 32, 3, 32, 5     # conv1: 3 -> 32, k=5, valid
OH1 = H1 - K + 1                        # 28
PH1 = OH1 // 2                          # 14   (after 2x2 maxpool)
H2, C2_IN, C2_OUT = PH1, C1_OUT, 64     # conv2: 32 -> 64, k=5, valid
OH2 = H2 - K + 1                        # 10
PH2 = OH2 // 2                          # 5
FC1_IN = C2_OUT * PH2 * PH2             # 1600
FC1_OUT = 128

LHS1_K = K * H1 * C1_IN                 # 480   conv1 contraction (taps folded)
CONV1_N = PH1 * C1_OUT                  # 448   per even/odd-w half
CONV2_KT = PH1 * C1_OUT                 # 448   conv2 contraction per tap
CONV2_N = PH2 * C2_OUT                  # 320


# ----------------------------------------------------------------------------
# The single fused kernel: one block of `bb` images per grid step, everything
# stays in VMEM.  Batch is stacked along the M (row) dim of every matmul.
# ----------------------------------------------------------------------------
def _fused_forward_kernel(x_ref, b1e_ref, b1o_ref, c1b_ref,
                          b2e_ref, b2o_ref, c2b_ref,
                          w1_ref, fb1_ref, w2_ref, fb2_ref,
                          o_ref, lhs2_s, p2_s):
    f32 = jnp.float32
    bf16 = jnp.bfloat16
    bb = o_ref.shape[0]                       # images in this grid step
    half = bb * PH1

    # ---- conv1: two tap-folded banded matmuls (even / odd output-w columns).
    x = x_ref[...]                                               # (bb*28, 480) bf16
    even = jnp.dot(x, b1e_ref[...], preferred_element_type=f32)  # (bb*28, 448)
    odd = jnp.dot(x, b1o_ref[...], preferred_element_type=f32)
    wmax = jnp.maximum(even, odd)                 # 2x2 pool, W direction (VPU)
    # H direction: wrapper ordered rows as [even-h rows | odd-h rows] per block,
    # so the pool is an elementwise max of two contiguous halves.
    hmax = jnp.maximum(wmax[:half, :], wmax[half:, :])           # (bb*14, 448)
    p1 = jnp.maximum(hmax + c1b_ref[...], 0.0)                   # bias + relu
    # dropout1: identity in eval mode.

    # ---- conv2 LHS gather: per-image 10-row windows of p1, one band per tap.
    for b in range(bb):
        base = b * PH1
        for kh in range(K):
            lhs2_s[kh, b * OH2:(b + 1) * OH2, :] = (
                p1[base + kh:base + kh + OH2, :])

    # ---- conv2: 2*K well-shaped (bb*10, 448)x(448, 320) MXU passes.
    acc_e = jnp.zeros((bb * OH2, CONV2_N), f32)
    acc_o = jnp.zeros((bb * OH2, CONV2_N), f32)
    for kh in range(K):
        lhs = lhs2_s[kh].astype(bf16)
        acc_e = acc_e + jnp.dot(lhs, b2e_ref[kh], preferred_element_type=f32)
        acc_o = acc_o + jnp.dot(lhs, b2o_ref[kh], preferred_element_type=f32)
    t2 = jnp.maximum(jnp.maximum(acc_e, acc_o) + c2b_ref[...], 0.0)  # (bb*10, 320)
    # dropout2: identity in eval mode.

    # ---- 2x2 pool (H direction) fused with the CHW-flatten gather for fc1.
    for b in range(bb):
        for ph in range(PH2):
            r = b * OH2 + 2 * ph
            p2_s[ph, b:b + 1, :] = jnp.maximum(t2[r:r + 1, :], t2[r + 1:r + 2, :])

    # ---- fc1 (flatten permutation pre-folded into w1): 5 batched dots -> relu.
    z1 = jnp.zeros((bb, FC1_OUT), f32)
    for ph in range(PH2):
        z1 = z1 + jnp.dot(p2_s[ph].astype(bf16), w1_ref[ph],
                          preferred_element_type=f32)
    h1 = jnp.maximum(z1 + fb1_ref[...], 0.0)                         # (bb, 128)
    logits = jnp.dot(h1.astype(bf16), w2_ref[...],
                     preferred_element_type=f32) + fb2_ref[...]      # (bb, 10)

    # ---- log_softmax (max-stabilized) over the 10 classes.
    m = jnp.max(logits, axis=-1, keepdims=True)
    zc = logits - m
    lse = jnp.log(jnp.sum(jnp.exp(zc), axis=-1, keepdims=True))
    o_ref[...] = (zc - lse).astype(o_ref.dtype)


# ----------------------------------------------------------------------------
# Parameter preparation (host-side numpy, done once): banded conv matrices,
# tiled biases and the flatten-permuted fc1 weight.  Matmul weights -> bf16.
# ----------------------------------------------------------------------------
def _banded_conv_halves(w_oihw, w_in):
    """Conv weight (Cout,Cin,KH,KW) -> per-kh banded matrices mapping one
    (H, W*Cin) input row-slab to the even-w / odd-w output columns, each of
    width (OW/2)*Cout.  out[h, (w//2)*Cout + co] = sum x[h+kh, w+kw, ci]*W."""
    w = np.asarray(w_oihw, np.float32)
    cout, cin, KH, KW = w.shape
    ow = w_in - KW + 1
    half = ow // 2
    be = np.zeros((KH, w_in * cin, half * cout), np.float32)
    bo = np.zeros((KH, w_in * cin, half * cout), np.float32)
    for kh in range(KH):
        for kw in range(KW):
            tap = w[:, :, kh, kw].T                   # (Cin, Cout)
            for wo in range(ow):
                r0 = (wo + kw) * cin
                c0 = (wo // 2) * cout
                dst = be if wo % 2 == 0 else bo
                dst[kh, r0:r0 + cin, c0:c0 + cout] = tap
    return be, bo


def prepare_params(params):
    """Torch-layout params -> kernel operands (numpy, host side, once)."""
    b1e, b1o = _banded_conv_halves(params["conv1_w"], H1)        # (5, 96, 448)
    # conv1 taps folded into the contraction dim -> (480, 448) each
    b1e = b1e.reshape(LHS1_K, CONV1_N)
    b1o = b1o.reshape(LHS1_K, CONV1_N)
    b2e, b2o = _banded_conv_halves(params["conv2_w"], H2)        # (5, 448, 320)
    c1b = np.tile(np.asarray(params["conv1_b"], np.float32), PH1).reshape(1, -1)
    c2b = np.tile(np.asarray(params["conv2_b"], np.float32), PH2).reshape(1, -1)
    # fc1: fold PyTorch's (C,H,W) flatten order into the weight so the pooled
    # (H, W*C) map feeds fc1 directly (no activation transpose in the graph).
    w1 = np.asarray(params["fc1_w"], np.float32).reshape(FC1_OUT, C2_OUT, PH2, PH2)
    w1 = np.transpose(w1, (2, 3, 1, 0)).reshape(PH2, PH2 * C2_OUT, FC1_OUT)
    fb1 = np.asarray(params["fc1_b"], np.float32).reshape(1, FC1_OUT)
    w2 = np.asarray(params["fc2_w"], np.float32).T               # (128, 10)
    fb2 = np.asarray(params["fc2_b"], np.float32).reshape(1, NUM_CLASSES)

    bf = jnp.bfloat16
    return dict(
        b1e=jnp.asarray(b1e, bf), b1o=jnp.asarray(b1o, bf), c1b=jnp.asarray(c1b),
        b2e=jnp.asarray(b2e, bf), b2o=jnp.asarray(b2o, bf), c2b=jnp.asarray(c2b),
        w1=jnp.asarray(w1, bf), fb1=jnp.asarray(fb1),
        w2=jnp.asarray(w2, bf), fb2=jnp.asarray(fb2))


# ----------------------------------------------------------------------------
# Forward wrapper: one pallas_call, grid over batch blocks.
# ----------------------------------------------------------------------------
_W_ORDER = ("b1e", "b1o", "c1b", "b2e", "b2o", "c2b", "w1", "fb1", "w2", "fb2")


def cifar10_classifier_forward(x_nchw, prep, batch_block=32):
    """x_nchw: (N, 3, 32, 32) float32 -> log-probs (N, NUM_CLASSES)."""
    n = x_nchw.shape[0]
    bb = int(min(batch_block, n))
    nb = -(-n // bb)
    n_pad = nb * bb

    x = x_nchw.astype(jnp.float32)
    if n_pad != n:
        x = jnp.concatenate(
            [x, jnp.zeros((n_pad - n,) + x.shape[1:], x.dtype)], axis=0)

    # NCHW -> (N, H, W*C), then build the tap-folded conv1 LHS (27 KB/image in
    # bf16) with rows ordered [even-h | odd-h] per batch block so the in-kernel
    # H-pool is a contiguous half-vs-half max.  Cheap XLA-side layout prep.
    xr = jnp.transpose(x, (0, 2, 3, 1)).reshape(n_pad, H1, H1 * C1_IN)
    lhs = jnp.concatenate([xr[:, kh:kh + OH1, :] for kh in range(K)], axis=-1)
    lhs = lhs.reshape(nb, bb, PH1, 2, LHS1_K)          # h = 2*ph + parity
    lhs = jnp.transpose(lhs, (0, 3, 1, 2, 4))          # (block, parity, image, ph)
    lhs = lhs.reshape(n_pad * OH1, LHS1_K).astype(jnp.bfloat16)

    def resident(arr):
        zeros = (0,) * arr.ndim
        return pl.BlockSpec(arr.shape, lambda i, _z=zeros: _z)

    weights = [prep[k] for k in _W_ORDER]

    flops = 2 * n_pad * (
        OH1 * LHS1_K * (OH1 * C1_OUT)                  # conv1 (both halves)
        + OH2 * (K * CONV2_KT) * (OH2 * C2_OUT)        # conv2 (both halves)
        + FC1_IN * FC1_OUT + FC1_OUT * NUM_CLASSES)
    bytes_accessed = int(lhs.size * lhs.dtype.itemsize
                         + sum(int(w.size) * w.dtype.itemsize for w in weights)
                         + n_pad * NUM_CLASSES * 4)

    out = pl.pallas_call(
        _fused_forward_kernel,
        out_shape=jax.ShapeDtypeStruct((n_pad, NUM_CLASSES), jnp.float32),
        grid=(nb,),
        in_specs=[pl.BlockSpec((bb * OH1, LHS1_K), lambda i: (i, 0))]
                 + [resident(w) for w in weights],
        out_specs=pl.BlockSpec((bb, NUM_CLASSES), lambda i: (i, 0)),
        scratch_shapes=[
            pltpu.VMEM((K, bb * OH2, CONV2_KT), jnp.float32),   # conv2 tap-banded LHS
            pltpu.VMEM((PH2, bb, CONV2_N), jnp.float32),        # pooled2 (fc1 LHS)
        ],
        compiler_params=pltpu.CompilerParams(
            dimension_semantics=("parallel",),
            vmem_limit_bytes=48 * 1024 * 1024),
        cost_estimate=pl.CostEstimate(flops=flops,
                                      transcendentals=(NUM_CLASSES + 1) * n_pad,
                                      bytes_accessed=bytes_accessed),
    )(lhs, *weights)
    return out[:n]


# ----------------------------------------------------------------------------
# Pure-XLA reference (same math, torch layouts) used as an in-script check.
# ----------------------------------------------------------------------------
def reference_forward(x_nchw, params):
    dn = ("NCHW", "OIHW", "NCHW")
    y = jax.lax.conv_general_dilated(x_nchw, params["conv1_w"], (1, 1), "VALID",
                                     dimension_numbers=dn)
    y = jax.nn.relu(y + params["conv1_b"].reshape(1, -1, 1, 1))
    y = jax.lax.reduce_window(y, -jnp.inf, jax.lax.max,
                              (1, 1, 2, 2), (1, 1, 2, 2), "VALID")
    y = jax.lax.conv_general_dilated(y, params["conv2_w"], (1, 1), "VALID",
                                     dimension_numbers=dn)
    y = jax.nn.relu(y + params["conv2_b"].reshape(1, -1, 1, 1))
    y = jax.lax.reduce_window(y, -jnp.inf, jax.lax.max,
                              (1, 1, 2, 2), (1, 1, 2, 2), "VALID")
    y = y.reshape(y.shape[0], -1)                       # torch (C,H,W) flatten
    y = jax.nn.relu(y @ params["fc1_w"].T + params["fc1_b"])
    y = y @ params["fc2_w"].T + params["fc2_b"]
    return jax.nn.log_softmax(y, axis=-1)


# ----------------------------------------------------------------------------
# Deterministic synthetic parameters in the PyTorch layouts.
# ----------------------------------------------------------------------------
def init_params(key):
    ks = jax.random.split(key, 8)

    def _w(k, shape, fan_in):
        return jax.random.normal(k, shape, jnp.float32) / np.sqrt(fan_in)

    return {
        # torch layouts: conv (Cout, Cin, KH, KW); linear (out_features, in_features)
        "conv1_w": _w(ks[0], (C1_OUT, C1_IN, K, K), C1_IN * K * K),
        "conv1_b": _w(ks[1], (C1_OUT,), C1_IN * K * K),
        "conv2_w": _w(ks[2], (C2_OUT, C2_IN, K, K), C2_IN * K * K),
        "conv2_b": _w(ks[3], (C2_OUT,), C2_IN * K * K),
        "fc1_w": _w(ks[4], (FC1_OUT, FC1_IN), FC1_IN),
        "fc1_b": _w(ks[5], (FC1_OUT,), FC1_IN),
        "fc2_w": _w(ks[6], (NUM_CLASSES, FC1_OUT), FC1_OUT),
        "fc2_b": _w(ks[7], (NUM_CLASSES,), FC1_OUT),
    }


if __name__ == "__main__":
    key = jax.random.PRNGKey(0)
    k_params, k_x_small, k_x_big = jax.random.split(key, 3)

    params = init_params(k_params)
    prep = prepare_params(params)                    # host-side, once
    fwd = jax.jit(cifar10_classifier_forward)
    ref = jax.jit(reference_forward)

    # Tolerance note: the kernel uses bf16 MXU operands with f32 accumulation,
    # and the XLA f32 reference itself uses the MXU's reduced-precision default;
    # structural/layout bugs would be O(1) off, so 3e-1 still catches them.
    TOL = 3e-1

    # (1) Small batch (single grid block, bb = 2).  Spatial must be 32x32, C=3.
    x_small = jax.random.normal(k_x_small, (2, C1_IN, H1, H1), jnp.float32)
    out_small = jax.block_until_ready(fwd(x_small, prep))
    assert out_small.shape == (2, NUM_CLASSES)
    err = float(jnp.max(jnp.abs(out_small - ref(x_small, params))))
    assert err < TOL, f"kernel/reference mismatch (n=2): max abs err = {err}"

    # (2) Batched path: 50 images -> two 32-image grid blocks (with padding),
    #     exercising the M-batched matmuls and the multi-block parallel grid.
    x_big = jax.random.normal(k_x_big, (50, C1_IN, H1, H1), jnp.float32)
    out_big = jax.block_until_ready(fwd(x_big, prep))
    assert out_big.shape == (50, NUM_CLASSES)
    err_big = float(jnp.max(jnp.abs(out_big - ref(x_big, params))))
    assert err_big < TOL, f"kernel/reference mismatch (n=50): max abs err = {err_big}"

    print("KERNEL_OK")
</pallas_src>

<mosaic_0001>
module attributes {stable_mosaic.version = 11 : i64} {
  func.func @_fused_forward_kernel(%arg0: i32, %arg1: memref<56x480xbf16, #tpu.memory_space<vmem>>, %arg2: memref<480x448xbf16, #tpu.memory_space<vmem>>, %arg3: memref<480x448xbf16, #tpu.memory_space<vmem>>, %arg4: memref<1x448xf32, #tpu.memory_space<vmem>>, %arg5: memref<5x448x320xbf16, #tpu.memory_space<vmem>>, %arg6: memref<5x448x320xbf16, #tpu.memory_space<vmem>>, %arg7: memref<1x320xf32, #tpu.memory_space<vmem>>, %arg8: memref<5x320x128xbf16, #tpu.memory_space<vmem>>, %arg9: memref<1x128xf32, #tpu.memory_space<vmem>>, %arg10: memref<128x10xbf16, #tpu.memory_space<vmem>>, %arg11: memref<1x10xf32, #tpu.memory_space<vmem>>, %arg12: memref<2x10xf32, #tpu.memory_space<vmem>>, %arg13: memref<5x20x448xf32, #tpu.memory_space<vmem>>, %arg14: memref<5x2x320xf32, #tpu.memory_space<vmem>>) attributes {dimension_semantics = [#tpu.dimension_semantics<parallel>], iteration_bounds = array<i64: 1>, scalar_prefetch = 0 : i64, scratch_operands = 2 : i64, tpu.core_type = #tpu.core_type<tc>, window_params = [{transform_indices = @transform_0, window_bounds = array<i64: 56, 480>}, {pipeline_mode = #tpu.pipeline_mode<synchronous>, transform_indices = @transform_1, window_bounds = array<i64: 480, 448>}, {pipeline_mode = #tpu.pipeline_mode<synchronous>, transform_indices = @transform_2, window_bounds = array<i64: 480, 448>}, {pipeline_mode = #tpu.pipeline_mode<synchronous>, transform_indices = @transform_3, window_bounds = array<i64: 1, 448>}, {pipeline_mode = #tpu.pipeline_mode<synchronous>, transform_indices = @transform_4, window_bounds = array<i64: 5, 448, 320>}, {pipeline_mode = #tpu.pipeline_mode<synchronous>, transform_indices = @transform_5, window_bounds = array<i64: 5, 448, 320>}, {pipeline_mode = #tpu.pipeline_mode<synchronous>, transform_indices = @transform_6, window_bounds = array<i64: 1, 320>}, {pipeline_mode = #tpu.pipeline_mode<synchronous>, transform_indices = @transform_7, window_bounds = array<i64: 5, 320, 128>}, {pipeline_mode = #tpu.pipeline_mode<synchronous>, transform_indices = @transform_8, window_bounds = array<i64: 1, 128>}, {pipeline_mode = #tpu.pipeline_mode<synchronous>, transform_indices = @transform_9, window_bounds = array<i64: 128, 10>}, {pipeline_mode = #tpu.pipeline_mode<synchronous>, transform_indices = @transform_10, window_bounds = array<i64: 1, 10>}, {transform_indices = @transform_11, window_bounds = array<i64: 2, 10>}]} {
    %c0 = arith.constant 0 : index
    %c0_0 = arith.constant 0 : index
    %0 = vector.load %arg1[%c0, %c0_0] : memref<56x480xbf16, #tpu.memory_space<vmem>>, vector<56x480xbf16>
    %c0_1 = arith.constant 0 : index
    %c0_2 = arith.constant 0 : index
    %1 = vector.load %arg2[%c0_1, %c0_2] : memref<480x448xbf16, #tpu.memory_space<vmem>>, vector<480x448xbf16>
    %cst = arith.constant dense<0.000000e+00> : vector<56x448xf32>
    %2 = tpu.matmul %0, %1, %cst {dimension_numbers = #tpu.dot_dimension_numbers<[1], [0], [0], [1], [0, 0, 1, 1], [], []>} : vector<56x480xbf16>, vector<480x448xbf16>, vector<56x448xf32> -> vector<56x448xf32>
    %c0_3 = arith.constant 0 : index
    %c0_4 = arith.constant 0 : index
    %3 = vector.load %arg3[%c0_3, %c0_4] : memref<480x448xbf16, #tpu.memory_space<vmem>>, vector<480x448xbf16>
    %cst_5 = arith.constant dense<0.000000e+00> : vector<56x448xf32>
    %4 = tpu.matmul %0, %3, %cst_5 {dimension_numbers = #tpu.dot_dimension_numbers<[1], [0], [0], [1], [0, 0, 1, 1], [], []>} : vector<56x480xbf16>, vector<480x448xbf16>, vector<56x448xf32> -> vector<56x448xf32>
    %5 = arith.maximumf %2, %4 : vector<56x448xf32>
    %6 = vector.extract_strided_slice %5 {offsets = [0, 0], sizes = [28, 448], strides = [1, 1]} : vector<56x448xf32> to vector<28x448xf32>
    %7 = vector.extract_strided_slice %5 {offsets = [28, 0], sizes = [28, 448], strides = [1, 1]} : vector<56x448xf32> to vector<28x448xf32>
    %8 = arith.maximumf %6, %7 : vector<28x448xf32>
    %c0_6 = arith.constant 0 : index
    %c0_7 = arith.constant 0 : index
    %9 = vector.load %arg4[%c0_6, %c0_7] : memref<1x448xf32, #tpu.memory_space<vmem>>, vector<1x448xf32>
    %10 = vector.broadcast %9 : vector<1x448xf32> to vector<28x448xf32>
    %11 = arith.addf %8, %10 : vector<28x448xf32>
    %cst_8 = arith.constant 0.000000e+00 : f32
    %12 = vector.broadcast %cst_8 : f32 to vector<28x448xf32>
    %13 = arith.maximumf %11, %12 : vector<28x448xf32>
    %14 = vector.extract_strided_slice %13 {offsets = [0, 0], sizes = [10, 448], strides = [1, 1]} : vector<28x448xf32> to vector<10x448xf32>
    %c0_9 = arith.constant 0 : index
    %c0_10 = arith.constant 0 : index
    %c0_11 = arith.constant 0 : index
    %15 = vector.load %arg13[%c0_9, %c0_10, %c0_11] : memref<5x20x448xf32, #tpu.memory_space<vmem>>, vector<1x10x448xf32>
    %16 = vector.shape_cast %15 : vector<1x10x448xf32> to vector<10x448xf32>
    %17 = vector.shape_cast %14 : vector<10x448xf32> to vector<1x10x448xf32>
    tpu.vector_store %arg13[%c0_9, %c0_10, %c0_11], %17 {strides = array<i32>} : memref<5x20x448xf32, #tpu.memory_space<vmem>>, vector<1x10x448xf32>,
    %18 = vector.extract_strided_slice %13 {offsets = [1, 0], sizes = [10, 448], strides = [1, 1]} : vector<28x448xf32> to vector<10x448xf32>
    %c1 = arith.constant 1 : index
    %c0_12 = arith.constant 0 : index
    %c0_13 = arith.constant 0 : index
    %19 = vector.load %arg13[%c1, %c0_12, %c0_13] : memref<5x20x448xf32, #tpu.memory_space<vmem>>, vector<1x10x448xf32>
    %20 = vector.shape_cast %19 : vector<1x10x448xf32> to vector<10x448xf32>
    %21 = vector.shape_cast %18 : vector<10x448xf32> to vector<1x10x448xf32>
    tpu.vector_store %arg13[%c1, %c0_12, %c0_13], %21 {strides = array<i32>} : memref<5x20x448xf32, #tpu.memory_space<vmem>>, vector<1x10x448xf32>,
    %22 = vector.extract_strided_slice %13 {offsets = [2, 0], sizes = [10, 448], strides = [1, 1]} : vector<28x448xf32> to vector<10x448xf32>
    %c2 = arith.constant 2 : index
    %c0_14 = arith.constant 0 : index
    %c0_15 = arith.constant 0 : index
    %23 = vector.load %arg13[%c2, %c0_14, %c0_15] : memref<5x20x448xf32, #tpu.memory_space<vmem>>, vector<1x10x448xf32>
    %24 = vector.shape_cast %23 : vector<1x10x448xf32> to vector<10x448xf32>
    %25 = vector.shape_cast %22 : vector<10x448xf32> to vector<1x10x448xf32>
    tpu.vector_store %arg13[%c2, %c0_14, %c0_15], %25 {strides = array<i32>} : memref<5x20x448xf32, #tpu.memory_space<vmem>>, vector<1x10x448xf32>,
    %26 = vector.extract_strided_slice %13 {offsets = [3, 0], sizes = [10, 448], strides = [1, 1]} : vector<28x448xf32> to vector<10x448xf32>
    %c3 = arith.constant 3 : index
    %c0_16 = arith.constant 0 : index
    %c0_17 = arith.constant 0 : index
    %27 = vector.load %arg13[%c3, %c0_16, %c0_17] : memref<5x20x448xf32, #tpu.memory_space<vmem>>, vector<1x10x448xf32>
    %28 = vector.shape_cast %27 : vector<1x10x448xf32> to vector<10x448xf32>
    %29 = vector.shape_cast %26 : vector<10x448xf32> to vector<1x10x448xf32>
    tpu.vector_store %arg13[%c3, %c0_16, %c0_17], %29 {strides = array<i32>} : memref<5x20x448xf32, #tpu.memory_space<vmem>>, vector<1x10x448xf32>,
    %30 = vector.extract_strided_slice %13 {offsets = [4, 0], sizes = [10, 448], strides = [1, 1]} : vector<28x448xf32> to vector<10x448xf32>
    %c4 = arith.constant 4 : index
    %c0_18 = arith.constant 0 : index
    %c0_19 = arith.constant 0 : index
    %31 = vector.load %arg13[%c4, %c0_18, %c0_19] : memref<5x20x448xf32, #tpu.memory_space<vmem>>, vector<1x10x448xf32>
    %32 = vector.shape_cast %31 : vector<1x10x448xf32> to vector<10x448xf32>
    %33 = vector.shape_cast %30 : vector<10x448xf32> to vector<1x10x448xf32>
    tpu.vector_store %arg13[%c4, %c0_18, %c0_19], %33 {strides = array<i32>} : memref<5x20x448xf32, #tpu.memory_space<vmem>>, vector<1x10x448xf32>,
    %34 = vector.extract_strided_slice %13 {offsets = [14, 0], sizes = [10, 448], strides = [1, 1]} : vector<28x448xf32> to vector<10x448xf32>
    %c0_20 = arith.constant 0 : index
    %c10 = arith.constant 10 : index
    %c0_21 = arith.constant 0 : index
    %35 = vector.load %arg13[%c0_20, %c10, %c0_21] : memref<5x20x448xf32, #tpu.memory_space<vmem>>, vector<1x10x448xf32>
    %36 = vector.shape_cast %35 : vector<1x10x448xf32> to vector<10x448xf32>
    %37 = vector.shape_cast %34 : vector<10x448xf32> to vector<1x10x448xf32>
    tpu.vector_store %arg13[%c0_20, %c10, %c0_21], %37 {strides = array<i32>} : memref<5x20x448xf32, #tpu.memory_space<vmem>>, vector<1x10x448xf32>,
    %38 = vector.extract_strided_slice %13 {offsets = [15, 0], sizes = [10, 448], strides = [1, 1]} : vector<28x448xf32> to vector<10x448xf32>
    %c1_22 = arith.constant 1 : index
    %c10_23 = arith.constant 10 : index
    %c0_24 = arith.constant 0 : index
    %39 = vector.load %arg13[%c1_22, %c10_23, %c0_24] : memref<5x20x448xf32, #tpu.memory_space<vmem>>, vector<1x10x448xf32>
    %40 = vector.shape_cast %39 : vector<1x10x448xf32> to vector<10x448xf32>
    %41 = vector.shape_cast %38 : vector<10x448xf32> to vector<1x10x448xf32>
    tpu.vector_store %arg13[%c1_22, %c10_23, %c0_24], %41 {strides = array<i32>} : memref<5x20x448xf32, #tpu.memory_space<vmem>>, vector<1x10x448xf32>,
    %42 = vector.extract_strided_slice %13 {offsets = [16, 0], sizes = [10, 448], strides = [1, 1]} : vector<28x448xf32> to vector<10x448xf32>
    %c2_25 = arith.constant 2 : index
    %c10_26 = arith.constant 10 : index
    %c0_27 = arith.constant 0 : index
    %43 = vector.load %arg13[%c2_25, %c10_26, %c0_27] : memref<5x20x448xf32, #tpu.memory_space<vmem>>, vector<1x10x448xf32>
    %44 = vector.shape_cast %43 : vector<1x10x448xf32> to vector<10x448xf32>
    %45 = vector.shape_cast %42 : vector<10x448xf32> to vector<1x10x448xf32>
    tpu.vector_store %arg13[%c2_25, %c10_26, %c0_27], %45 {strides = array<i32>} : memref<5x20x448xf32, #tpu.memory_space<vmem>>, vector<1x10x448xf32>,
    %46 = vector.extract_strided_slice %13 {offsets = [17, 0], sizes = [10, 448], strides = [1, 1]} : vector<28x448xf32> to vector<10x448xf32>
    %c3_28 = arith.constant 3 : index
    %c10_29 = arith.constant 10 : index
    %c0_30 = arith.constant 0 : index
    %47 = vector.load %arg13[%c3_28, %c10_29, %c0_30] : memref<5x20x448xf32, #tpu.memory_space<vmem>>, vector<1x10x448xf32>
    %48 = vector.shape_cast %47 : vector<1x10x448xf32> to vector<10x448xf32>
    %49 = vector.shape_cast %46 : vector<10x448xf32> to vector<1x10x448xf32>
    tpu.vector_store %arg13[%c3_28, %c10_29, %c0_30], %49 {strides = array<i32>} : memref<5x20x448xf32, #tpu.memory_space<vmem>>, vector<1x10x448xf32>,
    %50 = vector.extract_strided_slice %13 {offsets = [18, 0], sizes = [10, 448], strides = [1, 1]} : vector<28x448xf32> to vector<10x448xf32>
    %c4_31 = arith.constant 4 : index
    %c10_32 = arith.constant 10 : index
    %c0_33 = arith.constant 0 : index
    %51 = vector.load %arg13[%c4_31, %c10_32, %c0_33] : memref<5x20x448xf32, #tpu.memory_space<vmem>>, vector<1x10x448xf32>
    %52 = vector.shape_cast %51 : vector<1x10x448xf32> to vector<10x448xf32>
    %53 = vector.shape_cast %50 : vector<10x448xf32> to vector<1x10x448xf32>
    tpu.vector_store %arg13[%c4_31, %c10_32, %c0_33], %53 {strides = array<i32>} : memref<5x20x448xf32, #tpu.memory_space<vmem>>, vector<1x10x448xf32>,
    %cst_34 = arith.constant 0.000000e+00 : f32
    %54 = vector.broadcast %cst_34 : f32 to vector<20x320xf32>
    %cst_35 = arith.constant 0.000000e+00 : f32
    %55 = vector.broadcast %cst_35 : f32 to vector<20x320xf32>
    %c0_36 = arith.constant 0 : index
    %c0_37 = arith.constant 0 : index
    %c0_38 = arith.constant 0 : index
    %56 = vector.load %arg13[%c0_36, %c0_37, %c0_38] : memref<5x20x448xf32, #tpu.memory_space<vmem>>, vector<1x20x448xf32>
    %57 = vector.shape_cast %56 : vector<1x20x448xf32> to vector<20x448xf32>
    %58 = arith.truncf %57 : vector<20x448xf32> to vector<20x448xbf16>
    %c0_39 = arith.constant 0 : index
    %c0_40 = arith.constant 0 : index
    %c0_41 = arith.constant 0 : index
    %59 = vector.load %arg5[%c0_39, %c0_40, %c0_41] : memref<5x448x320xbf16, #tpu.memory_space<vmem>>, vector<1x448x320xbf16>
    %60 = vector.shape_cast %59 : vector<1x448x320xbf16> to vector<448x320xbf16>
    %cst_42 = arith.constant dense<0.000000e+00> : vector<20x320xf32>
    %61 = tpu.matmul %58, %60, %cst_42 {dimension_numbers = #tpu.dot_dimension_numbers<[1], [0], [0], [1], [0, 0, 1, 1], [], []>} : vector<20x448xbf16>, vector<448x320xbf16>, vector<20x320xf32> -> vector<20x320xf32>
    %62 = arith.addf %54, %61 : vector<20x320xf32>
    %c0_43 = arith.constant 0 : index
    %c0_44 = arith.constant 0 : index
    %c0_45 = arith.constant 0 : index
    %63 = vector.load %arg6[%c0_43, %c0_44, %c0_45] : memref<5x448x320xbf16, #tpu.memory_space<vmem>>, vector<1x448x320xbf16>
    %64 = vector.shape_cast %63 : vector<1x448x320xbf16> to vector<448x320xbf16>
    %cst_46 = arith.constant dense<0.000000e+00> : vector<20x320xf32>
    %65 = tpu.matmul %58, %64, %cst_46 {dimension_numbers = #tpu.dot_dimension_numbers<[1], [0], [0], [1], [0, 0, 1, 1], [], []>} : vector<20x448xbf16>, vector<448x320xbf16>, vector<20x320xf32> -> vector<20x320xf32>
    %66 = arith.addf %55, %65 : vector<20x320xf32>
    %c1_47 = arith.constant 1 : index
    %c0_48 = arith.constant 0 : index
    %c0_49 = arith.constant 0 : index
    %67 = vector.load %arg13[%c1_47, %c0_48, %c0_49] : memref<5x20x448xf32, #tpu.memory_space<vmem>>, vector<1x20x448xf32>
    %68 = vector.shape_cast %67 : vector<1x20x448xf32> to vector<20x448xf32>
    %69 = arith.truncf %68 : vector<20x448xf32> to vector<20x448xbf16>
    %c1_50 = arith.constant 1 : index
    %c0_51 = arith.constant 0 : index
    %c0_52 = arith.constant 0 : index
    %70 = vector.load %arg5[%c1_50, %c0_51, %c0_52] : memref<5x448x320xbf16, #tpu.memory_space<vmem>>, vector<1x448x320xbf16>
    %71 = vector.shape_cast %70 : vector<1x448x320xbf16> to vector<448x320xbf16>
    %cst_53 = arith.constant dense<0.000000e+00> : vector<20x320xf32>
    %72 = tpu.matmul %69, %71, %cst_53 {dimension_numbers = #tpu.dot_dimension_numbers<[1], [0], [0], [1], [0, 0, 1, 1], [], []>} : vector<20x448xbf16>, vector<448x320xbf16>, vector<20x320xf32> -> vector<20x320xf32>
    %73 = arith.addf %62, %72 : vector<20x320xf32>
    %c1_54 = arith.constant 1 : index
    %c0_55 = arith.constant 0 : index
    %c0_56 = arith.constant 0 : index
    %74 = vector.load %arg6[%c1_54, %c0_55, %c0_56] : memref<5x448x320xbf16, #tpu.memory_space<vmem>>, vector<1x448x320xbf16>
    %75 = vector.shape_cast %74 : vector<1x448x320xbf16> to vector<448x320xbf16>
    %cst_57 = arith.constant dense<0.000000e+00> : vector<20x320xf32>
    %76 = tpu.matmul %69, %75, %cst_57 {dimension_numbers = #tpu.dot_dimension_numbers<[1], [0], [0], [1], [0, 0, 1, 1], [], []>} : vector<20x448xbf16>, vector<448x320xbf16>, vector<20x320xf32> -> vector<20x320xf32>
    %77 = arith.addf %66, %76 : vector<20x320xf32>
    %c2_58 = arith.constant 2 : index
    %c0_59 = arith.constant 0 : index
    %c0_60 = arith.constant 0 : index
    %78 = vector.load %arg13[%c2_58, %c0_59, %c0_60] : memref<5x20x448xf32, #tpu.memory_space<vmem>>, vector<1x20x448xf32>
    %79 = vector.shape_cast %78 : vector<1x20x448xf32> to vector<20x448xf32>
    %80 = arith.truncf %79 : vector<20x448xf32> to vector<20x448xbf16>
    %c2_61 = arith.constant 2 : index
    %c0_62 = arith.constant 0 : index
    %c0_63 = arith.constant 0 : index
    %81 = vector.load %arg5[%c2_61, %c0_62, %c0_63] : memref<5x448x320xbf16, #tpu.memory_space<vmem>>, vector<1x448x320xbf16>
    %82 = vector.shape_cast %81 : vector<1x448x320xbf16> to vector<448x320xbf16>
    %cst_64 = arith.constant dense<0.000000e+00> : vector<20x320xf32>
    %83 = tpu.matmul %80, %82, %cst_64 {dimension_numbers = #tpu.dot_dimension_numbers<[1], [0], [0], [1], [0, 0, 1, 1], [], []>} : vector<20x448xbf16>, vector<448x320xbf16>, vector<20x320xf32> -> vector<20x320xf32>
    %84 = arith.addf %73, %83 : vector<20x320xf32>
    %c2_65 = arith.constant 2 : index
    %c0_66 = arith.constant 0 : index
    %c0_67 = arith.constant 0 : index
    %85 = vector.load %arg6[%c2_65, %c0_66, %c0_67] : memref<5x448x320xbf16, #tpu.memory_space<vmem>>, vector<1x448x320xbf16>
    %86 = vector.shape_cast %85 : vector<1x448x320xbf16> to vector<448x320xbf16>
    %cst_68 = arith.constant dense<0.000000e+00> : vector<20x320xf32>
    %87 = tpu.matmul %80, %86, %cst_68 {dimension_numbers = #tpu.dot_dimension_numbers<[1], [0], [0], [1], [0, 0, 1, 1], [], []>} : vector<20x448xbf16>, vector<448x320xbf16>, vector<20x320xf32> -> vector<20x320xf32>
    %88 = arith.addf %77, %87 : vector<20x320xf32>
    %c3_69 = arith.constant 3 : index
    %c0_70 = arith.constant 0 : index
    %c0_71 = arith.constant 0 : index
    %89 = vector.load %arg13[%c3_69, %c0_70, %c0_71] : memref<5x20x448xf32, #tpu.memory_space<vmem>>, vector<1x20x448xf32>
    %90 = vector.shape_cast %89 : vector<1x20x448xf32> to vector<20x448xf32>
    %91 = arith.truncf %90 : vector<20x448xf32> to vector<20x448xbf16>
    %c3_72 = arith.constant 3 : index
    %c0_73 = arith.constant 0 : index
    %c0_74 = arith.constant 0 : index
    %92 = vector.load %arg5[%c3_72, %c0_73, %c0_74] : memref<5x448x320xbf16, #tpu.memory_space<vmem>>, vector<1x448x320xbf16>
    %93 = vector.shape_cast %92 : vector<1x448x320xbf16> to vector<448x320xbf16>
    %cst_75 = arith.constant dense<0.000000e+00> : vector<20x320xf32>
    %94 = tpu.matmul %91, %93, %cst_75 {dimension_numbers = #tpu.dot_dimension_numbers<[1], [0], [0], [1], [0, 0, 1, 1], [], []>} : vector<20x448xbf16>, vector<448x320xbf16>, vector<20x320xf32> -> vector<20x320xf32>
    %95 = arith.addf %84, %94 : vector<20x320xf32>
    %c3_76 = arith.constant 3 : index
    %c0_77 = arith.constant 0 : index
    %c0_78 = arith.constant 0 : index
    %96 = vector.load %arg6[%c3_76, %c0_77, %c0_78] : memref<5x448x320xbf16, #tpu.memory_space<vmem>>, vector<1x448x320xbf16>
    %97 = vector.shape_cast %96 : vector<1x448x320xbf16> to vector<448x320xbf16>
    %cst_79 = arith.constant dense<0.000000e+00> : vector<20x320xf32>
    %98 = tpu.matmul %91, %97, %cst_79 {dimension_numbers = #tpu.dot_dimension_numbers<[1], [0], [0], [1], [0, 0, 1, 1], [], []>} : vector<20x448xbf16>, vector<448x320xbf16>, vector<20x320xf32> -> vector<20x320xf32>
    %99 = arith.addf %88, %98 : vector<20x320xf32>
    %c4_80 = arith.constant 4 : index
    %c0_81 = arith.constant 0 : index
    %c0_82 = arith.constant 0 : index
    %100 = vector.load %arg13[%c4_80, %c0_81, %c0_82] : memref<5x20x448xf32, #tpu.memory_space<vmem>>, vector<1x20x448xf32>
    %101 = vector.shape_cast %100 : vector<1x20x448xf32> to vector<20x448xf32>
    %102 = arith.truncf %101 : vector<20x448xf32> to vector<20x448xbf16>
    %c4_83 = arith.constant 4 : index
    %c0_84 = arith.constant 0 : index
    %c0_85 = arith.constant 0 : index
    %103 = vector.load %arg5[%c4_83, %c0_84, %c0_85] : memref<5x448x320xbf16, #tpu.memory_space<vmem>>, vector<1x448x320xbf16>
    %104 = vector.shape_cast %103 : vector<1x448x320xbf16> to vector<448x320xbf16>
    %cst_86 = arith.constant dense<0.000000e+00> : vector<20x320xf32>
    %105 = tpu.matmul %102, %104, %cst_86 {dimension_numbers = #tpu.dot_dimension_numbers<[1], [0], [0], [1], [0, 0, 1, 1], [], []>} : vector<20x448xbf16>, vector<448x320xbf16>, vector<20x320xf32> -> vector<20x320xf32>
    %106 = arith.addf %95, %105 : vector<20x320xf32>
    %c4_87 = arith.constant 4 : index
    %c0_88 = arith.constant 0 : index
    %c0_89 = arith.constant 0 : index
    %107 = vector.load %arg6[%c4_87, %c0_88, %c0_89] : memref<5x448x320xbf16, #tpu.memory_space<vmem>>, vector<1x448x320xbf16>
    %108 = vector.shape_cast %107 : vector<1x448x320xbf16> to vector<448x320xbf16>
    %cst_90 = arith.constant dense<0.000000e+00> : vector<20x320xf32>
    %109 = tpu.matmul %102, %108, %cst_90 {dimension_numbers = #tpu.dot_dimension_numbers<[1], [0], [0], [1], [0, 0, 1, 1], [], []>} : vector<20x448xbf16>, vector<448x320xbf16>, vector<20x320xf32> -> vector<20x320xf32>
    %110 = arith.addf %99, %109 : vector<20x320xf32>
    %111 = arith.maximumf %106, %110 : vector<20x320xf32>
    %c0_91 = arith.constant 0 : index
    %c0_92 = arith.constant 0 : index
    %112 = vector.load %arg7[%c0_91, %c0_92] : memref<1x320xf32, #tpu.memory_space<vmem>>, vector<1x320xf32>
    %113 = vector.broadcast %112 : vector<1x320xf32> to vector<20x320xf32>
    %114 = arith.addf %111, %113 : vector<20x320xf32>
    %cst_93 = arith.constant 0.000000e+00 : f32
    %115 = vector.broadcast %cst_93 : f32 to vector<20x320xf32>
    %116 = arith.maximumf %114, %115 : vector<20x320xf32>
    %117 = vector.extract_strided_slice %116 {offsets = [0, 0], sizes = [1, 320], strides = [1, 1]} : vector<20x320xf32> to vector<1x320xf32>
    %118 = vector.extract_strided_slice %116 {offsets = [1, 0], sizes = [1, 320], strides = [1, 1]} : vector<20x320xf32> to vector<1x320xf32>
    %119 = arith.maximumf %117, %118 : vector<1x320xf32>
    %c0_94 = arith.constant 0 : index
    %c0_95 = arith.constant 0 : index
    %c0_96 = arith.constant 0 : index
    %120 = vector.load %arg14[%c0_94, %c0_95, %c0_96] : memref<5x2x320xf32, #tpu.memory_space<vmem>>, vector<1x1x320xf32>
    %121 = vector.shape_cast %120 : vector<1x1x320xf32> to vector<1x320xf32>
    %122 = vector.shape_cast %119 : vector<1x320xf32> to vector<1x1x320xf32>
    tpu.vector_store %arg14[%c0_94, %c0_95, %c0_96], %122 {strides = array<i32>} : memref<5x2x320xf32, #tpu.memory_space<vmem>>, vector<1x1x320xf32>,
    %123 = vector.extract_strided_slice %116 {offsets = [2, 0], sizes = [1, 320], strides = [1, 1]} : vector<20x320xf32> to vector<1x320xf32>
    %124 = vector.extract_strided_slice %116 {offsets = [3, 0], sizes = [1, 320], strides = [1, 1]} : vector<20x320xf32> to vector<1x320xf32>
    %125 = arith.maximumf %123, %124 : vector<1x320xf32>
    %c1_97 = arith.constant 1 : index
    %c0_98 = arith.constant 0 : index
    %c0_99 = arith.constant 0 : index
    %126 = vector.load %arg14[%c1_97, %c0_98, %c0_99] : memref<5x2x320xf32, #tpu.memory_space<vmem>>, vector<1x1x320xf32>
    %127 = vector.shape_cast %126 : vector<1x1x320xf32> to vector<1x320xf32>
    %128 = vector.shape_cast %125 : vector<1x320xf32> to vector<1x1x320xf32>
    tpu.vector_store %arg14[%c1_97, %c0_98, %c0_99], %128 {strides = array<i32>} : memref<5x2x320xf32, #tpu.memory_space<vmem>>, vector<1x1x320xf32>,
    %129 = vector.extract_strided_slice %116 {offsets = [4, 0], sizes = [1, 320], strides = [1, 1]} : vector<20x320xf32> to vector<1x320xf32>
    %130 = vector.extract_strided_slice %116 {offsets = [5, 0], sizes = [1, 320], strides = [1, 1]} : vector<20x320xf32> to vector<1x320xf32>
    %131 = arith.maximumf %129, %130 : vector<1x320xf32>
    %c2_100 = arith.constant 2 : index
    %c0_101 = arith.constant 0 : index
    %c0_102 = arith.constant 0 : index
    %132 = vector.load %arg14[%c2_100, %c0_101, %c0_102] : memref<5x2x320xf32, #tpu.memory_space<vmem>>, vector<1x1x320xf32>
    %133 = vector.shape_cast %132 : vector<1x1x320xf32> to vector<1x320xf32>
    %134 = vector.shape_cast %131 : vector<1x320xf32> to vector<1x1x320xf32>
    tpu.vector_store %arg14[%c2_100, %c0_101, %c0_102], %134 {strides = array<i32>} : memref<5x2x320xf32, #tpu.memory_space<vmem>>, vector<1x1x320xf32>,
    %135 = vector.extract_strided_slice %116 {offsets = [6, 0], sizes = [1, 320], strides = [1, 1]} : vector<20x320xf32> to vector<1x320xf32>
    %136 = vector.extract_strided_slice %116 {offsets = [7, 0], sizes = [1, 320], strides = [1, 1]} : vector<20x320xf32> to vector<1x320xf32>
    %137 = arith.maximumf %135, %136 : vector<1x320xf32>
    %c3_103 = arith.constant 3 : index
    %c0_104 = arith.constant 0 : index
    %c0_105 = arith.constant 0 : index
    %138 = vector.load %arg14[%c3_103, %c0_104, %c0_105] : memref<5x2x320xf32, #tpu.memory_space<vmem>>, vector<1x1x320xf32>
    %139 = vector.shape_cast %138 : vector<1x1x320xf32> to vector<1x320xf32>
    %140 = vector.shape_cast %137 : vector<1x320xf32> to vector<1x1x320xf32>
    tpu.vector_store %arg14[%c3_103, %c0_104, %c0_105], %140 {strides = array<i32>} : memref<5x2x320xf32, #tpu.memory_space<vmem>>, vector<1x1x320xf32>,
    %141 = vector.extract_strided_slice %116 {offsets = [8, 0], sizes = [1, 320], strides = [1, 1]} : vector<20x320xf32> to vector<1x320xf32>
    %142 = vector.extract_strided_slice %116 {offsets = [9, 0], sizes = [1, 320], strides = [1, 1]} : vector<20x320xf32> to vector<1x320xf32>
    %143 = arith.maximumf %141, %142 : vector<1x320xf32>
    %c4_106 = arith.constant 4 : index
    %c0_107 = arith.constant 0 : index
    %c0_108 = arith.constant 0 : index
    %144 = vector.load %arg14[%c4_106, %c0_107, %c0_108] : memref<5x2x320xf32, #tpu.memory_space<vmem>>, vector<1x1x320xf32>
    %145 = vector.shape_cast %144 : vector<1x1x320xf32> to vector<1x320xf32>
    %146 = vector.shape_cast %143 : vector<1x320xf32> to vector<1x1x320xf32>
    tpu.vector_store %arg14[%c4_106, %c0_107, %c0_108], %146 {strides = array<i32>} : memref<5x2x320xf32, #tpu.memory_space<vmem>>, vector<1x1x320xf32>,
    %147 = vector.extract_strided_slice %116 {offsets = [10, 0], sizes = [1, 320], strides = [1, 1]} : vector<20x320xf32> to vector<1x320xf32>
    %148 = vector.extract_strided_slice %116 {offsets = [11, 0], sizes = [1, 320], strides = [1, 1]} : vector<20x320xf32> to vector<1x320xf32>
    %149 = arith.maximumf %147, %148 : vector<1x320xf32>
    %c0_109 = arith.constant 0 : index
    %c1_110 = arith.constant 1 : index
    %c0_111 = arith.constant 0 : index
    %150 = vector.load %arg14[%c0_109, %c1_110, %c0_111] : memref<5x2x320xf32, #tpu.memory_space<vmem>>, vector<1x1x320xf32>
    %151 = vector.shape_cast %150 : vector<1x1x320xf32> to vector<1x320xf32>
    %152 = vector.shape_cast %149 : vector<1x320xf32> to vector<1x1x320xf32>
    tpu.vector_store %arg14[%c0_109, %c1_110, %c0_111], %152 {strides = array<i32>} : memref<5x2x320xf32, #tpu.memory_space<vmem>>, vector<1x1x320xf32>,
    %153 = vector.extract_strided_slice %116 {offsets = [12, 0], sizes = [1, 320], strides = [1, 1]} : vector<20x320xf32> to vector<1x320xf32>
    %154 = vector.extract_strided_slice %116 {offsets = [13, 0], sizes = [1, 320], strides = [1, 1]} : vector<20x320xf32> to vector<1x320xf32>
    %155 = arith.maximumf %153, %154 : vector<1x320xf32>
    %c1_112 = arith.constant 1 : index
    %c1_113 = arith.constant 1 : index
    %c0_114 = arith.constant 0 : index
    %156 = vector.load %arg14[%c1_112, %c1_113, %c0_114] : memref<5x2x320xf32, #tpu.memory_space<vmem>>, vector<1x1x320xf32>
    %157 = vector.shape_cast %156 : vector<1x1x320xf32> to vector<1x320xf32>
    %158 = vector.shape_cast %155 : vector<1x320xf32> to vector<1x1x320xf32>
    tpu.vector_store %arg14[%c1_112, %c1_113, %c0_114], %158 {strides = array<i32>} : memref<5x2x320xf32, #tpu.memory_space<vmem>>, vector<1x1x320xf32>,
    %159 = vector.extract_strided_slice %116 {offsets = [14, 0], sizes = [1, 320], strides = [1, 1]} : vector<20x320xf32> to vector<1x320xf32>
    %160 = vector.extract_strided_slice %116 {offsets = [15, 0], sizes = [1, 320], strides = [1, 1]} : vector<20x320xf32> to vector<1x320xf32>
    %161 = arith.maximumf %159, %160 : vector<1x320xf32>
    %c2_115 = arith.constant 2 : index
    %c1_116 = arith.constant 1 : index
    %c0_117 = arith.constant 0 : index
    %162 = vector.load %arg14[%c2_115, %c1_116, %c0_117] : memref<5x2x320xf32, #tpu.memory_space<vmem>>, vector<1x1x320xf32>
    %163 = vector.shape_cast %162 : vector<1x1x320xf32> to vector<1x320xf32>
    %164 = vector.shape_cast %161 : vector<1x320xf32> to vector<1x1x320xf32>
    tpu.vector_store %arg14[%c2_115, %c1_116, %c0_117], %164 {strides = array<i32>} : memref<5x2x320xf32, #tpu.memory_space<vmem>>, vector<1x1x320xf32>,
    %165 = vector.extract_strided_slice %116 {offsets = [16, 0], sizes = [1, 320], strides = [1, 1]} : vector<20x320xf32> to vector<1x320xf32>
    %166 = vector.extract_strided_slice %116 {offsets = [17, 0], sizes = [1, 320], strides = [1, 1]} : vector<20x320xf32> to vector<1x320xf32>
    %167 = arith.maximumf %165, %166 : vector<1x320xf32>
    %c3_118 = arith.constant 3 : index
    %c1_119 = arith.constant 1 : index
    %c0_120 = arith.constant 0 : index
    %168 = vector.load %arg14[%c3_118, %c1_119, %c0_120] : memref<5x2x320xf32, #tpu.memory_space<vmem>>, vector<1x1x320xf32>
    %169 = vector.shape_cast %168 : vector<1x1x320xf32> to vector<1x320xf32>
    %170 = vector.shape_cast %167 : vector<1x320xf32> to vector<1x1x320xf32>
    tpu.vector_store %arg14[%c3_118, %c1_119, %c0_120], %170 {strides = array<i32>} : memref<5x2x320xf32, #tpu.memory_space<vmem>>, vector<1x1x320xf32>,
    %171 = vector.extract_strided_slice %116 {offsets = [18, 0], sizes = [1, 320], strides = [1, 1]} : vector<20x320xf32> to vector<1x320xf32>
    %172 = vector.extract_strided_slice %116 {offsets = [19, 0], sizes = [1, 320], strides = [1, 1]} : vector<20x320xf32> to vector<1x320xf32>
    %173 = arith.maximumf %171, %172 : vector<1x320xf32>
    %c4_121 = arith.constant 4 : index
    %c1_122 = arith.constant 1 : index
    %c0_123 = arith.constant 0 : index
    %174 = vector.load %arg14[%c4_121, %c1_122, %c0_123] : memref<5x2x320xf32, #tpu.memory_space<vmem>>, vector<1x1x320xf32>
    %175 = vector.shape_cast %174 : vector<1x1x320xf32> to vector<1x320xf32>
    %176 = vector.shape_cast %173 : vector<1x320xf32> to vector<1x1x320xf32>
    tpu.vector_store %arg14[%c4_121, %c1_122, %c0_123], %176 {strides = array<i32>} : memref<5x2x320xf32, #tpu.memory_space<vmem>>, vector<1x1x320xf32>,
    %cst_124 = arith.constant 0.000000e+00 : f32
    %177 = vector.broadcast %cst_124 : f32 to vector<2x128xf32>
    %c0_125 = arith.constant 0 : index
    %c0_126 = arith.constant 0 : index
    %c0_127 = arith.constant 0 : index
    %178 = vector.load %arg14[%c0_125, %c0_126, %c0_127] : memref<5x2x320xf32, #tpu.memory_space<vmem>>, vector<1x2x320xf32>
    %179 = vector.shape_cast %178 : vector<1x2x320xf32> to vector<2x320xf32>
    %180 = arith.truncf %179 : vector<2x320xf32> to vector<2x320xbf16>
    %c0_128 = arith.constant 0 : index
    %c0_129 = arith.constant 0 : index
    %c0_130 = arith.constant 0 : index
    %181 = vector.load %arg8[%c0_128, %c0_129, %c0_130] : memref<5x320x128xbf16, #tpu.memory_space<vmem>>, vector<1x320x128xbf16>
    %182 = vector.shape_cast %181 : vector<1x320x128xbf16> to vector<320x128xbf16>
    %cst_131 = arith.constant dense<0.000000e+00> : vector<2x128xf32>
    %183 = tpu.matmul %180, %182, %cst_131 {dimension_numbers = #tpu.dot_dimension_numbers<[1], [0], [0], [1], [0, 0, 1, 1], [], []>} : vector<2x320xbf16>, vector<320x128xbf16>, vector<2x128xf32> -> vector<2x128xf32>
    %184 = arith.addf %177, %183 : vector<2x128xf32>
    %c1_132 = arith.constant 1 : index
    %c0_133 = arith.constant 0 : index
    %c0_134 = arith.constant 0 : index
    %185 = vector.load %arg14[%c1_132, %c0_133, %c0_134] : memref<5x2x320xf32, #tpu.memory_space<vmem>>, vector<1x2x320xf32>
    %186 = vector.shape_cast %185 : vector<1x2x320xf32> to vector<2x320xf32>
    %187 = arith.truncf %186 : vector<2x320xf32> to vector<2x320xbf16>
    %c1_135 = arith.constant 1 : index
    %c0_136 = arith.constant 0 : index
    %c0_137 = arith.constant 0 : index
    %188 = vector.load %arg8[%c1_135, %c0_136, %c0_137] : memref<5x320x128xbf16, #tpu.memory_space<vmem>>, vector<1x320x128xbf16>
    %189 = vector.shape_cast %188 : vector<1x320x128xbf16> to vector<320x128xbf16>
    %cst_138 = arith.constant dense<0.000000e+00> : vector<2x128xf32>
    %190 = tpu.matmul %187, %189, %cst_138 {dimension_numbers = #tpu.dot_dimension_numbers<[1], [0], [0], [1], [0, 0, 1, 1], [], []>} : vector<2x320xbf16>, vector<320x128xbf16>, vector<2x128xf32> -> vector<2x128xf32>
    %191 = arith.addf %184, %190 : vector<2x128xf32>
    %c2_139 = arith.constant 2 : index
    %c0_140 = arith.constant 0 : index
    %c0_141 = arith.constant 0 : index
    %192 = vector.load %arg14[%c2_139, %c0_140, %c0_141] : memref<5x2x320xf32, #tpu.memory_space<vmem>>, vector<1x2x320xf32>
    %193 = vector.shape_cast %192 : vector<1x2x320xf32> to vector<2x320xf32>
    %194 = arith.truncf %193 : vector<2x320xf32> to vector<2x320xbf16>
    %c2_142 = arith.constant 2 : index
    %c0_143 = arith.constant 0 : index
    %c0_144 = arith.constant 0 : index
    %195 = vector.load %arg8[%c2_142, %c0_143, %c0_144] : memref<5x320x128xbf16, #tpu.memory_space<vmem>>, vector<1x320x128xbf16>
    %196 = vector.shape_cast %195 : vector<1x320x128xbf16> to vector<320x128xbf16>
    %cst_145 = arith.constant dense<0.000000e+00> : vector<2x128xf32>
    %197 = tpu.matmul %194, %196, %cst_145 {dimension_numbers = #tpu.dot_dimension_numbers<[1], [0], [0], [1], [0, 0, 1, 1], [], []>} : vector<2x320xbf16>, vector<320x128xbf16>, vector<2x128xf32> -> vector<2x128xf32>
    %198 = arith.addf %191, %197 : vector<2x128xf32>
    %c3_146 = arith.constant 3 : index
    %c0_147 = arith.constant 0 : index
    %c0_148 = arith.constant 0 : index
    %199 = vector.load %arg14[%c3_146, %c0_147, %c0_148] : memref<5x2x320xf32, #tpu.memory_space<vmem>>, vector<1x2x320xf32>
    %200 = vector.shape_cast %199 : vector<1x2x320xf32> to vector<2x320xf32>
    %201 = arith.truncf %200 : vector<2x320xf32> to vector<2x320xbf16>
    %c3_149 = arith.constant 3 : index
    %c0_150 = arith.constant 0 : index
    %c0_151 = arith.constant 0 : index
    %202 = vector.load %arg8[%c3_149, %c0_150, %c0_151] : memref<5x320x128xbf16, #tpu.memory_space<vmem>>, vector<1x320x128xbf16>
    %203 = vector.shape_cast %202 : vector<1x320x128xbf16> to vector<320x128xbf16>
    %cst_152 = arith.constant dense<0.000000e+00> : vector<2x128xf32>
    %204 = tpu.matmul %201, %203, %cst_152 {dimension_numbers = #tpu.dot_dimension_numbers<[1], [0], [0], [1], [0, 0, 1, 1], [], []>} : vector<2x320xbf16>, vector<320x128xbf16>, vector<2x128xf32> -> vector<2x128xf32>
    %205 = arith.addf %198, %204 : vector<2x128xf32>
    %c4_153 = arith.constant 4 : index
    %c0_154 = arith.constant 0 : index
    %c0_155 = arith.constant 0 : index
    %206 = vector.load %arg14[%c4_153, %c0_154, %c0_155] : memref<5x2x320xf32, #tpu.memory_space<vmem>>, vector<1x2x320xf32>
    %207 = vector.shape_cast %206 : vector<1x2x320xf32> to vector<2x320xf32>
    %208 = arith.truncf %207 : vector<2x320xf32> to vector<2x320xbf16>
    %c4_156 = arith.constant 4 : index
    %c0_157 = arith.constant 0 : index
    %c0_158 = arith.constant 0 : index
    %209 = vector.load %arg8[%c4_156, %c0_157, %c0_158] : memref<5x320x128xbf16, #tpu.memory_space<vmem>>, vector<1x320x128xbf16>
    %210 = vector.shape_cast %209 : vector<1x320x128xbf16> to vector<320x128xbf16>
    %cst_159 = arith.constant dense<0.000000e+00> : vector<2x128xf32>
    %211 = tpu.matmul %208, %210, %cst_159 {dimension_numbers = #tpu.dot_dimension_numbers<[1], [0], [0], [1], [0, 0, 1, 1], [], []>} : vector<2x320xbf16>, vector<320x128xbf16>, vector<2x128xf32> -> vector<2x128xf32>
    %212 = arith.addf %205, %211 : vector<2x128xf32>
    %c0_160 = arith.constant 0 : index
    %c0_161 = arith.constant 0 : index
    %213 = vector.load %arg9[%c0_160, %c0_161] : memref<1x128xf32, #tpu.memory_space<vmem>>, vector<1x128xf32>
    %214 = vector.broadcast %213 : vector<1x128xf32> to vector<2x128xf32>
    %215 = arith.addf %212, %214 : vector<2x128xf32>
    %cst_162 = arith.constant 0.000000e+00 : f32
    %216 = vector.broadcast %cst_162 : f32 to vector<2x128xf32>
    %217 = arith.maximumf %215, %216 : vector<2x128xf32>
    %218 = arith.truncf %217 : vector<2x128xf32> to vector<2x128xbf16>
    %c0_163 = arith.constant 0 : index
    %c0_164 = arith.constant 0 : index
    %219 = vector.load %arg10[%c0_163, %c0_164] : memref<128x10xbf16, #tpu.memory_space<vmem>>, vector<128x10xbf16>
    %cst_165 = arith.constant dense<0.000000e+00> : vector<2x10xf32>
    %220 = tpu.matmul %218, %219, %cst_165 {dimension_numbers = #tpu.dot_dimension_numbers<[1], [0], [0], [1], [0, 0, 1, 1], [], []>} : vector<2x128xbf16>, vector<128x10xbf16>, vector<2x10xf32> -> vector<2x10xf32>
    %c0_166 = arith.constant 0 : index
    %c0_167 = arith.constant 0 : index
    %221 = vector.load %arg11[%c0_166, %c0_167] : memref<1x10xf32, #tpu.memory_space<vmem>>, vector<1x10xf32>
    %222 = vector.broadcast %221 : vector<1x10xf32> to vector<2x10xf32>
    %223 = arith.addf %220, %222 : vector<2x10xf32>
    %cst_168 = arith.constant dense<0xFF800000> : vector<2xf32>
    %224 = vector.multi_reduction <maximumf>, %223, %cst_168 [1] : vector<2x10xf32> to vector<2xf32>
    %225 = vector.shape_cast %224 : vector<2xf32> to vector<2x1xf32>
    %226 = vector.broadcast %225 : vector<2x1xf32> to vector<2x10xf32>
    %227 = arith.subf %223, %226 : vector<2x10xf32>
    %228 = math.exp %227 : vector<2x10xf32>
    %cst_169 = arith.constant dense<0.000000e+00> : vector<2xf32>
    %229 = vector.multi_reduction <add>, %228, %cst_169 [1] : vector<2x10xf32> to vector<2xf32>
    %230 = vector.shape_cast %229 : vector<2xf32> to vector<2x1xf32>
    %231 = math.log %230 : vector<2x1xf32>
    %232 = vector.broadcast %231 : vector<2x1xf32> to vector<2x10xf32>
    %233 = arith.subf %227, %232 : vector<2x10xf32>
    %c0_170 = arith.constant 0 : index
    %c0_171 = arith.constant 0 : index
    %234 = vector.load %arg12[%c0_170, %c0_171] : memref<2x10xf32, #tpu.memory_space<vmem>>, vector<2x10xf32>
    tpu.vector_store %arg12[%c0_170, %c0_171], %233 {strides = array<i32>} : memref<2x10xf32, #tpu.memory_space<vmem>>, vector<2x10xf32>,
    return
  }
  func.func @transform_0(%arg0: i32) -> (i32, i32) {
    %c0_i32 = arith.constant 0 : i32
    %c0_i32_0 = arith.constant 0 : i32
    return %arg0, %c0_i32 : i32, i32
  }
  func.func @transform_1(%arg0: i32) -> (i32, i32) {
    %c0_i32 = arith.constant 0 : i32
    %c0_i32_0 = arith.constant 0 : i32
    %c0_i32_1 = arith.constant 0 : i32
    return %c0_i32, %c0_i32_0 : i32, i32
  }
  func.func @transform_2(%arg0: i32) -> (i32, i32) {
    %c0_i32 = arith.constant 0 : i32
    %c0_i32_0 = arith.constant 0 : i32
    %c0_i32_1 = arith.constant 0 : i32
    return %c0_i32, %c0_i32_0 : i32, i32
  }
  func.func @transform_3(%arg0: i32) -> (i32, i32) {
    %c0_i32 = arith.constant 0 : i32
    %c0_i32_0 = arith.constant 0 : i32
    %c0_i32_1 = arith.constant 0 : i32
    return %c0_i32, %c0_i32_0 : i32, i32
  }
  func.func @transform_4(%arg0: i32) -> (i32, i32, i32) {
    %c0_i32 = arith.constant 0 : i32
    %c0_i32_0 = arith.constant 0 : i32
    %c0_i32_1 = arith.constant 0 : i32
    %c0_i32_2 = arith.constant 0 : i32
    return %c0_i32, %c0_i32_0, %c0_i32_1 : i32, i32, i32
  }
  func.func @transform_5(%arg0: i32) -> (i32, i32, i32) {
    %c0_i32 = arith.constant 0 : i32
    %c0_i32_0 = arith.constant 0 : i32
    %c0_i32_1 = arith.constant 0 : i32
    %c0_i32_2 = arith.constant 0 : i32
    return %c0_i32, %c0_i32_0, %c0_i32_1 : i32, i32, i32
  }
  func.func @transform_6(%arg0: i32) -> (i32, i32) {
    %c0_i32 = arith.constant 0 : i32
    %c0_i32_0 = arith.constant 0 : i32
    %c0_i32_1 = arith.constant 0 : i32
    return %c0_i32, %c0_i32_0 : i32, i32
  }
  func.func @transform_7(%arg0: i32) -> (i32, i32, i32) {
    %c0_i32 = arith.constant 0 : i32
    %c0_i32_0 = arith.constant 0 : i32
    %c0_i32_1 = arith.constant 0 : i32
    %c0_i32_2 = arith.constant 0 : i32
    return %c0_i32, %c0_i32_0, %c0_i32_1 : i32, i32, i32
  }
  func.func @transform_8(%arg0: i32) -> (i32, i32) {
    %c0_i32 = arith.constant 0 : i32
    %c0_i32_0 = arith.constant 0 : i32
    %c0_i32_1 = arith.constant 0 : i32
    return %c0_i32, %c0_i32_0 : i32, i32
  }
  func.func @transform_9(%arg0: i32) -> (i32, i32) {
    %c0_i32 = arith.constant 0 : i32
    %c0_i32_0 = arith.constant 0 : i32
    %c0_i32_1 = arith.constant 0 : i32
    return %c0_i32, %c0_i32_0 : i32, i32
  }
  func.func @transform_10(%arg0: i32) -> (i32, i32) {
    %c0_i32 = arith.constant 0 : i32
    %c0_i32_0 = arith.constant 0 : i32
    %c0_i32_1 = arith.constant 0 : i32
    return %c0_i32, %c0_i32_0 : i32, i32
  }
  func.func @transform_11(%arg0: i32) -> (i32, i32) {
    %c0_i32 = arith.constant 0 : i32
    %c0_i32_0 = arith.constant 0 : i32
    return %arg0, %c0_i32 : i32, i32
  }
}

</mosaic_0001>

<bundles_post_ra>
// kernel: cifar10_classifier_forward.1
= control target key start
LH: loop header
LB: loop body
LE: loop exit
PB: predicated region body
PF: predicated region fallthrough
CT: control target
= control target key end

     0   :  { %vm844_vm0 = vcmask 785408   ;;  %vm2189_vm1 = vcmask 1043456   ;;  %vm2322_vm2 = vcmask 1046528   ;;  %vm2352_vm3 = vcmask 1045504   ;;  %s21734_s0 = inlined_call_operand.vmem [shape: bf16[56,480], index: 0, kind: input, shape index: {}]   ;;  %s21735_s1 = inlined_call_operand.vmem [shape: bf16[480,448], index: 1, kind: input, shape index: {}]   ;;  %s21736_s2 = inlined_call_operand.vmem [shape: bf16[480,448], index: 2, kind: input, shape index: {}]   ;;  %s21737_s3 = inlined_call_operand.vmem [shape: f32[1,448], index: 3, kind: input, shape index: {}]   ;;  %s21738_s4 = inlined_call_operand.vmem [shape: bf16[5,448,320], index: 4, kind: input, shape index: {}]   ;;  %s21739_s5 = inlined_call_operand.vmem [shape: bf16[5,448,320], index: 5, kind: input, shape index: {}]   ;;  %s21740_s6 = inlined_call_operand.vmem [shape: f32[1,320], index: 6, kind: input, shape index: {}]   ;;  %s21741_s7 = inlined_call_operand.vmem [shape: bf16[5,320,128], index: 7, kind: input, shape index: {}]   ;;  %s21742_s8 = inlined_call_operand.vmem [shape: f32[1,128], index: 8, kind: input, shape index: {}]   ;;  %s21743_s9 = inlined_call_operand.vmem [shape: bf16[128,10], index: 9, kind: input, shape index: {}]   ;;  %s21744_s10 = inlined_call_operand.vmem [shape: f32[1,10], index: 10, kind: input, shape index: {}]   ;;  %s21745_s11 = inlined_call_operand.hbm [shape: f32[2,10], index: 11, kind: output, shape index: {}]  }
   0x1   :  { %v14922_v0 = vld [vmem:[%s21735_s1 + $0xe4] ss:$16 sps:$4 sm:$0xff]   ;;  %v14926_v2 = vld [vmem:[%s21735_s1 + $0xe0] ss:$16 sps:$4 sm:$0xff]   ;;  %v16770_v42 = vld [vmem:[%s21734_s0 + $0xc] ss:$16 sps:$4 sm:$0xff]  }
   0x2   :  { %v14924_v1 = vld [vmem:[%s21735_s1 + $0x2e4] ss:$16 sps:$4 sm:$0xff]   ;;  %857 = vmatprep.subr.bf16.mxu0 %v14922_v0  ;;  %v14927_v3 = vld [vmem:[%s21735_s1 + $0x2e0] ss:$16 sps:$4 sm:$0xff]   ;;  %12225 = vmatprep.mubr.msk.bf16.mxu1 %vm844_vm0, %v16770_v42  ;;  %v15013_v59 = vld [vmem:[%s21735_s1 + $0xec] ss:$16 sps:$4 sm:$0xff]  }
   0x3   :  { %928 = vmatprep.subr.bf16.mxu1 %v14924_v1  ;;  %v14928_v4 = vld [vmem:[%s21735_s1 + $0xc4] ss:$16 sps:$4 sm:$0xff]   ;;  %858 = vmatpush1.bf16.msra.mxu0 %v14926_v2  ;;  %v14932_v6 = vld [vmem:[%s21735_s1 + $0xc0] ss:$16 sps:$4 sm:$0xff]   ;;  %v16831_v60 = vld [vmem:[%s21734_s0 + $0x8] ss:$16 sps:$4 sm:$0xff]  }
   0x4   :  { %929 = vmatpush1.bf16.msra.mxu1 %v14927_v3  ;;  %v14930_v5 = vld [vmem:[%s21735_s1 + $0x2c4] ss:$16 sps:$4 sm:$0xff]   ;;  %859 = vmatprep.subr.bf16.mxu0 %v14928_v4  ;;  %v14933_v7 = vld [vmem:[%s21735_s1 + $0x2c0] ss:$16 sps:$4 sm:$0xff]   ;;  %v15011_v61 = vld [vmem:[%s21735_s1 + $0xe8] ss:$16 sps:$4 sm:$0xff]  }
   0x5   :  { %930 = vmatprep.subr.bf16.mxu1 %v14930_v5  ;;  %v14934_v8 = vld [vmem:[%s21735_s1 + $0xa4] ss:$16 sps:$4 sm:$0xff]   ;;  %v14938_v10 = vld [vmem:[%s21735_s1 + $0xa0] ss:$16 sps:$4 sm:$0xff]   ;;  %v15019_v0 = vld [vmem:[%s21735_s1 + $0xcc] ss:$16 sps:$4 sm:$0xff]  }
   0x6   :  { %v14936_v9 = vld [vmem:[%s21735_s1 + $0x2a4] ss:$16 sps:$4 sm:$0xff]   ;;  %v14939_v11 = vld [vmem:[%s21735_s1 + $0x2a0] ss:$16 sps:$4 sm:$0xff]   ;;  %v15017_v1 = vld [vmem:[%s21735_s1 + $0xc8] ss:$16 sps:$4 sm:$0xff]  }
   0x7   :  { %860 = vmatpush1.bf16.msra.mxu0 %v14932_v6  ;;  %v14940_v12 = vld [vmem:[%s21735_s1 + $0x84] ss:$16 sps:$4 sm:$0xff]   ;;  %v14944_v14 = vld [vmem:[%s21735_s1 + $0x80] ss:$16 sps:$4 sm:$0xff]   ;;  %v15026_v3 = vld [vmem:[%s21735_s1 + $0xac] ss:$16 sps:$4 sm:$0xff]  }
   0x8   :  { %931 = vmatpush1.bf16.msra.mxu1 %v14933_v7  ;;  %861 = vmatprep.subr.bf16.mxu0 %v14934_v8  ;;  %v14942_v13 = vld [vmem:[%s21735_s1 + $0x284] ss:$16 sps:$4 sm:$0xff]   ;;  %v14945_v15 = vld [vmem:[%s21735_s1 + $0x280] ss:$16 sps:$4 sm:$0xff]   ;;  %v15029_v4 = vld [vmem:[%s21735_s1 + $0x2ec] ss:$16 sps:$4 sm:$0xff]  }
   0x9   :  { %932 = vmatprep.subr.bf16.mxu1 %v14936_v9  ;;  %v14946_v16 = vld [vmem:[%s21735_s1 + $0x64] ss:$16 sps:$4 sm:$0xff]   ;;  %v14950_v18 = vld [vmem:[%s21735_s1 + $0x60] ss:$16 sps:$4 sm:$0xff]   ;;  %v15024_v6 = vld [vmem:[%s21735_s1 + $0xa8] ss:$16 sps:$4 sm:$0xff]  }
   0xa   :  { %v14948_v17 = vld [vmem:[%s21735_s1 + $0x264] ss:$16 sps:$4 sm:$0xff]   ;;  %v14951_v19 = vld [vmem:[%s21735_s1 + $0x260] ss:$16 sps:$4 sm:$0xff]   ;;  %v15027_v7 = vld [vmem:[%s21735_s1 + $0x2e8] ss:$16 sps:$4 sm:$0xff]  }
   0xb   :  { %862 = vmatpush1.bf16.msra.mxu0 %v14938_v10  ;;  %v14952_v20 = vld [vmem:[%s21735_s1 + $0x44] ss:$16 sps:$4 sm:$0xff]   ;;  %v14956_v22 = vld [vmem:[%s21735_s1 + $0x40] ss:$16 sps:$4 sm:$0xff]   ;;  %v15032_v8 = vld [vmem:[%s21735_s1 + $0x8c] ss:$16 sps:$4 sm:$0xff]  }
   0xc   :  { %933 = vmatpush1.bf16.msra.mxu1 %v14939_v11  ;;  %863 = vmatprep.subr.bf16.mxu0 %v14940_v12  ;;  %v14954_v21 = vld [vmem:[%s21735_s1 + $0x244] ss:$16 sps:$4 sm:$0xff]   ;;  %v14957_v23 = vld [vmem:[%s21735_s1 + $0x240] ss:$16 sps:$4 sm:$0xff]   ;;  %v15035_v9 = vld [vmem:[%s21735_s1 + $0x2cc] ss:$16 sps:$4 sm:$0xff]  }
   0xd   :  { %934 = vmatprep.subr.bf16.mxu1 %v14942_v13  ;;  %v14958_v24 = vld [vmem:[%s21735_s1 + $0x24] ss:$16 sps:$4 sm:$0xff]   ;;  %v14962_v26 = vld [vmem:[%s21735_s1 + $0x20] ss:$16 sps:$4 sm:$0xff]   ;;  %v16878_v10 = vld [vmem:[%s21734_s0 + $0x2c] ss:$16 sps:$4 sm:$0xff]  }
   0xe   :  { %v14960_v25 = vld [vmem:[%s21735_s1 + $0x224] ss:$16 sps:$4 sm:$0xff]   ;;  %v14963_v27 = vld [vmem:[%s21735_s1 + $0x220] ss:$16 sps:$4 sm:$0xff]   ;;  %v16888_v12 = vld [vmem:[%s21734_s0 + $0x28] ss:$16 sps:$4 sm:$0xff]  }
   0xf   :  { %864 = vmatpush1.bf16.msra.mxu0 %v14944_v14  ;;  %v14964_v28 = vld [vmem:[%s21735_s1 + $0x4] ss:$16 sps:$4 sm:$0xff]   ;;  %v14968_v30 = vld [vmem:[%s21735_s1] ss:$16 sps:$4 sm:$0xff]   ;;  %v15030_v13 = vld [vmem:[%s21735_s1 + $0x88] ss:$16 sps:$4 sm:$0xff]  }
  0x10   :  { %935 = vmatpush1.bf16.msra.mxu1 %v14945_v15  ;;  %865 = vmatprep.subr.bf16.mxu0 %v14946_v16  ;;  %v14966_v29 = vld [vmem:[%s21735_s1 + $0x204] ss:$16 sps:$4 sm:$0xff]   ;;  %v14969_v31 = vld [vmem:[%s21735_s1 + $0x200] ss:$16 sps:$4 sm:$0xff]   ;;  %v15033_v14 = vld [vmem:[%s21735_s1 + $0x2c8] ss:$16 sps:$4 sm:$0xff]  }
  0x11   :  { %936 = vmatprep.subr.bf16.mxu1 %v14948_v17  ;;  %v14970_v32 = vld [vmem:[%s21735_s1 + $0x1e4] ss:$16 sps:$4 sm:$0xff]   ;;  %v14974_v34 = vld [vmem:[%s21735_s1 + $0x1e0] ss:$16 sps:$4 sm:$0xff]   ;;  %v15038_v15 = vld [vmem:[%s21735_s1 + $0x6c] ss:$16 sps:$4 sm:$0xff]  }
  0x12   :  { %v14972_v33 = vld [vmem:[%s21735_s1 + $0x3a4] ss:$16 sps:$4 sm:$0xff]   ;;  %v14975_v35 = vld [vmem:[%s21735_s1 + $0x3a0] ss:$16 sps:$4 sm:$0xff]   ;;  %v15041_v16 = vld [vmem:[%s21735_s1 + $0x2ac] ss:$16 sps:$4 sm:$0xff]  }
  0x13   :  { %866 = vmatpush1.bf16.msra.mxu0 %v14950_v18  ;;  %v14976_v36 = vld [vmem:[%s21735_s1 + $0x1c4] ss:$16 sps:$4 sm:$0xff]   ;;  %v14980_v38 = vld [vmem:[%s21735_s1 + $0x1c0] ss:$16 sps:$4 sm:$0xff]   ;;  %v15036_v17 = vld [vmem:[%s21735_s1 + $0x68] ss:$16 sps:$4 sm:$0xff]  }
  0x14   :  { %937 = vmatpush1.bf16.msra.mxu1 %v14951_v19  ;;  %867 = vmatprep.subr.bf16.mxu0 %v14952_v20  ;;  %v14978_v37 = vld [vmem:[%s21735_s1 + $0x384] ss:$16 sps:$4 sm:$0xff]   ;;  %v14981_v39 = vld [vmem:[%s21735_s1 + $0x380] ss:$16 sps:$4 sm:$0xff]   ;;  %v15039_v18 = vld [vmem:[%s21735_s1 + $0x2a8] ss:$16 sps:$4 sm:$0xff]  }
  0x15   :  { %938 = vmatprep.subr.bf16.mxu1 %v14954_v21  ;;  %v14982_v40 = vld [vmem:[%s21735_s1 + $0x1a4] ss:$16 sps:$4 sm:$0xff]   ;;  %v14986_v43 = vld [vmem:[%s21735_s1 + $0x1a0] ss:$16 sps:$4 sm:$0xff]   ;;  %v15044_v19 = vld [vmem:[%s21735_s1 + $0x4c] ss:$16 sps:$4 sm:$0xff]  }
  0x16   :  { %v14984_v41 = vld [vmem:[%s21735_s1 + $0x364] ss:$16 sps:$4 sm:$0xff]   ;;  %v14987_v44 = vld [vmem:[%s21735_s1 + $0x360] ss:$16 sps:$4 sm:$0xff]   ;;  %v15047_v21 = vld [vmem:[%s21735_s1 + $0x28c] ss:$16 sps:$4 sm:$0xff]  }
  0x17   :  { %868 = vmatpush1.bf16.msra.mxu0 %v14956_v22  ;;  %v14988_v45 = vld [vmem:[%s21735_s1 + $0x184] ss:$16 sps:$4 sm:$0xff]   ;;  %v14992_v47 = vld [vmem:[%s21735_s1 + $0x180] ss:$16 sps:$4 sm:$0xff]   ;;  %v16927_v22 = vld [vmem:[%s21734_s0 + $0x4c] ss:$16 sps:$4 sm:$0xff]  }
  0x18   :  { %939 = vmatpush1.bf16.msra.mxu1 %v14957_v23  ;;  %869 = vmatprep.subr.bf16.mxu0 %v14958_v24  ;;  %v14990_v46 = vld [vmem:[%s21735_s1 + $0x344] ss:$16 sps:$4 sm:$0xff]   ;;  %v14993_v48 = vld [vmem:[%s21735_s1 + $0x340] ss:$16 sps:$4 sm:$0xff]   ;;  %v16937_v24 = vld [vmem:[%s21734_s0 + $0x48] ss:$16 sps:$4 sm:$0xff]  }
  0x19   :  { %940 = vmatprep.subr.bf16.mxu1 %v14960_v25  ;;  %v14994_v49 = vld [vmem:[%s21735_s1 + $0x164] ss:$16 sps:$4 sm:$0xff]   ;;  %v14998_v52 = vld [vmem:[%s21735_s1 + $0x160] ss:$16 sps:$4 sm:$0xff]   ;;  %v15042_v25 = vld [vmem:[%s21735_s1 + $0x48] ss:$16 sps:$4 sm:$0xff]  }
  0x1a   :  { %v16798_v50 = vld [vmem:[%s21734_s0 + $0x4] ss:$16 sps:$4 sm:$0xff]   ;;  %v14999_v53 = vld [vmem:[%s21735_s1 + $0x320] ss:$16 sps:$4 sm:$0xff]   ;;  %vm2382_vm4 = vcmask 1044480   ;;  %vm2475_vm5 = vcmask 1042432  }
  0x1b   :  { %870 = vmatpush1.bf16.msra.mxu0 %v14962_v26  ;;  %v14996_v51 = vld [vmem:[%s21735_s1 + $0x324] ss:$16 sps:$4 sm:$0xff]   ;;  %889 = vmatprep.mubr.bf16.mxu0 %v16798_v50  ;;  %v15004_v56 = vld [vmem:[%s21735_s1 + $0x140] ss:$16 sps:$4 sm:$0xff]   ;;  %v15045_v26 = vld [vmem:[%s21735_s1 + $0x288] ss:$16 sps:$4 sm:$0xff]  }
  0x1c   :  { %941 = vmatpush1.bf16.msra.mxu1 %v14963_v27  ;;  %871 = vmatprep.subr.bf16.mxu0 %v14964_v28  ;;  %v15000_v54 = vld [vmem:[%s21735_s1 + $0x144] ss:$16 sps:$4 sm:$0xff]   ;;  %v15005_v57 = vld [vmem:[%s21735_s1 + $0x300] ss:$16 sps:$4 sm:$0xff]   ;;  %v15050_v27 = vld [vmem:[%s21735_s1 + $0x2c] ss:$16 sps:$4 sm:$0xff]  }
  0x1d   :  { %942 = vmatprep.subr.bf16.mxu1 %v14966_v29  ;;  %v15002_v55 = vld [vmem:[%s21735_s1 + $0x304] ss:$16 sps:$4 sm:$0xff]   ;;  %v15014_v62 = vld [vmem:[%s21735_s1 + $0x120] ss:$16 sps:$4 sm:$0xff]   ;;  %v15053_v28 = vld [vmem:[%s21735_s1 + $0x26c] ss:$16 sps:$4 sm:$0xff]  }
  0x1e   :  { %v15008_v58 = vld [vmem:[%s21735_s1 + $0x124] ss:$16 sps:$4 sm:$0xff]   ;;  %v15020_v2 = vld [vmem:[%s21735_s1 + $0x100] ss:$16 sps:$4 sm:$0xff]   ;;  %v15048_v29 = vld [vmem:[%s21735_s1 + $0x28] ss:$16 sps:$4 sm:$0xff]  }
  0x1f   :  { %872 = vmatpush1.bf16.msra.mxu0 %v14968_v30  ;;  %v15015_v63 = vld [vmem:[%s21735_s1 + $0x104] ss:$16 sps:$4 sm:$0xff]   ;;  %v16861_v5 = vld [vmem:[%s21734_s0] ss:$16 sps:$4 sm:$0xff]   ;;  %v15051_v30 = vld [vmem:[%s21735_s1 + $0x268] ss:$16 sps:$4 sm:$0xff]  }
  0x20   :  { %943 = vmatpush1.bf16.msra.mxu1 %v14969_v31  ;;  %873 = vmatprep.subr.bf16.mxu0 %v14970_v32  ;;  %v16883_v11 = vld [vmem:[%s21734_s0 + $0x24] ss:$16 sps:$4 sm:$0xff]   ;;  %v16919_v20 = vld [vmem:[%s21734_s0 + $0x20] ss:$16 sps:$4 sm:$0xff]   ;;  %vm2512_vm6 = vcmask 1041408   ;;  %vm2541_vm7 = vcmask 1040384  }
  0x21   :  { %948 = vmatprep.subr.bf16.mxu1 %v14972_v33  ;;  %v16932_v23 = vld [vmem:[%s21734_s0 + $0x44] ss:$16 sps:$4 sm:$0xff]   ;;  %v16965_v31 = vld [vmem:[%s21734_s0 + $0x40] ss:$16 sps:$4 sm:$0xff]   ;;  %v53_v33 = vld [vmem:[%s21734_s0 + $0x68] sm:$0xff]  ;;  %vm2307_vm8 = vcmask 523264  }
  0x22   :  { %v52_v32 = vld [vmem:[%s21734_s0 + $0x60] sm:$0xff]  ;;  %vm2312_vm9 = vcmask 517120   ;;  %vm2469_vm10 = vcmask 519168   ;;  %vm2464_vm11 = vcmask 523266  }
  0x23   :  { %874 = vmatpush2.bf16.msra.mxu0 %v14974_v34  ;;  %v15056_v34 = vld [vmem:[%s21735_s1 + $0xc] ss:$16 sps:$4 sm:$0xff]  }
  0x24   :  { %949 = vmatpush2.bf16.msra.mxu1 %v14975_v35  ;;  %875 = vmatprep.subr.bf16.mxu0 %v14976_v36  ;;  %v15059_v35 = vld [vmem:[%s21735_s1 + $0x24c] ss:$16 sps:$4 sm:$0xff]   ;;  %v16979_v36 = vcombine.high %v53_v33, %v53_v33 }
  0x25   :  { %950 = vmatprep.subr.bf16.mxu1 %v14978_v37  ;;  %v16981_v37 = vcombine.high %v52_v32, %v52_v32 }
  0x27   :  { %876 = vmatpush2.bf16.msra.mxu0 %v14980_v38  ;;  %v16983_v38 = vcombine.low %v53_v33, %v53_v33  ;;  %v15139_v33 = vld [vmem:[%s21736_s2 + $0x2a0] ss:$16 sps:$4 sm:$0xff]  }
  0x28   :  { %951 = vmatpush2.bf16.msra.mxu1 %v14981_v39  ;;  %877 = vmatprep.subr.bf16.mxu0 %v14982_v40  ;;  %v15054_v39 = vld [vmem:[%s21735_s1 + $0x8] ss:$16 sps:$4 sm:$0xff]  }
  0x29   :  { %952 = vmatprep.subr.bf16.mxu1 %v14984_v41  ;;  %v15057_v40 = vld [vmem:[%s21735_s1 + $0x248] ss:$16 sps:$4 sm:$0xff]   ;;  %v15062_v41 = vld [vmem:[%s21735_s1 + $0x1ec] ss:$16 sps:$4 sm:$0xff]  }
  0x2b   :  { %878 = vmatpush2.bf16.msra.mxu0 %v14986_v43  ;;  %v15065_v43 = vld [vmem:[%s21735_s1 + $0x22c] ss:$16 sps:$4 sm:$0xff]  }
  0x2c   :  { %953 = vmatpush2.bf16.msra.mxu1 %v14987_v44  ;;  %879 = vmatprep.subr.bf16.mxu0 %v14988_v45  ;;  %v17002_v44 = vcombine.low %v52_v32, %v52_v32  ;;  %v15060_v45 = vld [vmem:[%s21735_s1 + $0x1e8] ss:$16 sps:$4 sm:$0xff]   ;;  %v15136_v32 = vld [vmem:[%s21736_s2 + $0xa0] ss:$16 sps:$4 sm:$0xff]  }
  0x2d   :  { %954 = vmatprep.subr.bf16.mxu1 %v14990_v46  ;;  %v15063_v46 = vld [vmem:[%s21735_s1 + $0x228] ss:$16 sps:$4 sm:$0xff]  }
  0x2f   :  { %880 = vmatpush2.bf16.msra.mxu0 %v14992_v47  ;;  %v15074_v47 = vld [vmem:[%s21735_s1 + $0x1cc] ss:$16 sps:$4 sm:$0xff]  }
  0x30   :  { %955 = vmatpush2.bf16.msra.mxu1 %v14993_v48  ;;  %881 = vmatprep.subr.bf16.mxu0 %v14994_v49  ;;  %v15077_v48 = vld [vmem:[%s21735_s1 + $0x20c] ss:$16 sps:$4 sm:$0xff]   ;;  %v15072_v49 = vld [vmem:[%s21735_s1 + $0x1c8] ss:$16 sps:$4 sm:$0xff]  }
  0x31   :  { %956 = vmatprep.subr.bf16.mxu1 %v14996_v51  ;;  %v15075_v51 = vld [vmem:[%s21735_s1 + $0x208] ss:$16 sps:$4 sm:$0xff]  }
  0x33   :  { %882 = vmatpush2.bf16.msra.mxu0 %v14998_v52  ;;  %v15080_v52 = vld [vmem:[%s21735_s1 + $0x1ac] ss:$16 sps:$4 sm:$0xff]  }
  0x34   :  { %957 = vmatpush2.bf16.msra.mxu1 %v14999_v53  ;;  %883 = vmatprep.subr.bf16.mxu0 %v15000_v54  ;;  %v15083_v53 = vld [vmem:[%s21735_s1 + $0x3ac] ss:$16 sps:$4 sm:$0xff]   ;;  %v15078_v54 = vld [vmem:[%s21735_s1 + $0x1a8] ss:$16 sps:$4 sm:$0xff]  }
  0x35   :  { %958 = vmatprep.subr.bf16.mxu1 %v15002_v55  ;;  %v15081_v55 = vld [vmem:[%s21735_s1 + $0x3a8] ss:$16 sps:$4 sm:$0xff]  }
  0x37   :  { %884 = vmatpush2.bf16.msra.mxu0 %v15004_v56  ;;  %v15092_v56 = vld [vmem:[%s21735_s1 + $0x18c] ss:$16 sps:$4 sm:$0xff]  }
  0x38   :  { %959 = vmatpush2.bf16.msra.mxu1 %v15005_v57  ;;  %885 = vmatprep.subr.bf16.mxu0 %v15008_v58  ;;  %v15095_v57 = vld [vmem:[%s21735_s1 + $0x38c] ss:$16 sps:$4 sm:$0xff]   ;;  %v15090_v58 = vld [vmem:[%s21735_s1 + $0x188] ss:$16 sps:$4 sm:$0xff]  }
  0x39   :  { %999 = vmatprep.subr.bf16.mxu1 %v15013_v59  ;;  %v15093_v59 = vld [vmem:[%s21735_s1 + $0x388] ss:$16 sps:$4 sm:$0xff]  }
  0x3b   :  { %961 = vmatmul.mubr.bf16.vlgmr.msra.gmra.mxu1 %v16831_v60  ;;  %886 = vmatpush2.bf16.msra.mxu0 %v15014_v62  ;;  %v15101_v62 = vld [vmem:[%s21735_s1 + $0x36c] ss:$16 sps:$4 sm:$0xff]  }
  0x3c   :  { %1000 = vmatpush1.bf16.msra.mxu1 %v15011_v61  ;;  %887 = vmatprep.subr.bf16.mxu0 %v15015_v63  ;;  %v15098_v61 = vld [vmem:[%s21735_s1 + $0x16c] ss:$16 sps:$4 sm:$0xff]   ;;  %v15096_v63 = vld [vmem:[%s21735_s1 + $0x168] ss:$16 sps:$4 sm:$0xff]  }
  0x3d   :  { %1001 = vmatprep.subr.bf16.mxu1 %v15019_v0  ;;  %12226 = vmatprep.mubr.msk.bf16.mxu1 %vm844_vm0, %v16878_v10  ;;  %v15099_v0 = vld [vmem:[%s21735_s1 + $0x368] ss:$16 sps:$4 sm:$0xff]  }
  0x3f   :  { %888 = vmatpush2.bf16.msra.mxu0 %v15020_v2  ;;  %v15111_v2 = vld [vmem:[%s21735_s1 + $0x34c] ss:$16 sps:$4 sm:$0xff]  }
  0x40   :  { %1002 = vmatpush1.bf16.msra.mxu1 %v15017_v1  ;;  %1070 = vmatprep.subr.bf16.mxu0 %v15029_v4  ;;  %v15108_v1 = vld [vmem:[%s21735_s1 + $0x14c] ss:$16 sps:$4 sm:$0xff]   ;;  %v15109_v4 = vld [vmem:[%s21735_s1 + $0x348] ss:$16 sps:$4 sm:$0xff]  }
  0x41   :  { %1003 = vmatprep.subr.bf16.mxu1 %v15026_v3  ;;  %v15106_v3 = vld [vmem:[%s21735_s1 + $0x148] ss:$16 sps:$4 sm:$0xff]  }
  0x42   :  { %890 = vmatmul.mubr.bf16.vlgmr.msra.gmra.mxu0 %v16861_v5 }
  0x43   :  { %1071 = vmatpush1.bf16.msra.mxu0 %v15027_v7  ;;  %899 = vmatprep.mubr.bf16.mxu0 %v16883_v11  ;;  %v15117_v7 = vld [vmem:[%s21735_s1 + $0x32c] ss:$16 sps:$4 sm:$0xff]  }
  0x44   :  { %1004 = vmatpush1.bf16.msra.mxu1 %v15024_v6  ;;  %1072 = vmatprep.subr.bf16.mxu0 %v15035_v9  ;;  %v15114_v6 = vld [vmem:[%s21735_s1 + $0x12c] ss:$16 sps:$4 sm:$0xff]   ;;  %v15115_v9 = vld [vmem:[%s21735_s1 + $0x328] ss:$16 sps:$4 sm:$0xff]  }
  0x45   :  { %1005 = vmatprep.subr.bf16.mxu1 %v15032_v8  ;;  %971 = vmatmul.mubr.bf16.gmra.mxu1 %v16888_v12  ;;  %v15112_v8 = vld [vmem:[%s21735_s1 + $0x128] ss:$16 sps:$4 sm:$0xff]  }
  0x46   :  { %12227 = vmatprep.mubr.msk.bf16.mxu1 %vm844_vm0, %v16927_v22 }
  0x47   :  { %1073 = vmatpush1.bf16.msra.mxu0 %v15033_v14  ;;  %v15123_v14 = vld [vmem:[%s21735_s1 + $0x30c] ss:$16 sps:$4 sm:$0xff]  }
  0x48   :  { %1006 = vmatpush1.bf16.msra.mxu1 %v15030_v13  ;;  %1074 = vmatprep.subr.bf16.mxu0 %v15041_v16  ;;  %v15120_v13 = vld [vmem:[%s21735_s1 + $0x10c] ss:$16 sps:$4 sm:$0xff]   ;;  %v15121_v16 = vld [vmem:[%s21735_s1 + $0x308] ss:$16 sps:$4 sm:$0xff]  }
  0x49   :  { %1007 = vmatprep.subr.bf16.mxu1 %v15038_v15  ;;  %v15118_v15 = vld [vmem:[%s21735_s1 + $0x108] ss:$16 sps:$4 sm:$0xff]  }
  0x4a   :  { %900 = vmatmul.mubr.bf16.gmra.mxu0 %v16919_v20 }
  0x4b   :  { %1075 = vmatpush1.bf16.msra.mxu0 %v15039_v18  ;;  %909 = vmatprep.mubr.bf16.mxu0 %v16932_v23  ;;  %v15129_v18 = vld [vmem:[%s21736_s2 + $0x2e4] ss:$16 sps:$4 sm:$0xff]  }
  0x4c   :  { %1008 = vmatpush1.bf16.msra.mxu1 %v15036_v17  ;;  %1076 = vmatprep.subr.bf16.mxu0 %v15047_v21  ;;  %v15126_v17 = vld [vmem:[%s21736_s2 + $0xe4] ss:$16 sps:$4 sm:$0xff]   ;;  %v15127_v21 = vld [vmem:[%s21736_s2 + $0x2e0] ss:$16 sps:$4 sm:$0xff]  }
  0x4d   :  { %1009 = vmatprep.subr.bf16.mxu1 %v15044_v19  ;;  %981 = vmatmul.mubr.bf16.gmra.mxu1 %v16937_v24  ;;  %v15124_v19 = vld [vmem:[%s21736_s2 + $0xe0] ss:$16 sps:$4 sm:$0xff]  }
  0x4e   :  { %12228 = vmatprep.mubr.msk.bf16.mxu1 %vm844_vm0, %v16979_v36 }
  0x4f   :  { %1077 = vmatpush1.bf16.msra.mxu0 %v15045_v26  ;;  %v15135_v26 = vld [vmem:[%s21736_s2 + $0x2c4] ss:$16 sps:$4 sm:$0xff]  }
  0x50   :  { %1010 = vmatpush1.bf16.msra.mxu1 %v15042_v25  ;;  %1078 = vmatprep.subr.bf16.mxu0 %v15053_v28  ;;  %v15132_v25 = vld [vmem:[%s21736_s2 + $0xc4] ss:$16 sps:$4 sm:$0xff]   ;;  %v15133_v28 = vld [vmem:[%s21736_s2 + $0x2c0] ss:$16 sps:$4 sm:$0xff]  }
  0x51   :  { %1011 = vmatprep.subr.bf16.mxu1 %v15050_v27  ;;  %v15130_v27 = vld [vmem:[%s21736_s2 + $0xc0] ss:$16 sps:$4 sm:$0xff]  }
  0x52   :  { %910 = vmatmul.mubr.bf16.gmra.mxu0 %v16965_v31 }
  0x53   :  { %1079 = vmatpush1.bf16.msra.mxu0 %v15051_v30  ;;  %919 = vmatprep.mubr.bf16.mxu0 %v16981_v37  ;;  %v15141_v30 = vld [vmem:[%s21736_s2 + $0x2a4] ss:$16 sps:$4 sm:$0xff]  }
  0x54   :  { %1012 = vmatpush1.bf16.msra.mxu1 %v15048_v29  ;;  %1080 = vmatprep.subr.bf16.mxu0 %v15059_v35  ;;  %v15138_v29 = vld [vmem:[%s21736_s2 + $0xa4] ss:$16 sps:$4 sm:$0xff]   ;;  %v15142_v35 = vld [vmem:[%s21736_s2 + $0x80] ss:$16 sps:$4 sm:$0xff]  }
  0x55   :  { %1013 = vmatprep.subr.bf16.mxu1 %v15056_v34  ;;  %991 = vmatmul.mubr.bf16.gmra.mxu1 %v16983_v38  ;;  %v15144_v34 = vld [vmem:[%s21736_s2 + $0x84] ss:$16 sps:$4 sm:$0xff]  }
  0x56   :  { %1031 = vmatprep.mubr.bf16.mxu1 %v16798_v50 }
  0x57   :  { %1081 = vmatpush1.bf16.msra.mxu0 %v15057_v40  ;;  %v15150_v40 = vld [vmem:[%s21736_s2 + $0x64] ss:$16 sps:$4 sm:$0xff]  }
  0x58   :  { %1014 = vmatpush1.bf16.msra.mxu1 %v15054_v39  ;;  %1082 = vmatprep.subr.bf16.mxu0 %v15065_v43  ;;  %v15145_v39 = vld [vmem:[%s21736_s2 + $0x280] ss:$16 sps:$4 sm:$0xff]  }
  0x59   :  { %1015 = vmatprep.subr.bf16.mxu1 %v15062_v41  ;;  %v15148_v41 = vld [vmem:[%s21736_s2 + $0x60] ss:$16 sps:$4 sm:$0xff]  }
  0x5a   :  { %920 = vmatmul.mubr.bf16.gmra.mxu0 %v17002_v44  ;;  %v15151_v43 = vld [vmem:[%s21736_s2 + $0x260] ss:$16 sps:$4 sm:$0xff]  }
  0x5b   :  { %1083 = vmatpush1.bf16.msra.mxu0 %v15063_v46  ;;  %12229 = vmatprep.mubr.msk.bf16.mxu0 %vm844_vm0, %v16770_v42  ;;  %v15154_v46 = vld [vmem:[%s21736_s2 + $0x40] ss:$16 sps:$4 sm:$0xff]  }
  0x5c   :  { %1016 = vmatpush2.bf16.msra.mxu1 %v15060_v45  ;;  %1084 = vmatprep.subr.bf16.mxu0 %v15077_v48  ;;  %v15156_v45 = vld [vmem:[%s21736_s2 + $0x44] ss:$16 sps:$4 sm:$0xff]  }
  0x5d   :  { %1017 = vmatprep.subr.bf16.mxu1 %v15074_v47  ;;  %v15157_v47 = vld [vmem:[%s21736_s2 + $0x240] ss:$16 sps:$4 sm:$0xff]   ;;  %v15162_v48 = vld [vmem:[%s21736_s2 + $0x24] ss:$16 sps:$4 sm:$0xff]  }
  0x5f   :  { %1085 = vmatpush1.bf16.msra.mxu0 %v15075_v51  ;;  %v15163_v51 = vld [vmem:[%s21736_s2 + $0x220] ss:$16 sps:$4 sm:$0xff]  }
  0x60   :  { %1018 = vmatpush2.bf16.msra.mxu1 %v15072_v49  ;;  %1090 = vmatprep.subr.bf16.mxu0 %v15083_v53  ;;  %v15160_v49 = vld [vmem:[%s21736_s2 + $0x20] ss:$16 sps:$4 sm:$0xff]   ;;  %v15171_v53 = vld [vmem:[%s21736_s2 + $0x204] ss:$16 sps:$4 sm:$0xff]  }
  0x61   :  { %1019 = vmatprep.subr.bf16.mxu1 %v15080_v52  ;;  %v15168_v52 = vld [vmem:[%s21736_s2 + $0x4] ss:$16 sps:$4 sm:$0xff]  }
  0x63   :  { %1091 = vmatpush2.bf16.msra.mxu0 %v15081_v55  ;;  %v15169_v55 = vld [vmem:[%s21736_s2 + $0x200] ss:$16 sps:$4 sm:$0xff]  }
  0x64   :  { %1020 = vmatpush2.bf16.msra.mxu1 %v15078_v54  ;;  %1092 = vmatprep.subr.bf16.mxu0 %v15095_v57  ;;  %v15166_v54 = vld [vmem:[%s21736_s2] ss:$16 sps:$4 sm:$0xff]   ;;  %v15177_v57 = vld [vmem:[%s21736_s2 + $0x3a4] ss:$16 sps:$4 sm:$0xff]  }
  0x65   :  { %1021 = vmatprep.subr.bf16.mxu1 %v15092_v56  ;;  %v15174_v56 = vld [vmem:[%s21736_s2 + $0x1e4] ss:$16 sps:$4 sm:$0xff]  }
  0x67   :  { %1093 = vmatpush2.bf16.msra.mxu0 %v15093_v59  ;;  %v15175_v59 = vld [vmem:[%s21736_s2 + $0x3a0] ss:$16 sps:$4 sm:$0xff]  }
  0x68   :  { %1022 = vmatpush2.bf16.msra.mxu1 %v15090_v58  ;;  %1094 = vmatprep.subr.bf16.mxu0 %v15101_v62  ;;  %v15172_v58 = vld [vmem:[%s21736_s2 + $0x1e0] ss:$16 sps:$4 sm:$0xff]  }
  0x69   :  { %1023 = vmatprep.subr.bf16.mxu1 %v15098_v61  ;;  %v15180_v61 = vld [vmem:[%s21736_s2 + $0x1c4] ss:$16 sps:$4 sm:$0xff]   ;;  %v15181_v62 = vld [vmem:[%s21736_s2 + $0x380] ss:$16 sps:$4 sm:$0xff]  }
  0x6b   :  { %1095 = vmatpush2.bf16.msra.mxu0 %v15099_v0  ;;  %v15189_v0 = vld [vmem:[%s21736_s2 + $0x364] ss:$16 sps:$4 sm:$0xff]  }
  0x6c   :  { %1024 = vmatpush2.bf16.msra.mxu1 %v15096_v63  ;;  %1096 = vmatprep.subr.bf16.mxu0 %v15111_v2  ;;  %v15186_v63 = vld [vmem:[%s21736_s2 + $0x1a4] ss:$16 sps:$4 sm:$0xff]   ;;  %v15187_v2 = vld [vmem:[%s21736_s2 + $0x360] ss:$16 sps:$4 sm:$0xff]  }
  0x6d   :  { %1025 = vmatprep.subr.bf16.mxu1 %v15108_v1  ;;  %v15184_v1 = vld [vmem:[%s21736_s2 + $0x1a0] ss:$16 sps:$4 sm:$0xff]  }
  0x6f   :  { %1097 = vmatpush2.bf16.msra.mxu0 %v15109_v4  ;;  %v15195_v4 = vld [vmem:[%s21736_s2 + $0x344] ss:$16 sps:$4 sm:$0xff]  }
  0x70   :  { %1026 = vmatpush2.bf16.msra.mxu1 %v15106_v3  ;;  %1098 = vmatprep.subr.bf16.mxu0 %v15117_v7  ;;  %v15192_v3 = vld [vmem:[%s21736_s2 + $0x184] ss:$16 sps:$4 sm:$0xff]   ;;  %v15193_v7 = vld [vmem:[%s21736_s2 + $0x340] ss:$16 sps:$4 sm:$0xff]  }
  0x71   :  { %1027 = vmatprep.subr.bf16.mxu1 %v15114_v6  ;;  %v15190_v6 = vld [vmem:[%s21736_s2 + $0x180] ss:$16 sps:$4 sm:$0xff]  }
  0x73   :  { %1099 = vmatpush2.bf16.msra.mxu0 %v15115_v9  ;;  %v15201_v9 = vld [vmem:[%s21736_s2 + $0x324] ss:$16 sps:$4 sm:$0xff]  }
  0x74   :  { %1028 = vmatpush2.bf16.msra.mxu1 %v15112_v8  ;;  %1100 = vmatprep.subr.bf16.mxu0 %v15123_v14  ;;  %v15198_v8 = vld [vmem:[%s21736_s2 + $0x164] ss:$16 sps:$4 sm:$0xff]   ;;  %v15199_v14 = vld [vmem:[%s21736_s2 + $0x320] ss:$16 sps:$4 sm:$0xff]  }
  0x75   :  { %1029 = vmatprep.subr.bf16.mxu1 %v15120_v13  ;;  %v15196_v13 = vld [vmem:[%s21736_s2 + $0x160] ss:$16 sps:$4 sm:$0xff]  }
  0x77   :  { %1101 = vmatpush2.bf16.msra.mxu0 %v15121_v16  ;;  %v15207_v16 = vld [vmem:[%s21736_s2 + $0x304] ss:$16 sps:$4 sm:$0xff]  }
  0x78   :  { %1030 = vmatpush2.bf16.msra.mxu1 %v15118_v15  ;;  %1861 = vmatprep.subr.bf16.mxu0 %v15126_v17  ;;  %v15204_v15 = vld [vmem:[%s21736_s2 + $0x144] ss:$16 sps:$4 sm:$0xff]   ;;  %v15202_v17 = vld [vmem:[%s21736_s2 + $0x140] ss:$16 sps:$4 sm:$0xff]  }
  0x79   :  { %1932 = vmatprep.subr.bf16.mxu1 %v15129_v18  ;;  %v15205_v18 = vld [vmem:[%s21736_s2 + $0x300] ss:$16 sps:$4 sm:$0xff]  }
  0x7a   :  { %1103 = vmatmul.mubr.bf16.vlgmr.msra.gmra.mxu0 %v16831_v60 }
  0x7b   :  { %1032 = vmatmul.mubr.bf16.vlgmr.msra.gmra.mxu1 %v16861_v5  ;;  %1862 = vmatpush1.bf16.msra.mxu0 %v15124_v19  ;;  %v15210_v19 = vld [vmem:[%s21736_s2 + $0x124] ss:$16 sps:$4 sm:$0xff]  }
  0x7c   :  { %1933 = vmatpush1.bf16.msra.mxu1 %v15127_v21  ;;  %1863 = vmatprep.subr.bf16.mxu0 %v15132_v25  ;;  %v15213_v21 = vld [vmem:[%s21736_s2 + $0xec] ss:$16 sps:$4 sm:$0xff]   ;;  %v15208_v25 = vld [vmem:[%s21736_s2 + $0x120] ss:$16 sps:$4 sm:$0xff]  }
  0x7d   :  { %1934 = vmatprep.subr.bf16.mxu1 %v15135_v26  ;;  %1041 = vmatprep.mubr.bf16.mxu1 %v16883_v11  ;;  %v15147_v11 = vld [vmem:[%s21736_s2 + $0x284] ss:$16 sps:$4 sm:$0xff]   ;;  %v15211_v26 = vld [vmem:[%s21736_s2 + $0xe8] ss:$16 sps:$4 sm:$0xff]  }
  0x7e   :  { %12230 = vmatprep.mubr.msk.bf16.mxu0 %vm844_vm0, %v16878_v10 }
  0x7f   :  { %1864 = vmatpush1.bf16.msra.mxu0 %v15130_v27  ;;  %v15216_v27 = vld [vmem:[%s21736_s2 + $0x104] ss:$16 sps:$4 sm:$0xff]  }
  0x80   :  { %1935 = vmatpush1.bf16.msra.mxu1 %v15133_v28  ;;  %1865 = vmatprep.subr.bf16.mxu0 %v15138_v29  ;;  %v15219_v28 = vld [vmem:[%s21736_s2 + $0xcc] ss:$16 sps:$4 sm:$0xff]   ;;  %v15214_v29 = vld [vmem:[%s21736_s2 + $0x100] ss:$16 sps:$4 sm:$0xff]  }
  0x81   :  { %1936 = vmatprep.subr.bf16.mxu1 %v15141_v30  ;;  %v15217_v30 = vld [vmem:[%s21736_s2 + $0xc8] ss:$16 sps:$4 sm:$0xff]  }
  0x82   :  { %1113 = vmatmul.mubr.bf16.gmra.mxu0 %v16888_v12 }
  0x83   :  { %1042 = vmatmul.mubr.bf16.gmra.mxu1 %v16919_v20  ;;  %1866 = vmatpush1.bf16.msra.mxu0 %v15136_v32  ;;  %v15153_v20 = vld [vmem:[%s21736_s2 + $0x264] ss:$16 sps:$4 sm:$0xff]   ;;  %v15222_v32 = vld [vmem:[%s21736_s2 + $0xac] ss:$16 sps:$4 sm:$0xff]  }
  0x84   :  { %1937 = vmatpush1.bf16.msra.mxu1 %v15139_v33  ;;  %1867 = vmatprep.subr.bf16.mxu0 %v15144_v34  ;;  %v15225_v33 = vld [vmem:[%s21736_s2 + $0x2ec] ss:$16 sps:$4 sm:$0xff]   ;;  %v15220_v34 = vld [vmem:[%s21736_s2 + $0xa8] ss:$16 sps:$4 sm:$0xff]  }
  0x85   :  { %1938 = vmatprep.subr.bf16.mxu1 %v15147_v11  ;;  %1051 = vmatprep.mubr.bf16.mxu1 %v16932_v23  ;;  %v15159_v23 = vld [vmem:[%s21736_s2 + $0x244] ss:$16 sps:$4 sm:$0xff]   ;;  %v15228_v11 = vld [vmem:[%s21736_s2 + $0x8c] ss:$16 sps:$4 sm:$0xff]  }
  0x86   :  { %12231 = vmatprep.mubr.msk.bf16.mxu0 %vm844_vm0, %v16927_v22 }
  0x87   :  { %1868 = vmatpush1.bf16.msra.mxu0 %v15142_v35  ;;  %v15231_v35 = vld [vmem:[%s21736_s2 + $0x2cc] ss:$16 sps:$4 sm:$0xff]  }
  0x88   :  { %1939 = vmatpush1.bf16.msra.mxu1 %v15145_v39  ;;  %1869 = vmatprep.subr.bf16.mxu0 %v15150_v40  ;;  %v15226_v39 = vld [vmem:[%s21736_s2 + $0x88] ss:$16 sps:$4 sm:$0xff]   ;;  %v15234_v40 = vld [vmem:[%s21736_s2 + $0x6c] ss:$16 sps:$4 sm:$0xff]  }
  0x89   :  { %1940 = vmatprep.subr.bf16.mxu1 %v15153_v20  ;;  %v15237_v20 = vld [vmem:[%s21736_s2 + $0x2ac] ss:$16 sps:$4 sm:$0xff]  }
  0x8a   :  { %1123 = vmatmul.mubr.bf16.gmra.mxu0 %v16937_v24 }
  0x8b   :  { %1052 = vmatmul.mubr.bf16.gmra.mxu1 %v16965_v31  ;;  %1870 = vmatpush1.bf16.msra.mxu0 %v15148_v41  ;;  %v15165_v31 = vld [vmem:[%s21736_s2 + $0x224] ss:$16 sps:$4 sm:$0xff]  }
  0x8c   :  { %1941 = vmatpush1.bf16.msra.mxu1 %v15151_v43  ;;  %1871 = vmatprep.subr.bf16.mxu0 %v15156_v45  ;;  %v17348_v41 = vld [vmem:[%s21734_s0 + $0x24] ss:$16 sps:$4 sm:$0xff]   ;;  %v15240_v43 = vld [vmem:[%s21736_s2 + $0x4c] ss:$16 sps:$4 sm:$0xff]  }
  0x8d   :  { %1942 = vmatprep.subr.bf16.mxu1 %v15159_v23  ;;  %1061 = vmatprep.mubr.bf16.mxu1 %v16981_v37  ;;  %v15243_v45 = vld [vmem:[%s21736_s2 + $0x28c] ss:$16 sps:$4 sm:$0xff]   ;;  %v15238_v23 = vld [vmem:[%s21736_s2 + $0x48] ss:$16 sps:$4 sm:$0xff]  }
  0x8e   :  { %12232 = vmatprep.mubr.msk.bf16.mxu0 %vm844_vm0, %v16979_v36 }
  0x8f   :  { %1872 = vmatpush1.bf16.msra.mxu0 %v15154_v46  ;;  %v17374_v46 = vld [vmem:[%s21734_s0 + $0x20] ss:$16 sps:$4 sm:$0xff]  }
  0x90   :  { %1943 = vmatpush1.bf16.msra.mxu1 %v15157_v47  ;;  %1873 = vmatprep.subr.bf16.mxu0 %v15162_v48  ;;  %v15246_v47 = vld [vmem:[%s21736_s2 + $0x2c] ss:$16 sps:$4 sm:$0xff]  }
  0x91   :  { %1944 = vmatprep.subr.bf16.mxu1 %v15165_v31  ;;  %v15249_v48 = vld [vmem:[%s21736_s2 + $0x26c] ss:$16 sps:$4 sm:$0xff]   ;;  %v17387_v31 = vld [vmem:[%s21734_s0 + $0x44] ss:$16 sps:$4 sm:$0xff]  }
  0x92   :  { %1133 = vmatmul.mubr.bf16.gmra.mxu0 %v16983_v38 }
  0x93   :  { %1062 = vmatmul.mubr.bf16.gmra.mxu1 %v17002_v44  ;;  %1874 = vmatpush1.bf16.msra.mxu0 %v15160_v49  ;;  %v15247_v49 = vld [vmem:[%s21736_s2 + $0x268] ss:$16 sps:$4 sm:$0xff]  }
  0x94   :  { %1945 = vmatpush1.bf16.msra.mxu1 %v15163_v51  ;;  %1875 = vmatprep.subr.bf16.mxu0 %v15168_v52  ;;  %v15252_v51 = vld [vmem:[%s21736_s2 + $0xc] ss:$16 sps:$4 sm:$0xff]  }
  0x95   :  { %1946 = vmatprep.subr.bf16.mxu1 %v15171_v53  ;;  %12353 = vmatprep.mubr.msk.bf16.mxu1 %vm844_vm0, %v16770_v42  ;;  %v15183_v42 = vld [vmem:[%s21736_s2 + $0x384] ss:$16 sps:$4 sm:$0xff]   ;;  %v15255_v52 = vld [vmem:[%s21736_s2 + $0x24c] ss:$16 sps:$4 sm:$0xff]   ;;  %v15250_v53 = vld [vmem:[%s21736_s2 + $0x8] ss:$16 sps:$4 sm:$0xff]  }
  0x96   :  { %1893 = vmatprep.mubr.bf16.mxu0 %v16798_v50  ;;  %v15178_v50 = vld [vmem:[%s21736_s2 + $0x1c0] ss:$16 sps:$4 sm:$0xff]  }
  0x97   :  { %1876 = vmatpush1.bf16.msra.mxu0 %v15166_v54  ;;  %v15253_v54 = vld [vmem:[%s21736_s2 + $0x248] ss:$16 sps:$4 sm:$0xff]  }
  0x98   :  { %1947 = vmatpush1.bf16.msra.mxu1 %v15169_v55  ;;  %1877 = vmatprep.subr.bf16.mxu0 %v15174_v56  ;;  %v17413_v55 = vld [vmem:[%s21734_s0 + $0x40] ss:$16 sps:$4 sm:$0xff]   ;;  %v15258_v56 = vld [vmem:[%s21736_s2 + $0x1ec] ss:$16 sps:$4 sm:$0xff]  }
  0x99   :  { %1952 = vmatprep.subr.bf16.mxu1 %v15177_v57  ;;  %v15261_v57 = vld [vmem:[%s21736_s2 + $0x22c] ss:$16 sps:$4 sm:$0xff]  }
  0x9b   :  { %1878 = vmatpush2.bf16.msra.mxu0 %v15172_v58  ;;  %v15256_v58 = vld [vmem:[%s21736_s2 + $0x1e8] ss:$16 sps:$4 sm:$0xff]  }
  0x9c   :  { %1953 = vmatpush2.bf16.msra.mxu1 %v15175_v59  ;;  %1879 = vmatprep.subr.bf16.mxu0 %v15180_v61  ;;  %v15259_v59 = vld [vmem:[%s21736_s2 + $0x228] ss:$16 sps:$4 sm:$0xff]   ;;  %v16545_v61 = vld [vmem:[%s21734_s0 + $0x4] ss:$16 sps:$4 sm:$0xff]  }
  0x9d   :  { %1954 = vmatprep.subr.bf16.mxu1 %v15183_v42  ;;  %v15264_v42 = vld [vmem:[%s21736_s2 + $0x1cc] ss:$16 sps:$4 sm:$0xff]  }
  0x9f   :  { %1880 = vmatpush2.bf16.msra.mxu0 %v15178_v50  ;;  %v15267_v50 = vld [vmem:[%s21736_s2 + $0x20c] ss:$16 sps:$4 sm:$0xff]  }
  0xa0   :  { %1955 = vmatpush2.bf16.msra.mxu1 %v15181_v62  ;;  %1881 = vmatprep.subr.bf16.mxu0 %v15186_v63  ;;  %v15262_v62 = vld [vmem:[%s21736_s2 + $0x1c8] ss:$16 sps:$4 sm:$0xff]  }
  0xa1   :  { %1956 = vmatprep.subr.bf16.mxu1 %v15189_v0  ;;  %v15265_v63 = vld [vmem:[%s21736_s2 + $0x208] ss:$16 sps:$4 sm:$0xff]   ;;  %v15270_v0 = vld [vmem:[%s21736_s2 + $0x1ac] ss:$16 sps:$4 sm:$0xff]  }
  0xa3   :  { %1882 = vmatpush2.bf16.msra.mxu0 %v15184_v1  ;;  %v15273_v1 = vld [vmem:[%s21736_s2 + $0x3ac] ss:$16 sps:$4 sm:$0xff]  }
  0xa4   :  { %1957 = vmatpush2.bf16.msra.mxu1 %v15187_v2  ;;  %1883 = vmatprep.subr.bf16.mxu0 %v15192_v3  ;;  %v15268_v2 = vld [vmem:[%s21736_s2 + $0x1a8] ss:$16 sps:$4 sm:$0xff]  }
  0xa5   :  { %1958 = vmatprep.subr.bf16.mxu1 %v15195_v4  ;;  %v15271_v3 = vld [vmem:[%s21736_s2 + $0x3a8] ss:$16 sps:$4 sm:$0xff]   ;;  %v16546_v4 = vld [vmem:[%s21734_s0 + $0xc] ss:$16 sps:$4 sm:$0xff]  }
  0xa7   :  { %1884 = vmatpush2.bf16.msra.mxu0 %v15190_v6  ;;  %v15276_v6 = vld [vmem:[%s21736_s2 + $0x18c] ss:$16 sps:$4 sm:$0xff]  }
  0xa8   :  { %1959 = vmatpush2.bf16.msra.mxu1 %v15193_v7  ;;  %1885 = vmatprep.subr.bf16.mxu0 %v15198_v8  ;;  %v15279_v7 = vld [vmem:[%s21736_s2 + $0x38c] ss:$16 sps:$4 sm:$0xff]   ;;  %v15274_v8 = vld [vmem:[%s21736_s2 + $0x188] ss:$16 sps:$4 sm:$0xff]  }
  0xa9   :  { %1960 = vmatprep.subr.bf16.mxu1 %v15201_v9  ;;  %v15277_v9 = vld [vmem:[%s21736_s2 + $0x388] ss:$16 sps:$4 sm:$0xff]  }
  0xab   :  { %1886 = vmatpush2.bf16.msra.mxu0 %v15196_v13  ;;  %v15282_v13 = vld [vmem:[%s21736_s2 + $0x16c] ss:$16 sps:$4 sm:$0xff]  }
  0xac   :  { %1961 = vmatpush2.bf16.msra.mxu1 %v15199_v14  ;;  %1887 = vmatprep.subr.bf16.mxu0 %v15204_v15  ;;  %v15285_v14 = vld [vmem:[%s21736_s2 + $0x36c] ss:$16 sps:$4 sm:$0xff]   ;;  %v15280_v15 = vld [vmem:[%s21736_s2 + $0x168] ss:$16 sps:$4 sm:$0xff]  }
  0xad   :  { %1962 = vmatprep.subr.bf16.mxu1 %v15207_v16  ;;  %v15283_v16 = vld [vmem:[%s21736_s2 + $0x368] ss:$16 sps:$4 sm:$0xff]  }
  0xaf   :  { %1888 = vmatpush2.bf16.msra.mxu0 %v15202_v17  ;;  %v15288_v17 = vld [vmem:[%s21736_s2 + $0x14c] ss:$16 sps:$4 sm:$0xff]  }
  0xb0   :  { %1963 = vmatpush2.bf16.msra.mxu1 %v15205_v18  ;;  %1889 = vmatprep.subr.bf16.mxu0 %v15210_v19  ;;  %v15291_v18 = vld [vmem:[%s21736_s2 + $0x34c] ss:$16 sps:$4 sm:$0xff]   ;;  %v15286_v19 = vld [vmem:[%s21736_s2 + $0x148] ss:$16 sps:$4 sm:$0xff]  }
  0xb1   :  { %2003 = vmatprep.subr.bf16.mxu1 %v15213_v21  ;;  %v15289_v21 = vld [vmem:[%s21736_s2 + $0x348] ss:$16 sps:$4 sm:$0xff]  }
  0xb3   :  { %1965 = vmatmul.mubr.bf16.vlgmr.msra.gmra.mxu1 %v16831_v60  ;;  %1890 = vmatpush2.bf16.msra.mxu0 %v15208_v25  ;;  %v15223_v60 = vld [vmem:[%s21736_s2 + $0x2e8] ss:$16 sps:$4 sm:$0xff]   ;;  %v15294_v25 = vld [vmem:[%s21736_s2 + $0x12c] ss:$16 sps:$4 sm:$0xff]  }
  0xb4   :  { %2004 = vmatpush1.bf16.msra.mxu1 %v15211_v26  ;;  %1891 = vmatprep.subr.bf16.mxu0 %v15216_v27  ;;  %v15297_v26 = vld [vmem:[%s21736_s2 + $0x32c] ss:$16 sps:$4 sm:$0xff]   ;;  %v15292_v27 = vld [vmem:[%s21736_s2 + $0x128] ss:$16 sps:$4 sm:$0xff]  }
  0xb5   :  { %2005 = vmatprep.subr.bf16.mxu1 %v15219_v28  ;;  %12354 = vmatprep.mubr.msk.bf16.mxu1 %vm844_vm0, %v16878_v10  ;;  %v15229_v10 = vld [vmem:[%s21736_s2 + $0x2c8] ss:$16 sps:$4 sm:$0xff]  }
  0xb6   :  { %v15295_v28 = vld [vmem:[%s21736_s2 + $0x328] ss:$16 sps:$4 sm:$0xff]  }
  0xb7   :  { %1892 = vmatpush2.bf16.msra.mxu0 %v15214_v29  ;;  %v15300_v29 = vld [vmem:[%s21736_s2 + $0x10c] ss:$16 sps:$4 sm:$0xff]  }
  0xb8   :  { %2006 = vmatpush1.bf16.msra.mxu1 %v15217_v30  ;;  %2074 = vmatprep.subr.bf16.mxu0 %v15225_v33  ;;  %v15303_v30 = vld [vmem:[%s21736_s2 + $0x30c] ss:$16 sps:$4 sm:$0xff]   ;;  %v15301_v33 = vld [vmem:[%s21736_s2 + $0x308] ss:$16 sps:$4 sm:$0xff]  }
  0xb9   :  { %2007 = vmatprep.subr.bf16.mxu1 %v15222_v32  ;;  %v15298_v32 = vld [vmem:[%s21736_s2 + $0x108] ss:$16 sps:$4 sm:$0xff]  }
  0xba   :  { %1894 = vmatmul.mubr.bf16.vlgmr.msra.gmra.mxu0 %v16861_v5  ;;  %v15232_v5 = vld [vmem:[%s21736_s2 + $0x68] ss:$16 sps:$4 sm:$0xff]  }
  0xbb   :  { %1975 = vmatmul.mubr.bf16.gmra.mxu1 %v16888_v12  ;;  %2075 = vmatpush1.bf16.msra.mxu0 %v15223_v60  ;;  %v15235_v12 = vld [vmem:[%s21736_s2 + $0x2a8] ss:$16 sps:$4 sm:$0xff]  }
  0xbc   :  { %2008 = vmatpush1.bf16.msra.mxu1 %v15220_v34  ;;  %2076 = vmatprep.subr.bf16.mxu0 %v15231_v35  ;;  %v15306_v34 = vld [vmem:[%s21738_s4 + $0x34c] ss:$12 sps:$4 sm:$0xff]   ;;  %v15304_v60 = vld [vmem:[%s21738_s4 + $0x348] ss:$12 sps:$4 sm:$0xff]  }
  0xbd   :  { %2009 = vmatprep.subr.bf16.mxu1 %v15228_v11  ;;  %1903 = vmatprep.mubr.bf16.mxu0 %v17348_v41  ;;  %v16547_v11 = vld [vmem:[%s21734_s0] ss:$16 sps:$4 sm:$0xff]   ;;  %v16548_v35 = vld [vmem:[%s21734_s0 + $0x8] ss:$16 sps:$4 sm:$0xff]  }
  0xbe   :  { %12355 = vmatprep.mubr.msk.bf16.mxu1 %vm844_vm0, %v16927_v22  ;;  %v15241_v22 = vld [vmem:[%s21736_s2 + $0x288] ss:$16 sps:$4 sm:$0xff]  }
  0xbf   :  { %2077 = vmatpush1.bf16.msra.mxu0 %v15229_v10  ;;  %v16549_v10 = vld [vmem:[%s21734_s0 + $0x2c] ss:$16 sps:$4 sm:$0xff]  }
  0xc0   :  { %2010 = vmatpush1.bf16.msra.mxu1 %v15226_v39  ;;  %2078 = vmatprep.subr.bf16.mxu0 %v15237_v20  ;;  %v15309_v39 = vld [vmem:[%s21738_s4 + $0x334] ss:$12 sps:$4 sm:$0xff]   ;;  %v15312_v20 = vld [vmem:[%s21738_s4 + $0x31c] ss:$12 sps:$4 sm:$0xff]  }
  0xc1   :  { %2011 = vmatprep.subr.bf16.mxu1 %v15234_v40  ;;  %v15307_v40 = vld [vmem:[%s21738_s4 + $0x330] ss:$12 sps:$4 sm:$0xff]  }
  0xc2   :  { %1904 = vmatmul.mubr.bf16.gmra.mxu0 %v17374_v46 }
  0xc3   :  { %1985 = vmatmul.mubr.bf16.gmra.mxu1 %v16937_v24  ;;  %2079 = vmatpush1.bf16.msra.mxu0 %v15235_v12  ;;  %v15244_v24 = vld [vmem:[%s21736_s2 + $0x28] ss:$16 sps:$4 sm:$0xff]  }
  0xc4   :  { %2012 = vmatpush1.bf16.msra.mxu1 %v15232_v5  ;;  %2080 = vmatprep.subr.bf16.mxu0 %v15243_v45  ;;  %v16550_v12 = vld [vmem:[%s21734_s0 + $0x28] ss:$16 sps:$4 sm:$0xff]   ;;  %v16551_v45 = vld [vmem:[%s21734_s0 + $0x4c] ss:$16 sps:$4 sm:$0xff]  }
  0xc5   :  { %2013 = vmatprep.subr.bf16.mxu1 %v15240_v43  ;;  %1913 = vmatprep.mubr.bf16.mxu0 %v17387_v31  ;;  %v15315_v43 = vld [vmem:[%s21738_s4 + $0x304] ss:$12 sps:$4 sm:$0xff]  }
  0xc6   :  { %12356 = vmatprep.mubr.msk.bf16.mxu1 %vm844_vm0, %v16979_v36 }
  0xc7   :  { %2081 = vmatpush1.bf16.msra.mxu0 %v15241_v22 }
  0xc8   :  { %2014 = vmatpush1.bf16.msra.mxu1 %v15238_v23  ;;  %2082 = vmatprep.subr.bf16.mxu0 %v15249_v48  ;;  %v15313_v23 = vld [vmem:[%s21738_s4 + $0x300] ss:$12 sps:$4 sm:$0xff]   ;;  %v15316_v48 = vld [vmem:[%s21738_s4 + $0x2e8] ss:$12 sps:$4 sm:$0xff]  }
  0xc9   :  { %2015 = vmatprep.subr.bf16.mxu1 %v15246_v47 }
  0xca   :  { %1914 = vmatmul.mubr.bf16.gmra.mxu0 %v17413_v55 }
  0xcb   :  { %1995 = vmatmul.mubr.bf16.gmra.mxu1 %v16983_v38  ;;  %2083 = vmatpush1.bf16.msra.mxu0 %v15247_v49  ;;  %v15321_v49 = vld [vmem:[%s21738_s4 + $0x2d4] ss:$12 sps:$4 sm:$0xff]  }
  0xcc   :  { %2016 = vmatpush1.bf16.msra.mxu1 %v15244_v24  ;;  %2084 = vmatprep.subr.bf16.mxu0 %v15255_v52  ;;  %v16552_v24 = vld [vmem:[%s21734_s0 + $0x48] ss:$16 sps:$4 sm:$0xff]  }
  0xcd   :  { %2017 = vmatprep.subr.bf16.mxu1 %v15252_v51  ;;  %1923 = vmatprep.mubr.bf16.mxu0 %v16981_v37 }
  0xce   :  { %2035 = vmatprep.mubr.bf16.mxu1 %v16545_v61 }
  0xcf   :  { %2085 = vmatpush1.bf16.msra.mxu0 %v15253_v54 }
  0xd0   :  { %2018 = vmatpush1.bf16.msra.mxu1 %v15250_v53  ;;  %2086 = vmatprep.subr.bf16.mxu0 %v15261_v57  ;;  %v15319_v53 = vld [vmem:[%s21738_s4 + $0x2d0] ss:$12 sps:$4 sm:$0xff]  }
  0xd1   :  { %2019 = vmatprep.subr.bf16.mxu1 %v15258_v56 }
  0xd2   :  { %1924 = vmatmul.mubr.bf16.gmra.mxu0 %v17002_v44 }
  0xd3   :  { %2087 = vmatpush1.bf16.msra.mxu0 %v15259_v59  ;;  %12357 = vmatprep.mubr.msk.bf16.mxu0 %vm844_vm0, %v16546_v4 }
  0xd4   :  { %2020 = vmatpush2.bf16.msra.mxu1 %v15256_v58  ;;  %2088 = vmatprep.subr.bf16.mxu0 %v15267_v50  ;;  %v15324_v58 = vld [vmem:[%s21738_s4 + $0x2bc] ss:$12 sps:$4 sm:$0xff]  }
  0xd5   :  { %2021 = vmatprep.subr.bf16.mxu1 %v15264_v42 }
  0xd7   :  { %2089 = vmatpush1.bf16.msra.mxu0 %v15265_v63 }
  0xd8   :  { %2022 = vmatpush2.bf16.msra.mxu1 %v15262_v62  ;;  %2094 = vmatprep.subr.bf16.mxu0 %v15273_v1 }
  0xd9   :  { %2023 = vmatprep.subr.bf16.mxu1 %v15270_v0  ;;  %v15327_v0 = vld [vmem:[%s21738_s4 + $0x2a4] ss:$12 sps:$4 sm:$0xff]  }
  0xdb   :  { %2095 = vmatpush2.bf16.msra.mxu0 %v15271_v3 }
  0xdc   :  { %2024 = vmatpush2.bf16.msra.mxu1 %v15268_v2  ;;  %2096 = vmatprep.subr.bf16.mxu0 %v15279_v7  ;;  %v15325_v2 = vld [vmem:[%s21738_s4 + $0x2a0] ss:$12 sps:$4 sm:$0xff]  }
  0xdd   :  { %2025 = vmatprep.subr.bf16.mxu1 %v15276_v6 }
  0xdf   :  { %2097 = vmatpush2.bf16.msra.mxu0 %v15277_v9 }
  0xe0   :  { %2026 = vmatpush2.bf16.msra.mxu1 %v15274_v8  ;;  %2098 = vmatprep.subr.bf16.mxu0 %v15285_v14 }
  0xe1   :  { %2027 = vmatprep.subr.bf16.mxu1 %v15282_v13  ;;  %v15330_v13 = vld [vmem:[%s21738_s4 + $0x40c] ss:$12 sps:$4 sm:$0xff]  }
  0xe3   :  { %2099 = vmatpush2.bf16.msra.mxu0 %v15283_v16  ;;  %v15328_v16 = vld [vmem:[%s21738_s4 + $0x408] ss:$12 sps:$4 sm:$0xff]  }
  0xe4   :  { %2028 = vmatpush2.bf16.msra.mxu1 %v15280_v15  ;;  %2100 = vmatprep.subr.bf16.mxu0 %v15291_v18 }
  0xe5   :  { %2029 = vmatprep.subr.bf16.mxu1 %v15288_v17 }
  0xe7   :  { %2101 = vmatpush2.bf16.msra.mxu0 %v15289_v21 }
  0xe8   :  { %2030 = vmatpush2.bf16.msra.mxu1 %v15286_v19  ;;  %2102 = vmatprep.subr.bf16.mxu0 %v15297_v26 }
  0xe9   :  { %2031 = vmatprep.subr.bf16.mxu1 %v15294_v25 }
  0xeb   :  { %2103 = vmatpush2.bf16.msra.mxu0 %v15295_v28 }
  0xec   :  { %2032 = vmatpush2.bf16.msra.mxu1 %v15292_v27  ;;  %2104 = vmatprep.subr.bf16.mxu0 %v15303_v30 }
  0xed   :  { %2033 = vmatprep.subr.bf16.mxu1 %v15300_v29 }
  0xef   :  { %2105 = vmatpush2.bf16.msra.mxu0 %v15301_v33 }
  0xf0   :  { %2034 = vmatpush2.bf16.msra.mxu1 %v15298_v32  ;;  %3409 = vmatprep.subr.bf16.mxu0 %v15306_v34  ;;  %v15333_v34 = vld [vmem:[%s21738_s4 + $0x3f4] ss:$12 sps:$4 sm:$0xff]  }
  0xf2   :  { %2107 = vmatmul.mubr.bf16.vlgmr.msra.gmra.mxu0 %v16548_v35 }
  0xf3   :  { %2036 = vmatmul.mubr.bf16.vlgmr.msra.gmra.mxu1 %v16547_v11  ;;  %12358 = vmatprep.mubr.msk.bf16.mxu0 %vm844_vm0, %v16549_v10  ;;  %v15331_v11 = vld [vmem:[%s21738_s4 + $0x3f0] ss:$12 sps:$4 sm:$0xff]  }
  0xf4   :  { %2045 = vmatprep.mubr.bf16.mxu1 %v17348_v41  ;;  %3410 = vmatpush1.bf16.msra.mxu0 %v15304_v60  ;;  %v15310_v41 = vld [vmem:[%s21738_s4 + $0x318] ss:$12 sps:$4 sm:$0xff]   ;;  %v15336_v10 = vld [vmem:[%s21738_s4 + $0x3dc] ss:$12 sps:$4 sm:$0xff]  }
  0xf5   :  { %3411 = vmatprep.subr.bf16.mxu0 %v15309_v39 }
  0xf8   :  { %3412 = vmatpush1.bf16.msra.mxu0 %v15307_v40  ;;  %v15334_v40 = vld [vmem:[%s21738_s4 + $0x3d8] ss:$12 sps:$4 sm:$0xff]  }
  0xf9   :  { %3413 = vmatprep.subr.bf16.mxu0 %v15312_v20  ;;  %v15339_v20 = vld [vmem:[%s21738_s4 + $0x3c4] ss:$12 sps:$4 sm:$0xff]  }
  0xfa   :  { %2117 = vmatmul.mubr.bf16.gmra.mxu0 %v16550_v12  ;;  %v15340_v12 = vld [vmem:[%s21738_s4 + $0x3a8] ss:$12 sps:$4 sm:$0xff]  }
  0xfb   :  { %v962_v5 = vpop.f32.mrf.mxu1  ;;  %2046 = vmatmul.mubr.bf16.gmra.mxu1 %v17374_v46  ;;  %12359 = vmatprep.mubr.msk.bf16.mxu0 %vm844_vm0, %v16551_v45  ;;  %v15318_v46 = vld [vmem:[%s21738_s4 + $0x2ec] ss:$12 sps:$4 sm:$0xff]   ;;  %v15343_v45 = vld [vmem:[%s21738_s4 + $0x390] ss:$12 sps:$4 sm:$0xff]  }
  0xfc   :  { %2055 = vmatprep.mubr.bf16.mxu1 %v17387_v31  ;;  %3414 = vmatpush1.bf16.msra.mxu0 %v15310_v41  ;;  %v15337_v41 = vld [vmem:[%s21738_s4 + $0x3c0] ss:$12 sps:$4 sm:$0xff]  }
  0xfd   :  { %v964_v22 = vpop.f32.mrf.mxu1  ;;  %3415 = vmatprep.subr.bf16.mxu0 %v15315_v43  ;;  %v15345_v43 = vld [vmem:[%s21738_s4 + $0x394] ss:$12 sps:$4 sm:$0xff]  }
  0xff   :  { %v966_v47 = vpop.f32.mrf.mxu1 }
 0x100   :  { %3416 = vmatpush1.bf16.msra.mxu0 %v15313_v23  ;;  %v15346_v23 = vld [vmem:[%s21738_s4 + $0x378] ss:$12 sps:$4 sm:$0xff]  }
 0x101   :  { %3417 = vmatprep.subr.bf16.mxu0 %v15318_v46  ;;  %v17579_v51 = vpop.f32.mrf.mxu1  ;;  %v15351_v46 = vld [vmem:[%s21738_s4 + $0x364] ss:$12 sps:$4 sm:$0xff]  }
 0x102   :  { %v891_v31 = vpop.f32.mrf.mxu0  ;;  %2127 = vmatmul.mubr.bf16.gmra.mxu0 %v16552_v24  ;;  %v15352_v24 = vld [vmem:[%s21738_s4 + $0x4c8] ss:$12 sps:$4 sm:$0xff]  }
 0x103   :  { %2056 = vmatmul.mubr.bf16.gmra.mxu1 %v17413_v55  ;;  %v17581_v52 = vadd.f32 %v962_v5, %v891_v31  ;;  %12360 = vmatprep.mubr.msk.bf16.mxu0 %vm844_vm0, %v16979_v36  ;;  %v15322_v36 = vld [vmem:[%s21738_s4 + $0x2b8] ss:$12 sps:$4 sm:$0xff]  }
 0x104   :  { %2065 = vmatprep.mubr.bf16.mxu1 %v16981_v37  ;;  %v893_v54 = vpop.f32.mrf.mxu0  ;;  %3418 = vmatpush1.bf16.msra.mxu0 %v15316_v48  ;;  %v15342_v5 = vld [vmem:[%s21738_s4 + $0x3ac] ss:$12 sps:$4 sm:$0xff]  }
 0x105   :  { %v17589_v55 = vadd.f32 %v964_v22, %v893_v54  ;;  %v972_v56 = vpop.f32.mrf.mxu1  ;;  %3419 = vmatprep.subr.bf16.mxu0 %v15321_v49  ;;  %v15348_v22 = vld [vmem:[%s21738_s4 + $0x37c] ss:$12 sps:$4 sm:$0xff]   ;;  %v15354_v49 = vld [vmem:[%s21738_s4 + $0x4cc] ss:$12 sps:$4 sm:$0xff]   ;;  %v21746_v54 = vmov 0  }
 0x106   :  { %v895_v57 = vpop.f32.mrf.mxu0  ;;  %3460 = vmatprep.subr.bf16.mxu1 %v15354_v49  ;;  %v15372_v49 = vld [vmem:[%s21738_s4 + $0x450] ss:$12 sps:$4 sm:$0xff]  }
 0x107   :  { %v17594_v59 = vadd.f32 %v966_v47, %v895_v57  ;;  %v974_v37 = vpop.f32.mrf.mxu1  ;;  %v15349_v47 = vld [vmem:[%s21738_s4 + $0x360] ss:$12 sps:$4 sm:$0xff]   ;;  %3461 = vmatpush1.bf16.msra.mxu1 %v15352_v24 }
 0x108   :  { %v17599_v61 = vpop.f32.mrf.mxu0  ;;  %3420 = vmatpush1.bf16.msra.mxu0 %v15319_v53 }
 0x109   :  { %v976_v42 = vpop.f32.mrf.mxu1  ;;  %3421 = vmatprep.subr.bf16.mxu0 %v15324_v58 }
 0x10a   :  { %2137 = vmatmul.mubr.bf16.gmra.mxu0 %v16983_v38  ;;  %v901_v50 = vpop.f32.mrf.mxu0 }
 0x10b   :  { %2066 = vmatmul.mubr.bf16.gmra.mxu1 %v17002_v44  ;;  %v17603_v62 = vadd.f32 %v972_v56, %v901_v50  ;;  %v17605_v63 = vpop.f32.mrf.mxu1 }
 0x10c   :  { %v903_v1 = vpop.f32.mrf.mxu0  ;;  %3422 = vmatpush1.bf16.msra.mxu0 %v15322_v36 }
 0x10d   :  { %v17613_v3 = vadd.f32 %v974_v37, %v903_v1  ;;  %v982_v44 = vpop.f32.mrf.mxu1  ;;  %3423 = vmatprep.subr.bf16.mxu0 %v15327_v0  ;;  %v15356_v1 = vld [vmem:[%s21738_s4 + $0x4b0] ss:$12 sps:$4 sm:$0xff]  }
 0x10e   :  { %v905_v38 = vpop.f32.mrf.mxu0 }
 0x10f   :  { %v17615_v4 = vadd.f32 %v976_v42, %v905_v38  ;;  %v984_v6 = vpop.f32.mrf.mxu1 }
 0x110   :  { %v17617_v7 = vpop.f32.mrf.mxu0  ;;  %3424 = vmatpush1.bf16.msra.mxu0 %v15325_v2  ;;  %v15358_v2 = vld [vmem:[%s21738_s4 + $0x4b4] ss:$12 sps:$4 sm:$0xff]  }
 0x111   :  { %v986_v8 = vpop.f32.mrf.mxu1  ;;  %3425 = vmatprep.subr.bf16.mxu0 %v15330_v13  ;;  %3462 = vmatprep.subr.bf16.mxu1 %v15358_v2 }
 0x112   :  { %v911_v9 = vpop.f32.mrf.mxu0  ;;  %3463 = vmatpush1.bf16.msra.mxu1 %v15356_v1 }
 0x113   :  { %v17622_v14 = vadd.f32 %v982_v44, %v911_v9  ;;  %v17624_v15 = vpop.f32.mrf.mxu1  ;;  %v15362_v9 = vld [vmem:[%s21738_s4 + $0x49c] ss:$12 sps:$4 sm:$0xff]  }
 0x114   :  { %v913_v17 = vpop.f32.mrf.mxu0  ;;  %3426 = vmatpush2.bf16.msra.mxu0 %v15328_v16  ;;  %3464 = vmatprep.subr.bf16.mxu1 %v15362_v9  ;;  %v15386_v9 = vld [vmem:[%s21738_s4 + $0x52c] ss:$12 sps:$4 sm:$0xff]  }
 0x115   :  { %v17629_v18 = vadd.f32 %v984_v6, %v913_v17  ;;  %v992_v19 = vpop.f32.mrf.mxu1  ;;  %3427 = vmatprep.subr.bf16.mxu0 %v15333_v34 }
 0x116   :  { %v915_v21 = vpop.f32.mrf.mxu0 }
 0x117   :  { %v17631_v25 = vadd.f32 %v986_v8, %v915_v21  ;;  %v994_v26 = vpop.f32.mrf.mxu1  ;;  %v15360_v8 = vld [vmem:[%s21738_s4 + $0x498] ss:$12 sps:$4 sm:$0xff]  }
 0x118   :  { %v17633_v27 = vpop.f32.mrf.mxu0  ;;  %3428 = vmatpush2.bf16.msra.mxu0 %v15331_v11  ;;  %3465 = vmatpush1.bf16.msra.mxu1 %v15360_v8  ;;  %v15366_v11 = vld [vmem:[%s21738_s4 + $0x484] ss:$12 sps:$4 sm:$0xff]   ;;  %v15380_v8 = vld [vmem:[%s21738_s4 + $0x420] ss:$12 sps:$4 sm:$0xff]  }
 0x119   :  { %v996_v28 = vpop.f32.mrf.mxu1  ;;  %3429 = vmatprep.subr.bf16.mxu0 %v15336_v10  ;;  %v15364_v10 = vld [vmem:[%s21738_s4 + $0x480] ss:$12 sps:$4 sm:$0xff]   ;;  %3466 = vmatprep.subr.bf16.mxu1 %v15366_v11  ;;  %v15398_v11 = vld [vmem:[%s21738_s4 + $0x4e4] ss:$12 sps:$4 sm:$0xff]  }
 0x11a   :  { %v921_v29 = vpop.f32.mrf.mxu0 }
 0x11b   :  { %v17635_v30 = vadd.f32 %v992_v19, %v921_v29  ;;  %v997_v32 = vpop.f32.mrf.mxu1 }
 0x11c   :  { %v923_v33 = vpop.f32.mrf.mxu0  ;;  %3430 = vmatpush2.bf16.msra.mxu0 %v15334_v40  ;;  %3467 = vmatpush1.bf16.msra.mxu1 %v15364_v10 }
 0x11d   :  { %v17640_v60 = vadd.f32 %v994_v26, %v923_v33  ;;  %3431 = vmatprep.subr.bf16.mxu0 %v15339_v20 }
 0x11e   :  { %v925_v35 = vpop.f32.mrf.mxu0 }
 0x120   :  { %v926_v39 = vpop.f32.mrf.mxu0  ;;  %3432 = vmatpush2.bf16.msra.mxu0 %v15337_v41 }
 0x121   :  { %3433 = vmatprep.subr.bf16.mxu0 %v15342_v5 }
 0x124   :  { %3434 = vmatpush2.bf16.msra.mxu0 %v15340_v12  ;;  %v15370_v12 = vld [vmem:[%s21738_s4 + $0x46c] ss:$12 sps:$4 sm:$0xff]  }
 0x125   :  { %3435 = vmatprep.subr.bf16.mxu0 %v15345_v43  ;;  %3468 = vmatprep.subr.bf16.mxu1 %v15370_v12 }
 0x128   :  { %3436 = vmatpush2.bf16.msra.mxu0 %v15343_v45 }
 0x129   :  { %3437 = vmatprep.subr.bf16.mxu0 %v15348_v22 }
 0x12c   :  { %3438 = vmatpush2.bf16.msra.mxu0 %v15346_v23  ;;  %v15368_v23 = vld [vmem:[%s21738_s4 + $0x468] ss:$12 sps:$4 sm:$0xff]  }
 0x12d   :  { %3439 = vmatprep.subr.bf16.mxu0 %v15351_v46  ;;  %3469 = vmatpush1.bf16.msra.mxu1 %v15368_v23 }
 0x130   :  { %3440 = vmatpush2.bf16.msra.mxu0 %v15349_v47 }
 0x131   :  { %3559 = vmatprep.subr.bf16.mxu0 %v21746_v54 }
 0x13a   :  { %v1104_v31 = vpop.f32.mrf.mxu0 }
 0x13b   :  { %v1033_v48 = vpop.f32.mrf.mxu1 }
 0x13c   :  { %v17687_v53 = vadd.f32 %v1104_v31, %v1033_v48  ;;  %v1106_v57 = vpop.f32.mrf.mxu0  ;;  %v15374_v48 = vld [vmem:[%s21738_s4 + $0x454] ss:$12 sps:$4 sm:$0xff]  }
 0x13d   :  { %v1035_v56 = vpop.f32.mrf.mxu1  ;;  %3470 = vmatprep.subr.bf16.mxu1 %v15374_v48 }
 0x13e   :  { %v17690_v58 = vadd.f32 %v1106_v57, %v1035_v56  ;;  %v1108_v36 = vpop.f32.mrf.mxu0  ;;  %3471 = vmatpush1.bf16.msra.mxu1 %v15372_v49 }
 0x13f   :  { %v1037_v37 = vpop.f32.mrf.mxu1 }
 0x140   :  { %v17692_v42 = vadd.f32 %v1108_v36, %v1037_v37  ;;  %v17696_v0 = vpop.f32.mrf.mxu0  ;;  %v15378_v36 = vld [vmem:[%s21738_s4 + $0x43c] ss:$12 sps:$4 sm:$0xff]  }
 0x141   :  { %v17694_v50 = vpop.f32.mrf.mxu1  ;;  %3472 = vmatprep.subr.bf16.mxu1 %v15378_v36  ;;  %v21748_v36 = vlaneseq }
 0x142   :  { %v1114_v38 = vpop.f32.mrf.mxu0 }
 0x143   :  { %v1043_v44 = vpop.f32.mrf.mxu1 }
 0x144   :  { %v17704_v6 = vadd.f32 %v1114_v38, %v1043_v44  ;;  %v1116_v16 = vpop.f32.mrf.mxu0  ;;  %v15376_v44 = vld [vmem:[%s21738_s4 + $0x438] ss:$12 sps:$4 sm:$0xff]  }
 0x145   :  { %v1045_v13 = vpop.f32.mrf.mxu1  ;;  %3473 = vmatpush1.bf16.msra.mxu1 %v15376_v44  ;;  %v15382_v38 = vld [vmem:[%s21738_s4 + $0x424] ss:$12 sps:$4 sm:$0xff]  }
 0x146   :  { %21750 = vst [vmem:[#allocation7_spill] sm:$0xff] %v17704_v6  ;;  %v17712_v17 = vadd.f32 %v1116_v16, %v1045_v13  ;;  %v1118_v21 = vpop.f32.mrf.mxu0  ;;  %3474 = vmatprep.subr.bf16.mxu1 %v15382_v38  ;;  %v15384_v13 = vld [vmem:[%s21738_s4 + $0x528] ss:$12 sps:$4 sm:$0xff]   ;;  %v17794_v38 = vshrl.u32 %v21748_v36, 7  ;;  %v17805_v36 = vld [vmem:[%s21737_s3] sm:$0xf] }
 0x147   :  { %v1047_v19 = vpop.f32.mrf.mxu1  ;;  %v15390_v16 = vld [vmem:[%s21738_s4 + $0x514] ss:$12 sps:$4 sm:$0xff]  }
 0x148   :  { %21751 = vst [vmem:[#allocation8_spill] sm:$0xff] %v17712_v17  ;;  %v17714_v26 = vadd.f32 %v1118_v21, %v1047_v19  ;;  %v17718_v29 = vpop.f32.mrf.mxu0  ;;  %v15388_v19 = vld [vmem:[%s21738_s4 + $0x510] ss:$12 sps:$4 sm:$0xff]   ;;  %v15392_v21 = vld [vmem:[%s21738_s4 + $0x4f8] ss:$12 sps:$4 sm:$0xff]  }
 0x149   :  { %v17716_v28 = vpop.f32.mrf.mxu1  ;;  %3475 = vmatpush1.bf16.msra.mxu1 %v15380_v8 }
 0x14a   :  { %v1124_v33 = vpop.f32.mrf.mxu0  ;;  %3484 = vmatprep.subr.bf16.mxu1 %v15386_v9 }
 0x14b   :  { %v1053_v32 = vpop.f32.mrf.mxu1 }
 0x14c   :  { %v17720_v34 = vadd.f32 %v1124_v33, %v1053_v32  ;;  %v1126_v39 = vpop.f32.mrf.mxu0  ;;  %v15394_v32 = vld [vmem:[%s21738_s4 + $0x4fc] ss:$12 sps:$4 sm:$0xff]   ;;  %v15396_v33 = vld [vmem:[%s21738_s4 + $0x4e0] ss:$12 sps:$4 sm:$0xff]  }
 0x14d   :  { %v1055_v35 = vpop.f32.mrf.mxu1  ;;  %3485 = vmatpush2.bf16.msra.mxu1 %v15384_v13 }
 0x14e   :  { %v17728_v40 = vadd.f32 %v1126_v39, %v1055_v35  ;;  %v1128_v41 = vpop.f32.mrf.mxu0  ;;  %3486 = vmatprep.subr.bf16.mxu1 %v15390_v16  ;;  %v15400_v35 = vld [vmem:[%s21738_s4 + $0x410] ss:$12 sps:$4 sm:$0xff]  }
 0x14f   :  { %v1057_v20 = vpop.f32.mrf.mxu1 }
 0x150   :  { %v17730_v5 = vadd.f32 %v1128_v41, %v1057_v20  ;;  %v17737_v45 = vpop.f32.mrf.mxu0 }
 0x151   :  { %v17735_v43 = vpop.f32.mrf.mxu1  ;;  %3487 = vmatpush2.bf16.msra.mxu1 %v15388_v19 }
 0x152   :  { %v1134_v46 = vpop.f32.mrf.mxu0  ;;  %3488 = vmatprep.subr.bf16.mxu1 %v15394_v32 }
 0x153   :  { %v1063_v22 = vpop.f32.mrf.mxu1 }
 0x154   :  { %v17742_v47 = vadd.f32 %v1134_v46, %v1063_v22  ;;  %v1136_v24 = vpop.f32.mrf.mxu0 }
 0x155   :  { %v1065_v31 = vpop.f32.mrf.mxu1  ;;  %3489 = vmatpush2.bf16.msra.mxu1 %v15392_v21  ;;  %v979_v21 = vadd.f32 %v17605_v63, %v17617_v7  ;;  %v969_v7 = vadd.f32 %v17579_v51, %v17599_v61  ;;  %v989_v51 = vadd.f32 %v17624_v15, %v17633_v27 }
 0x156   :  { %v17750_v56 = vadd.f32 %v1136_v24, %v1065_v31  ;;  %v1138_v37 = vpop.f32.mrf.mxu0  ;;  %3490 = vmatprep.subr.bf16.mxu1 %v15398_v11 }
 0x157   :  { %v1067_v57 = vpop.f32.mrf.mxu1 }
 0x158   :  { %v1139_v2 = vpop.f32.mrf.mxu0 }
 0x159   :  { %v1068_v1 = vpop.f32.mrf.mxu1  ;;  %3491 = vmatpush2.bf16.msra.mxu1 %v15396_v33 }
 0x15a   :  { %14412 = vmatprep.subr.bf16.mxu1 %v15400_v35 }
 0x173   :  { %v1966_v39 = vpop.f32.mrf.mxu1 }
 0x175   :  { %v1968_v10 = vpop.f32.mrf.mxu1 }
 0x177   :  { %v1970_v20 = vpop.f32.mrf.mxu1 }
 0x179   :  { %v1972_v41 = vpop.f32.mrf.mxu1 }
 0x17a   :  { %v1895_v12 = vpop.f32.mrf.mxu0 }
 0x17b   :  { %v17791_v23 = vpop.f32.mrf.mxu1 }
 0x17c   :  { %v1897_v22 = vpop.f32.mrf.mxu0 }
 0x17d   :  { %v1978_v46 = vpop.f32.mrf.mxu1 }
 0x17e   :  { %v1899_v48 = vpop.f32.mrf.mxu0 }
 0x17f   :  { %v1980_v31 = vpop.f32.mrf.mxu1 }
 0x180   :  { %v1901_v24 = vpop.f32.mrf.mxu0 }
 0x181   :  { %v1982_v49 = vpop.f32.mrf.mxu1 }
 0x182   :  { %v1905_v57 = vpop.f32.mrf.mxu0 }
 0x183   :  { %v1986_v37 = vpop.f32.mrf.mxu1 }
 0x184   :  { %v1907_v1 = vpop.f32.mrf.mxu0 }
 0x185   :  { %v1988_v2 = vpop.f32.mrf.mxu1 }
 0x186   :  { %v1909_v44 = vpop.f32.mrf.mxu0 }
 0x187   :  { %v1990_v8 = vpop.f32.mrf.mxu1  ;;  %v1981_v9 = vadd.f32 %v1980_v31, %v1909_v44  ;;  %v1967_v31 = vadd.f32 %v1966_v39, %v1895_v12 }
 0x188   :  { %v1911_v13 = vpop.f32.mrf.mxu0 }
 0x189   :  { %v1992_v16 = vpop.f32.mrf.mxu1  ;;  %v1983_v19 = vadd.f32 %v1982_v49, %v1911_v13  ;;  %v17800_v35 = vmax.f32 %v17615_v4, %v1981_v9  ;;  %v1969_v9 = vadd.f32 %v1968_v10, %v1897_v22  ;;  %v2145_v61 = vmax.f32 %v17581_v52, %v1967_v31 }
 0x18a   :  { %v1915_v32 = vpop.f32.mrf.mxu0  ;;  %v1973_v52 = vadd.f32 %v1972_v41, %v1901_v24 }
 0x18b   :  { %v1996_v11 = vpop.f32.mrf.mxu1  ;;  %v1987_v54 = vadd.f32 %v1986_v37, %v1915_v32  ;;  %v17807_v44 = vmax.f32 %v979_v21, %v1983_v19  ;;  %v1971_v37 = vadd.f32 %v1970_v20, %v1899_v48  ;;  %v21752_v32 = vsub.s32 0, %v17794_v38 }
 0x18c   :  { %v1917_v49 = vpop.f32.mrf.mxu0  ;;  %v2190_v19 = vrot.slane %v17800_v35, 4 }
 0x18d   :  { %v1998_v63 = vpop.f32.mrf.mxu1  ;;  %v2161_v33 = vmax.f32 %v17622_v14, %v1987_v54  ;;  %v1989_v4 = vadd.f32 %v1988_v2, %v1917_v49  ;;  %v17816_v17 = vrot.slane %v17805_v36, %v21752_v32  ;;  %v2193_v14 = vrot.slane %v17807_v44, 4 }
 0x18e   :  { %v1919_v39 = vpop.f32.mrf.mxu0  ;;  %v21753_v54 = vsub.s32 1, %v17794_v38  ;;  %v2149_v15 = vmax.f32 %v17594_v59, %v1971_v37 }
 0x18f   :  { %v2000_v12 = vpop.f32.mrf.mxu1  ;;  %v2191_v21 = vrot.slane %v2161_v33, 4  ;;  %v2162_v13 = vmax.f32 %v17629_v18, %v1989_v4  ;;  %v1991_v6 = vadd.f32 %v1990_v8, %v1919_v39  ;;  %v2146_v33 = vmax.f32 %v17589_v55, %v1969_v9 }
 0x190   :  { %v17827_v10 = vrot.slane %v17805_v36, %v21753_v54  ;;  %v1921_v20 = vpop.f32.mrf.mxu0  ;;  %v1977_v12 = vadd.f32 %v17791_v23, %v1905_v57  ;;  %v17835_v54 = vadd.f32 %v1978_v46, %v1907_v1 }
 0x191   :  { %v2001_v22 = vpop.f32.mrf.mxu1  ;;  %v2192_v48 = vsel %vm2189_vm1, %v2190_v19, %v2191_v21  ;;  %v2194_v2 = vrot.slane %v2162_v13, 4  ;;  %v2165_v18 = vmax.f32 %v17631_v25, %v1991_v6  ;;  %v1993_v8 = vadd.f32 %v1992_v16, %v1921_v20 }
 0x192   :  { %v2234_v27 = vmax.f32 %v2145_v61, %v2192_v48  ;;  %v1925_v31 = vpop.f32.mrf.mxu0  ;;  %v2150_v19 = vmax.f32 %v969_v7, %v1973_v52  ;;  %v2153_v1 = vmax.f32 %v17603_v62, %v1977_v12 }
 0x193   :  { %v2195_v49 = vsel %vm2189_vm1, %v2193_v14, %v2194_v2  ;;  %v2202_v4 = vrot.slane %v2165_v18, 4  ;;  %v2166_v32 = vmax.f32 %v989_v51, %v1993_v8  ;;  %v1997_v39 = vadd.f32 %v1996_v11, %v1925_v31 }
 0x194   :  { %v2272_v13 = vadd.f32 %v17816_v17, %v2234_v27  ;;  %v2235_v25 = vmax.f32 %v2146_v33, %v2195_v49  ;;  %v1927_v6 = vpop.f32.mrf.mxu0 }
 0x195   :  { %v2203_v55 = vsel %vm2189_vm1, %v2191_v21, %v2202_v4  ;;  %v2204_v59 = vrot.slane %v2166_v32, 4  ;;  %v2169_v41 = vmax.f32 %v17635_v30, %v1997_v39  ;;  %v1999_v24 = vadd.f32 %v1998_v63, %v1927_v6 }
 0x196   :  { %v2288_v16 = vmax.f32 %v2272_v13, 0.0  ;;  %v2273_v9 = vadd.f32 %v17827_v10, %v2235_v25  ;;  %v2238_v37 = vmax.f32 %v2149_v15, %v2203_v55  ;;  %v1929_v11 = vpop.f32.mrf.mxu0  ;;  %v2154_v21 = vmax.f32 %v17613_v3, %v17835_v54 }
 0x197   :  { %v2205_v23 = vsel %vm2189_vm1, %v2194_v2, %v2204_v59  ;;  %v2210_v46 = vrot.slane %v2169_v41, 4  ;;  %v2170_v57 = vmax.f32 %v17640_v60, %v1999_v24 }
 0x198   :  { %2304 = vst [vmem:[#allocation2] sm:$0xff] %v2288_v16  ;;  %v1930_v30 = vpop.f32.mrf.mxu0  ;;  %v17846_v63 = vmax.f32 %v2273_v9, 0.0  ;;  %v2276_v51 = vadd.f32 %v17816_v17, %v2238_v37  ;;  %v2239_v61 = vmax.f32 %v2150_v19, %v2205_v23  ;;  %v2323_v14 = vrot.slane %v2288_v16, 1 }
 0x199   :  { %v2211_v7 = vsel %vm2189_vm1, %v2202_v4, %v2210_v46  ;;  %v2246_v60 = vmax.f32 %v17800_v35, %v2210_v46  ;;  %v17851_v62 = vrot.slane %v2170_v57, 4  ;;  %v2353_v22 = vrot.slane %v2288_v16, 2 }
 0x19a   :  { %v2242_v20 = vmax.f32 %v2153_v1, %v2211_v7  ;;  %v2383_v48 = vrot.slane %v2288_v16, 3  ;;  %v2412_v2 = vrot.slane %v2288_v16, 4  ;;  %2305 = vst [vmem:[#allocation2 + $0x8] sm:$0xff] %v17846_v63  ;;  %v2326_v18 = vrot.slane %v17846_v63, 1 }
 0x19b   :  { %v2292_v8 = vmax.f32 %v2276_v51, 0.0  ;;  %v2277_v33 = vadd.f32 %v17827_v10, %v2239_v61  ;;  %v2284_v52 = vadd.f32 %v17816_v17, %v2246_v60  ;;  %v2356_v35 = vrot.slane %v17846_v63, 2 }
 0x19c   :  { %v2280_v15 = vadd.f32 %v17816_v17, %v2242_v20  ;;  %v2386_v27 = vrot.slane %v17846_v63, 3  ;;  %v2415_v31 = vrot.slane %v17846_v63, 4  ;;  %v2213_v49 = vsel %vm2189_vm1, %v2204_v59, %v17851_v62 }
 0x19d   :  { %2309 = vst [vmem:[#allocation2 + $0x20] sm:$0x3] %v2292_v8  ;;  %v2324_v4 = vrot.slane %v2292_v8, 1  ;;  %v2354_v32 = vrot.slane %v2292_v8, 2  ;;  %v2384_v39 = vrot.slane %v2292_v8, 3  ;;  %v2413_v12 = vrot.slane %v2292_v8, 4 }
 0x19e   :  { %v17863_v13 = vmax.f32 %v2277_v33, 0.0  ;;  %v2296_v25 = vmax.f32 %v2280_v15, 0.0  ;;  %v2300_v17 = vmax.f32 %v2284_v52, 0.0  ;;  %v2247_v6 = vmax.f32 %v17807_v44, %v17851_v62 }
 0x19f   :  { %v17868_v55 = vsel %vm2322_vm2, %v2323_v14, %v2324_v4  ;;  %2348 = vst [vmem:[#allocation2 + $0x80] sm:$0x3] %v2324_v4  ;;  %v2355_v41 = vsel %vm2352_vm3, %v2353_v22, %v2354_v32  ;;  %2378 = vst [vmem:[#allocation2 + $0xe0] sm:$0x3] %v2354_v32  ;;  %v2385_v59 = vsel %vm2382_vm4, %v2383_v48, %v2384_v39  ;;  %v2476_v11 = vrot.slane %v2292_v8, 5 }
 0x1a0   :  { %2408 = vst [vmem:[#allocation2 + $0x140] sm:$0x3] %v2384_v39  ;;  %v2414_v24 = vsel %vm2189_vm1, %v2412_v2, %v2413_v12  ;;  %2437 = vst [vmem:[#allocation2 + $0x1a0] sm:$0x3] %v2413_v12  ;;  %v2327_v44 = vrot.slane %v17863_v13, 1  ;;  %v2357_v16 = vrot.slane %v17863_v13, 2  ;;  %v2243_v22 = vmax.f32 %v2154_v21, %v2213_v49 }
 0x1a1   :  { %2374 = vst [vmem:[#allocation2 + $0xc0] sm:$0xff] %v2355_v41  ;;  %2404 = vst [vmem:[#allocation2 + $0x120] sm:$0xff] %v2385_v59  ;;  %v2387_v9 = vrot.slane %v17863_v13, 3  ;;  %v2416_v37 = vrot.slane %v17863_v13, 4  ;;  %v2445_v19 = vrot.slane %v2296_v25, 4  ;;  %v2477_v23 = vrot.slane %v2296_v25, 5 }
 0x1a2   :  { %2433 = vst [vmem:[#allocation2 + $0x180] sm:$0xff] %v2414_v24  ;;  %2310 = vst [vmem:[#allocation2 + $0x28] sm:$0x3] %v17863_v13  ;;  %v2488_v46 = vrot.slane %v2300_v17, 5  ;;  %v17879_v57 = vsel %vm2322_vm2, %v2326_v18, %v2327_v44  ;;  %v2358_v1 = vsel %vm2352_vm3, %v2356_v35, %v2357_v16  ;;  %v2513_v14 = vrot.slane %v2296_v25, 6 }
 0x1a3   :  { %2570 = vst [vmem:[#allocation2 + $0x1a0] sm:$0xfc] %v2296_v25  ;;  %2574 = vst [vmem:[#allocation2 + $0x1c0] sm:$0xf] %v2300_v17  ;;  %v2388_v30 = vsel %vm2382_vm4, %v2386_v27, %v2387_v9  ;;  %v2417_v63 = vsel %vm2189_vm1, %v2415_v31, %v2416_v37  ;;  %v2446_v51 = vsel %vm2189_vm1, %v2413_v12, %v2445_v19  ;;  %v2517_v20 = vrot.slane %v2300_v17, 6 }
 0x1a4   :  { %2349 = vst [vmem:[#allocation2 + $0x88] sm:$0x3] %v2327_v44  ;;  %2379 = vst [vmem:[#allocation2 + $0xe8] sm:$0x3] %v2357_v16  ;;  %v2478_v61 = vsel %vm2475_vm5, %v2476_v11, %v2477_v23  ;;  %v2489_v7 = vsel %vm2475_vm5, %v2477_v23, %v2488_v46  ;;  %v2542_v60 = vrot.slane %v2296_v25, 7  ;;  %v2546_v62 = vrot.slane %v2300_v17, 7 }
 0x1a5   :  { %2409 = vst [vmem:[#allocation2 + $0x148] sm:$0x3] %v2387_v9  ;;  %2438 = vst [vmem:[#allocation2 + $0x1a8] sm:$0x3] %v2416_v37  ;;  %v2285_v48 = vadd.f32 %v17827_v10, %v2247_v6  ;;  %v2518_v2 = vsel %vm2512_vm6, %v2513_v14, %v2517_v20  ;;  %v2281_v8 = vadd.f32 %v17827_v10, %v2243_v22  ;;  %v2479_v15 = vrot.slane %v17863_v13, 5 }
 0x1a6   :  { %2375 = vst [vmem:[#allocation2 + $0xc8] sm:$0xff] %v2358_v1  ;;  %2405 = vst [vmem:[#allocation2 + $0x128] sm:$0xff] %v2388_v30  ;;  %v2547_v18 = vsel %vm2541_vm7, %v2542_v60, %v2546_v62 }
 0x1a7   :  { %2434 = vst [vmem:[#allocation2 + $0x188] sm:$0xff] %v2417_v63  ;;  %2466 = vst [vmem:[#allocation2 + $0x40] sm:$0xf] %v2445_v19  ;;  %v2301_v33 = vmax.f32 %v2285_v48, 0.0  ;;  %v2297_v52 = vmax.f32 %v2281_v8, 0.0  ;;  %v21754_v63 = vmov 0   ;;  %v1121_v8 = vadd.f32 %v17718_v29, %v17716_v28 }
 0x1a8   :  { %2461 = vst [vmem:[#allocation2 + $0x20] sm:$0xfc] %v2446_v51  ;;  %2504 = vst [vmem:[#allocation2 + $0x80] sm:$0xfc] %v2478_v61 }
 0x1a9   :  { %2508 = vst [vmem:[#allocation2 + $0xa0] sm:$0xf] %v2489_v7  ;;  %2533 = vst [vmem:[#allocation2 + $0xe0] sm:$0xfc] %v2513_v14  ;;  %v2490_v35 = vrot.slane %v2301_v33, 5  ;;  %v2519_v27 = vrot.slane %v2301_v33, 6 }
 0x1aa   :  { %2562 = vst [vmem:[#allocation2 + $0x140] sm:$0xfc] %v2542_v60  ;;  %2537 = vst [vmem:[#allocation2 + $0x100] sm:$0xf] %v2518_v2  ;;  %v2548_v3 = vrot.slane %v2301_v33, 7  ;;  %v2447_v54 = vrot.slane %v2297_v52, 4 }
 0x1ab   :  { %2566 = vst [vmem:[#allocation2 + $0x160] sm:$0xf] %v2547_v18  ;;  %2575 = vst [vmem:[#allocation2 + $0x1c8] sm:$0xf] %v2301_v33  ;;  %v2480_v21 = vrot.slane %v2297_v52, 5  ;;  %v2514_v31 = vrot.slane %v2297_v52, 6 }
 0x1ac   :  { %v2543_v49 = vrot.slane %v2297_v52, 7  ;;  %2571 = vst [vmem:[#allocation2 + $0x1a8] sm:$0xfc] %v2297_v52  ;;  %v2448_v4 = vsel %vm2189_vm1, %v2416_v37, %v2447_v54  ;;  %2467 = vst [vmem:[#allocation2 + $0x48] sm:$0xf] %v2447_v54  ;;  %v2262_v52 = vsub.s32 2, %v17794_v38 }
 0x1ad   :  { %v2481_v10 = vsel %vm2475_vm5, %v2479_v15, %v2480_v21  ;;  %v2491_v32 = vsel %vm2475_vm5, %v2480_v21, %v2490_v35  ;;  %v2520_v39 = vsel %vm2512_vm6, %v2514_v31, %v2519_v27  ;;  %2534 = vst [vmem:[#allocation2 + $0xe8] sm:$0xfc] %v2514_v31  ;;  %2462 = vst [vmem:[#allocation2 + $0x28] sm:$0xfc] %v2448_v4  ;;  %v15355_v37 = vld [vmem:[%s21738_s4 + $0x4d0] ss:$12 sps:$4 sm:$0xff]  }
 0x1ae   :  { %2563 = vst [vmem:[#allocation2 + $0x148] sm:$0xfc] %v2543_v49  ;;  %2505 = vst [vmem:[#allocation2 + $0x88] sm:$0xfc] %v2481_v10  ;;  %v2549_v12 = vsel %vm2541_vm7, %v2543_v49, %v2548_v3  ;;  %v15363_v7 = vld [vmem:[%s21738_s4 + $0x4a0] ss:$12 sps:$4 sm:$0xff]  }
 0x1af   :  { %2509 = vst [vmem:[#allocation2 + $0xa8] sm:$0xf] %v2491_v32  ;;  %2538 = vst [vmem:[#allocation2 + $0x108] sm:$0xf] %v2520_v39  ;;  %v2826_v17 = vld [vmem:[#allocation2 + $0x80] sm:$0xff]  ;;  %v2266_v3 = vsub.s32 3, %v17794_v38  ;;  %v17961_v39 = vrot.slane %v17805_v36, %v2262_v52 }
 0x1b0   :  { %2567 = vst [vmem:[#allocation2 + $0x168] sm:$0xf] %v2549_v12  ;;  %v17907_v11 = vpack.c.bf16 %v2826_v17, %v17868_v55  ;;  %v2830_v30 = vld [vmem:[#allocation2 + $0xa0] sm:$0xf]  ;;  %v15367_v18 = vld [vmem:[%s21738_s4 + $0x488] ss:$12 sps:$4 sm:$0xff]  }
 0x1b1   :  { %v17933_v60 = vpack.c.bf16 %v2830_v30, %v2830_v30  ;;  %v15371_v4 = vld [vmem:[%s21738_s4 + $0x470] ss:$12 sps:$4 sm:$0xff]   ;;  %v15375_v30 = vld [vmem:[%s21738_s4 + $0x458] ss:$12 sps:$4 sm:$0xff]  }
 0x1b2   :  { %v2108_v25 = vpop.f32.mrf.mxu0 }
 0x1b3   :  { %v2037_v13 = vpop.f32.mrf.mxu1 }
 0x1b4   :  { %v2110_v41 = vpop.f32.mrf.mxu0  ;;  %v2109_v54 = vadd.f32 %v2108_v25, %v2037_v13 }
 0x1b5   :  { %v2039_v6 = vpop.f32.mrf.mxu1  ;;  %v2827_v59 = vld [vmem:[#allocation2 + $0x88] sm:$0xff] }
 0x1b6   :  { %v2831_v24 = vld [vmem:[#allocation2 + $0xa8] sm:$0xf]  ;;  %v17901_v44 = vpack.c.bf16 %v2827_v59, %v17879_v57  ;;  %v2112_v9 = vpop.f32.mrf.mxu0  ;;  %v15359_v57 = vld [vmem:[%s21738_s4 + $0x4b8] ss:$12 sps:$4 sm:$0xff]   ;;  %v2111_v10 = vadd.f32 %v2110_v41, %v2039_v6  ;;  %v17971_v41 = vrot.slane %v17805_v36, %v2266_v3 }
 0x1b7   :  { %v2041_v16 = vpop.f32.mrf.mxu1  ;;  %v17910_v19 = vpack.c.bf16 %v2831_v24, %v2831_v24 }
 0x1b8   :  { %3441 = vmatprep.mubr.bf16.mxu0 %v17901_v44  ;;  %v17914_v46 = vpop.f32.mrf.mxu0  ;;  %v2113_v32 = vadd.f32 %v2112_v9, %v2041_v16 }
 0x1b9   :  { %v17912_v23 = vpop.f32.mrf.mxu1  ;;  %3442 = vmatmul.mubr.bf16.vlgmr.msra.gmra.mxu0 %v17907_v11 }
 0x1ba   :  { %3451 = vmatprep.mubr.bf16.mxu0 %v17910_v19  ;;  %3560 = vmatpush1.bf16.msra.mxu0 %v15355_v37  ;;  %v17923_v55 = vpop.f32.mrf.mxu0 }
 0x1bb   :  { %v17921_v1 = vpop.f32.mrf.mxu1  ;;  %3561 = vmatprep.subr.bf16.mxu0 %v21754_v63 }
 0x1bc   :  { %v17928_v61 = vpop.f32.mrf.mxu0 }
 0x1bd   :  { %v17926_v51 = vpop.f32.mrf.mxu1 }
 0x1be   :  { %3562 = vmatpush1.bf16.msra.mxu0 %v15359_v57  ;;  %v2122_v20 = vpop.f32.mrf.mxu0 }
 0x1bf   :  { %v2051_v14 = vpop.f32.mrf.mxu1  ;;  %3563 = vmatprep.subr.bf16.mxu0 %v21754_v63 }
 0x1c0   :  { %v2123_v62 = vadd.f32 %v2122_v20, %v2051_v14  ;;  %v2124_v48 = vpop.f32.mrf.mxu0 }
 0x1c1   :  { %v2053_v22 = vpop.f32.mrf.mxu1  ;;  %3452 = vmatmul.mubr.bf16.gmra.mxu0 %v17933_v60 }
 0x1c2   :  { %v2125_v2 = vadd.f32 %v2124_v48, %v2053_v22  ;;  %3564 = vmatpush1.bf16.msra.mxu0 %v15363_v7  ;;  %v2128_v15 = vpop.f32.mrf.mxu0  ;;  %v17944_v35 = vmax.f32 %v17714_v26, %v2123_v62  ;;  %v17956_v26 = vadd.f32 %v17696_v0, %v17694_v50  ;;  %v1131_v50 = vadd.f32 %v17737_v45, %v17735_v43 }
 0x1c3   :  { %v2057_v33 = vpop.f32.mrf.mxu1  ;;  %3565 = vmatprep.subr.bf16.mxu0 %v21754_v63  ;;  %v2147_v0 = vmax.f32 %v17687_v53, %v2109_v54  ;;  %v2148_v43 = vmax.f32 %v17690_v58, %v2111_v10  ;;  %v2151_v53 = vmax.f32 %v17692_v42, %v2113_v32  ;;  %v2115_v45 = vadd.f32 %v17914_v46, %v17912_v23 }
 0x1c4   :  { %v2129_v27 = vadd.f32 %v2128_v15, %v2057_v33  ;;  %v17948_v21 = vmax.f32 %v1121_v8, %v2125_v2  ;;  %v2130_v49 = vpop.f32.mrf.mxu0  ;;  %v2119_v48 = vadd.f32 %v17923_v55, %v17921_v1  ;;  %v17988_v58 = vadd.f32 %v17928_v61, %v17926_v51  ;;  %v15379_v61 = vld [vmem:[%s21738_s4 + $0x440] ss:$12 sps:$4 sm:$0xff]  }
 0x1c5   :  { %v2059_v31 = vpop.f32.mrf.mxu1  ;;  %v2152_v54 = vmax.f32 %v17956_v26, %v2115_v45 }
 0x1c6   :  { %v2163_v28 = vmax.f32 %v17720_v34, %v2129_v27  ;;  %v2131_v29 = vadd.f32 %v2130_v49, %v2059_v31  ;;  %3566 = vmatpush1.bf16.msra.mxu0 %v15367_v18  ;;  %v2132_v13 = vpop.f32.mrf.mxu0  ;;  %v2196_v34 = vrot.slane %v17944_v35, 4  ;;  %v2199_v6 = vrot.slane %v17948_v21, 4 }
 0x1c7   :  { %v2061_v12 = vpop.f32.mrf.mxu1  ;;  %3567 = vmatprep.subr.bf16.mxu0 %v21754_v63 }
 0x1c8   :  { %v2197_v25 = vrot.slane %v2163_v28, 4  ;;  %v2164_v17 = vmax.f32 %v17728_v40, %v2131_v29  ;;  %v2133_v59 = vadd.f32 %v2132_v13, %v2061_v12  ;;  %v2134_v16 = vpop.f32.mrf.mxu0  ;;  %v21755_v28 = vld [vmem:[#allocation7_spill] sm:$0xff] }
 0x1c9   :  { %v2063_v24 = vpop.f32.mrf.mxu1  ;;  %v2155_v29 = vmax.f32 %v21755_v28, %v2119_v48 }
 0x1ca   :  { %v2198_v9 = vsel %vm2189_vm1, %v2196_v34, %v2197_v25  ;;  %v2200_v37 = vrot.slane %v2164_v17, 4  ;;  %v2167_v40 = vmax.f32 %v17730_v5, %v2133_v59  ;;  %v2135_v57 = vadd.f32 %v2134_v16, %v2063_v24  ;;  %3568 = vmatpush1.bf16.msra.mxu0 %v15371_v4  ;;  %v2138_v14 = vpop.f32.mrf.mxu0  ;;  %v21756_v4 = vld [vmem:[#allocation8_spill] sm:$0xff] }
 0x1cb   :  { %v2236_v36 = vmax.f32 %v2147_v0, %v2198_v9  ;;  %v2067_v7 = vpop.f32.mrf.mxu1  ;;  %3569 = vmatprep.subr.bf16.mxu0 %v21754_v63  ;;  %v2156_v10 = vmax.f32 %v21756_v4, %v17988_v58  ;;  %v15383_v0 = vld [vmem:[%s21738_s4 + $0x428] ss:$12 sps:$4 sm:$0xff]  }
 0x1cc   :  { %v2201_v20 = vsel %vm2189_vm1, %v2199_v6, %v2200_v37  ;;  %v2206_v62 = vrot.slane %v2167_v40, 4  ;;  %v2168_v5 = vmax.f32 %v1131_v50, %v2135_v57  ;;  %v2139_v22 = vadd.f32 %v2138_v14, %v2067_v7  ;;  %v2140_v2 = vpop.f32.mrf.mxu0 }
 0x1cd   :  { %v2274_v42 = vadd.f32 %v17961_v39, %v2236_v36  ;;  %v2237_v23 = vmax.f32 %v2148_v43, %v2201_v20  ;;  %v2069_v46 = vpop.f32.mrf.mxu1 }
 0x1ce   :  { %v2207_v18 = vsel %vm2189_vm1, %v2197_v25, %v2206_v62  ;;  %v2208_v8 = vrot.slane %v2168_v5, 4  ;;  %v2171_v33 = vmax.f32 %v17742_v47, %v2139_v22  ;;  %v2141_v15 = vadd.f32 %v2140_v2, %v2069_v46  ;;  %3570 = vmatpush1.bf16.msra.mxu0 %v15375_v30  ;;  %v2142_v51 = vpop.f32.mrf.mxu0  ;;  %v15387_v30 = vld [vmem:[%s21738_s4 + $0x530] ss:$12 sps:$4 sm:$0xff]  }
 0x1cf   :  { %v17993_v27 = vmax.f32 %v2274_v42, 0.0  ;;  %v2275_v3 = vadd.f32 %v17971_v41, %v2237_v23  ;;  %v2240_v1 = vmax.f32 %v2151_v53, %v2207_v18  ;;  %v2071_v55 = vpop.f32.mrf.mxu1  ;;  %3571 = vmatprep.subr.bf16.mxu0 %v21754_v63 }
 0x1d0   :  { %v2209_v31 = vsel %vm2189_vm1, %v2200_v37, %v2208_v8  ;;  %v2214_v49 = vrot.slane %v2171_v33, 4  ;;  %v2172_v47 = vmax.f32 %v17750_v56, %v2141_v15  ;;  %v2143_v12 = vpop.f32.mrf.mxu0  ;;  %v15391_v15 = vld [vmem:[%s21738_s4 + $0x518] ss:$12 sps:$4 sm:$0xff]  }
 0x1d1   :  { %v2072_v32 = vpop.f32.mrf.mxu1  ;;  %v18006_v13 = vmax.f32 %v2275_v3, 0.0  ;;  %v2278_v26 = vadd.f32 %v17961_v39, %v2240_v1  ;;  %v2241_v34 = vmax.f32 %v2152_v54, %v2209_v31  ;;  %v2329_v56 = vrot.slane %v17993_v27, 1 }
 0x1d2   :  { %v2215_v25 = vsel %vm2189_vm1, %v2206_v62, %v2214_v49  ;;  %v2248_v59 = vmax.f32 %v17944_v35, %v2214_v49  ;;  %v18012_v50 = vrot.slane %v2172_v47, 4  ;;  %3572 = vmatpush1.bf16.msra.mxu0 %v15379_v61  ;;  %v2359_v6 = vrot.slane %v17993_v27, 2 }
 0x1d3   :  { %v2244_v17 = vmax.f32 %v2155_v29, %v2215_v25  ;;  %v2389_v24 = vrot.slane %v17993_v27, 3  ;;  %v2418_v16 = vrot.slane %v17993_v27, 4  ;;  %2308 = vst.msk [vmem:[#allocation2 + $0x18] sm:$0xff] %vm2307_vm8, %v18006_v13  ;;  %v2332_v9 = vrot.slane %v18006_v13, 1  ;;  %3573 = vmatprep.subr.bf16.mxu0 %v21754_v63 }
 0x1d4   :  { %v2294_v35 = vmax.f32 %v2278_v26, 0.0  ;;  %v2279_v37 = vadd.f32 %v17971_v41, %v2241_v34  ;;  %v2286_v57 = vadd.f32 %v17961_v39, %v2248_v59  ;;  %v2362_v43 = vrot.slane %v18006_v13, 2 }
 0x1d5   :  { %v2282_v40 = vadd.f32 %v17961_v39, %v2244_v17  ;;  %v2392_v53 = vrot.slane %v18006_v13, 3  ;;  %v2421_v45 = vrot.slane %v18006_v13, 4  ;;  %v2217_v36 = vsel %vm2189_vm1, %v2208_v8, %v18012_v50 }
 0x1d6   :  { %2311 = vst [vmem:[#allocation2 + $0x30] sm:$0x3] %v2294_v35  ;;  %v2330_v7 = vrot.slane %v2294_v35, 1  ;;  %v2360_v14 = vrot.slane %v2294_v35, 2  ;;  %v2390_v20 = vrot.slane %v2294_v35, 3  ;;  %v2419_v62 = vrot.slane %v2294_v35, 4  ;;  %3574 = vmatpush1.bf16.msra.mxu0 %v15383_v0 }
 0x1d7   :  { %v18035_v39 = vmax.f32 %v2279_v37, 0.0  ;;  %v2298_v5 = vmax.f32 %v2282_v40, 0.0  ;;  %v2302_v22 = vmax.f32 %v2286_v57, 0.0  ;;  %v2249_v48 = vmax.f32 %v17948_v21, %v18012_v50  ;;  %3583 = vmatprep.subr.bf16.mxu0 %v21754_v63  ;;  %v15399_v0 = vld [vmem:[%s21738_s4 + $0x4e8] ss:$12 sps:$4 sm:$0xff]  }
 0x1d8   :  { %v18041_v42 = vsel %vm2322_vm2, %v2329_v56, %v2330_v7  ;;  %2350 = vst [vmem:[#allocation2 + $0x90] sm:$0x3] %v2330_v7  ;;  %v2361_v23 = vsel %vm2352_vm3, %v2359_v6, %v2360_v14  ;;  %2380 = vst [vmem:[#allocation2 + $0xf0] sm:$0x3] %v2360_v14  ;;  %v2391_v46 = vsel %vm2382_vm4, %v2389_v24, %v2390_v20  ;;  %v2482_v3 = vrot.slane %v2294_v35, 5 }
 0x1d9   :  { %2410 = vst [vmem:[#allocation2 + $0x150] sm:$0x3] %v2390_v20  ;;  %v2420_v2 = vsel %vm2189_vm1, %v2418_v16, %v2419_v62  ;;  %2439 = vst [vmem:[#allocation2 + $0x1b0] sm:$0x3] %v2419_v62  ;;  %v2333_v21 = vrot.slane %v18035_v39, 1  ;;  %v2363_v18 = vrot.slane %v18035_v39, 2  ;;  %v2245_v34 = vmax.f32 %v2156_v10, %v2217_v36 }
 0x1da   :  { %2376 = vst [vmem:[#allocation2 + $0xd0] sm:$0xff] %v2361_v23  ;;  %2406 = vst [vmem:[#allocation2 + $0x130] sm:$0xff] %v2391_v46  ;;  %v2393_v8 = vrot.slane %v18035_v39, 3  ;;  %v18052_v33 = vrot.slane %v18035_v39, 4  ;;  %v2449_v1 = vrot.slane %v2298_v5, 4  ;;  %v2483_v55 = vrot.slane %v2298_v5, 5  ;;  %3584 = vmatpush2.bf16.msra.mxu0 %v15387_v30 }
 0x1db   :  { %2435 = vst [vmem:[#allocation2 + $0x190] sm:$0xff] %v2420_v2  ;;  %2313 = vst.msk [vmem:[#allocation2 + $0x38] sm:$0x3] %vm2312_vm9, %v18035_v39  ;;  %v2492_v51 = vrot.slane %v2302_v22, 5  ;;  %v2334_v61 = vsel %vm2322_vm2, %v2332_v9, %v2333_v21  ;;  %v2364_v54 = vsel %vm2352_vm3, %v2362_v43, %v2363_v18  ;;  %3585 = vmatprep.subr.bf16.mxu0 %v21754_v63  ;;  %v2515_v32 = vrot.slane %v2298_v5, 6 }
 0x1dc   :  { %2572 = vst [vmem:[#allocation2 + $0x1b0] sm:$0xfc] %v2298_v5  ;;  %2576 = vst [vmem:[#allocation2 + $0x1d0] sm:$0xf] %v2302_v22  ;;  %v2394_v31 = vsel %vm2382_vm4, %v2392_v53, %v2393_v8  ;;  %v2423_v49 = vsel %vm2189_vm1, %v2421_v45, %v18052_v33  ;;  %v2450_v47 = vsel %vm2189_vm1, %v2419_v62, %v2449_v1  ;;  %v2521_v12 = vrot.slane %v2302_v22, 6 }
 0x1dd   :  { %2351 = vst.msk [vmem:[#allocation2 + $0x98] sm:$0x3] %vm2312_vm9, %v2333_v21  ;;  %2381 = vst.msk [vmem:[#allocation2 + $0xf8] sm:$0x3] %vm2312_vm9, %v2363_v18  ;;  %v2484_v28 = vsel %vm2475_vm5, %v2482_v3, %v2483_v55  ;;  %v2493_v29 = vsel %vm2475_vm5, %v2483_v55, %v2492_v51  ;;  %v2544_v13 = vrot.slane %v2298_v5, 7  ;;  %v2550_v26 = vrot.slane %v2302_v22, 7 }
 0x1de   :  { %2411 = vst.msk [vmem:[#allocation2 + $0x158] sm:$0x3] %vm2312_vm9, %v2393_v8  ;;  %2440 = vst.msk [vmem:[#allocation2 + $0x1b8] sm:$0x3] %vm2312_vm9, %v18052_v33  ;;  %v2287_v25 = vadd.f32 %v17971_v41, %v2249_v48  ;;  %3586 = vmatpush2.bf16.msra.mxu0 %v15391_v15  ;;  %v15395_v56 = vld [vmem:[%s21738_s4 + $0x500] ss:$12 sps:$4 sm:$0xff]   ;;  %v2522_v17 = vsel %vm2512_vm6, %v2515_v32, %v2521_v12  ;;  %v2283_v50 = vadd.f32 %v17971_v41, %v2245_v34 }
 0x1df   :  { %2347 = vst.msk [vmem:[#allocation2 + $0x78] sm:$0xff] %vm2307_vm8, %v2334_v61  ;;  %2377 = vst.msk [vmem:[#allocation2 + $0xd8] sm:$0xff] %vm2307_vm8, %v2364_v54  ;;  %v2551_v59 = vsel %vm2541_vm7, %v2544_v13, %v2550_v26  ;;  %3587 = vmatprep.subr.bf16.mxu0 %v21754_v63  ;;  %v2485_v4 = vrot.slane %v18035_v39, 5  ;;  %v15403_v40 = vld [vmem:[%s21738_s4 + $0x22c] ss:$12 sps:$4 sm:$0xff]  }
 0x1e0   :  { %2407 = vst.msk [vmem:[#allocation2 + $0x138] sm:$0xff] %vm2307_vm8, %v2394_v31  ;;  %2436 = vst.msk [vmem:[#allocation2 + $0x198] sm:$0xff] %vm2307_vm8, %v2423_v49  ;;  %v2303_v58 = vmax.f32 %v2287_v25, 0.0  ;;  %v2299_v10 = vmax.f32 %v2283_v50, 0.0  ;;  %v15401_v62 = vld [vmem:[%s21738_s4 + $0x228] ss:$12 sps:$4 sm:$0xff]  }
 0x1e1   :  { %2468 = vst [vmem:[#allocation2 + $0x50] sm:$0xf] %v2449_v1  ;;  %2463 = vst [vmem:[#allocation2 + $0x30] sm:$0xfc] %v2450_v47  ;;  %v15404_v39 = vld [vmem:[%s21738_s4 + $0x350] ss:$12 sps:$4 sm:$0xff]  }
 0x1e2   :  { %2506 = vst [vmem:[#allocation2 + $0x90] sm:$0xfc] %v2484_v28  ;;  %2510 = vst [vmem:[#allocation2 + $0xb0] sm:$0xf] %v2493_v29  ;;  %v2494_v6 = vrot.slane %v2303_v58, 5  ;;  %v2523_v24 = vrot.slane %v2303_v58, 6  ;;  %3588 = vmatpush2.bf16.msra.mxu0 %v15395_v56 }
 0x1e3   :  { %2535 = vst [vmem:[#allocation2 + $0xf0] sm:$0xfc] %v2515_v32  ;;  %2564 = vst [vmem:[#allocation2 + $0x150] sm:$0xfc] %v2544_v13  ;;  %v2552_v16 = vrot.slane %v2303_v58, 7  ;;  %v2451_v41 = vrot.slane %v2299_v10, 4  ;;  %3589 = vmatprep.subr.bf16.mxu0 %v21754_v63 }
 0x1e4   :  { %2539 = vst [vmem:[#allocation2 + $0x110] sm:$0xf] %v2522_v17  ;;  %2568 = vst [vmem:[#allocation2 + $0x170] sm:$0xf] %v2551_v59  ;;  %v2486_v9 = vrot.slane %v2299_v10, 5  ;;  %v2516_v35 = vrot.slane %v2299_v10, 6 }
 0x1e5   :  { %2577 = vst.msk [vmem:[#allocation2 + $0x1d8] sm:$0xf] %vm2469_vm10, %v2303_v58  ;;  %v2545_v37 = vrot.slane %v2299_v10, 7  ;;  %v2452_v57 = vsel %vm2189_vm1, %v18052_v33, %v2451_v41  ;;  %2470 = vst.msk [vmem:[#allocation2 + $0x58] sm:$0xf] %vm2469_vm10, %v2451_v41  ;;  %v2581_v1 = vld [vmem:[#allocation2 + $0x18] sm:$0xff] }
 0x1e6   :  { %2573 = vst.msk [vmem:[#allocation2 + $0x1b8] sm:$0xfc] %vm2464_vm11, %v2299_v10  ;;  %v2487_v30 = vsel %vm2475_vm5, %v2485_v4, %v2486_v9  ;;  %v2495_v43 = vsel %vm2475_vm5, %v2486_v9, %v2494_v6  ;;  %v2524_v53 = vsel %vm2512_vm6, %v2516_v35, %v2523_v24  ;;  %2536 = vst.msk [vmem:[#allocation2 + $0xf8] sm:$0xfc] %vm2464_vm11, %v2516_v35  ;;  %3590 = vmatpush2.bf16.msra.mxu0 %v15399_v0  ;;  %v2825_v7 = vld [vmem:[#allocation2 + $0x78] sm:$0xff] }
 0x1e7   :  { %2565 = vst.msk [vmem:[#allocation2 + $0x158] sm:$0xfc] %vm2464_vm11, %v2545_v37  ;;  %2465 = vst.msk [vmem:[#allocation2 + $0x38] sm:$0xfc] %vm2464_vm11, %v2452_v57  ;;  %v2553_v45 = vsel %vm2541_vm7, %v2545_v37, %v2552_v16  ;;  %4112 = vmatprep.subr.bf16.mxu0 %v15403_v40  ;;  %v15405_v48 = vld [vmem:[%s21738_s4 + $0x3f8] ss:$12 sps:$4 sm:$0xff]  }
 0x1e8   :  { %2507 = vst.msk [vmem:[#allocation2 + $0x98] sm:$0xfc] %vm2464_vm11, %v2487_v30  ;;  %v15408_v23 = vld [vmem:[%s21738_s4 + $0x214] ss:$12 sps:$4 sm:$0xff]   ;;  %v15406_v46 = vld [vmem:[%s21738_s4 + $0x210] ss:$12 sps:$4 sm:$0xff]  }
 0x1e9   :  { %2511 = vst.msk [vmem:[#allocation2 + $0xb8] sm:$0xf] %vm2469_vm10, %v2495_v43  ;;  %2540 = vst.msk [vmem:[#allocation2 + $0x118] sm:$0xf] %vm2469_vm10, %v2524_v53  ;;  %v2828_v36 = vld [vmem:[#allocation2 + $0x90] sm:$0xff]  ;;  %v2583_v43 = vld [vmem:[#allocation2 + $0x28] sm:$0xff] }
 0x1ea   :  { %2569 = vst.msk [vmem:[#allocation2 + $0x178] sm:$0xf] %vm2469_vm10, %v2553_v45  ;;  %v18119_v22 = vpack.c.bf16 %v2828_v36, %v18041_v42  ;;  %v15409_v2 = vld [vmem:[%s21738_s4 + $0x338] ss:$12 sps:$4 sm:$0xff]   ;;  %v15410_v21 = vld [vmem:[%s21738_s4 + $0x3e0] ss:$12 sps:$4 sm:$0xff]  }
 0x1eb   :  { %v15413_v18 = vld [vmem:[%s21738_s4 + $0x1fc] ss:$12 sps:$4 sm:$0xff]   ;;  %v15411_v8 = vld [vmem:[%s21738_s4 + $0x1f8] ss:$12 sps:$4 sm:$0xff]   ;;  %v2832_v33 = vld [vmem:[#allocation2 + $0xb0] sm:$0xf] }
 0x1ec   :  { %v15414_v15 = vld [vmem:[%s21738_s4 + $0x320] ss:$12 sps:$4 sm:$0xff]   ;;  %v15415_v55 = vld [vmem:[%s21738_s4 + $0x3c8] ss:$12 sps:$4 sm:$0xff]   ;;  %v15418_v51 = vld [vmem:[%s21738_s4 + $0x1e4] ss:$12 sps:$4 sm:$0xff]   ;;  %v18163_v61 = vpack.c.bf16 %v2832_v33, %v2832_v33 }
 0x1ed   :  { %v15416_v31 = vld [vmem:[%s21738_s4 + $0x1e0] ss:$12 sps:$4 sm:$0xff]   ;;  %v15419_v49 = vld [vmem:[%s21738_s4 + $0x308] ss:$12 sps:$4 sm:$0xff]   ;;  %v15420_v47 = vld [vmem:[%s21738_s4 + $0x3b0] ss:$12 sps:$4 sm:$0xff]  }
 0x1ee   :  { %v2585_v3 = vld [vmem:[#allocation2 + $0x38] sm:$0xff]  ;;  %v15421_v29 = vld [vmem:[%s21738_s4 + $0x1c8] ss:$12 sps:$4 sm:$0xff]   ;;  %v15430_v25 = vld [vmem:[%s21738_s4 + $0x380] ss:$12 sps:$4 sm:$0xff]  }
 0x1ef   :  { %v2829_v14 = vld [vmem:[#allocation2 + $0x98] sm:$0xff]  ;;  %v18167_v54 = vpack.c.bf16 %v2585_v3, %v2581_v1  ;;  %v15428_v13 = vld [vmem:[%s21738_s4 + $0x1b4] ss:$12 sps:$4 sm:$0xff]   ;;  %v15438_v58 = vld [vmem:[%s21738_s4 + $0x184] ss:$12 sps:$4 sm:$0xff]  }
 0x1f0   :  { %v18110_v20 = vpack.c.bf16 %v2829_v14, %v2825_v7  ;;  %v2833_v5 = vld [vmem:[#allocation2 + $0xb8] sm:$0xf]  ;;  %v15424_v32 = vld [vmem:[%s21738_s4 + $0x2f0] ss:$12 sps:$4 sm:$0xff]   ;;  %v15434_v59 = vld [vmem:[%s21738_s4 + $0x2c0] ss:$12 sps:$4 sm:$0xff]  }
 0x1f1   :  { %v18133_v42 = vpack.c.bf16 %v2833_v5, %v2833_v5  ;;  %v15423_v28 = vld [vmem:[%s21738_s4 + $0x1cc] ss:$12 sps:$4 sm:$0xff]   ;;  %v15426_v26 = vld [vmem:[%s21738_s4 + $0x1b0] ss:$12 sps:$4 sm:$0xff]   ;;  %v15435_v50 = vld [vmem:[%s21738_s4 + $0x368] ss:$12 sps:$4 sm:$0xff]  }
 0x1f2   :  { %12557 = vmatprep.mubr.msk.bf16.mxu1 %vm2307_vm8, %v18110_v20  ;;  %12559 = vmatprep.mubr.msk.bf16.mxu0 %vm2307_vm8, %v18110_v20  ;;  %v15425_v12 = vld [vmem:[%s21738_s4 + $0x398] ss:$12 sps:$4 sm:$0xff]   ;;  %v15433_v56 = vld [vmem:[%s21738_s4 + $0x19c] ss:$12 sps:$4 sm:$0xff]   ;;  %v15436_v4 = vld [vmem:[%s21738_s4 + $0x180] ss:$12 sps:$4 sm:$0xff]  }
 0x1f3   :  { %3493 = vmatmul.mubr.bf16.vlgmr.msra.gmra.mxu1 %v18119_v22  ;;  %3592 = vmatmul.mubr.bf16.vlgmr.msra.gmra.mxu0 %v18119_v22  ;;  %v15429_v34 = vld [vmem:[%s21738_s4 + $0x2d8] ss:$12 sps:$4 sm:$0xff]   ;;  %v15439_v10 = vld [vmem:[%s21738_s4 + $0x2a8] ss:$12 sps:$4 sm:$0xff]   ;;  %v15446_v9 = vld [vmem:[%s21738_s4 + $0x90] ss:$12 sps:$4 sm:$0xff]  }
 0x1f4   :  { %14413 = vmatpush3.bf16.msra.mxu1 %v15404_v39  ;;  %4113 = vmatpush1.bf16.msra.mxu0 %v15401_v62  ;;  %v15431_v17 = vld [vmem:[%s21738_s4 + $0x198] ss:$12 sps:$4 sm:$0xff]   ;;  %v15440_v24 = vld [vmem:[%s21738_s4 + $0xa8] ss:$12 sps:$4 sm:$0xff]   ;;  %v15449_v37 = vld [vmem:[%s21738_s4 + $0x270] ss:$12 sps:$4 sm:$0xff]  }
 0x1f5   :  { %12558 = vmatprep.mubr.msk.bf16.mxu1 %vm2307_vm8, %v18133_v42  ;;  %12560 = vmatprep.mubr.msk.bf16.mxu0 %vm2307_vm8, %v18133_v42  ;;  %v15442_v0 = vld [vmem:[%s21738_s4 + $0xac] ss:$12 sps:$4 sm:$0xff]   ;;  %v15443_v16 = vld [vmem:[%s21738_s4 + $0x288] ss:$12 sps:$4 sm:$0xff]   ;;  %v15460_v45 = vld [vmem:[%s21738_s4 + $0x64] ss:$12 sps:$4 sm:$0xff]  }
 0x1f6   :  { %14414 = vmatprep.subr.bf16.mxu1 %v15405_v48  ;;  %4114 = vmatprep.subr.bf16.mxu0 %v15408_v23  ;;  %v15445_v6 = vld [vmem:[%s21738_s4 + $0x28c] ss:$12 sps:$4 sm:$0xff]   ;;  %v15448_v41 = vld [vmem:[%s21738_s4 + $0x94] ss:$12 sps:$4 sm:$0xff]   ;;  %v15454_v40 = vld [vmem:[%s21738_s4 + $0x7c] ss:$12 sps:$4 sm:$0xff]  }
 0x1f7   :  { %v15451_v35 = vld [vmem:[%s21738_s4 + $0x274] ss:$12 sps:$4 sm:$0xff]   ;;  %v15452_v57 = vld [vmem:[%s21738_s4 + $0x78] ss:$12 sps:$4 sm:$0xff]   ;;  %v15457_v30 = vld [vmem:[%s21738_s4 + $0x25c] ss:$12 sps:$4 sm:$0xff]  }
 0x1f8   :  { %14415 = vmatpush3.bf16.msra.mxu1 %v15409_v2  ;;  %4115 = vmatpush1.bf16.msra.mxu0 %v15406_v46  ;;  %v15455_v53 = vld [vmem:[%s21738_s4 + $0x258] ss:$12 sps:$4 sm:$0xff]   ;;  %v2579_v36 = vld [vmem:[#allocation2 + $0x8] sm:$0xff]  ;;  %v2584_v23 = vld [vmem:[#allocation2 + $0x30] sm:$0xff] }
 0x1f9   :  { %14416 = vmatprep.subr.bf16.mxu1 %v15410_v21  ;;  %4116 = vmatprep.subr.bf16.mxu0 %v15413_v18  ;;  %v18267_v7 = vpack.c.bf16 %v2583_v43, %v2579_v36  ;;  %v15458_v14 = vld [vmem:[%s21738_s4 + $0x60] ss:$12 sps:$4 sm:$0xff]   ;;  %v15463_v62 = vld [vmem:[%s21738_s4 + $0x244] ss:$12 sps:$4 sm:$0xff]   ;;  %v15464_v48 = vld [vmem:[%s21738_s4 + $0x48] ss:$12 sps:$4 sm:$0xff]   ;;  %v18290_v21 = vpack.c.bf16 %v2584_v23, %v17993_v27 }
 0x1fa   :  { %v15461_v39 = vld [vmem:[%s21738_s4 + $0x240] ss:$12 sps:$4 sm:$0xff]   ;;  %v15467_v46 = vld [vmem:[%s21738_s4 + $0x230] ss:$12 sps:$4 sm:$0xff]   ;;  %v2589_v2 = vld [vmem:[#allocation2 + $0x58] sm:$0xf] }
 0x1fb   :  { %3503 = vmatmul.mubr.bf16.gmra.mxu1 %v18163_v61  ;;  %3600 = vmatmul.mubr.bf16.gmra.mxu0 %v18163_v61  ;;  %v15466_v5 = vld [vmem:[%s21738_s4 + $0x4c] ss:$12 sps:$4 sm:$0xff]   ;;  %v15468_v18 = vld [vmem:[%s21738_s4 + $0x30] ss:$12 sps:$4 sm:$0xff]   ;;  %v18299_v33 = vpack.c.bf16 %v2589_v2, %v2589_v2  ;;  %v15513_v36 = vld [vmem:[%s21739_s5 + $0x4c8] ss:$12 sps:$4 sm:$0xff]  }
 0x1fc   :  { %14417 = vmatpush3.bf16.msra.mxu1 %v15414_v15  ;;  %4117 = vmatpush1.bf16.msra.mxu0 %v15411_v8  ;;  %v15470_v8 = vld [vmem:[%s21738_s4 + $0x34] ss:$12 sps:$4 sm:$0xff]   ;;  %v15471_v15 = vld [vmem:[%s21738_s4 + $0x218] ss:$12 sps:$4 sm:$0xff]   ;;  %v15474_v27 = vld [vmem:[%s21738_s4 + $0x1c] ss:$12 sps:$4 sm:$0xff]  }
 0x1fd   :  { %3543 = vmatprep.mubr.bf16.mxu1 %v17901_v44  ;;  %12645 = vmatprep.mubr.msk.bf16.mxu0 %vm2307_vm8, %v18167_v54  ;;  %v15472_v3 = vld [vmem:[%s21738_s4 + $0x18] ss:$12 sps:$4 sm:$0xff]   ;;  %v2588_v1 = vld [vmem:[#allocation2 + $0x50] sm:$0xf] }
 0x1fe   :  { %14418 = vmatprep.subr.bf16.mxu1 %v15415_v55  ;;  %4118 = vmatprep.subr.bf16.mxu0 %v15418_v51  ;;  %v15475_v55 = vld [vmem:[%s21738_s4 + $0x200] ss:$12 sps:$4 sm:$0xff]   ;;  %v18317_v51 = vpack.c.bf16 %v2588_v1, %v2588_v1  ;;  %v15518_v23 = vld [vmem:[%s21739_s5 + $0x4b0] ss:$12 sps:$4 sm:$0xff]   ;;  %v15521_v2 = vld [vmem:[%s21738_s4 + $0x98] ss:$12 sps:$4 sm:$0xff]  }
 0x1ff   :  { %v15515_v43 = vld [vmem:[%s21739_s5 + $0x4cc] ss:$12 sps:$4 sm:$0xff]  }
 0x200   :  { %14419 = vmatpush3.bf16.msra.mxu1 %v15419_v49  ;;  %4119 = vmatpush1.bf16.msra.mxu0 %v15416_v31  ;;  %v15476_v31 = vld [vmem:[%s21738_s4] ss:$12 sps:$4 sm:$0xff]   ;;  %v15478_v49 = vld [vmem:[%s21738_s4 + $0x4] ss:$12 sps:$4 sm:$0xff]  }
 0x201   :  { %14420 = vmatprep.subr.bf16.mxu1 %v15420_v47  ;;  %4120 = vmatprep.subr.bf16.mxu0 %v15423_v28  ;;  %v15479_v47 = vld [vmem:[%s21738_s4 + $0x1e8] ss:$12 sps:$4 sm:$0xff]   ;;  %v15482_v28 = vld [vmem:[%s21738_s4 + $0x16c] ss:$12 sps:$4 sm:$0xff]  }
 0x204   :  { %14421 = vmatpush3.bf16.msra.mxu1 %v15424_v32  ;;  %4121 = vmatpush1.bf16.msra.mxu0 %v15421_v29  ;;  %v15480_v29 = vld [vmem:[%s21738_s4 + $0x168] ss:$12 sps:$4 sm:$0xff]   ;;  %v15483_v32 = vld [vmem:[%s21738_s4 + $0x1d0] ss:$12 sps:$4 sm:$0xff]  }
 0x205   :  { %14422 = vmatprep.subr.bf16.mxu1 %v15425_v12  ;;  %4122 = vmatprep.subr.bf16.mxu0 %v15428_v13  ;;  %v15486_v12 = vld [vmem:[%s21738_s4 + $0x154] ss:$12 sps:$4 sm:$0xff]   ;;  %v15484_v13 = vld [vmem:[%s21738_s4 + $0x150] ss:$12 sps:$4 sm:$0xff]  }
 0x208   :  { %14423 = vmatpush3.bf16.msra.mxu1 %v15429_v34  ;;  %4123 = vmatpush1.bf16.msra.mxu0 %v15426_v26  ;;  %v15487_v26 = vld [vmem:[%s21738_s4 + $0x1b8] ss:$12 sps:$4 sm:$0xff]   ;;  %v15490_v34 = vld [vmem:[%s21738_s4 + $0x13c] ss:$12 sps:$4 sm:$0xff]  }
 0x209   :  { %14424 = vmatprep.subr.bf16.mxu1 %v15430_v25  ;;  %4124 = vmatprep.subr.bf16.mxu0 %v15433_v56  ;;  %v15488_v25 = vld [vmem:[%s21738_s4 + $0x138] ss:$12 sps:$4 sm:$0xff]   ;;  %v15491_v56 = vld [vmem:[%s21738_s4 + $0x1a0] ss:$12 sps:$4 sm:$0xff]  }
 0x20c   :  { %14425 = vmatpush3.bf16.msra.mxu1 %v15434_v59  ;;  %4125 = vmatpush1.bf16.msra.mxu0 %v15431_v17  ;;  %v15494_v17 = vld [vmem:[%s21738_s4 + $0x124] ss:$12 sps:$4 sm:$0xff]   ;;  %v15492_v59 = vld [vmem:[%s21738_s4 + $0x120] ss:$12 sps:$4 sm:$0xff]  }
 0x20d   :  { %14426 = vmatprep.subr.bf16.mxu1 %v15435_v50  ;;  %4126 = vmatprep.subr.bf16.mxu0 %v15438_v58  ;;  %v15495_v50 = vld [vmem:[%s21738_s4 + $0x188] ss:$12 sps:$4 sm:$0xff]   ;;  %v15498_v58 = vld [vmem:[%s21738_s4 + $0x10c] ss:$12 sps:$4 sm:$0xff]  }
 0x210   :  { %14427 = vmatpush3.bf16.msra.mxu1 %v15439_v10  ;;  %4127 = vmatpush1.bf16.msra.mxu0 %v15436_v4  ;;  %v15496_v4 = vld [vmem:[%s21738_s4 + $0x108] ss:$12 sps:$4 sm:$0xff]   ;;  %v15499_v10 = vld [vmem:[%s21738_s4 + $0x290] ss:$12 sps:$4 sm:$0xff]  }
 0x211   :  { %4061 = vmatprep.subr.bf16.mxu1 %v15442_v0  ;;  %4136 = vmatprep.subr.bf16.mxu0 %v15445_v6  ;;  %v15502_v0 = vld [vmem:[%s21738_s4 + $0xf4] ss:$12 sps:$4 sm:$0xff]   ;;  %v15500_v6 = vld [vmem:[%s21738_s4 + $0xf0] ss:$12 sps:$4 sm:$0xff]  }
 0x213   :  { %3544 = vmatmul.mubr.bf16.vlgmr.msra.gmra.mxu1 %v17907_v11 }
 0x214   :  { %3551 = vmatprep.mubr.bf16.mxu1 %v17910_v19  ;;  %4062 = vmatpush1.bf16.msra.mxu1 %v15440_v24  ;;  %v15503_v24 = vld [vmem:[%s21738_s4 + $0x278] ss:$12 sps:$4 sm:$0xff]  }
 0x215   :  { %4137 = vmatpush2.bf16.msra.mxu0 %v15443_v16  ;;  %4063 = vmatprep.subr.bf16.mxu1 %v15448_v41  ;;  %v15506_v16 = vld [vmem:[%s21738_s4 + $0xdc] ss:$12 sps:$4 sm:$0xff]   ;;  %v15504_v41 = vld [vmem:[%s21738_s4 + $0xd8] ss:$12 sps:$4 sm:$0xff]  }
 0x216   :  { %4138 = vmatprep.subr.bf16.mxu0 %v15451_v35  ;;  %v15510_v35 = vld [vmem:[%s21738_s4 + $0xc4] ss:$12 sps:$4 sm:$0xff]  }
 0x218   :  { %4064 = vmatpush1.bf16.msra.mxu1 %v15446_v9  ;;  %v15507_v9 = vld [vmem:[%s21738_s4 + $0x260] ss:$12 sps:$4 sm:$0xff]  }
 0x219   :  { %4139 = vmatpush2.bf16.msra.mxu0 %v15449_v37  ;;  %4065 = vmatprep.subr.bf16.mxu1 %v15454_v40  ;;  %v15508_v37 = vld [vmem:[%s21738_s4 + $0xc0] ss:$12 sps:$4 sm:$0xff]   ;;  %v15511_v40 = vld [vmem:[%s21738_s4 + $0x248] ss:$12 sps:$4 sm:$0xff]  }
 0x21a   :  { %4140 = vmatprep.subr.bf16.mxu0 %v15457_v30  ;;  %v15512_v30 = vld [vmem:[%s21738_s4 + $0x170] ss:$12 sps:$4 sm:$0xff]  }
 0x21b   :  { %3552 = vmatmul.mubr.bf16.gmra.mxu1 %v17933_v60 }
 0x21c   :  { %4066 = vmatpush1.bf16.msra.mxu1 %v15452_v57  ;;  %4093 = vmatprep.mubr.bf16.mxu1 %v18267_v7  ;;  %v2582_v57 = vld [vmem:[#allocation2 + $0x20] sm:$0xff] }
 0x21d   :  { %4141 = vmatpush2.bf16.msra.mxu0 %v15455_v53  ;;  %4067 = vmatprep.subr.bf16.mxu1 %v15460_v45  ;;  %v2578_v53 = vld [vmem:[#allocation2] sm:$0xff]  ;;  %v2587_v45 = vld [vmem:[#allocation2 + $0x48] sm:$0xf] }
 0x21e   :  { %4142 = vmatprep.subr.bf16.mxu0 %v15463_v62  ;;  %v18425_v62 = vpack.c.bf16 %v2582_v57, %v2578_v53  ;;  %v15564_v57 = vld [vmem:[%s21739_s5 + $0x318] ss:$12 sps:$4 sm:$0xff]  }
 0x21f   :  { %v15572_v53 = vld [vmem:[%s21739_s5 + $0x304] ss:$12 sps:$4 sm:$0xff]  }
 0x220   :  { %4068 = vmatpush1.bf16.msra.mxu1 %v15458_v14  ;;  %v15516_v14 = vld [vmem:[%s21738_s4 + $0xb0] ss:$12 sps:$4 sm:$0xff]  }
 0x221   :  { %4143 = vmatpush2.bf16.msra.mxu0 %v15461_v39  ;;  %4069 = vmatprep.subr.bf16.mxu1 %v15466_v5  ;;  %v18427_v39 = vpack.c.bf16 %v2587_v45, %v2587_v45  ;;  %v15517_v5 = vld [vmem:[%s21738_s4 + $0x158] ss:$12 sps:$4 sm:$0xff]  }
 0x222   :  { %4211 = vmatprep.subr.bf16.mxu0 %v21754_v63 }
 0x224   :  { %4145 = vmatmul.mubr.bf16.vlgmr.msra.gmra.mxu0 %v18290_v21  ;;  %4070 = vmatpush1.bf16.msra.mxu1 %v15464_v48  ;;  %v15520_v48 = vld [vmem:[%s21739_s5 + $0x4b4] ss:$12 sps:$4 sm:$0xff]  }
 0x225   :  { %12646 = vmatprep.mubr.msk.bf16.mxu0 %vm2307_vm8, %v18299_v33  ;;  %4212 = vmatpush1.bf16.msra.mxu0 %v15467_v46  ;;  %v2586_v46 = vld [vmem:[#allocation2 + $0x40] sm:$0xf] }
 0x226   :  { %4071 = vmatprep.subr.bf16.mxu1 %v15470_v8  ;;  %4213 = vmatprep.subr.bf16.mxu0 %v21754_v63  ;;  %v15525_v8 = vld [vmem:[%s21739_s5 + $0x49c] ss:$12 sps:$4 sm:$0xff]   ;;  %v18461_v1 = vpack.c.bf16 %v2586_v46, %v2586_v46 }
 0x228   :  { %4072 = vmatpush1.bf16.msra.mxu1 %v15468_v18  ;;  %v15522_v18 = vld [vmem:[%s21738_s4 + $0x140] ss:$12 sps:$4 sm:$0xff]  }
 0x229   :  { %4214 = vmatpush1.bf16.msra.mxu0 %v15471_v15  ;;  %4073 = vmatprep.subr.bf16.mxu1 %v15474_v27  ;;  %v15523_v15 = vld [vmem:[%s21739_s5 + $0x498] ss:$12 sps:$4 sm:$0xff]   ;;  %v15526_v27 = vld [vmem:[%s21738_s4 + $0x80] ss:$12 sps:$4 sm:$0xff]  }
 0x22a   :  { %4215 = vmatprep.subr.bf16.mxu0 %v21754_v63 }
 0x22c   :  { %4155 = vmatmul.mubr.bf16.gmra.mxu0 %v18317_v51  ;;  %4074 = vmatpush1.bf16.msra.mxu1 %v15472_v3  ;;  %v15527_v3 = vld [vmem:[%s21738_s4 + $0x128] ss:$12 sps:$4 sm:$0xff]  }
 0x22d   :  { %4216 = vmatpush1.bf16.msra.mxu0 %v15475_v55  ;;  %12647 = vmatprep.mubr.msk.bf16.mxu0 %vm2307_vm8, %v18167_v54  ;;  %v15530_v55 = vld [vmem:[%s21739_s5 + $0x484] ss:$12 sps:$4 sm:$0xff]  }
 0x22e   :  { %4075 = vmatprep.subr.bf16.mxu1 %v15478_v49  ;;  %4217 = vmatprep.subr.bf16.mxu0 %v21754_v63  ;;  %v15531_v49 = vld [vmem:[%s21738_s4 + $0x68] ss:$12 sps:$4 sm:$0xff]  }
 0x230   :  { %4076 = vmatpush1.bf16.msra.mxu1 %v15476_v31  ;;  %v15528_v31 = vld [vmem:[%s21739_s5 + $0x480] ss:$12 sps:$4 sm:$0xff]  }
 0x231   :  { %4218 = vmatpush1.bf16.msra.mxu0 %v15479_v47  ;;  %4077 = vmatprep.subr.bf16.mxu1 %v15482_v28  ;;  %v15532_v47 = vld [vmem:[%s21738_s4 + $0x110] ss:$12 sps:$4 sm:$0xff]   ;;  %v15535_v28 = vld [vmem:[%s21739_s5 + $0x46c] ss:$12 sps:$4 sm:$0xff]  }
 0x232   :  { %4219 = vmatprep.subr.bf16.mxu0 %v21754_v63 }
 0x234   :  { %4078 = vmatpush2.bf16.msra.mxu1 %v15480_v29  ;;  %v15533_v29 = vld [vmem:[%s21739_s5 + $0x468] ss:$12 sps:$4 sm:$0xff]  }
 0x235   :  { %4220 = vmatpush1.bf16.msra.mxu0 %v15483_v32  ;;  %4079 = vmatprep.subr.bf16.mxu1 %v15486_v12  ;;  %v15536_v32 = vld [vmem:[%s21738_s4 + $0x50] ss:$12 sps:$4 sm:$0xff]   ;;  %v15537_v12 = vld [vmem:[%s21738_s4 + $0xf8] ss:$12 sps:$4 sm:$0xff]  }
 0x236   :  { %4221 = vmatprep.subr.bf16.mxu0 %v21754_v63 }
 0x238   :  { %4080 = vmatpush2.bf16.msra.mxu1 %v15484_v13  ;;  %v15540_v13 = vld [vmem:[%s21739_s5 + $0x454] ss:$12 sps:$4 sm:$0xff]  }
 0x239   :  { %4222 = vmatpush1.bf16.msra.mxu0 %v15487_v26  ;;  %4081 = vmatprep.subr.bf16.mxu1 %v15490_v34  ;;  %v15538_v26 = vld [vmem:[%s21739_s5 + $0x450] ss:$12 sps:$4 sm:$0xff]   ;;  %v15541_v34 = vld [vmem:[%s21738_s4 + $0x38] ss:$12 sps:$4 sm:$0xff]  }
 0x23a   :  { %4223 = vmatprep.subr.bf16.mxu0 %v21754_v63 }
 0x23c   :  { %4082 = vmatpush2.bf16.msra.mxu1 %v15488_v25  ;;  %v15542_v25 = vld [vmem:[%s21738_s4 + $0xe0] ss:$12 sps:$4 sm:$0xff]  }
 0x23d   :  { %4224 = vmatpush1.bf16.msra.mxu0 %v15491_v56  ;;  %4083 = vmatprep.subr.bf16.mxu1 %v15494_v17  ;;  %v15545_v56 = vld [vmem:[%s21739_s5 + $0x43c] ss:$12 sps:$4 sm:$0xff]   ;;  %v15543_v17 = vld [vmem:[%s21739_s5 + $0x438] ss:$12 sps:$4 sm:$0xff]  }
 0x23e   :  { %4225 = vmatprep.subr.bf16.mxu0 %v21754_v63 }
 0x240   :  { %4084 = vmatpush2.bf16.msra.mxu1 %v15492_v59  ;;  %v15546_v59 = vld [vmem:[%s21738_s4 + $0x20] ss:$12 sps:$4 sm:$0xff]  }
 0x241   :  { %4226 = vmatpush1.bf16.msra.mxu0 %v15495_v50  ;;  %4085 = vmatprep.subr.bf16.mxu1 %v15498_v58  ;;  %v15547_v50 = vld [vmem:[%s21738_s4 + $0xc8] ss:$12 sps:$4 sm:$0xff]   ;;  %v15550_v58 = vld [vmem:[%s21739_s5 + $0x424] ss:$12 sps:$4 sm:$0xff]  }
 0x242   :  { %4235 = vmatprep.subr.bf16.mxu0 %v21754_v63 }
 0x244   :  { %4086 = vmatpush2.bf16.msra.mxu1 %v15496_v4  ;;  %v15548_v4 = vld [vmem:[%s21739_s5 + $0x420] ss:$12 sps:$4 sm:$0xff]  }
 0x245   :  { %4236 = vmatpush2.bf16.msra.mxu0 %v15499_v10  ;;  %4087 = vmatprep.subr.bf16.mxu1 %v15502_v0  ;;  %v15551_v10 = vld [vmem:[%s21738_s4 + $0x8] ss:$12 sps:$4 sm:$0xff]   ;;  %v15554_v0 = vld [vmem:[%s21739_s5 + $0x34c] ss:$12 sps:$4 sm:$0xff]  }
 0x246   :  { %4237 = vmatprep.subr.bf16.mxu0 %v21754_v63 }
 0x248   :  { %4088 = vmatpush2.bf16.msra.mxu1 %v15500_v6  ;;  %v15557_v6 = vld [vmem:[%s21739_s5 + $0x52c] ss:$12 sps:$4 sm:$0xff]  }
 0x249   :  { %4238 = vmatpush2.bf16.msra.mxu0 %v15503_v24  ;;  %4089 = vmatprep.subr.bf16.mxu1 %v15506_v16  ;;  %v15552_v24 = vld [vmem:[%s21739_s5 + $0x348] ss:$12 sps:$4 sm:$0xff]  }
 0x24a   :  { %4239 = vmatprep.subr.bf16.mxu0 %v21754_v63  ;;  %v15555_v16 = vld [vmem:[%s21739_s5 + $0x528] ss:$12 sps:$4 sm:$0xff]  }
 0x24c   :  { %4090 = vmatpush2.bf16.msra.mxu1 %v15504_v41  ;;  %v15560_v41 = vld [vmem:[%s21739_s5 + $0x334] ss:$12 sps:$4 sm:$0xff]  }
 0x24d   :  { %4240 = vmatpush2.bf16.msra.mxu0 %v15507_v9  ;;  %4091 = vmatprep.subr.bf16.mxu1 %v15510_v35  ;;  %v15558_v9 = vld [vmem:[%s21739_s5 + $0x330] ss:$12 sps:$4 sm:$0xff]   ;;  %v15563_v35 = vld [vmem:[%s21739_s5 + $0x514] ss:$12 sps:$4 sm:$0xff]  }
 0x24e   :  { %4241 = vmatprep.subr.bf16.mxu0 %v21754_v63 }
 0x250   :  { %4092 = vmatpush2.bf16.msra.mxu1 %v15508_v37  ;;  %v15561_v37 = vld [vmem:[%s21739_s5 + $0x510] ss:$12 sps:$4 sm:$0xff]  }
 0x251   :  { %4242 = vmatpush2.bf16.msra.mxu0 %v15511_v40  ;;  %14440 = vmatprep.subr.bf16.mxu1 %v15512_v30  ;;  %v15566_v40 = vld [vmem:[%s21739_s5 + $0x31c] ss:$12 sps:$4 sm:$0xff]  }
 0x252   :  { %4871 = vmatprep.subr.bf16.mxu0 %v15515_v43  ;;  %v15569_v30 = vld [vmem:[%s21739_s5 + $0x4fc] ss:$12 sps:$4 sm:$0xff]   ;;  %v15567_v43 = vld [vmem:[%s21739_s5 + $0x4f8] ss:$12 sps:$4 sm:$0xff]  }
 0x253   :  { %4094 = vmatmul.mubr.bf16.vlgmr.msra.gmra.mxu1 %v18425_v62 }
 0x254   :  { %4244 = vmatmul.mubr.bf16.vlgmr.msra.gmra.mxu0 %v18290_v21  ;;  %4103 = vmatprep.mubr.bf16.mxu1 %v18427_v39 }
 0x255   :  { %14441 = vmatpush3.bf16.msra.mxu1 %v15516_v14  ;;  %12648 = vmatprep.mubr.msk.bf16.mxu0 %vm2307_vm8, %v18299_v33  ;;  %v15575_v14 = vld [vmem:[%s21739_s5 + $0x4e4] ss:$12 sps:$4 sm:$0xff]  }
 0x256   :  { %4872 = vmatpush1.bf16.msra.mxu0 %v15513_v36  ;;  %14442 = vmatprep.subr.bf16.mxu1 %v15517_v5  ;;  %v15570_v36 = vld [vmem:[%s21739_s5 + $0x300] ss:$12 sps:$4 sm:$0xff]  }
 0x257   :  { %4873 = vmatprep.subr.bf16.mxu0 %v15520_v48  ;;  %v15573_v5 = vld [vmem:[%s21739_s5 + $0x4e0] ss:$12 sps:$4 sm:$0xff]  }
 0x259   :  { %14443 = vmatpush3.bf16.msra.mxu1 %v15521_v2  ;;  %v15576_v2 = vld [vmem:[%s21739_s5 + $0x2e8] ss:$12 sps:$4 sm:$0xff]  }
 0x25a   :  { %4874 = vmatpush1.bf16.msra.mxu0 %v15518_v23  ;;  %14444 = vmatprep.subr.bf16.mxu1 %v15522_v18  ;;  %v15578_v23 = vld [vmem:[%s21739_s5 + $0x2ec] ss:$12 sps:$4 sm:$0xff]  }
 0x25b   :  { %4104 = vmatmul.mubr.bf16.gmra.mxu1 %v18461_v1  ;;  %4875 = vmatprep.subr.bf16.mxu0 %v15525_v8  ;;  %v15579_v8 = vld [vmem:[%s21739_s5 + $0x4d0] ss:$12 sps:$4 sm:$0xff]  }
 0x25c   :  { %4252 = vmatmul.mubr.bf16.gmra.mxu0 %v18317_v51  ;;  %4195 = vmatprep.mubr.bf16.mxu1 %v18267_v7 }
 0x25d   :  { %14445 = vmatpush3.bf16.msra.mxu1 %v15526_v27  ;;  %12845 = vmatprep.mubr.msk.bf16.mxu0 %vm2307_vm8, %v18110_v20  ;;  %v15580_v27 = vld [vmem:[%s21739_s5 + $0x2d0] ss:$12 sps:$4 sm:$0xff]  }
 0x25e   :  { %4876 = vmatpush1.bf16.msra.mxu0 %v15523_v15  ;;  %14446 = vmatprep.subr.bf16.mxu1 %v15527_v3  ;;  %v15582_v3 = vld [vmem:[%s21739_s5 + $0x2d4] ss:$12 sps:$4 sm:$0xff]  }
 0x25f   :  { %4877 = vmatprep.subr.bf16.mxu0 %v15530_v55  ;;  %v15583_v55 = vld [vmem:[%s21739_s5 + $0x4b8] ss:$12 sps:$4 sm:$0xff]  }
 0x261   :  { %14447 = vmatpush3.bf16.msra.mxu1 %v15531_v49  ;;  %v15586_v49 = vld [vmem:[%s21739_s5 + $0x2bc] ss:$12 sps:$4 sm:$0xff]  }
 0x262   :  { %4878 = vmatpush1.bf16.msra.mxu0 %v15528_v31  ;;  %14448 = vmatprep.subr.bf16.mxu1 %v15532_v47 }
 0x263   :  { %4879 = vmatprep.subr.bf16.mxu0 %v15535_v28  ;;  %v15584_v28 = vld [vmem:[%s21739_s5 + $0x2b8] ss:$12 sps:$4 sm:$0xff]  }
 0x265   :  { %14449 = vmatpush3.bf16.msra.mxu1 %v15536_v32  ;;  %v15587_v32 = vld [vmem:[%s21739_s5 + $0x4a0] ss:$12 sps:$4 sm:$0xff]  }
 0x266   :  { %4880 = vmatpush1.bf16.msra.mxu0 %v15533_v29  ;;  %14450 = vmatprep.subr.bf16.mxu1 %v15537_v12  ;;  %v15588_v12 = vld [vmem:[%s21739_s5 + $0x2a0] ss:$12 sps:$4 sm:$0xff]  }
 0x267   :  { %4881 = vmatprep.subr.bf16.mxu0 %v15540_v13  ;;  %v15590_v13 = vld [vmem:[%s21739_s5 + $0x2a4] ss:$12 sps:$4 sm:$0xff]  }
 0x269   :  { %14451 = vmatpush3.bf16.msra.mxu1 %v15541_v34  ;;  %v15594_v34 = vld [vmem:[%s21739_s5 + $0x40c] ss:$12 sps:$4 sm:$0xff]  }
 0x26a   :  { %4882 = vmatpush1.bf16.msra.mxu0 %v15538_v26  ;;  %14452 = vmatprep.subr.bf16.mxu1 %v15542_v25  ;;  %v15591_v26 = vld [vmem:[%s21739_s5 + $0x488] ss:$12 sps:$4 sm:$0xff]  }
 0x26b   :  { %4883 = vmatprep.subr.bf16.mxu0 %v15545_v56  ;;  %v15592_v25 = vld [vmem:[%s21739_s5 + $0x408] ss:$12 sps:$4 sm:$0xff]   ;;  %v15595_v56 = vld [vmem:[%s21739_s5 + $0x470] ss:$12 sps:$4 sm:$0xff]  }
 0x26d   :  { %14453 = vmatpush3.bf16.msra.mxu1 %v15546_v59  ;;  %v15599_v59 = vld [vmem:[%s21739_s5 + $0x458] ss:$12 sps:$4 sm:$0xff]  }
 0x26e   :  { %4884 = vmatpush1.bf16.msra.mxu0 %v15543_v17  ;;  %14454 = vmatprep.subr.bf16.mxu1 %v15547_v50  ;;  %v15598_v17 = vld [vmem:[%s21739_s5 + $0x3f4] ss:$12 sps:$4 sm:$0xff]   ;;  %v15602_v50 = vld [vmem:[%s21739_s5 + $0x3dc] ss:$12 sps:$4 sm:$0xff]  }
 0x26f   :  { %4885 = vmatprep.subr.bf16.mxu0 %v15550_v58  ;;  %v15600_v58 = vld [vmem:[%s21739_s5 + $0x3d8] ss:$12 sps:$4 sm:$0xff]  }
 0x271   :  { %14455 = vmatpush3.bf16.msra.mxu1 %v15551_v10  ;;  %v15606_v10 = vld [vmem:[%s21739_s5 + $0x3c4] ss:$12 sps:$4 sm:$0xff]  }
 0x272   :  { %4886 = vmatpush1.bf16.msra.mxu0 %v15548_v4  ;;  %4820 = vmatprep.subr.bf16.mxu1 %v15554_v0  ;;  %v15603_v4 = vld [vmem:[%s21739_s5 + $0x440] ss:$12 sps:$4 sm:$0xff]  }
 0x273   :  { %4895 = vmatprep.subr.bf16.mxu0 %v15557_v6  ;;  %v15604_v0 = vld [vmem:[%s21739_s5 + $0x3c0] ss:$12 sps:$4 sm:$0xff]   ;;  %v15607_v6 = vld [vmem:[%s21739_s5 + $0x428] ss:$12 sps:$4 sm:$0xff]  }
 0x274   :  { %4196 = vmatmul.mubr.bf16.vlgmr.msra.gmra.mxu1 %v18425_v62 }
 0x275   :  { %4203 = vmatprep.mubr.bf16.mxu1 %v18427_v39  ;;  %4821 = vmatpush1.bf16.msra.mxu1 %v15552_v24  ;;  %v15610_v24 = vld [vmem:[%s21739_s5 + $0x3ac] ss:$12 sps:$4 sm:$0xff]  }
 0x276   :  { %4896 = vmatpush2.bf16.msra.mxu0 %v15555_v16  ;;  %4822 = vmatprep.subr.bf16.mxu1 %v15560_v41  ;;  %v15608_v16 = vld [vmem:[%s21739_s5 + $0x3a8] ss:$12 sps:$4 sm:$0xff]   ;;  %v15611_v41 = vld [vmem:[%s21739_s5 + $0x530] ss:$12 sps:$4 sm:$0xff]  }
 0x277   :  { %4897 = vmatprep.subr.bf16.mxu0 %v15563_v35  ;;  %v15612_v35 = vld [vmem:[%s21739_s5 + $0x390] ss:$12 sps:$4 sm:$0xff]  }
 0x279   :  { %4823 = vmatpush1.bf16.msra.mxu1 %v15558_v9  ;;  %v18566_v45 = vpop.f32.mrf.mxu0  ;;  %v15614_v9 = vld [vmem:[%s21739_s5 + $0x394] ss:$12 sps:$4 sm:$0xff]  }
 0x27a   :  { %4898 = vmatpush2.bf16.msra.mxu0 %v15561_v37  ;;  %4824 = vmatprep.subr.bf16.mxu1 %v15566_v40  ;;  %v15615_v37 = vld [vmem:[%s21739_s5 + $0x518] ss:$12 sps:$4 sm:$0xff]   ;;  %v15618_v40 = vld [vmem:[%s21739_s5 + $0x37c] ss:$12 sps:$4 sm:$0xff]  }
 0x27b   :  { %4899 = vmatprep.subr.bf16.mxu0 %v15569_v30  ;;  %v18579_v48 = vpop.f32.mrf.mxu0  ;;  %v15619_v30 = vld [vmem:[%s21739_s5 + $0x500] ss:$12 sps:$4 sm:$0xff]  }
 0x27c   :  { %4204 = vmatmul.mubr.bf16.gmra.mxu1 %v18461_v1 }
 0x27d   :  { %4825 = vmatpush1.bf16.msra.mxu1 %v15564_v57  ;;  %4852 = vmatprep.mubr.bf16.mxu1 %v17901_v44  ;;  %v18584_v46 = vpop.f32.mrf.mxu0  ;;  %v15616_v57 = vld [vmem:[%s21739_s5 + $0x378] ss:$12 sps:$4 sm:$0xff]  }
 0x27e   :  { %4900 = vmatpush2.bf16.msra.mxu0 %v15567_v43  ;;  %4826 = vmatprep.subr.bf16.mxu1 %v15572_v53  ;;  %v15622_v43 = vld [vmem:[%s21739_s5 + $0x364] ss:$12 sps:$4 sm:$0xff]   ;;  %v15620_v53 = vld [vmem:[%s21739_s5 + $0x360] ss:$12 sps:$4 sm:$0xff]  }
 0x27f   :  { %4901 = vmatprep.subr.bf16.mxu0 %v15575_v14  ;;  %v18589_v18 = vpop.f32.mrf.mxu0  ;;  %v15624_v14 = vld [vmem:[%s21739_s5 + $0x410] ss:$12 sps:$4 sm:$0xff]  }
 0x281   :  { %4827 = vmatpush1.bf16.msra.mxu1 %v15570_v36  ;;  %v18595_v15 = vpop.f32.mrf.mxu0  ;;  %v15623_v36 = vld [vmem:[%s21739_s5 + $0x4e8] ss:$12 sps:$4 sm:$0xff]  }
 0x282   :  { %4902 = vmatpush2.bf16.msra.mxu0 %v15573_v5  ;;  %4828 = vmatprep.subr.bf16.mxu1 %v15578_v23  ;;  %v15627_v5 = vld [vmem:[%s21739_s5 + $0x22c] ss:$12 sps:$4 sm:$0xff]   ;;  %v15628_v23 = vld [vmem:[%s21739_s5 + $0x350] ss:$12 sps:$4 sm:$0xff]  }
 0x283   :  { %4970 = vmatprep.subr.bf16.mxu0 %v21754_v63  ;;  %v18607_v31 = vpop.f32.mrf.mxu0 }
 0x285   :  { %4904 = vmatmul.mubr.bf16.vlgmr.msra.gmra.mxu0 %v18119_v22  ;;  %4829 = vmatpush1.bf16.msra.mxu1 %v15576_v2  ;;  %v3457_v47 = vpop.f32.mrf.mxu0  ;;  %v15625_v2 = vld [vmem:[%s21739_s5 + $0x228] ss:$12 sps:$4 sm:$0xff]  }
 0x286   :  { %12846 = vmatprep.mubr.msk.bf16.mxu0 %vm2307_vm8, %v18133_v42  ;;  %4971 = vmatpush1.bf16.msra.mxu0 %v15579_v8  ;;  %v15629_v8 = vld [vmem:[%s21739_s5 + $0x3f8] ss:$12 sps:$4 sm:$0xff]  }
 0x287   :  { %4830 = vmatprep.subr.bf16.mxu1 %v15582_v3  ;;  %4972 = vmatprep.subr.bf16.mxu0 %v21754_v63  ;;  %v3458_v29 = vpop.f32.mrf.mxu0 }
 0x288   :  { %v15630_v29 = vld [vmem:[%s21739_s5 + $0x210] ss:$12 sps:$4 sm:$0xff]  }
 0x289   :  { %4831 = vmatpush1.bf16.msra.mxu1 %v15580_v27  ;;  %v15632_v27 = vld [vmem:[%s21739_s5 + $0x214] ss:$12 sps:$4 sm:$0xff]  }
 0x28a   :  { %4973 = vmatpush1.bf16.msra.mxu0 %v15583_v55  ;;  %4832 = vmatprep.subr.bf16.mxu1 %v15586_v49 }
 0x28b   :  { %4974 = vmatprep.subr.bf16.mxu0 %v21754_v63 }
 0x28d   :  { %4914 = vmatmul.mubr.bf16.gmra.mxu0 %v18163_v61  ;;  %4833 = vmatpush1.bf16.msra.mxu1 %v15584_v28 }
 0x28e   :  { %4975 = vmatpush1.bf16.msra.mxu0 %v15587_v32  ;;  %12847 = vmatprep.mubr.msk.bf16.mxu0 %vm2307_vm8, %v18110_v20  ;;  %v15596_v20 = vld [vmem:[%s21739_s5 + $0x3f0] ss:$12 sps:$4 sm:$0xff]   ;;  %v15633_v32 = vld [vmem:[%s21739_s5 + $0x338] ss:$12 sps:$4 sm:$0xff]  }
 0x28f   :  { %4834 = vmatprep.subr.bf16.mxu1 %v15590_v13  ;;  %4976 = vmatprep.subr.bf16.mxu0 %v21754_v63 }
 0x291   :  { %4835 = vmatpush1.bf16.msra.mxu1 %v15588_v12  ;;  %v15637_v12 = vld [vmem:[%s21739_s5 + $0x1fc] ss:$12 sps:$4 sm:$0xff]  }
 0x292   :  { %4977 = vmatpush1.bf16.msra.mxu0 %v15591_v26  ;;  %4836 = vmatprep.subr.bf16.mxu1 %v15594_v34 }
 0x293   :  { %4978 = vmatprep.subr.bf16.mxu0 %v21754_v63 }
 0x295   :  { %4837 = vmatpush2.bf16.msra.mxu1 %v15592_v25  ;;  %v15635_v25 = vld [vmem:[%s21739_s5 + $0x1f8] ss:$12 sps:$4 sm:$0xff]  }
 0x296   :  { %4979 = vmatpush1.bf16.msra.mxu0 %v15595_v56  ;;  %4838 = vmatprep.subr.bf16.mxu1 %v15598_v17  ;;  %v15638_v56 = vld [vmem:[%s21739_s5 + $0x320] ss:$12 sps:$4 sm:$0xff]   ;;  %v15639_v17 = vld [vmem:[%s21739_s5 + $0x3c8] ss:$12 sps:$4 sm:$0xff]  }
 0x297   :  { %4980 = vmatprep.subr.bf16.mxu0 %v21754_v63 }
 0x299   :  { %4839 = vmatpush2.bf16.msra.mxu1 %v15596_v20 }
 0x29a   :  { %4981 = vmatpush1.bf16.msra.mxu0 %v15599_v59  ;;  %4840 = vmatprep.subr.bf16.mxu1 %v15602_v50 }
 0x29b   :  { %4982 = vmatprep.subr.bf16.mxu0 %v21754_v63 }
 0x29d   :  { %4841 = vmatpush2.bf16.msra.mxu1 %v15600_v58 }
 0x29e   :  { %4983 = vmatpush1.bf16.msra.mxu0 %v15603_v4  ;;  %4842 = vmatprep.subr.bf16.mxu1 %v15606_v10  ;;  %v15640_v10 = vld [vmem:[%s21739_s5 + $0x1e0] ss:$12 sps:$4 sm:$0xff]  }
 0x29f   :  { %4984 = vmatprep.subr.bf16.mxu0 %v21754_v63 }
 0x2a1   :  { %4843 = vmatpush2.bf16.msra.mxu1 %v15604_v0  ;;  %v15643_v0 = vld [vmem:[%s21739_s5 + $0x308] ss:$12 sps:$4 sm:$0xff]  }
 0x2a2   :  { %4985 = vmatpush1.bf16.msra.mxu0 %v15607_v6  ;;  %4844 = vmatprep.subr.bf16.mxu1 %v15610_v24 }
 0x2a3   :  { %4994 = vmatprep.subr.bf16.mxu0 %v21754_v63 }
 0x2a5   :  { %4845 = vmatpush2.bf16.msra.mxu1 %v15608_v16 }
 0x2a6   :  { %4995 = vmatpush2.bf16.msra.mxu0 %v15611_v41  ;;  %4846 = vmatprep.subr.bf16.mxu1 %v15614_v9  ;;  %v15648_v9 = vld [vmem:[%s21739_s5 + $0x2f0] ss:$12 sps:$4 sm:$0xff]  }
 0x2a7   :  { %4996 = vmatprep.subr.bf16.mxu0 %v21754_v63 }
 0x2a9   :  { %4847 = vmatpush2.bf16.msra.mxu1 %v15612_v35  ;;  %v15649_v35 = vld [vmem:[%s21739_s5 + $0x398] ss:$12 sps:$4 sm:$0xff]  }
 0x2aa   :  { %4997 = vmatpush2.bf16.msra.mxu0 %v15615_v37  ;;  %4848 = vmatprep.subr.bf16.mxu1 %v15618_v40  ;;  %v15652_v37 = vld [vmem:[%s21739_s5 + $0x1b4] ss:$12 sps:$4 sm:$0xff]   ;;  %v15650_v40 = vld [vmem:[%s21739_s5 + $0x1b0] ss:$12 sps:$4 sm:$0xff]  }
 0x2ab   :  { %4998 = vmatprep.subr.bf16.mxu0 %v21754_v63 }
 0x2ad   :  { %4849 = vmatpush2.bf16.msra.mxu1 %v15616_v57  ;;  %v15653_v57 = vld [vmem:[%s21739_s5 + $0x2d8] ss:$12 sps:$4 sm:$0xff]  }
 0x2ae   :  { %4999 = vmatpush2.bf16.msra.mxu0 %v15619_v30  ;;  %4850 = vmatprep.subr.bf16.mxu1 %v15622_v43  ;;  %v15654_v30 = vld [vmem:[%s21739_s5 + $0x380] ss:$12 sps:$4 sm:$0xff]   ;;  %v15657_v43 = vld [vmem:[%s21739_s5 + $0x19c] ss:$12 sps:$4 sm:$0xff]  }
 0x2af   :  { %5000 = vmatprep.subr.bf16.mxu0 %v21754_v63 }
 0x2b1   :  { %4851 = vmatpush2.bf16.msra.mxu1 %v15620_v53  ;;  %v15655_v53 = vld [vmem:[%s21739_s5 + $0x198] ss:$12 sps:$4 sm:$0xff]  }
 0x2b2   :  { %5001 = vmatpush2.bf16.msra.mxu0 %v15623_v36  ;;  %14468 = vmatprep.subr.bf16.mxu1 %v15624_v14  ;;  %v15658_v36 = vld [vmem:[%s21739_s5 + $0x2c0] ss:$12 sps:$4 sm:$0xff]   ;;  %v15659_v14 = vld [vmem:[%s21739_s5 + $0x368] ss:$12 sps:$4 sm:$0xff]  }
 0x2b3   :  { %5517 = vmatprep.subr.bf16.mxu0 %v15627_v5  ;;  %v3494_v3 = vpop.f32.mrf.mxu1  ;;  %v18733_v55 = vpop.f32.mrf.mxu0  ;;  %v15662_v5 = vld [vmem:[%s21739_s5 + $0x184] ss:$12 sps:$4 sm:$0xff]  }
 0x2b4   :  { %4853 = vmatmul.mubr.bf16.vlgmr.msra.gmra.mxu1 %v17907_v11  ;;  %v18737_v49 = vadd.f32 %v3494_v3, %v18566_v45  ;;  %v15664_v3 = vld [vmem:[%s21739_s5 + $0xa8] ss:$12 sps:$4 sm:$0xff]  }
 0x2b5   :  { %5003 = vmatmul.mubr.bf16.vlgmr.msra.gmra.mxu0 %v18119_v22  ;;  %4862 = vmatprep.mubr.bf16.mxu1 %v17910_v19  ;;  %v3496_v47 = vpop.f32.mrf.mxu1  ;;  %v3595_v28 = vpop.f32.mrf.mxu0  ;;  %v15634_v22 = vld [vmem:[%s21739_s5 + $0x3e0] ss:$12 sps:$4 sm:$0xff]  }
 0x2b6   :  { %14469 = vmatpush3.bf16.msra.mxu1 %v15628_v23  ;;  %12848 = vmatprep.mubr.msk.bf16.mxu0 %vm2307_vm8, %v18133_v42  ;;  %v18750_v45 = vadd.f32 %v3496_v47, %v18579_v48  ;;  %v15660_v23 = vld [vmem:[%s21739_s5 + $0x180] ss:$12 sps:$4 sm:$0xff]   ;;  %v15667_v47 = vld [vmem:[%s21739_s5 + $0x288] ss:$12 sps:$4 sm:$0xff]  }
 0x2b7   :  { %5518 = vmatpush1.bf16.msra.mxu0 %v15625_v2  ;;  %14470 = vmatprep.subr.bf16.mxu1 %v15629_v8  ;;  %v3498_v13 = vpop.f32.mrf.mxu1  ;;  %v18758_v26 = vpop.f32.mrf.mxu0  ;;  %v15663_v2 = vld [vmem:[%s21739_s5 + $0x2a8] ss:$12 sps:$4 sm:$0xff]   ;;  %v15666_v8 = vld [vmem:[%s21739_s5 + $0xac] ss:$12 sps:$4 sm:$0xff]  }
 0x2b8   :  { %5519 = vmatprep.subr.bf16.mxu0 %v15632_v27  ;;  %v18761_v34 = vadd.f32 %v3498_v13, %v18584_v46  ;;  %v15642_v46 = vld [vmem:[%s21739_s5 + $0x1e4] ss:$12 sps:$4 sm:$0xff]   ;;  %v15669_v27 = vld [vmem:[%s21739_s5 + $0x28c] ss:$12 sps:$4 sm:$0xff]   ;;  %v15672_v28 = vld [vmem:[%s21739_s5 + $0x94] ss:$12 sps:$4 sm:$0xff]  }
 0x2b9   :  { %v18763_v42 = vpop.f32.mrf.mxu1  ;;  %v3598_v48 = vpop.f32.mrf.mxu0  ;;  %v15673_v13 = vld [vmem:[%s21739_s5 + $0x270] ss:$12 sps:$4 sm:$0xff]  }
 0x2ba   :  { %14471 = vmatpush3.bf16.msra.mxu1 %v15633_v32  ;;  %v15670_v32 = vld [vmem:[%s21739_s5 + $0x90] ss:$12 sps:$4 sm:$0xff]  }
 0x2bb   :  { %5520 = vmatpush1.bf16.msra.mxu0 %v15630_v29  ;;  %14472 = vmatprep.subr.bf16.mxu1 %v15634_v22  ;;  %v3504_v20 = vpop.f32.mrf.mxu1  ;;  %v18777_v59 = vpop.f32.mrf.mxu0  ;;  %v15675_v22 = vld [vmem:[%s21739_s5 + $0x274] ss:$12 sps:$4 sm:$0xff]  }
 0x2bc   :  { %4863 = vmatmul.mubr.bf16.gmra.mxu1 %v17933_v60  ;;  %5521 = vmatprep.subr.bf16.mxu0 %v15637_v12  ;;  %v18781_v50 = vadd.f32 %v3504_v20, %v18595_v15  ;;  %v15679_v20 = vld [vmem:[%s21739_s5 + $0x258] ss:$12 sps:$4 sm:$0xff]  }
 0x2bd   :  { %5011 = vmatmul.mubr.bf16.gmra.mxu0 %v18163_v61  ;;  %4954 = vmatprep.mubr.bf16.mxu1 %v17901_v44  ;;  %v3506_v58 = vpop.f32.mrf.mxu1  ;;  %v3603_v4 = vpop.f32.mrf.mxu0  ;;  %v15644_v44 = vld [vmem:[%s21739_s5 + $0x3b0] ss:$12 sps:$4 sm:$0xff]   ;;  %v15647_v61 = vld [vmem:[%s21739_s5 + $0x1cc] ss:$12 sps:$4 sm:$0xff]  }
 0x2be   :  { %14473 = vmatpush3.bf16.msra.mxu1 %v15638_v56  ;;  %12933 = vmatprep.mubr.msk.bf16.mxu0 %vm2307_vm8, %v18167_v54  ;;  %v18794_v15 = vadd.f32 %v3506_v58, %v18607_v31  ;;  %v15645_v31 = vld [vmem:[%s21739_s5 + $0x1c8] ss:$12 sps:$4 sm:$0xff]  }
 0x2bf   :  { %5522 = vmatpush1.bf16.msra.mxu0 %v15635_v25  ;;  %14474 = vmatprep.subr.bf16.mxu1 %v15639_v17  ;;  %v3508_v6 = vpop.f32.mrf.mxu1  ;;  %v3604_v24 = vpop.f32.mrf.mxu0  ;;  %v15678_v25 = vld [vmem:[%s21739_s5 + $0x7c] ss:$12 sps:$4 sm:$0xff]  }
 0x2c0   :  { %5523 = vmatprep.subr.bf16.mxu0 %v15642_v46  ;;  %v15685_v6 = vld [vmem:[%s21739_s5 + $0x240] ss:$12 sps:$4 sm:$0xff]  }
 0x2c1   :  { %v3509_v16 = vpop.f32.mrf.mxu1  ;;  %v3605_v41 = vpop.f32.mrf.mxu0  ;;  %v15690_v24 = vld [vmem:[%s21739_s5 + $0x4c] ss:$12 sps:$4 sm:$0xff]  }
 0x2c2   :  { %14475 = vmatpush3.bf16.msra.mxu1 %v15643_v0  ;;  %v15682_v0 = vld [vmem:[%s21739_s5 + $0x60] ss:$12 sps:$4 sm:$0xff]  }
 0x2c3   :  { %5524 = vmatpush1.bf16.msra.mxu0 %v15640_v10  ;;  %14476 = vmatprep.subr.bf16.mxu1 %v15644_v44  ;;  %v15687_v44 = vld [vmem:[%s21739_s5 + $0x244] ss:$12 sps:$4 sm:$0xff]  }
 0x2c4   :  { %5525 = vmatprep.subr.bf16.mxu0 %v15647_v61 }
 0x2c6   :  { %14477 = vmatpush3.bf16.msra.mxu1 %v15648_v9  ;;  %v15691_v9 = vld [vmem:[%s21739_s5 + $0x230] ss:$12 sps:$4 sm:$0xff]  }
 0x2c7   :  { %5526 = vmatpush1.bf16.msra.mxu0 %v15645_v31  ;;  %14478 = vmatprep.subr.bf16.mxu1 %v15649_v35 }
 0x2c8   :  { %5527 = vmatprep.subr.bf16.mxu0 %v15652_v37  ;;  %v15694_v37 = vld [vmem:[%s21739_s5 + $0x34] ss:$12 sps:$4 sm:$0xff]  }
 0x2ca   :  { %14479 = vmatpush3.bf16.msra.mxu1 %v15653_v57 }
 0x2cb   :  { %5528 = vmatpush1.bf16.msra.mxu0 %v15650_v40  ;;  %14480 = vmatprep.subr.bf16.mxu1 %v15654_v30  ;;  %v15695_v40 = vld [vmem:[%s21739_s5 + $0x218] ss:$12 sps:$4 sm:$0xff]   ;;  %v15698_v30 = vld [vmem:[%s21739_s5 + $0x1c] ss:$12 sps:$4 sm:$0xff]  }
 0x2cc   :  { %5529 = vmatprep.subr.bf16.mxu0 %v15657_v43 }
 0x2ce   :  { %14481 = vmatpush3.bf16.msra.mxu1 %v15658_v36 }
 0x2cf   :  { %5530 = vmatpush1.bf16.msra.mxu0 %v15655_v53  ;;  %14482 = vmatprep.subr.bf16.mxu1 %v15659_v14  ;;  %v15696_v53 = vld [vmem:[%s21739_s5 + $0x18] ss:$12 sps:$4 sm:$0xff]   ;;  %v15699_v14 = vld [vmem:[%s21739_s5 + $0x200] ss:$12 sps:$4 sm:$0xff]  }
 0x2d0   :  { %5531 = vmatprep.subr.bf16.mxu0 %v15662_v5 }
 0x2d2   :  { %14483 = vmatpush3.bf16.msra.mxu1 %v15663_v2  ;;  %v15702_v2 = vld [vmem:[%s21739_s5 + $0x4] ss:$12 sps:$4 sm:$0xff]  }
 0x2d3   :  { %5532 = vmatpush1.bf16.msra.mxu0 %v15660_v23  ;;  %v14428_v29 = vpop.f32.mrf.mxu1  ;;  %5466 = vmatprep.subr.bf16.mxu1 %v15666_v8  ;;  %v15700_v23 = vld [vmem:[%s21739_s5] ss:$12 sps:$4 sm:$0xff]   ;;  %v15703_v8 = vld [vmem:[%s21739_s5 + $0x1e8] ss:$12 sps:$4 sm:$0xff]  }
 0x2d4   :  { %5541 = vmatprep.subr.bf16.mxu0 %v15669_v27 }
 0x2d5   :  { %4955 = vmatmul.mubr.bf16.vlgmr.msra.gmra.mxu1 %v17907_v11  ;;  %v14429_v12 = vpop.f32.mrf.mxu1  ;;  %v15676_v11 = vld [vmem:[%s21739_s5 + $0x78] ss:$12 sps:$4 sm:$0xff]  }
 0x2d6   :  { %4962 = vmatprep.mubr.bf16.mxu1 %v17910_v19  ;;  %5467 = vmatpush1.bf16.msra.mxu1 %v15664_v3  ;;  %v14430_v48 = vadd.f32 %v14429_v12, %v14428_v29  ;;  %v15681_v19 = vld [vmem:[%s21739_s5 + $0x25c] ss:$12 sps:$4 sm:$0xff]   ;;  %v15706_v3 = vld [vmem:[%s21739_s5 + $0x16c] ss:$12 sps:$4 sm:$0xff]  }
 0x2d7   :  { %5542 = vmatpush2.bf16.msra.mxu0 %v15667_v47  ;;  %v14431_v56 = vpop.f32.mrf.mxu1  ;;  %5468 = vmatprep.subr.bf16.mxu1 %v15672_v28  ;;  %v15704_v28 = vld [vmem:[%s21739_s5 + $0x168] ss:$12 sps:$4 sm:$0xff]   ;;  %v15707_v29 = vld [vmem:[%s21739_s5 + $0x1d0] ss:$12 sps:$4 sm:$0xff]   ;;  %v15711_v12 = vld [vmem:[%s21739_s5 + $0x1b8] ss:$12 sps:$4 sm:$0xff]  }
 0x2d8   :  { %v18874_v17 = vadd.f32 %v14430_v48, %v18733_v55  ;;  %5543 = vmatprep.subr.bf16.mxu0 %v15675_v22  ;;  %v15684_v55 = vld [vmem:[%s21739_s5 + $0x64] ss:$12 sps:$4 sm:$0xff]   ;;  %v15710_v22 = vld [vmem:[%s21739_s5 + $0x154] ss:$12 sps:$4 sm:$0xff]  }
 0x2d9   :  { %v14432_v46 = vpop.f32.mrf.mxu1  ;;  %v15712_v48 = vld [vmem:[%s21739_s5 + $0x138] ss:$12 sps:$4 sm:$0xff]  }
 0x2da   :  { %5469 = vmatpush1.bf16.msra.mxu1 %v15670_v32  ;;  %v14433_v58 = vadd.f32 %v14432_v46, %v14431_v56  ;;  %v15718_v56 = vld [vmem:[%s21739_s5 + $0x124] ss:$12 sps:$4 sm:$0xff]   ;;  %v15722_v46 = vld [vmem:[%s21739_s5 + $0x10c] ss:$12 sps:$4 sm:$0xff]  }
 0x2db   :  { %5544 = vmatpush2.bf16.msra.mxu0 %v15673_v13  ;;  %v14434_v4 = vpop.f32.mrf.mxu1  ;;  %5470 = vmatprep.subr.bf16.mxu1 %v15678_v25  ;;  %v15714_v13 = vld [vmem:[%s21739_s5 + $0x13c] ss:$12 sps:$4 sm:$0xff]   ;;  %v15715_v25 = vld [vmem:[%s21739_s5 + $0x1a0] ss:$12 sps:$4 sm:$0xff]  }
 0x2dc   :  { %v18889_v10 = vadd.f32 %v14433_v58, %v18758_v26  ;;  %5545 = vmatprep.subr.bf16.mxu0 %v15681_v19  ;;  %v15719_v19 = vld [vmem:[%s21739_s5 + $0x188] ss:$12 sps:$4 sm:$0xff]   ;;  %v15723_v58 = vld [vmem:[%s21739_s5 + $0x290] ss:$12 sps:$4 sm:$0xff]  }
 0x2dd   :  { %4963 = vmatmul.mubr.bf16.gmra.mxu1 %v17933_v60  ;;  %v14435_v61 = vpop.f32.mrf.mxu1  ;;  %v15688_v60 = vld [vmem:[%s21739_s5 + $0x48] ss:$12 sps:$4 sm:$0xff]  }
 0x2de   :  { %5471 = vmatpush1.bf16.msra.mxu1 %v15676_v11  ;;  %5498 = vmatprep.mubr.bf16.mxu1 %v18267_v7  ;;  %v14436_v26 = vadd.f32 %v14435_v61, %v14434_v4  ;;  %v15716_v11 = vld [vmem:[%s21739_s5 + $0x120] ss:$12 sps:$4 sm:$0xff]   ;;  %v15724_v4 = vld [vmem:[%s21739_s5 + $0xf0] ss:$12 sps:$4 sm:$0xff]   ;;  %v15728_v61 = vld [vmem:[%s21739_s5 + $0xd8] ss:$12 sps:$4 sm:$0xff]  }
 0x2df   :  { %5546 = vmatpush2.bf16.msra.mxu0 %v15679_v20  ;;  %v14437_v16 = vpop.f32.mrf.mxu1  ;;  %5472 = vmatprep.subr.bf16.mxu1 %v15684_v55  ;;  %v15720_v20 = vld [vmem:[%s21739_s5 + $0x108] ss:$12 sps:$4 sm:$0xff]  }
 0x2e0   :  { %v18906_v41 = vadd.f32 %v14436_v26, %v18777_v59  ;;  %5547 = vmatprep.subr.bf16.mxu0 %v15687_v44  ;;  %v15692_v59 = vld [vmem:[%s21739_s5 + $0x30] ss:$12 sps:$4 sm:$0xff]   ;;  %v15726_v55 = vld [vmem:[%s21739_s5 + $0xf4] ss:$12 sps:$4 sm:$0xff]  }
 0x2e1   :  { %v14438_v31 = vpop.f32.mrf.mxu1  ;;  %v15730_v44 = vld [vmem:[%s21739_s5 + $0xdc] ss:$12 sps:$4 sm:$0xff]   ;;  %v15734_v26 = vld [vmem:[%s21739_s5 + $0xc4] ss:$12 sps:$4 sm:$0xff]  }
 0x2e2   :  { %5473 = vmatpush1.bf16.msra.mxu1 %v15682_v0  ;;  %v15727_v0 = vld [vmem:[%s21739_s5 + $0x278] ss:$12 sps:$4 sm:$0xff]   ;;  %v15735_v16 = vld [vmem:[%s21739_s5 + $0x248] ss:$12 sps:$4 sm:$0xff]  }
 0x2e3   :  { %5548 = vmatpush2.bf16.msra.mxu0 %v15685_v6  ;;  %5474 = vmatprep.subr.bf16.mxu1 %v15690_v24  ;;  %v15731_v6 = vld [vmem:[%s21739_s5 + $0x260] ss:$12 sps:$4 sm:$0xff]  }
 0x2e4   :  { %v18914_v35 = vpop.f32.mrf.mxu0  ;;  %5616 = vmatprep.subr.bf16.mxu0 %v21754_v63  ;;  %v15732_v24 = vld [vmem:[%s21739_s5 + $0xc0] ss:$12 sps:$4 sm:$0xff]  }
 0x2e5   :  { %v15739_v31 = vld [vmem:[%s21738_s4 + $0x76c] ss:$12 sps:$4 sm:$0xff]  }
 0x2e6   :  { %5550 = vmatmul.mubr.bf16.vlgmr.msra.gmra.mxu0 %v18290_v21  ;;  %5475 = vmatpush1.bf16.msra.mxu1 %v15688_v60  ;;  %v18927_v57 = vpop.f32.mrf.mxu0  ;;  %v15736_v60 = vld [vmem:[%s21739_s5 + $0x170] ss:$12 sps:$4 sm:$0xff]  }
 0x2e7   :  { %12934 = vmatprep.mubr.msk.bf16.mxu0 %vm2307_vm8, %v18299_v33  ;;  %5617 = vmatpush1.bf16.msra.mxu0 %v15691_v9  ;;  %v15740_v9 = vld [vmem:[%s21739_s5 + $0xb0] ss:$12 sps:$4 sm:$0xff]  }
 0x2e8   :  { %v18934_v43 = vpop.f32.mrf.mxu0  ;;  %5476 = vmatprep.subr.bf16.mxu1 %v15694_v37  ;;  %5618 = vmatprep.subr.bf16.mxu0 %v21754_v63  ;;  %v15741_v37 = vld [vmem:[%s21739_s5 + $0x158] ss:$12 sps:$4 sm:$0xff]  }
 0x2ea   :  { %5477 = vmatpush1.bf16.msra.mxu1 %v15692_v59  ;;  %v18940_v36 = vpop.f32.mrf.mxu0  ;;  %v15737_v59 = vld [vmem:[%s21738_s4 + $0x768] ss:$12 sps:$4 sm:$0xff]  }
 0x2eb   :  { %5619 = vmatpush1.bf16.msra.mxu0 %v15695_v40  ;;  %5478 = vmatprep.subr.bf16.mxu1 %v15698_v30 }
 0x2ec   :  { %v18945_v5 = vpop.f32.mrf.mxu0  ;;  %5620 = vmatprep.subr.bf16.mxu0 %v21754_v63 }
 0x2ee   :  { %5560 = vmatmul.mubr.bf16.gmra.mxu0 %v18317_v51  ;;  %5479 = vmatpush1.bf16.msra.mxu1 %v15696_v53  ;;  %v18958_v27 = vpop.f32.mrf.mxu0 }
 0x2ef   :  { %5621 = vmatpush1.bf16.msra.mxu0 %v15699_v14  ;;  %12935 = vmatprep.mubr.msk.bf16.mxu0 %vm2307_vm8, %v18167_v54  ;;  %v15708_v54 = vld [vmem:[%s21739_s5 + $0x150] ss:$12 sps:$4 sm:$0xff]  }
 0x2f0   :  { %v4160_v47 = vpop.f32.mrf.mxu0  ;;  %5480 = vmatprep.subr.bf16.mxu1 %v15702_v2  ;;  %5622 = vmatprep.subr.bf16.mxu0 %v21754_v63 }
 0x2f2   :  { %5481 = vmatpush1.bf16.msra.mxu1 %v15700_v23  ;;  %v4161_v32 = vpop.f32.mrf.mxu0 }
 0x2f3   :  { %5623 = vmatpush1.bf16.msra.mxu0 %v15703_v8  ;;  %5482 = vmatprep.subr.bf16.mxu1 %v15706_v3 }
 0x2f4   :  { %5624 = vmatprep.subr.bf16.mxu0 %v21754_v63 }
 0x2f6   :  { %5483 = vmatpush2.bf16.msra.mxu1 %v15704_v28 }
 0x2f7   :  { %5625 = vmatpush1.bf16.msra.mxu0 %v15707_v29  ;;  %5484 = vmatprep.subr.bf16.mxu1 %v15710_v22 }
 0x2f8   :  { %5626 = vmatprep.subr.bf16.mxu0 %v21754_v63 }
 0x2fa   :  { %5485 = vmatpush2.bf16.msra.mxu1 %v15708_v54 }
 0x2fb   :  { %5627 = vmatpush1.bf16.msra.mxu0 %v15711_v12  ;;  %5486 = vmatprep.subr.bf16.mxu1 %v15714_v13 }
 0x2fc   :  { %5628 = vmatprep.subr.bf16.mxu0 %v21754_v63 }
 0x2fe   :  { %5487 = vmatpush2.bf16.msra.mxu1 %v15712_v48 }
 0x2ff   :  { %5629 = vmatpush1.bf16.msra.mxu0 %v15715_v25  ;;  %5488 = vmatprep.subr.bf16.mxu1 %v15718_v56 }
 0x300   :  { %5630 = vmatprep.subr.bf16.mxu0 %v21754_v63 }
 0x302   :  { %5489 = vmatpush2.bf16.msra.mxu1 %v15716_v11 }
 0x303   :  { %5631 = vmatpush1.bf16.msra.mxu0 %v15719_v19  ;;  %5490 = vmatprep.subr.bf16.mxu1 %v15722_v46 }
 0x304   :  { %5640 = vmatprep.subr.bf16.mxu0 %v21754_v63 }
 0x306   :  { %5491 = vmatpush2.bf16.msra.mxu1 %v15720_v20 }
 0x307   :  { %5641 = vmatpush2.bf16.msra.mxu0 %v15723_v58  ;;  %5492 = vmatprep.subr.bf16.mxu1 %v15726_v55 }
 0x308   :  { %5642 = vmatprep.subr.bf16.mxu0 %v21754_v63 }
 0x30a   :  { %5493 = vmatpush2.bf16.msra.mxu1 %v15724_v4 }
 0x30b   :  { %5643 = vmatpush2.bf16.msra.mxu0 %v15727_v0  ;;  %5494 = vmatprep.subr.bf16.mxu1 %v15730_v44 }
 0x30c   :  { %5644 = vmatprep.subr.bf16.mxu0 %v21754_v63 }
 0x30e   :  { %5495 = vmatpush2.bf16.msra.mxu1 %v15728_v61 }
 0x30f   :  { %5645 = vmatpush2.bf16.msra.mxu0 %v15731_v6  ;;  %5496 = vmatprep.subr.bf16.mxu1 %v15734_v26 }
 0x310   :  { %5646 = vmatprep.subr.bf16.mxu0 %v21754_v63 }
 0x312   :  { %5497 = vmatpush2.bf16.msra.mxu1 %v15732_v24 }
 0x313   :  { %5647 = vmatpush2.bf16.msra.mxu0 %v15735_v16  ;;  %v4095_v40 = vpop.f32.mrf.mxu1  ;;  %14496 = vmatprep.subr.bf16.mxu1 %v15736_v60 }
 0x314   :  { %v4096_v30 = vadd.f32 %v4095_v40, %v18737_v49  ;;  %v19059_v53 = vpop.f32.mrf.mxu0  ;;  %6302 = vmatprep.subr.bf16.mxu0 %v15739_v31 }
 0x315   :  { %16 = vsyncpa [#allocation5], 0  ;;  %5499 = vmatmul.mubr.bf16.vlgmr.msra.gmra.mxu1 %v18425_v62  ;;  %v4097_v14 = vpop.f32.mrf.mxu1  ;;  %v15744_v23 = vld [vmem:[%s21738_s4 + $0x754] ss:$12 sps:$4 sm:$0xff]   ;;  %v15745_v47 = vld [vmem:[%s21739_s5 + $0x98] ss:$12 sps:$4 sm:$0xff]  }
 0x316   :  { %v19066_v2 = vadd.f32 %v18914_v35, %v4096_v30  ;;  %5649 = vmatmul.mubr.bf16.vlgmr.msra.gmra.mxu0 %v18290_v21  ;;  %5508 = vmatprep.mubr.bf16.mxu1 %v18427_v39  ;;  %v4098_v49 = vadd.f32 %v4097_v14, %v18750_v45  ;;  %v4247_v8 = vpop.f32.mrf.mxu0  ;;  %v15742_v45 = vld [vmem:[%s21738_s4 + $0x750] ss:$12 sps:$4 sm:$0xff]   ;;  %v15750_v12 = vld [vmem:[%s21739_s5 + $0x80] ss:$12 sps:$4 sm:$0xff]   ;;  %v15747_v25 = vld [vmem:[%s21738_s4 + $0x738] ss:$12 sps:$4 sm:$0xff]  }
 0x317   :  { %14497 = vmatpush3.bf16.msra.mxu1 %v15740_v9  ;;  %12936 = vmatprep.mubr.msk.bf16.mxu0 %vm2307_vm8, %v18299_v33  ;;  %v4099_v3 = vpop.f32.mrf.mxu1  ;;  %v15746_v33 = vld [vmem:[%s21739_s5 + $0x140] ss:$12 sps:$4 sm:$0xff]   ;;  %v5671_v22 = vld [vmem:[#allocation2 + $0xf8] sm:$0xff]  ;;  %v15751_v56 = vld [vmem:[%s21739_s5 + $0x128] ss:$12 sps:$4 sm:$0xff]   ;;  %vm16577_vm12 = vmmov 0  }
 0x318   :  { %6303 = vmatpush1.bf16.msra.mxu0 %v15737_v59  ;;  %v19077_v35 = vadd.f32 %v18927_v57, %v4098_v49  ;;  %v4100_v21 = vadd.f32 %v4099_v3, %v18761_v34  ;;  %v19080_v28 = vpop.f32.mrf.mxu0  ;;  %14498 = vmatprep.subr.bf16.mxu1 %v15741_v37  ;;  %v15749_v57 = vld [vmem:[%s21738_s4 + $0x73c] ss:$12 sps:$4 sm:$0xff]   ;;  %v15759_v44 = vld [vmem:[%s21738_s4 + $0x70c] ss:$12 sps:$4 sm:$0xff]   ;;  %v15764_v24 = vld [vmem:[%s21738_s4 + $0x6f4] ss:$12 sps:$4 sm:$0xff]  }
 0x319   :  { %6304 = vmatprep.subr.bf16.mxu0 %v15744_v23  ;;  %v19088_v29 = vpop.f32.mrf.mxu1  ;;  %v15755_v4 = vld [vmem:[%s21739_s5 + $0x68] ss:$12 sps:$4 sm:$0xff]   ;;  %v15761_v26 = vld [vmem:[%s21739_s5 + $0xf8] ss:$12 sps:$4 sm:$0xff]   ;;  %v15762_v60 = vld [vmem:[%s21738_s4 + $0x6f0] ss:$12 sps:$4 sm:$0xff]  }
 0x31a   :  { %v19094_v34 = vadd.f32 %v18934_v43, %v4100_v21  ;;  %v4250_v32 = vpop.f32.mrf.mxu0  ;;  %v5667_v43 = vld [vmem:[#allocation2 + $0xd8] sm:$0xff]  ;;  %v15757_v6 = vld [vmem:[%s21738_s4 + $0x708] ss:$12 sps:$4 sm:$0xff]   ;;  %v15766_v31 = vld [vmem:[%s21739_s5 + $0xe0] ss:$12 sps:$4 sm:$0xff]   ;;  %vm12057_vm14 = vcmask 74752  }
 0x31b   :  { %14499 = vmatpush3.bf16.msra.mxu1 %v15745_v47  ;;  %v4105_v54 = vpop.f32.mrf.mxu1  ;;  %v19109_v11 = vpack.c.bf16 %v5671_v22, %v5667_v43  ;;  %v15765_v16 = vld [vmem:[%s21739_s5 + $0x38] ss:$12 sps:$4 sm:$0xff]   ;;  %v15769_v9 = vld [vmem:[%s21738_s4 + $0x6dc] ss:$12 sps:$4 sm:$0xff]   ;;  %v15770_v59 = vld [vmem:[%s21739_s5 + $0x20] ss:$12 sps:$4 sm:$0xff]  }
 0x31c   :  { %6305 = vmatpush1.bf16.msra.mxu0 %v15742_v45  ;;  %v4106_v13 = vadd.f32 %v4105_v54, %v18781_v50  ;;  %v19100_v48 = vpop.f32.mrf.mxu0  ;;  %14500 = vmatprep.subr.bf16.mxu1 %v15746_v33  ;;  %v15754_v50 = vld [vmem:[%s21738_s4 + $0x724] ss:$12 sps:$4 sm:$0xff]   ;;  %v15771_v40 = vld [vmem:[%s21739_s5 + $0xc8] ss:$12 sps:$4 sm:$0xff]   ;;  %v15772_v23 = vld [vmem:[%s21738_s4 + $0x6c0] ss:$12 sps:$4 sm:$0xff]  }
 0x31d   :  { %5509 = vmatmul.mubr.bf16.gmra.mxu1 %v18461_v1  ;;  %6306 = vmatprep.subr.bf16.mxu0 %v15749_v57  ;;  %v4107_v19 = vpop.f32.mrf.mxu1  ;;  %v15767_v37 = vld [vmem:[%s21738_s4 + $0x6d8] ss:$12 sps:$4 sm:$0xff]   ;;  %v15775_v14 = vld [vmem:[%s21739_s5 + $0x8] ss:$12 sps:$4 sm:$0xff]   ;;  %v15782_v22 = vld [vmem:[%s21738_s4 + $0x5d0] ss:$12 sps:$4 sm:$0xff]  }
 0x31e   :  { %v19115_v46 = vadd.f32 %v18945_v5, %v4106_v13  ;;  %5657 = vmatmul.mubr.bf16.gmra.mxu0 %v18317_v51  ;;  %5600 = vmatprep.mubr.bf16.mxu1 %v18267_v7  ;;  %v4108_v20 = vadd.f32 %v4107_v19, %v18794_v15  ;;  %v4255_v58 = vpop.f32.mrf.mxu0  ;;  %v15752_v7 = vld [vmem:[%s21738_s4 + $0x720] ss:$12 sps:$4 sm:$0xff]   ;;  %v15756_v51 = vld [vmem:[%s21739_s5 + $0x110] ss:$12 sps:$4 sm:$0xff]   ;;  %v15776_v3 = vld [vmem:[%s21738_s4 + $0x5e8] ss:$12 sps:$4 sm:$0xff]  }
 0x31f   :  { %14501 = vmatpush3.bf16.msra.mxu1 %v15750_v12  ;;  %13133 = vmatprep.mubr.msk.bf16.mxu0 %vm2307_vm8, %v19109_v11  ;;  %v4109_v55 = vpop.f32.mrf.mxu1  ;;  %v15774_v30 = vld [vmem:[%s21738_s4 + $0x6c4] ss:$12 sps:$4 sm:$0xff]   ;;  %v15778_v49 = vld [vmem:[%s21738_s4 + $0x5ec] ss:$12 sps:$4 sm:$0xff]   ;;  %v15779_v21 = vld [vmem:[%s21738_s4 + $0x7c8] ss:$12 sps:$4 sm:$0xff]  }
 0x320   :  { %6307 = vmatpush1.bf16.msra.mxu0 %v15747_v25  ;;  %v19126_v5 = vadd.f32 %v18958_v27, %v4108_v20  ;;  %v4256_v0 = vpop.f32.mrf.mxu0  ;;  %14502 = vmatprep.subr.bf16.mxu1 %v15751_v56  ;;  %v15760_v27 = vld [vmem:[%s21739_s5 + $0x50] ss:$12 sps:$4 sm:$0xff]   ;;  %v15781_v8 = vld [vmem:[%s21738_s4 + $0x7cc] ss:$12 sps:$4 sm:$0xff]   ;;  %v15784_v45 = vld [vmem:[%s21738_s4 + $0x5d4] ss:$12 sps:$4 sm:$0xff]  }
 0x321   :  { %6308 = vmatprep.subr.bf16.mxu0 %v15754_v50  ;;  %v4110_v15 = vpop.f32.mrf.mxu1  ;;  %v15787_v33 = vld [vmem:[%s21738_s4 + $0x7b4] ss:$12 sps:$4 sm:$0xff]   ;;  %v15785_v12 = vld [vmem:[%s21738_s4 + $0x7b0] ss:$12 sps:$4 sm:$0xff]   ;;  %v5669_v43 = vld [vmem:[#allocation2 + $0xe8] sm:$0xff] }
 0x322   :  { %v4257_v61 = vpop.f32.mrf.mxu0  ;;  %v15788_v50 = vld [vmem:[%s21738_s4 + $0x5b8] ss:$12 sps:$4 sm:$0xff]   ;;  %v5665_v58 = vld [vmem:[#allocation2 + $0xc8] sm:$0xff] }
 0x323   :  { %14503 = vmatpush3.bf16.msra.mxu1 %v15755_v4  ;;  %v15796_v55 = vld [vmem:[%s21738_s4 + $0x5a4] ss:$12 sps:$4 sm:$0xff]   ;;  %v19225_v4 = vpack.c.bf16 %v5669_v43, %v5665_v58  ;;  %v15797_v61 = vld [vmem:[%s21738_s4 + $0x780] ss:$12 sps:$4 sm:$0xff]  }
 0x324   :  { %6309 = vmatpush1.bf16.msra.mxu0 %v15752_v7  ;;  %14504 = vmatprep.subr.bf16.mxu1 %v15756_v51  ;;  %v15799_v0 = vld [vmem:[%s21738_s4 + $0x784] ss:$12 sps:$4 sm:$0xff]  }
 0x325   :  { %6310 = vmatprep.subr.bf16.mxu0 %v15759_v44  ;;  %v15820_v43 = vld [vmem:[%s21738_s4 + $0x690] ss:$12 sps:$4 sm:$0xff]  }
 0x326   :  { %v15830_v58 = vld [vmem:[%s21738_s4 + $0x664] ss:$12 sps:$4 sm:$0xff]  }
 0x327   :  { %14505 = vmatpush3.bf16.msra.mxu1 %v15760_v27 }
 0x328   :  { %6311 = vmatpush1.bf16.msra.mxu0 %v15757_v6  ;;  %14506 = vmatprep.subr.bf16.mxu1 %v15761_v26  ;;  %v5670_v6 = vld [vmem:[#allocation2 + $0xf0] sm:$0xff] }
 0x329   :  { %6312 = vmatprep.subr.bf16.mxu0 %v15764_v24  ;;  %v15800_v24 = vld [vmem:[%s21738_s4 + $0x588] ss:$12 sps:$4 sm:$0xff]  }
 0x32b   :  { %14507 = vmatpush3.bf16.msra.mxu1 %v15765_v16  ;;  %v5675_v16 = vld [vmem:[#allocation2 + $0x118] sm:$0xf] }
 0x32c   :  { %6313 = vmatpush1.bf16.msra.mxu0 %v15762_v60  ;;  %14508 = vmatprep.subr.bf16.mxu1 %v15766_v31  ;;  %v5666_v60 = vld [vmem:[#allocation2 + $0xd0] sm:$0xff] }
 0x32d   :  { %6314 = vmatprep.subr.bf16.mxu0 %v15769_v9  ;;  %v15803_v31 = vld [vmem:[%s21738_s4 + $0x770] ss:$12 sps:$4 sm:$0xff]   ;;  %v19256_v9 = vpack.c.bf16 %v5670_v6, %v5666_v60 }
 0x32e   :  { %v15846_v6 = vld [vmem:[%s21738_s4 + $0x604] ss:$12 sps:$4 sm:$0xff]  }
 0x32f   :  { %14509 = vmatpush3.bf16.msra.mxu1 %v15770_v59  ;;  %v19262_v59 = vpack.c.bf16 %v5675_v16, %v5675_v16  ;;  %v15847_v16 = vld [vmem:[%s21738_s4 + $0x788] ss:$12 sps:$4 sm:$0xff]   ;;  %v15848_v60 = vld [vmem:[%s21738_s4 + $0x6b0] ss:$12 sps:$4 sm:$0xff]  }
 0x330   :  { %6315 = vmatpush1.bf16.msra.mxu0 %v15767_v37  ;;  %14510 = vmatprep.subr.bf16.mxu1 %v15771_v40  ;;  %v15804_v40 = vld [vmem:[%s21738_s4 + $0x570] ss:$12 sps:$4 sm:$0xff]  }
 0x331   :  { %6316 = vmatprep.subr.bf16.mxu0 %v15774_v30  ;;  %v15807_v30 = vld [vmem:[%s21738_s4 + $0x758] ss:$12 sps:$4 sm:$0xff]  }
 0x333   :  { %14511 = vmatpush3.bf16.msra.mxu1 %v15775_v14  ;;  %v15810_v14 = vld [vmem:[%s21738_s4 + $0x55c] ss:$12 sps:$4 sm:$0xff]  }
 0x334   :  { %6317 = vmatpush1.bf16.msra.mxu0 %v15772_v23  ;;  %v14456_v47 = vpop.f32.mrf.mxu1  ;;  %6251 = vmatprep.subr.bf16.mxu1 %v15778_v49  ;;  %v5674_v49 = vld [vmem:[#allocation2 + $0x110] sm:$0xf] }
 0x335   :  { %6326 = vmatprep.subr.bf16.mxu0 %v15781_v8 }
 0x336   :  { %5601 = vmatmul.mubr.bf16.vlgmr.msra.gmra.mxu1 %v18425_v62  ;;  %v14457_v57 = vpop.f32.mrf.mxu1  ;;  %v15790_v62 = vld [vmem:[%s21738_s4 + $0x5bc] ss:$12 sps:$4 sm:$0xff]  }
 0x337   :  { %5608 = vmatprep.mubr.bf16.mxu1 %v18427_v39  ;;  %6252 = vmatpush1.bf16.msra.mxu1 %v15776_v3  ;;  %v14458_v32 = vadd.f32 %v14457_v57, %v14456_v47  ;;  %v15793_v39 = vld [vmem:[%s21738_s4 + $0x79c] ss:$12 sps:$4 sm:$0xff]   ;;  %v15808_v3 = vld [vmem:[%s21738_s4 + $0x558] ss:$12 sps:$4 sm:$0xff]   ;;  %v15811_v47 = vld [vmem:[%s21738_s4 + $0x740] ss:$12 sps:$4 sm:$0xff]  }
 0x338   :  { %6327 = vmatpush2.bf16.msra.mxu0 %v15779_v21  ;;  %v14459_v54 = vpop.f32.mrf.mxu1  ;;  %6253 = vmatprep.subr.bf16.mxu1 %v15784_v45  ;;  %v19291_v45 = vpack.c.bf16 %v5674_v49, %v5674_v49 }
 0x339   :  { %v4198_v13 = vadd.f32 %v14458_v32, %v18874_v17  ;;  %6328 = vmatprep.subr.bf16.mxu0 %v15787_v33  ;;  %v15791_v17 = vld [vmem:[%s21738_s4 + $0x798] ss:$12 sps:$4 sm:$0xff]   ;;  %v15812_v32 = vld [vmem:[%s21738_s4 + $0x540] ss:$12 sps:$4 sm:$0xff]  }
 0x33a   :  { %v14460_v25 = vpop.f32.mrf.mxu1  ;;  %v15814_v33 = vld [vmem:[%s21738_s4 + $0x544] ss:$12 sps:$4 sm:$0xff]  }
 0x33b   :  { %v19213_v56 = vadd.f32 %v19059_v53, %v4198_v13  ;;  %6254 = vmatpush1.bf16.msra.mxu1 %v15782_v22  ;;  %v14461_v19 = vadd.f32 %v14460_v25, %v14459_v54  ;;  %v15815_v22 = vld [vmem:[%s21738_s4 + $0x728] ss:$12 sps:$4 sm:$0xff]   ;;  %v15818_v54 = vld [vmem:[%s21738_s4 + $0x6ac] ss:$12 sps:$4 sm:$0xff]  }
 0x33c   :  { %6329 = vmatpush2.bf16.msra.mxu0 %v15785_v12  ;;  %v14462_v20 = vpop.f32.mrf.mxu1  ;;  %6255 = vmatprep.subr.bf16.mxu1 %v15790_v62  ;;  %v15816_v13 = vld [vmem:[%s21738_s4 + $0x6a8] ss:$12 sps:$4 sm:$0xff]  }
 0x33d   :  { %v4201_v53 = vadd.f32 %v14461_v19, %v18889_v10  ;;  %6330 = vmatprep.subr.bf16.mxu0 %v15793_v39  ;;  %v15794_v10 = vld [vmem:[%s21738_s4 + $0x5a0] ss:$12 sps:$4 sm:$0xff]   ;;  %v15819_v39 = vld [vmem:[%s21738_s4 + $0x710] ss:$12 sps:$4 sm:$0xff]   ;;  %v15823_v19 = vld [vmem:[%s21738_s4 + $0x6f8] ss:$12 sps:$4 sm:$0xff]  }
 0x33e   :  { %5609 = vmatmul.mubr.bf16.gmra.mxu1 %v18461_v1  ;;  %v14463_v7 = vpop.f32.mrf.mxu1  ;;  %v15802_v1 = vld [vmem:[%s21738_s4 + $0x58c] ss:$12 sps:$4 sm:$0xff]   ;;  %v15822_v25 = vld [vmem:[%s21738_s4 + $0x694] ss:$12 sps:$4 sm:$0xff]  }
 0x33f   :  { %v19232_v51 = vadd.f32 %v19080_v28, %v4201_v53  ;;  %6256 = vmatpush1.bf16.msra.mxu1 %v15788_v50  ;;  %6283 = vmatprep.mubr.bf16.mxu1 %v19225_v4  ;;  %v14464_v15 = vadd.f32 %v14463_v7, %v14462_v20  ;;  %v15826_v50 = vld [vmem:[%s21738_s4 + $0x67c] ss:$12 sps:$4 sm:$0xff]   ;;  %v15824_v20 = vld [vmem:[%s21738_s4 + $0x678] ss:$12 sps:$4 sm:$0xff]  }
 0x340   :  { %6331 = vmatpush2.bf16.msra.mxu0 %v15791_v17  ;;  %v14465_v44 = vpop.f32.mrf.mxu1  ;;  %6257 = vmatprep.subr.bf16.mxu1 %v15796_v55  ;;  %v15827_v17 = vld [vmem:[%s21738_s4 + $0x6e0] ss:$12 sps:$4 sm:$0xff]   ;;  %v15831_v53 = vld [vmem:[%s21738_s4 + $0x6c8] ss:$12 sps:$4 sm:$0xff]  }
 0x341   :  { %v4206_v28 = vadd.f32 %v14464_v15, %v18906_v41  ;;  %6332 = vmatprep.subr.bf16.mxu0 %v15799_v0  ;;  %v15828_v55 = vld [vmem:[%s21738_s4 + $0x660] ss:$12 sps:$4 sm:$0xff]   ;;  %v15832_v7 = vld [vmem:[%s21738_s4 + $0x648] ss:$12 sps:$4 sm:$0xff]   ;;  %v15835_v15 = vld [vmem:[%s21738_s4 + $0x7d0] ss:$12 sps:$4 sm:$0xff]  }
 0x342   :  { %v14466_v27 = vpop.f32.mrf.mxu1  ;;  %v15834_v0 = vld [vmem:[%s21738_s4 + $0x64c] ss:$12 sps:$4 sm:$0xff]   ;;  %v15836_v44 = vld [vmem:[%s21738_s4 + $0x630] ss:$12 sps:$4 sm:$0xff]  }
 0x343   :  { %v19246_v26 = vadd.f32 %v19100_v48, %v4206_v28  ;;  %6258 = vmatpush1.bf16.msra.mxu1 %v15794_v10  ;;  %v15806_v48 = vld [vmem:[%s21738_s4 + $0x574] ss:$12 sps:$4 sm:$0xff]   ;;  %v15840_v28 = vld [vmem:[%s21738_s4 + $0x618] ss:$12 sps:$4 sm:$0xff]  }
 0x344   :  { %6333 = vmatpush2.bf16.msra.mxu0 %v15797_v61  ;;  %6259 = vmatprep.subr.bf16.mxu1 %v15802_v1  ;;  %v15838_v10 = vld [vmem:[%s21738_s4 + $0x634] ss:$12 sps:$4 sm:$0xff]   ;;  %v15839_v61 = vld [vmem:[%s21738_s4 + $0x7b8] ss:$12 sps:$4 sm:$0xff]   ;;  %v15842_v1 = vld [vmem:[%s21738_s4 + $0x61c] ss:$12 sps:$4 sm:$0xff]  }
 0x345   :  { %v19254_v41 = vpop.f32.mrf.mxu0  ;;  %6401 = vmatprep.subr.bf16.mxu0 %v21754_v63  ;;  %v15843_v27 = vld [vmem:[%s21738_s4 + $0x7a0] ss:$12 sps:$4 sm:$0xff]  }
 0x347   :  { %6335 = vmatmul.mubr.bf16.vlgmr.msra.gmra.mxu0 %v19256_v9  ;;  %6260 = vmatpush1.bf16.msra.mxu1 %v15800_v24  ;;  %v19265_v37 = vpop.f32.mrf.mxu0  ;;  %v15844_v24 = vld [vmem:[%s21738_s4 + $0x600] ss:$12 sps:$4 sm:$0xff]  }
 0x348   :  { %13134 = vmatprep.mubr.msk.bf16.mxu0 %vm2307_vm8, %v19262_v59  ;;  %6402 = vmatpush1.bf16.msra.mxu0 %v15803_v31  ;;  %v5668_v31 = vld [vmem:[#allocation2 + $0xe0] sm:$0xff] }
 0x349   :  { %v19278_v23 = vpop.f32.mrf.mxu0  ;;  %6261 = vmatprep.subr.bf16.mxu1 %v15806_v48  ;;  %6403 = vmatprep.subr.bf16.mxu0 %v21754_v63  ;;  %v15851_v48 = vld [vmem:[%s21739_s5 + $0x76c] ss:$12 sps:$4 sm:$0xff]  }
 0x34b   :  { %6262 = vmatpush1.bf16.msra.mxu1 %v15804_v40  ;;  %v19281_v8 = vpop.f32.mrf.mxu0  ;;  %v5673_v40 = vld [vmem:[#allocation2 + $0x108] sm:$0xf] }
 0x34c   :  { %6404 = vmatpush1.bf16.msra.mxu0 %v15807_v30  ;;  %6263 = vmatprep.subr.bf16.mxu1 %v15810_v14  ;;  %v5664_v30 = vld [vmem:[#allocation2 + $0xc0] sm:$0xff] }
 0x34d   :  { %v19289_v21 = vpop.f32.mrf.mxu0  ;;  %6405 = vmatprep.subr.bf16.mxu0 %v21754_v63  ;;  %v19395_v49 = vpack.c.bf16 %v5668_v31, %v5664_v30  ;;  %v15871_v31 = vld [vmem:[%s21739_s5 + $0x70c] ss:$12 sps:$4 sm:$0xff]   ;;  %v15869_v30 = vld [vmem:[%s21739_s5 + $0x708] ss:$12 sps:$4 sm:$0xff]  }
 0x34f   :  { %6345 = vmatmul.mubr.bf16.gmra.mxu0 %v19291_v45  ;;  %6264 = vmatpush1.bf16.msra.mxu1 %v15808_v3  ;;  %v19298_v57 = vpop.f32.mrf.mxu0  ;;  %v15852_v3 = vld [vmem:[%s21738_s4 + $0x5f0] ss:$12 sps:$4 sm:$0xff]  }
 0x350   :  { %6406 = vmatpush1.bf16.msra.mxu0 %v15811_v47  ;;  %13135 = vmatprep.mubr.msk.bf16.mxu0 %vm2307_vm8, %v19109_v11 }
 0x351   :  { %v4919_v12 = vpop.f32.mrf.mxu0  ;;  %6265 = vmatprep.subr.bf16.mxu1 %v15814_v33  ;;  %6407 = vmatprep.subr.bf16.mxu0 %v21754_v63 }
 0x353   :  { %6266 = vmatpush1.bf16.msra.mxu1 %v15812_v32  ;;  %v4920_v62 = vpop.f32.mrf.mxu0  ;;  %v15849_v32 = vld [vmem:[%s21739_s5 + $0x768] ss:$12 sps:$4 sm:$0xff]  }
 0x354   :  { %6408 = vmatpush1.bf16.msra.mxu0 %v15815_v22  ;;  %6267 = vmatprep.subr.bf16.mxu1 %v15818_v54  ;;  %v19408_v22 = vpack.c.bf16 %v5673_v40, %v5673_v40  ;;  %v15853_v54 = vld [vmem:[%s21738_s4 + $0x698] ss:$12 sps:$4 sm:$0xff]   ;;  %v15872_v40 = vld [vmem:[%s21738_s4 + $0x590] ss:$12 sps:$4 sm:$0xff]  }
 0x355   :  { %6409 = vmatprep.subr.bf16.mxu0 %v21754_v63 }
 0x357   :  { %6268 = vmatpush2.bf16.msra.mxu1 %v15816_v13 }
 0x358   :  { %6410 = vmatpush1.bf16.msra.mxu0 %v15819_v39  ;;  %6269 = vmatprep.subr.bf16.mxu1 %v15822_v25  ;;  %v15857_v25 = vld [vmem:[%s21738_s4 + $0x5d8] ss:$12 sps:$4 sm:$0xff]  }
 0x359   :  { %6411 = vmatprep.subr.bf16.mxu0 %v21754_v63 }
 0x35b   :  { %6270 = vmatpush2.bf16.msra.mxu1 %v15820_v43 }
 0x35c   :  { %6412 = vmatpush1.bf16.msra.mxu0 %v15823_v19  ;;  %6271 = vmatprep.subr.bf16.mxu1 %v15826_v50  ;;  %v5672_v50 = vld [vmem:[#allocation2 + $0x100] sm:$0xf] }
 0x35d   :  { %6413 = vmatprep.subr.bf16.mxu0 %v21754_v63 }
 0x35f   :  { %6272 = vmatpush2.bf16.msra.mxu1 %v15824_v20  ;;  %v15858_v20 = vld [vmem:[%s21738_s4 + $0x680] ss:$12 sps:$4 sm:$0xff]  }
 0x360   :  { %6414 = vmatpush1.bf16.msra.mxu0 %v15827_v17  ;;  %6273 = vmatprep.subr.bf16.mxu1 %v15830_v58 }
 0x361   :  { %6415 = vmatprep.subr.bf16.mxu0 %v21754_v63 }
 0x363   :  { %6274 = vmatpush2.bf16.msra.mxu1 %v15828_v55 }
 0x364   :  { %6416 = vmatpush1.bf16.msra.mxu0 %v15831_v53  ;;  %6275 = vmatprep.subr.bf16.mxu1 %v15834_v0  ;;  %v19443_v53 = vpack.c.bf16 %v5672_v50, %v5672_v50  ;;  %v15862_v0 = vld [vmem:[%s21738_s4 + $0x5c0] ss:$12 sps:$4 sm:$0xff]   ;;  %v15887_v50 = vld [vmem:[%s21738_s4 + $0x548] ss:$12 sps:$4 sm:$0xff]  }
 0x365   :  { %6425 = vmatprep.subr.bf16.mxu0 %v21754_v63 }
 0x367   :  { %6276 = vmatpush2.bf16.msra.mxu1 %v15832_v7 }
 0x368   :  { %6426 = vmatpush2.bf16.msra.mxu0 %v15835_v15  ;;  %6277 = vmatprep.subr.bf16.mxu1 %v15838_v10  ;;  %v15859_v10 = vld [vmem:[%s21739_s5 + $0x738] ss:$12 sps:$4 sm:$0xff]  }
 0x369   :  { %6427 = vmatprep.subr.bf16.mxu0 %v21754_v63 }
 0x36b   :  { %6278 = vmatpush2.bf16.msra.mxu1 %v15836_v44  ;;  %v15863_v44 = vld [vmem:[%s21738_s4 + $0x668] ss:$12 sps:$4 sm:$0xff]  }
 0x36c   :  { %6428 = vmatpush2.bf16.msra.mxu0 %v15839_v61  ;;  %6279 = vmatprep.subr.bf16.mxu1 %v15842_v1 }
 0x36d   :  { %6429 = vmatprep.subr.bf16.mxu0 %v21754_v63 }
 0x36f   :  { %6280 = vmatpush2.bf16.msra.mxu1 %v15840_v28 }
 0x370   :  { %6430 = vmatpush2.bf16.msra.mxu0 %v15843_v27  ;;  %6281 = vmatprep.subr.bf16.mxu1 %v15846_v6  ;;  %v15867_v6 = vld [vmem:[%s21738_s4 + $0x5a8] ss:$12 sps:$4 sm:$0xff]  }
 0x371   :  { %6431 = vmatprep.subr.bf16.mxu0 %v21754_v63 }
 0x373   :  { %6282 = vmatpush2.bf16.msra.mxu1 %v15844_v24 }
 0x374   :  { %6432 = vmatpush2.bf16.msra.mxu0 %v15847_v16  ;;  %v4854_v14 = vpop.f32.mrf.mxu1  ;;  %14524 = vmatprep.subr.bf16.mxu1 %v15848_v60  ;;  %v15864_v16 = vld [vmem:[%s21739_s5 + $0x720] ss:$12 sps:$4 sm:$0xff]  }
 0x375   :  { %v19401_v47 = vadd.f32 %v19254_v41, %v4854_v14  ;;  %v19403_v33 = vpop.f32.mrf.mxu0  ;;  %7070 = vmatprep.subr.bf16.mxu0 %v15851_v48  ;;  %v15856_v41 = vld [vmem:[%s21739_s5 + $0x754] ss:$12 sps:$4 sm:$0xff]   ;;  %v15873_v14 = vld [vmem:[%s21738_s4 + $0x638] ss:$12 sps:$4 sm:$0xff]  }
 0x376   :  { %6284 = vmatmul.mubr.bf16.vlgmr.msra.gmra.mxu1 %v19395_v49  ;;  %v4856_v12 = vpop.f32.mrf.mxu1 }
 0x377   :  { %6434 = vmatmul.mubr.bf16.vlgmr.msra.gmra.mxu0 %v19256_v9  ;;  %6293 = vmatprep.mubr.bf16.mxu1 %v19408_v22  ;;  %v19420_v62 = vadd.f32 %v19265_v37, %v4856_v12  ;;  %v5006_v13 = vpop.f32.mrf.mxu0  ;;  %v15854_v37 = vld [vmem:[%s21739_s5 + $0x750] ss:$12 sps:$4 sm:$0xff]   ;;  %v15878_v12 = vld [vmem:[%s21738_s4 + $0x620] ss:$12 sps:$4 sm:$0xff]  }
 0x378   :  { %14525 = vmatpush3.bf16.msra.mxu1 %v15852_v3  ;;  %13136 = vmatprep.mubr.msk.bf16.mxu0 %vm2307_vm8, %v19262_v59  ;;  %v4858_v39 = vpop.f32.mrf.mxu1  ;;  %v15876_v3 = vld [vmem:[%s21739_s5 + $0x6f4] ss:$12 sps:$4 sm:$0xff]  }
 0x379   :  { %7071 = vmatpush1.bf16.msra.mxu0 %v15849_v32  ;;  %v19428_v43 = vadd.f32 %v19278_v23, %v4858_v39  ;;  %v19430_v19 = vpop.f32.mrf.mxu0  ;;  %14526 = vmatprep.subr.bf16.mxu1 %v15853_v54  ;;  %v15861_v23 = vld [vmem:[%s21739_s5 + $0x73c] ss:$12 sps:$4 sm:$0xff]   ;;  %v15877_v32 = vld [vmem:[%s21738_s4 + $0x578] ss:$12 sps:$4 sm:$0xff]   ;;  %v15882_v13 = vld [vmem:[%s21738_s4 + $0x560] ss:$12 sps:$4 sm:$0xff]  }
 0x37a   :  { %7072 = vmatprep.subr.bf16.mxu0 %v15856_v41  ;;  %v19438_v17 = vpop.f32.mrf.mxu1  ;;  %v15874_v54 = vld [vmem:[%s21739_s5 + $0x6f0] ss:$12 sps:$4 sm:$0xff]   ;;  %v15879_v39 = vld [vmem:[%s21739_s5 + $0x6d8] ss:$12 sps:$4 sm:$0xff]  }
 0x37b   :  { %v5009_v58 = vpop.f32.mrf.mxu0  ;;  %v15881_v41 = vld [vmem:[%s21739_s5 + $0x6dc] ss:$12 sps:$4 sm:$0xff]  }
 0x37c   :  { %14527 = vmatpush3.bf16.msra.mxu1 %v15857_v25  ;;  %v4864_v55 = vpop.f32.mrf.mxu1  ;;  %v15883_v25 = vld [vmem:[%s21738_s4 + $0x608] ss:$12 sps:$4 sm:$0xff]   ;;  %v15893_v58 = vld [vmem:[%s21739_s5 + $0x7cc] ss:$12 sps:$4 sm:$0xff]  }
 0x37d   :  { %7073 = vmatpush1.bf16.msra.mxu0 %v15854_v37  ;;  %v19449_v7 = vadd.f32 %v19289_v21, %v4864_v55  ;;  %v19451_v15 = vpop.f32.mrf.mxu0  ;;  %14528 = vmatprep.subr.bf16.mxu1 %v15858_v20  ;;  %v15866_v21 = vld [vmem:[%s21739_s5 + $0x724] ss:$12 sps:$4 sm:$0xff]   ;;  %v15884_v20 = vld [vmem:[%s21739_s5 + $0x6c0] ss:$12 sps:$4 sm:$0xff]   ;;  %v15888_v55 = vld [vmem:[%s21739_s5 + $0x5e8] ss:$12 sps:$4 sm:$0xff]  }
 0x37e   :  { %6294 = vmatmul.mubr.bf16.gmra.mxu1 %v19443_v53  ;;  %7074 = vmatprep.subr.bf16.mxu0 %v15861_v23  ;;  %v4866_v61 = vpop.f32.mrf.mxu1  ;;  %v15886_v37 = vld [vmem:[%s21739_s5 + $0x6c4] ss:$12 sps:$4 sm:$0xff]   ;;  %v15890_v23 = vld [vmem:[%s21739_s5 + $0x5ec] ss:$12 sps:$4 sm:$0xff]  }
 0x37f   :  { %6442 = vmatmul.mubr.bf16.gmra.mxu0 %v19291_v45  ;;  %6385 = vmatprep.mubr.bf16.mxu1 %v19225_v4  ;;  %v19466_v1 = vadd.f32 %v19298_v57, %v4866_v61  ;;  %v5014_v28 = vpop.f32.mrf.mxu0  ;;  %v15868_v57 = vld [vmem:[%s21738_s4 + $0x650] ss:$12 sps:$4 sm:$0xff]   ;;  %v15899_v61 = vld [vmem:[%s21739_s5 + $0x7b4] ss:$12 sps:$4 sm:$0xff]  }
 0x380   :  { %14529 = vmatpush3.bf16.msra.mxu1 %v15862_v0  ;;  %13333 = vmatprep.mubr.msk.bf16.mxu0 %vm2307_vm8, %v19109_v11  ;;  %v4868_v27 = vpop.f32.mrf.mxu1 }
 0x381   :  { %7075 = vmatpush1.bf16.msra.mxu0 %v15859_v10  ;;  %v5015_v24 = vpop.f32.mrf.mxu0  ;;  %14530 = vmatprep.subr.bf16.mxu1 %v15863_v44  ;;  %v15891_v10 = vld [vmem:[%s21739_s5 + $0x7c8] ss:$12 sps:$4 sm:$0xff]   ;;  %v15894_v27 = vld [vmem:[%s21739_s5 + $0x5d0] ss:$12 sps:$4 sm:$0xff]  }
 0x382   :  { %7076 = vmatprep.subr.bf16.mxu0 %v15866_v21  ;;  %v4869_v60 = vpop.f32.mrf.mxu1  ;;  %v15896_v44 = vld [vmem:[%s21739_s5 + $0x5d4] ss:$12 sps:$4 sm:$0xff]   ;;  %v15897_v24 = vld [vmem:[%s21739_s5 + $0x7b0] ss:$12 sps:$4 sm:$0xff]  }
 0x383   :  { %v5016_v48 = vpop.f32.mrf.mxu0  ;;  %v15905_v60 = vld [vmem:[%s21739_s5 + $0x79c] ss:$12 sps:$4 sm:$0xff]  }
 0x384   :  { %14531 = vmatpush3.bf16.msra.mxu1 %v15867_v6 }
 0x385   :  { %7077 = vmatpush1.bf16.msra.mxu0 %v15864_v16  ;;  %14532 = vmatprep.subr.bf16.mxu1 %v15868_v57  ;;  %v15902_v16 = vld [vmem:[%s21739_s5 + $0x5bc] ss:$12 sps:$4 sm:$0xff]  }
 0x386   :  { %7078 = vmatprep.subr.bf16.mxu0 %v15871_v31 }
 0x388   :  { %14533 = vmatpush3.bf16.msra.mxu1 %v15872_v40  ;;  %v15900_v40 = vld [vmem:[%s21739_s5 + $0x5b8] ss:$12 sps:$4 sm:$0xff]  }
 0x389   :  { %7079 = vmatpush1.bf16.msra.mxu0 %v15869_v30  ;;  %14534 = vmatprep.subr.bf16.mxu1 %v15873_v14  ;;  %v15908_v14 = vld [vmem:[%s21739_s5 + $0x5a4] ss:$12 sps:$4 sm:$0xff]  }
 0x38a   :  { %7080 = vmatprep.subr.bf16.mxu0 %v15876_v3 }
 0x38c   :  { %14535 = vmatpush3.bf16.msra.mxu1 %v15877_v32  ;;  %v15911_v32 = vld [vmem:[%s21739_s5 + $0x784] ss:$12 sps:$4 sm:$0xff]  }
 0x38d   :  { %7081 = vmatpush1.bf16.msra.mxu0 %v15874_v54  ;;  %14536 = vmatprep.subr.bf16.mxu1 %v15878_v12 }
 0x38e   :  { %7082 = vmatprep.subr.bf16.mxu0 %v15881_v41  ;;  %v15906_v41 = vld [vmem:[%s21739_s5 + $0x5a0] ss:$12 sps:$4 sm:$0xff]  }
 0x390   :  { %14537 = vmatpush3.bf16.msra.mxu1 %v15882_v13 }
 0x391   :  { %7083 = vmatpush1.bf16.msra.mxu0 %v15879_v39  ;;  %14538 = vmatprep.subr.bf16.mxu1 %v15883_v25  ;;  %v15914_v39 = vld [vmem:[%s21739_s5 + $0x58c] ss:$12 sps:$4 sm:$0xff]  }
 0x392   :  { %7084 = vmatprep.subr.bf16.mxu0 %v15886_v37 }
 0x394   :  { %14539 = vmatpush3.bf16.msra.mxu1 %v15887_v50  ;;  %v15912_v50 = vld [vmem:[%s21739_s5 + $0x588] ss:$12 sps:$4 sm:$0xff]  }
 0x395   :  { %7085 = vmatpush1.bf16.msra.mxu0 %v15884_v20  ;;  %v14484_v0 = vpop.f32.mrf.mxu1  ;;  %7019 = vmatprep.subr.bf16.mxu1 %v15890_v23  ;;  %v15915_v20 = vld [vmem:[%s21739_s5 + $0x770] ss:$12 sps:$4 sm:$0xff]  }
 0x396   :  { %7094 = vmatprep.subr.bf16.mxu0 %v15893_v58 }
 0x397   :  { %6386 = vmatmul.mubr.bf16.vlgmr.msra.gmra.mxu1 %v19395_v49  ;;  %v14485_v21 = vpop.f32.mrf.mxu1 }
 0x398   :  { %6393 = vmatprep.mubr.bf16.mxu1 %v19408_v22  ;;  %7020 = vmatpush1.bf16.msra.mxu1 %v15888_v55  ;;  %v14486_v28 = vadd.f32 %v14485_v21, %v14484_v0  ;;  %v15916_v55 = vld [vmem:[%s21739_s5 + $0x570] ss:$12 sps:$4 sm:$0xff]   ;;  %v15919_v0 = vld [vmem:[%s21739_s5 + $0x758] ss:$12 sps:$4 sm:$0xff]  }
 0x399   :  { %7095 = vmatpush2.bf16.msra.mxu0 %v15891_v10  ;;  %v14487_v6 = vpop.f32.mrf.mxu1  ;;  %7021 = vmatprep.subr.bf16.mxu1 %v15896_v44  ;;  %v15922_v10 = vld [vmem:[%s21739_s5 + $0x55c] ss:$12 sps:$4 sm:$0xff]   ;;  %v15920_v21 = vld [vmem:[%s21739_s5 + $0x558] ss:$12 sps:$4 sm:$0xff]  }
 0x39a   :  { %v19554_v57 = vadd.f32 %v14486_v28, %v19403_v33  ;;  %7096 = vmatprep.subr.bf16.mxu0 %v15899_v61  ;;  %v15903_v33 = vld [vmem:[%s21739_s5 + $0x798] ss:$12 sps:$4 sm:$0xff]   ;;  %v15923_v28 = vld [vmem:[%s21739_s5 + $0x740] ss:$12 sps:$4 sm:$0xff]  }
 0x39b   :  { %v14488_v31 = vpop.f32.mrf.mxu1 }
 0x39c   :  { %7022 = vmatpush1.bf16.msra.mxu1 %v15894_v27  ;;  %v14489_v48 = vadd.f32 %v14488_v31, %v14487_v6  ;;  %v15926_v6 = vld [vmem:[%s21739_s5 + $0x544] ss:$12 sps:$4 sm:$0xff]   ;;  %v15930_v31 = vld [vmem:[%s21739_s5 + $0x6ac] ss:$12 sps:$4 sm:$0xff]  }
 0x39d   :  { %7097 = vmatpush2.bf16.msra.mxu0 %v15897_v24  ;;  %v14490_v30 = vpop.f32.mrf.mxu1  ;;  %7023 = vmatprep.subr.bf16.mxu1 %v15902_v16  ;;  %v15924_v16 = vld [vmem:[%s21739_s5 + $0x540] ss:$12 sps:$4 sm:$0xff]  }
 0x39e   :  { %v19569_v3 = vadd.f32 %v14489_v48, %v19430_v19  ;;  %7098 = vmatprep.subr.bf16.mxu0 %v15905_v60  ;;  %v15909_v19 = vld [vmem:[%s21739_s5 + $0x780] ss:$12 sps:$4 sm:$0xff]   ;;  %v15927_v60 = vld [vmem:[%s21739_s5 + $0x728] ss:$12 sps:$4 sm:$0xff]  }
 0x39f   :  { %6394 = vmatmul.mubr.bf16.gmra.mxu1 %v19443_v53  ;;  %v14491_v54 = vpop.f32.mrf.mxu1 }
 0x3a0   :  { %7024 = vmatpush1.bf16.msra.mxu1 %v15900_v40  ;;  %7051 = vmatprep.mubr.bf16.mxu1 %v19225_v4  ;;  %v14492_v12 = vadd.f32 %v14491_v54, %v14490_v30  ;;  %v15928_v30 = vld [vmem:[%s21739_s5 + $0x6a8] ss:$12 sps:$4 sm:$0xff]  }
 0x3a1   :  { %7099 = vmatpush2.bf16.msra.mxu0 %v15903_v33  ;;  %v14493_v13 = vpop.f32.mrf.mxu1  ;;  %7025 = vmatprep.subr.bf16.mxu1 %v15908_v14  ;;  %v15934_v33 = vld [vmem:[%s21739_s5 + $0x694] ss:$12 sps:$4 sm:$0xff]   ;;  %v15932_v14 = vld [vmem:[%s21739_s5 + $0x690] ss:$12 sps:$4 sm:$0xff]  }
 0x3a2   :  { %v19586_v25 = vadd.f32 %v14492_v12, %v19451_v15  ;;  %7100 = vmatprep.subr.bf16.mxu0 %v15911_v32  ;;  %v15918_v15 = vld [vmem:[%s21739_s5 + $0x574] ss:$12 sps:$4 sm:$0xff]   ;;  %v15935_v32 = vld [vmem:[%s21739_s5 + $0x6f8] ss:$12 sps:$4 sm:$0xff]   ;;  %v15938_v54 = vld [vmem:[%s21739_s5 + $0x67c] ss:$12 sps:$4 sm:$0xff]  }
 0x3a3   :  { %v14494_v37 = vpop.f32.mrf.mxu1  ;;  %v15936_v12 = vld [vmem:[%s21739_s5 + $0x678] ss:$12 sps:$4 sm:$0xff]  }
 0x3a4   :  { %7026 = vmatpush1.bf16.msra.mxu1 %v15906_v41  ;;  %v15939_v41 = vld [vmem:[%s21739_s5 + $0x6e0] ss:$12 sps:$4 sm:$0xff]   ;;  %v15942_v13 = vld [vmem:[%s21739_s5 + $0x664] ss:$12 sps:$4 sm:$0xff]  }
 0x3a5   :  { %7101 = vmatpush2.bf16.msra.mxu0 %v15909_v19  ;;  %7027 = vmatprep.subr.bf16.mxu1 %v15914_v39  ;;  %v15940_v19 = vld [vmem:[%s21739_s5 + $0x660] ss:$12 sps:$4 sm:$0xff]   ;;  %v15943_v39 = vld [vmem:[%s21739_s5 + $0x6c8] ss:$12 sps:$4 sm:$0xff]  }
 0x3a6   :  { %v19594_v23 = vpop.f32.mrf.mxu0  ;;  %7169 = vmatprep.subr.bf16.mxu0 %v21754_v63  ;;  %v15946_v37 = vld [vmem:[%s21739_s5 + $0x64c] ss:$12 sps:$4 sm:$0xff]  }
 0x3a8   :  { %7103 = vmatmul.mubr.bf16.vlgmr.msra.gmra.mxu0 %v19256_v9  ;;  %7028 = vmatpush1.bf16.msra.mxu1 %v15912_v50  ;;  %v19601_v58 = vpop.f32.mrf.mxu0  ;;  %v15944_v50 = vld [vmem:[%s21739_s5 + $0x648] ss:$12 sps:$4 sm:$0xff]  }
 0x3a9   :  { %13334 = vmatprep.mubr.msk.bf16.mxu0 %vm2307_vm8, %v19262_v59  ;;  %7170 = vmatpush1.bf16.msra.mxu0 %v15915_v20  ;;  %v15947_v20 = vld [vmem:[%s21739_s5 + $0x7d0] ss:$12 sps:$4 sm:$0xff]  }
 0x3aa   :  { %v19614_v44 = vpop.f32.mrf.mxu0  ;;  %7029 = vmatprep.subr.bf16.mxu1 %v15918_v15  ;;  %7171 = vmatprep.subr.bf16.mxu0 %v21754_v63  ;;  %v15950_v15 = vld [vmem:[%s21739_s5 + $0x634] ss:$12 sps:$4 sm:$0xff]  }
 0x3ac   :  { %7030 = vmatpush1.bf16.msra.mxu1 %v15916_v55  ;;  %v19617_v61 = vpop.f32.mrf.mxu0  ;;  %v15948_v55 = vld [vmem:[%s21739_s5 + $0x630] ss:$12 sps:$4 sm:$0xff]  }
 0x3ad   :  { %7172 = vmatpush1.bf16.msra.mxu0 %v15919_v0  ;;  %7031 = vmatprep.subr.bf16.mxu1 %v15922_v10  ;;  %v15951_v0 = vld [vmem:[%s21739_s5 + $0x7b8] ss:$12 sps:$4 sm:$0xff]   ;;  %v15954_v10 = vld [vmem:[%s21739_s5 + $0x61c] ss:$12 sps:$4 sm:$0xff]  }
 0x3ae   :  { %v19625_v27 = vpop.f32.mrf.mxu0  ;;  %7173 = vmatprep.subr.bf16.mxu0 %v21754_v63 }
 0x3b0   :  { %7113 = vmatmul.mubr.bf16.gmra.mxu0 %v19291_v45  ;;  %7032 = vmatpush1.bf16.msra.mxu1 %v15920_v21  ;;  %v19632_v24 = vpop.f32.mrf.mxu0  ;;  %v15952_v21 = vld [vmem:[%s21739_s5 + $0x618] ss:$12 sps:$4 sm:$0xff]  }
 0x3b1   :  { %7174 = vmatpush1.bf16.msra.mxu0 %v15923_v28  ;;  %13335 = vmatprep.mubr.msk.bf16.mxu0 %vm2307_vm8, %v19109_v11  ;;  %v15931_v11 = vld [vmem:[%s21739_s5 + $0x710] ss:$12 sps:$4 sm:$0xff]   ;;  %v15955_v28 = vld [vmem:[%s21739_s5 + $0x7a0] ss:$12 sps:$4 sm:$0xff]  }
 0x3b2   :  { %v5565_v48 = vpop.f32.mrf.mxu0  ;;  %7033 = vmatprep.subr.bf16.mxu1 %v15926_v6  ;;  %7175 = vmatprep.subr.bf16.mxu0 %v21754_v63  ;;  %v15958_v6 = vld [vmem:[%s21739_s5 + $0x604] ss:$12 sps:$4 sm:$0xff]  }
 0x3b3   :  { %v15963_v48 = vld [vmem:[%s21738_s4 + $0xa0c] ss:$12 sps:$4 sm:$0xff]  }
 0x3b4   :  { %7034 = vmatpush1.bf16.msra.mxu1 %v15924_v16  ;;  %v5566_v40 = vpop.f32.mrf.mxu0  ;;  %v15956_v16 = vld [vmem:[%s21739_s5 + $0x600] ss:$12 sps:$4 sm:$0xff]  }
 0x3b5   :  { %7176 = vmatpush1.bf16.msra.mxu0 %v15927_v60  ;;  %7035 = vmatprep.subr.bf16.mxu1 %v15930_v31  ;;  %v15959_v60 = vld [vmem:[%s21739_s5 + $0x788] ss:$12 sps:$4 sm:$0xff]   ;;  %v15960_v31 = vld [vmem:[%s21739_s5 + $0x6b0] ss:$12 sps:$4 sm:$0xff]  }
 0x3b6   :  { %7177 = vmatprep.subr.bf16.mxu0 %v21754_v63 }
 0x3b8   :  { %7036 = vmatpush2.bf16.msra.mxu1 %v15928_v30  ;;  %v15964_v30 = vld [vmem:[%s21739_s5 + $0x5f0] ss:$12 sps:$4 sm:$0xff]  }
 0x3b9   :  { %7178 = vmatpush1.bf16.msra.mxu0 %v15931_v11  ;;  %7037 = vmatprep.subr.bf16.mxu1 %v15934_v33 }
 0x3ba   :  { %7179 = vmatprep.subr.bf16.mxu0 %v21754_v63 }
 0x3bc   :  { %7038 = vmatpush2.bf16.msra.mxu1 %v15932_v14  ;;  %v15961_v14 = vld [vmem:[%s21738_s4 + $0xa08] ss:$12 sps:$4 sm:$0xff]  }
 0x3bd   :  { %7180 = vmatpush1.bf16.msra.mxu0 %v15935_v32  ;;  %7039 = vmatprep.subr.bf16.mxu1 %v15938_v54  ;;  %v15965_v32 = vld [vmem:[%s21739_s5 + $0x698] ss:$12 sps:$4 sm:$0xff]  }
 0x3be   :  { %7181 = vmatprep.subr.bf16.mxu0 %v21754_v63 }
 0x3c0   :  { %7040 = vmatpush2.bf16.msra.mxu1 %v15936_v12  ;;  %v15968_v12 = vld [vmem:[%s21738_s4 + $0x9f4] ss:$12 sps:$4 sm:$0xff]  }
 0x3c1   :  { %7182 = vmatpush1.bf16.msra.mxu0 %v15939_v41  ;;  %7041 = vmatprep.subr.bf16.mxu1 %v15942_v13 }
 0x3c2   :  { %7183 = vmatprep.subr.bf16.mxu0 %v21754_v63 }
 0x3c4   :  { %7042 = vmatpush2.bf16.msra.mxu1 %v15940_v19 }
 0x3c5   :  { %7184 = vmatpush1.bf16.msra.mxu0 %v15943_v39  ;;  %7043 = vmatprep.subr.bf16.mxu1 %v15946_v37  ;;  %v15969_v39 = vld [vmem:[%s21739_s5 + $0x5d8] ss:$12 sps:$4 sm:$0xff]  }
 0x3c6   :  { %7193 = vmatprep.subr.bf16.mxu0 %v21754_v63 }
 0x3c8   :  { %7044 = vmatpush2.bf16.msra.mxu1 %v15944_v50 }
 0x3c9   :  { %7194 = vmatpush2.bf16.msra.mxu0 %v15947_v20  ;;  %7045 = vmatprep.subr.bf16.mxu1 %v15950_v15  ;;  %v7233_v15 = vld [vmem:[#allocation2 + $0x158] sm:$0xff] }
 0x3ca   :  { %7195 = vmatprep.subr.bf16.mxu0 %v21754_v63 }
 0x3cc   :  { %7046 = vmatpush2.bf16.msra.mxu1 %v15948_v55 }
 0x3cd   :  { %7196 = vmatpush2.bf16.msra.mxu0 %v15951_v0  ;;  %7047 = vmatprep.subr.bf16.mxu1 %v15954_v10  ;;  %v15974_v0 = vld [vmem:[%s21739_s5 + $0x5c0] ss:$12 sps:$4 sm:$0xff]  }
 0x3ce   :  { %7197 = vmatprep.subr.bf16.mxu0 %v21754_v63 }
 0x3d0   :  { %7048 = vmatpush2.bf16.msra.mxu1 %v15952_v21 }
 0x3d1   :  { %7198 = vmatpush2.bf16.msra.mxu0 %v15955_v28  ;;  %7049 = vmatprep.subr.bf16.mxu1 %v15958_v6  ;;  %v15971_v28 = vld [vmem:[%s21738_s4 + $0x9d8] ss:$12 sps:$4 sm:$0xff]   ;;  %v15975_v6 = vld [vmem:[%s21739_s5 + $0x668] ss:$12 sps:$4 sm:$0xff]  }
 0x3d2   :  { %7199 = vmatprep.subr.bf16.mxu0 %v21754_v63 }
 0x3d4   :  { %7050 = vmatpush2.bf16.msra.mxu1 %v15956_v16 }
 0x3d5   :  { %7200 = vmatpush2.bf16.msra.mxu0 %v15959_v60  ;;  %v5500_v40 = vpop.f32.mrf.mxu1  ;;  %14552 = vmatprep.subr.bf16.mxu1 %v15960_v31 }
 0x3d6   :  { %v5501_v11 = vadd.f32 %v5500_v40, %v19401_v47  ;;  %v19733_v33 = vpop.f32.mrf.mxu0  ;;  %7864 = vmatprep.subr.bf16.mxu0 %v15963_v48 }
 0x3d7   :  { %7052 = vmatmul.mubr.bf16.vlgmr.msra.gmra.mxu1 %v19395_v49  ;;  %v5502_v54 = vpop.f32.mrf.mxu1 }
 0x3d8   :  { %v19746_v47 = vadd.f32 %v19594_v23, %v5501_v11  ;;  %7202 = vmatmul.mubr.bf16.vlgmr.msra.gmra.mxu0 %v19256_v9  ;;  %7061 = vmatprep.mubr.bf16.mxu1 %v19408_v22  ;;  %v5503_v41 = vadd.f32 %v5502_v54, %v19420_v62  ;;  %v5652_v13 = vpop.f32.mrf.mxu0  ;;  %v15966_v62 = vld [vmem:[%s21738_s4 + $0x9f0] ss:$12 sps:$4 sm:$0xff]   ;;  %v15979_v11 = vld [vmem:[%s21739_s5 + $0x5a8] ss:$12 sps:$4 sm:$0xff]  }
 0x3d9   :  { %14553 = vmatpush3.bf16.msra.mxu1 %v15964_v30  ;;  %13336 = vmatprep.mubr.msk.bf16.mxu0 %vm2307_vm8, %v19262_v59  ;;  %v5504_v19 = vpop.f32.mrf.mxu1  ;;  %v15970_v59 = vld [vmem:[%s21739_s5 + $0x680] ss:$12 sps:$4 sm:$0xff]  }
 0x3da   :  { %7865 = vmatpush1.bf16.msra.mxu0 %v15961_v14  ;;  %v19757_v23 = vadd.f32 %v19601_v58, %v5503_v41  ;;  %v5505_v9 = vadd.f32 %v5504_v19, %v19428_v43  ;;  %v19760_v37 = vpop.f32.mrf.mxu0  ;;  %14554 = vmatprep.subr.bf16.mxu1 %v15965_v32  ;;  %v15973_v58 = vld [vmem:[%s21738_s4 + $0x9dc] ss:$12 sps:$4 sm:$0xff]   ;;  %v15983_v32 = vld [vmem:[%s21738_s4 + $0x9ac] ss:$12 sps:$4 sm:$0xff]   ;;  %v15988_v13 = vld [vmem:[%s21738_s4 + $0x994] ss:$12 sps:$4 sm:$0xff]  }
 0x3db   :  { %7866 = vmatprep.subr.bf16.mxu0 %v15968_v12  ;;  %v19768_v50 = vpop.f32.mrf.mxu1  ;;  %v15981_v12 = vld [vmem:[%s21738_s4 + $0x9a8] ss:$12 sps:$4 sm:$0xff]   ;;  %v15985_v41 = vld [vmem:[%s21739_s5 + $0x638] ss:$12 sps:$4 sm:$0xff]  }
 0x3dc   :  { %v19774_v43 = vadd.f32 %v19614_v44, %v5505_v9  ;;  %v5655_v20 = vpop.f32.mrf.mxu0  ;;  %v7229_v44 = vld [vmem:[#allocation2 + $0x138] sm:$0xff]  ;;  %v15990_v9 = vld [vmem:[%s21739_s5 + $0x620] ss:$12 sps:$4 sm:$0xff]  }
 0x3dd   :  { %14555 = vmatpush3.bf16.msra.mxu1 %v15969_v39  ;;  %v5510_v55 = vpop.f32.mrf.mxu1  ;;  %v19789_v16 = vpack.c.bf16 %v7233_v15, %v7229_v44  ;;  %v15989_v19 = vld [vmem:[%s21739_s5 + $0x578] ss:$12 sps:$4 sm:$0xff]   ;;  %v15986_v39 = vld [vmem:[%s21738_s4 + $0x990] ss:$12 sps:$4 sm:$0xff]   ;;  %v15995_v20 = vld [vmem:[%s21739_s5 + $0x608] ss:$12 sps:$4 sm:$0xff]  }
 0x3de   :  { %7867 = vmatpush1.bf16.msra.mxu0 %v15966_v62  ;;  %v5511_v10 = vadd.f32 %v5510_v55, %v19449_v7  ;;  %v19780_v21 = vpop.f32.mrf.mxu0  ;;  %14556 = vmatprep.subr.bf16.mxu1 %v15970_v59  ;;  %v15978_v7 = vld [vmem:[%s21738_s4 + $0x9c4] ss:$12 sps:$4 sm:$0xff]   ;;  %v15993_v62 = vld [vmem:[%s21738_s4 + $0x97c] ss:$12 sps:$4 sm:$0xff]   ;;  %v15994_v59 = vld [vmem:[%s21739_s5 + $0x560] ss:$12 sps:$4 sm:$0xff]  }
 0x3df   :  { %7062 = vmatmul.mubr.bf16.gmra.mxu1 %v19443_v53  ;;  %7868 = vmatprep.subr.bf16.mxu0 %v15973_v58  ;;  %v5512_v60 = vpop.f32.mrf.mxu1  ;;  %v15991_v58 = vld [vmem:[%s21738_s4 + $0x978] ss:$12 sps:$4 sm:$0xff]   ;;  %v15999_v55 = vld [vmem:[%s21739_s5 + $0x548] ss:$12 sps:$4 sm:$0xff]  }
 0x3e0   :  { %v19795_v31 = vadd.f32 %v19625_v27, %v5511_v10  ;;  %7210 = vmatmul.mubr.bf16.gmra.mxu0 %v19291_v45  ;;  %7153 = vmatprep.mubr.bf16.mxu1 %v19225_v4  ;;  %v5513_v48 = vadd.f32 %v5512_v60, %v19466_v1  ;;  %v5660_v40 = vpop.f32.mrf.mxu0  ;;  %v15976_v4 = vld [vmem:[%s21738_s4 + $0x9c0] ss:$12 sps:$4 sm:$0xff]   ;;  %v15980_v45 = vld [vmem:[%s21739_s5 + $0x650] ss:$12 sps:$4 sm:$0xff]   ;;  %v16000_v44 = vld [vmem:[%s21738_s4 + $0x888] ss:$12 sps:$4 sm:$0xff]  }
 0x3e1   :  { %14557 = vmatpush3.bf16.msra.mxu1 %v15974_v0  ;;  %13533 = vmatprep.mubr.msk.bf16.mxu0 %vm2307_vm8, %v19789_v16  ;;  %v5514_v30 = vpop.f32.mrf.mxu1  ;;  %v15998_v15 = vld [vmem:[%s21738_s4 + $0x964] ss:$12 sps:$4 sm:$0xff]   ;;  %v15996_v0 = vld [vmem:[%s21738_s4 + $0x960] ss:$12 sps:$4 sm:$0xff]   ;;  %v16003_v60 = vld [vmem:[%s21738_s4 + $0xa68] ss:$12 sps:$4 sm:$0xff]  }
 0x3e2   :  { %7869 = vmatpush1.bf16.msra.mxu0 %v15971_v28  ;;  %v19806_v27 = vadd.f32 %v19632_v24, %v5513_v48  ;;  %v5661_v14 = vpop.f32.mrf.mxu0  ;;  %14558 = vmatprep.subr.bf16.mxu1 %v15975_v6  ;;  %v15984_v24 = vld [vmem:[%s21739_s5 + $0x590] ss:$12 sps:$4 sm:$0xff]   ;;  %v16002_v10 = vld [vmem:[%s21738_s4 + $0x88c] ss:$12 sps:$4 sm:$0xff]   ;;  %v16011_v48 = vld [vmem:[%s21738_s4 + $0xa54] ss:$12 sps:$4 sm:$0xff]  }
 0x3e3   :  { %7870 = vmatprep.subr.bf16.mxu0 %v15978_v7  ;;  %v5515_v1 = vpop.f32.mrf.mxu1  ;;  %v16005_v28 = vld [vmem:[%s21738_s4 + $0xa6c] ss:$12 sps:$4 sm:$0xff]   ;;  %v16008_v7 = vld [vmem:[%s21738_s4 + $0x874] ss:$12 sps:$4 sm:$0xff]  }
 0x3e4   :  { %v5662_v54 = vpop.f32.mrf.mxu0 }
 0x3e5   :  { %14559 = vmatpush3.bf16.msra.mxu1 %v15979_v11  ;;  %v16006_v11 = vld [vmem:[%s21738_s4 + $0x870] ss:$12 sps:$4 sm:$0xff]  }
 0x3e6   :  { %7871 = vmatpush1.bf16.msra.mxu0 %v15976_v4  ;;  %14560 = vmatprep.subr.bf16.mxu1 %v15980_v45  ;;  %v16009_v4 = vld [vmem:[%s21738_s4 + $0xa50] ss:$12 sps:$4 sm:$0xff]  }
 0x3e7   :  { %7872 = vmatprep.subr.bf16.mxu0 %v15983_v32  ;;  %v7231_v32 = vld [vmem:[#allocation2 + $0x148] sm:$0xff] }
 0x3e9   :  { %14561 = vmatpush3.bf16.msra.mxu1 %v15984_v24 }
 0x3ea   :  { %7873 = vmatpush1.bf16.msra.mxu0 %v15981_v12  ;;  %14562 = vmatprep.subr.bf16.mxu1 %v15985_v41  ;;  %v16012_v12 = vld [vmem:[%s21738_s4 + $0x858] ss:$12 sps:$4 sm:$0xff]  }
 0x3eb   :  { %7874 = vmatprep.subr.bf16.mxu0 %v15988_v13  ;;  %v7227_v13 = vld [vmem:[#allocation2 + $0x128] sm:$0xff] }
 0x3ed   :  { %14563 = vmatpush3.bf16.msra.mxu1 %v15989_v19  ;;  %v16020_v19 = vld [vmem:[%s21738_s4 + $0x844] ss:$12 sps:$4 sm:$0xff]  }
 0x3ee   :  { %7875 = vmatpush1.bf16.msra.mxu0 %v15986_v39  ;;  %14564 = vmatprep.subr.bf16.mxu1 %v15990_v9  ;;  %v19905_v39 = vpack.c.bf16 %v7231_v32, %v7227_v13  ;;  %v16023_v9 = vld [vmem:[%s21738_s4 + $0xa24] ss:$12 sps:$4 sm:$0xff]   ;;  %v16039_v13 = vld [vmem:[%s21738_s4 + $0x9c8] ss:$12 sps:$4 sm:$0xff]  }
 0x3ef   :  { %7876 = vmatprep.subr.bf16.mxu0 %v15993_v62 }
 0x3f1   :  { %14565 = vmatpush3.bf16.msra.mxu1 %v15994_v59 }
 0x3f2   :  { %7877 = vmatpush1.bf16.msra.mxu0 %v15991_v58  ;;  %14566 = vmatprep.subr.bf16.mxu1 %v15995_v20 }
 0x3f3   :  { %7878 = vmatprep.subr.bf16.mxu0 %v15998_v15  ;;  %v16021_v15 = vld [vmem:[%s21738_s4 + $0xa20] ss:$12 sps:$4 sm:$0xff]  }
 0x3f5   :  { %14567 = vmatpush3.bf16.msra.mxu1 %v15999_v55 }
 0x3f6   :  { %7879 = vmatpush1.bf16.msra.mxu0 %v15996_v0  ;;  %v14512_v6 = vpop.f32.mrf.mxu1  ;;  %7813 = vmatprep.subr.bf16.mxu1 %v16002_v10  ;;  %v7232_v0 = vld [vmem:[#allocation2 + $0x150] sm:$0xff] }
 0x3f7   :  { %7888 = vmatprep.subr.bf16.mxu0 %v16005_v28  ;;  %v16024_v28 = vld [vmem:[%s21738_s4 + $0x828] ss:$12 sps:$4 sm:$0xff]  }
 0x3f8   :  { %7154 = vmatmul.mubr.bf16.vlgmr.msra.gmra.mxu1 %v19395_v49  ;;  %v14513_v40 = vpop.f32.mrf.mxu1  ;;  %v16014_v49 = vld [vmem:[%s21738_s4 + $0x85c] ss:$12 sps:$4 sm:$0xff]  }
 0x3f9   :  { %7161 = vmatprep.mubr.bf16.mxu1 %v19408_v22  ;;  %7814 = vmatpush1.bf16.msra.mxu1 %v16000_v44  ;;  %v14514_v30 = vadd.f32 %v14513_v40, %v14512_v6  ;;  %v16017_v22 = vld [vmem:[%s21738_s4 + $0xa3c] ss:$12 sps:$4 sm:$0xff]   ;;  %v7237_v44 = vld [vmem:[#allocation2 + $0x178] sm:$0xf]  ;;  %v7228_v6 = vld [vmem:[#allocation2 + $0x130] sm:$0xff] }
 0x3fa   :  { %7889 = vmatpush2.bf16.msra.mxu0 %v16003_v60  ;;  %v14515_v14 = vpop.f32.mrf.mxu1  ;;  %7815 = vmatprep.subr.bf16.mxu1 %v16008_v7  ;;  %v16027_v60 = vld [vmem:[%s21738_s4 + $0xa10] ss:$12 sps:$4 sm:$0xff]   ;;  %v19936_v7 = vpack.c.bf16 %v7232_v0, %v7228_v6  ;;  %v16058_v6 = vld [vmem:[%s21738_s4 + $0x8ec] ss:$12 sps:$4 sm:$0xff]  }
 0x3fb   :  { %v5603_v45 = vadd.f32 %v14514_v30, %v19554_v57  ;;  %7890 = vmatprep.subr.bf16.mxu0 %v16011_v48  ;;  %v16015_v57 = vld [vmem:[%s21738_s4 + $0xa38] ss:$12 sps:$4 sm:$0xff]   ;;  %v19942_v48 = vpack.c.bf16 %v7237_v44, %v7237_v44  ;;  %v16028_v30 = vld [vmem:[%s21738_s4 + $0x810] ss:$12 sps:$4 sm:$0xff]   ;;  %v16055_v44 = vld [vmem:[%s21738_s4 + $0x968] ss:$12 sps:$4 sm:$0xff]  }
 0x3fc   :  { %v14516_v1 = vpop.f32.mrf.mxu1  ;;  %v16054_v0 = vld [vmem:[%s21738_s4 + $0x904] ss:$12 sps:$4 sm:$0xff]  }
 0x3fd   :  { %v19893_v54 = vadd.f32 %v19733_v33, %v5603_v45  ;;  %7816 = vmatpush1.bf16.msra.mxu1 %v16006_v11  ;;  %v14517_v24 = vadd.f32 %v14516_v1, %v14515_v14  ;;  %v16031_v11 = vld [vmem:[%s21738_s4 + $0x9f8] ss:$12 sps:$4 sm:$0xff]   ;;  %v16034_v14 = vld [vmem:[%s21738_s4 + $0x7fc] ss:$12 sps:$4 sm:$0xff]   ;;  %v16035_v1 = vld [vmem:[%s21738_s4 + $0x9e0] ss:$12 sps:$4 sm:$0xff]  }
 0x3fe   :  { %7891 = vmatpush2.bf16.msra.mxu0 %v16009_v4  ;;  %v14518_v41 = vpop.f32.mrf.mxu1  ;;  %7817 = vmatprep.subr.bf16.mxu1 %v16014_v49  ;;  %v7236_v49 = vld [vmem:[#allocation2 + $0x170] sm:$0xf] }
 0x3ff   :  { %v5606_v33 = vadd.f32 %v14517_v24, %v19569_v3  ;;  %7892 = vmatprep.subr.bf16.mxu0 %v16017_v22  ;;  %v16018_v3 = vld [vmem:[%s21738_s4 + $0x840] ss:$12 sps:$4 sm:$0xff]   ;;  %v16032_v22 = vld [vmem:[%s21738_s4 + $0x7f8] ss:$12 sps:$4 sm:$0xff]   ;;  %v19971_v24 = vpack.c.bf16 %v7236_v49, %v7236_v49  ;;  %v16066_v49 = vld [vmem:[%s21738_s4 + $0x8bc] ss:$12 sps:$4 sm:$0xff]  }
 0x400   :  { %7162 = vmatmul.mubr.bf16.gmra.mxu1 %v19443_v53  ;;  %v14519_v62 = vpop.f32.mrf.mxu1  ;;  %v16026_v53 = vld [vmem:[%s21738_s4 + $0x82c] ss:$12 sps:$4 sm:$0xff]  }
 0x401   :  { %v19912_v59 = vadd.f32 %v19760_v37, %v5606_v33  ;;  %7818 = vmatpush1.bf16.msra.mxu1 %v16012_v12  ;;  %7845 = vmatprep.mubr.bf16.mxu1 %v19905_v39  ;;  %v14520_v58 = vadd.f32 %v14519_v62, %v14518_v41  ;;  %v16038_v12 = vld [vmem:[%s21738_s4 + $0x7e4] ss:$12 sps:$4 sm:$0xff]   ;;  %v16040_v62 = vld [vmem:[%s21738_s4 + $0x948] ss:$12 sps:$4 sm:$0xff]  }
 0x402   :  { %7893 = vmatpush2.bf16.msra.mxu0 %v16015_v57  ;;  %v14521_v20 = vpop.f32.mrf.mxu1  ;;  %7819 = vmatprep.subr.bf16.mxu1 %v16020_v19  ;;  %v16036_v57 = vld [vmem:[%s21738_s4 + $0x7e0] ss:$12 sps:$4 sm:$0xff]  }
 0x403   :  { %v5611_v37 = vadd.f32 %v14520_v58, %v19586_v25  ;;  %7894 = vmatprep.subr.bf16.mxu0 %v16023_v9  ;;  %v16042_v19 = vld [vmem:[%s21738_s4 + $0x94c] ss:$12 sps:$4 sm:$0xff]   ;;  %v16043_v58 = vld [vmem:[%s21738_s4 + $0x9b0] ss:$12 sps:$4 sm:$0xff]  }
 0x404   :  { %v14522_v55 = vpop.f32.mrf.mxu1  ;;  %v16044_v20 = vld [vmem:[%s21738_s4 + $0x930] ss:$12 sps:$4 sm:$0xff]  }
 0x405   :  { %v19926_v10 = vadd.f32 %v19780_v21, %v5611_v37  ;;  %7820 = vmatpush1.bf16.msra.mxu1 %v16018_v3  ;;  %v16030_v21 = vld [vmem:[%s21738_s4 + $0x814] ss:$12 sps:$4 sm:$0xff]   ;;  %v16048_v37 = vld [vmem:[%s21738_s4 + $0x918] ss:$12 sps:$4 sm:$0xff]  }
 0x406   :  { %7895 = vmatpush2.bf16.msra.mxu0 %v16021_v15  ;;  %7821 = vmatprep.subr.bf16.mxu1 %v16026_v53  ;;  %v16046_v3 = vld [vmem:[%s21738_s4 + $0x934] ss:$12 sps:$4 sm:$0xff]   ;;  %v16047_v15 = vld [vmem:[%s21738_s4 + $0x998] ss:$12 sps:$4 sm:$0xff]   ;;  %v16050_v53 = vld [vmem:[%s21738_s4 + $0x91c] ss:$12 sps:$4 sm:$0xff]  }
 0x407   :  { %v19934_v25 = vpop.f32.mrf.mxu0  ;;  %7963 = vmatprep.subr.bf16.mxu0 %v21754_v63  ;;  %v16051_v55 = vld [vmem:[%s21738_s4 + $0x980] ss:$12 sps:$4 sm:$0xff]  }
 0x409   :  { %7897 = vmatmul.mubr.bf16.vlgmr.msra.gmra.mxu0 %v19936_v7  ;;  %7822 = vmatpush1.bf16.msra.mxu1 %v16024_v28  ;;  %v19945_v40 = vpop.f32.mrf.mxu0  ;;  %v16052_v28 = vld [vmem:[%s21738_s4 + $0x900] ss:$12 sps:$4 sm:$0xff]  }
 0x40a   :  { %13534 = vmatprep.mubr.msk.bf16.mxu0 %vm2307_vm8, %v19942_v48  ;;  %7964 = vmatpush1.bf16.msra.mxu0 %v16027_v60  ;;  %v16056_v60 = vld [vmem:[%s21738_s4 + $0x8e8] ss:$12 sps:$4 sm:$0xff]  }
 0x40b   :  { %v19958_v4 = vpop.f32.mrf.mxu0  ;;  %7823 = vmatprep.subr.bf16.mxu1 %v16030_v21  ;;  %7965 = vmatprep.subr.bf16.mxu0 %v21754_v63  ;;  %v16059_v21 = vld [vmem:[%s21738_s4 + $0xa70] ss:$12 sps:$4 sm:$0xff]  }
 0x40d   :  { %7824 = vmatpush1.bf16.msra.mxu1 %v16028_v30  ;;  %v19961_v45 = vpop.f32.mrf.mxu0  ;;  %v16062_v30 = vld [vmem:[%s21738_s4 + $0x8d4] ss:$12 sps:$4 sm:$0xff]  }
 0x40e   :  { %7966 = vmatpush1.bf16.msra.mxu0 %v16031_v11  ;;  %7825 = vmatprep.subr.bf16.mxu1 %v16034_v14  ;;  %v16060_v11 = vld [vmem:[%s21738_s4 + $0x8d0] ss:$12 sps:$4 sm:$0xff]   ;;  %v16063_v14 = vld [vmem:[%s21738_s4 + $0xa58] ss:$12 sps:$4 sm:$0xff]  }
 0x40f   :  { %v19969_v32 = vpop.f32.mrf.mxu0  ;;  %7967 = vmatprep.subr.bf16.mxu0 %v21754_v63 }
 0x411   :  { %7907 = vmatmul.mubr.bf16.gmra.mxu0 %v19971_v24  ;;  %7826 = vmatpush1.bf16.msra.mxu1 %v16032_v22  ;;  %v19978_v41 = vpop.f32.mrf.mxu0  ;;  %v16064_v22 = vld [vmem:[%s21738_s4 + $0x8b8] ss:$12 sps:$4 sm:$0xff]  }
 0x412   :  { %7968 = vmatpush1.bf16.msra.mxu0 %v16035_v1  ;;  %13535 = vmatprep.mubr.msk.bf16.mxu0 %vm2307_vm8, %v19789_v16  ;;  %v16067_v1 = vld [vmem:[%s21738_s4 + $0xa40] ss:$12 sps:$4 sm:$0xff]  }
 0x413   :  { %v6350_v33 = vpop.f32.mrf.mxu0  ;;  %7827 = vmatprep.subr.bf16.mxu1 %v16038_v12  ;;  %7969 = vmatprep.subr.bf16.mxu0 %v21754_v63  ;;  %v16070_v12 = vld [vmem:[%s21738_s4 + $0x8a4] ss:$12 sps:$4 sm:$0xff]  }
 0x414   :  { %v7230_v33 = vld [vmem:[#allocation2 + $0x140] sm:$0xff] }
 0x415   :  { %7828 = vmatpush1.bf16.msra.mxu1 %v16036_v57  ;;  %v6351_v9 = vpop.f32.mrf.mxu0  ;;  %v16068_v57 = vld [vmem:[%s21738_s4 + $0x8a0] ss:$12 sps:$4 sm:$0xff]  }
 0x416   :  { %7970 = vmatpush1.bf16.msra.mxu0 %v16039_v13  ;;  %7829 = vmatprep.subr.bf16.mxu1 %v16042_v19  ;;  %v16071_v13 = vld [vmem:[%s21738_s4 + $0xa28] ss:$12 sps:$4 sm:$0xff]   ;;  %v16072_v19 = vld [vmem:[%s21738_s4 + $0x950] ss:$12 sps:$4 sm:$0xff]   ;;  %v16075_v9 = vld [vmem:[%s21739_s5 + $0xa0c] ss:$12 sps:$4 sm:$0xff]  }
 0x417   :  { %7971 = vmatprep.subr.bf16.mxu0 %v21754_v63 }
 0x419   :  { %7830 = vmatpush2.bf16.msra.mxu1 %v16040_v62  ;;  %v7235_v62 = vld [vmem:[#allocation2 + $0x168] sm:$0xf] }
 0x41a   :  { %7972 = vmatpush1.bf16.msra.mxu0 %v16043_v58  ;;  %7831 = vmatprep.subr.bf16.mxu1 %v16046_v3  ;;  %v7226_v58 = vld [vmem:[#allocation2 + $0x120] sm:$0xff] }
 0x41b   :  { %7973 = vmatprep.subr.bf16.mxu0 %v21754_v63 }
 0x41d   :  { %7832 = vmatpush2.bf16.msra.mxu1 %v16044_v20  ;;  %v20075_v20 = vpack.c.bf16 %v7230_v33, %v7226_v58  ;;  %v16086_v33 = vld [vmem:[%s21738_s4 + $0x860] ss:$12 sps:$4 sm:$0xff]   ;;  %v16087_v58 = vld [vmem:[%s21738_s4 + $0x908] ss:$12 sps:$4 sm:$0xff]  }
 0x41e   :  { %7974 = vmatpush1.bf16.msra.mxu0 %v16047_v15  ;;  %7833 = vmatprep.subr.bf16.mxu1 %v16050_v53  ;;  %v16076_v15 = vld [vmem:[%s21738_s4 + $0x890] ss:$12 sps:$4 sm:$0xff]  }
 0x41f   :  { %7975 = vmatprep.subr.bf16.mxu0 %v21754_v63 }
 0x421   :  { %7834 = vmatpush2.bf16.msra.mxu1 %v16048_v37 }
 0x422   :  { %7976 = vmatpush1.bf16.msra.mxu0 %v16051_v55  ;;  %7835 = vmatprep.subr.bf16.mxu1 %v16054_v0  ;;  %v16073_v55 = vld [vmem:[%s21739_s5 + $0xa08] ss:$12 sps:$4 sm:$0xff]   ;;  %v20086_v0 = vpack.c.bf16 %v7235_v62, %v7235_v62 }
 0x423   :  { %7977 = vmatprep.subr.bf16.mxu0 %v21754_v63 }
 0x425   :  { %7836 = vmatpush2.bf16.msra.mxu1 %v16052_v28  ;;  %v16077_v28 = vld [vmem:[%s21738_s4 + $0x938] ss:$12 sps:$4 sm:$0xff]  }
 0x426   :  { %7978 = vmatpush1.bf16.msra.mxu0 %v16055_v44  ;;  %7837 = vmatprep.subr.bf16.mxu1 %v16058_v6 }
 0x427   :  { %7987 = vmatprep.subr.bf16.mxu0 %v21754_v63 }
 0x429   :  { %7838 = vmatpush2.bf16.msra.mxu1 %v16056_v60 }
 0x42a   :  { %7988 = vmatpush2.bf16.msra.mxu0 %v16059_v21  ;;  %7839 = vmatprep.subr.bf16.mxu1 %v16062_v30 }
 0x42b   :  { %7989 = vmatprep.subr.bf16.mxu0 %v21754_v63 }
 0x42d   :  { %7840 = vmatpush2.bf16.msra.mxu1 %v16060_v11  ;;  %v16081_v11 = vld [vmem:[%s21738_s4 + $0x878] ss:$12 sps:$4 sm:$0xff]  }
 0x42e   :  { %7990 = vmatpush2.bf16.msra.mxu0 %v16063_v14  ;;  %7841 = vmatprep.subr.bf16.mxu1 %v16066_v49 }
 0x42f   :  { %7991 = vmatprep.subr.bf16.mxu0 %v21754_v63 }
 0x431   :  { %7842 = vmatpush2.bf16.msra.mxu1 %v16064_v22  ;;  %v7234_v22 = vld [vmem:[#allocation2 + $0x160] sm:$0xf] }
 0x432   :  { %7992 = vmatpush2.bf16.msra.mxu0 %v16067_v1  ;;  %7843 = vmatprep.subr.bf16.mxu1 %v16070_v12  ;;  %v16082_v1 = vld [vmem:[%s21738_s4 + $0x920] ss:$12 sps:$4 sm:$0xff]  }
 0x433   :  { %7993 = vmatprep.subr.bf16.mxu0 %v21754_v63 }
 0x435   :  { %7844 = vmatpush2.bf16.msra.mxu1 %v16068_v57 }
 0x436   :  { %7994 = vmatpush2.bf16.msra.mxu0 %v16071_v13  ;;  %v6285_v3 = vpop.f32.mrf.mxu1  ;;  %14580 = vmatprep.subr.bf16.mxu1 %v16072_v19  ;;  %v20126_v19 = vpack.c.bf16 %v7234_v22, %v7234_v22  ;;  %v16100_v22 = vld [vmem:[%s21739_s5 + $0x994] ss:$12 sps:$4 sm:$0xff]  }
 0x437   :  { %v6337_v53 = vadd.f32 %v19934_v25, %v6285_v3  ;;  %v20081_v37 = vpop.f32.mrf.mxu0  ;;  %8632 = vmatprep.subr.bf16.mxu0 %v16075_v9  ;;  %v16080_v25 = vld [vmem:[%s21739_s5 + $0x9f4] ss:$12 sps:$4 sm:$0xff]  }
 0x438   :  { %7846 = vmatmul.mubr.bf16.vlgmr.msra.gmra.mxu1 %v20075_v20  ;;  %v6287_v44 = vpop.f32.mrf.mxu1 }
 0x439   :  { %v20096_v6 = vadd.f32 %v6337_v53, %v19066_v2  ;;  %7996 = vmatmul.mubr.bf16.vlgmr.msra.gmra.mxu0 %v19936_v7  ;;  %7855 = vmatprep.mubr.bf16.mxu1 %v20086_v0  ;;  %v6339_v60 = vadd.f32 %v19945_v40, %v6287_v44  ;;  %v6437_v21 = vpop.f32.mrf.mxu0  ;;  %v16078_v40 = vld [vmem:[%s21739_s5 + $0x9f0] ss:$12 sps:$4 sm:$0xff]   ;;  %v16091_v44 = vld [vmem:[%s21738_s4 + $0x848] ss:$12 sps:$4 sm:$0xff]  }
 0x43a   :  { %14581 = vmatpush3.bf16.msra.mxu1 %v16076_v15  ;;  %13536 = vmatprep.mubr.msk.bf16.mxu0 %vm2307_vm8, %v19942_v48  ;;  %v6289_v30 = vpop.f32.mrf.mxu1  ;;  %v16090_v15 = vld [vmem:[%s21739_s5 + $0x9c4] ss:$12 sps:$4 sm:$0xff]  }
 0x43b   :  { %8633 = vmatpush1.bf16.msra.mxu0 %v16073_v55  ;;  %v20107_v2 = vadd.f32 %v6339_v60, %v19077_v35  ;;  %v6341_v14 = vadd.f32 %v19958_v4, %v6289_v30  ;;  %v20110_v49 = vpop.f32.mrf.mxu0  ;;  %14582 = vmatprep.subr.bf16.mxu1 %v16077_v28  ;;  %v16085_v35 = vld [vmem:[%s21739_s5 + $0x9dc] ss:$12 sps:$4 sm:$0xff]   ;;  %v16095_v30 = vld [vmem:[%s21739_s5 + $0x9ac] ss:$12 sps:$4 sm:$0xff]  }
 0x43c   :  { %8634 = vmatprep.subr.bf16.mxu0 %v16080_v25  ;;  %v20118_v12 = vpop.f32.mrf.mxu1  ;;  %v16092_v60 = vld [vmem:[%s21738_s4 + $0x8f0] ss:$12 sps:$4 sm:$0xff]  }
 0x43d   :  { %v20124_v4 = vadd.f32 %v6341_v14, %v19094_v34  ;;  %v6440_v57 = vpop.f32.mrf.mxu0  ;;  %v16083_v34 = vld [vmem:[%s21739_s5 + $0x9d8] ss:$12 sps:$4 sm:$0xff]   ;;  %v16093_v14 = vld [vmem:[%s21739_s5 + $0x9a8] ss:$12 sps:$4 sm:$0xff]  }
 0x43e   :  { %14583 = vmatpush3.bf16.msra.mxu1 %v16081_v11  ;;  %v6295_v13 = vpop.f32.mrf.mxu1  ;;  %v16102_v57 = vld [vmem:[%s21738_s4 + $0x8c0] ss:$12 sps:$4 sm:$0xff]  }
 0x43f   :  { %8635 = vmatpush1.bf16.msra.mxu0 %v16078_v40  ;;  %v6347_v9 = vadd.f32 %v19969_v32, %v6295_v13  ;;  %v20132_v62 = vpop.f32.mrf.mxu0  ;;  %14584 = vmatprep.subr.bf16.mxu1 %v16082_v1  ;;  %v16097_v40 = vld [vmem:[%s21738_s4 + $0x8d8] ss:$12 sps:$4 sm:$0xff]   ;;  %v16105_v13 = vld [vmem:[%s21739_s5 + $0x97c] ss:$12 sps:$4 sm:$0xff]  }
 0x440   :  { %7856 = vmatmul.mubr.bf16.gmra.mxu1 %v20126_v19  ;;  %8636 = vmatprep.subr.bf16.mxu0 %v16085_v35  ;;  %v6297_v3 = vpop.f32.mrf.mxu1  ;;  %v16101_v1 = vld [vmem:[%s21738_s4 + $0x818] ss:$12 sps:$4 sm:$0xff]   ;;  %v16098_v35 = vld [vmem:[%s21739_s5 + $0x990] ss:$12 sps:$4 sm:$0xff]  }
 0x441   :  { %v20145_v32 = vadd.f32 %v6347_v9, %v19115_v46  ;;  %8004 = vmatmul.mubr.bf16.gmra.mxu0 %v19971_v24  ;;  %7947 = vmatprep.mubr.bf16.mxu1 %v19905_v39  ;;  %v6349_v53 = vadd.f32 %v19978_v41, %v6297_v3  ;;  %v6445_v55 = vpop.f32.mrf.mxu0  ;;  %v16088_v41 = vld [vmem:[%s21739_s5 + $0x9c0] ss:$12 sps:$4 sm:$0xff]   ;;  %v16103_v9 = vld [vmem:[%s21739_s5 + $0x978] ss:$12 sps:$4 sm:$0xff]   ;;  %v16111_v3 = vld [vmem:[%s21738_s4 + $0x7e8] ss:$12 sps:$4 sm:$0xff]  }
 0x442   :  { %14585 = vmatpush3.bf16.msra.mxu1 %v16086_v33  ;;  %13733 = vmatprep.mubr.msk.bf16.mxu0 %vm2307_vm8, %v19789_v16  ;;  %v6299_v28 = vpop.f32.mrf.mxu1  ;;  %v16106_v33 = vld [vmem:[%s21738_s4 + $0x800] ss:$12 sps:$4 sm:$0xff]  }
 0x443   :  { %8637 = vmatpush1.bf16.msra.mxu0 %v16083_v34  ;;  %v20156_v46 = vadd.f32 %v6349_v53, %v19126_v5  ;;  %v6446_v25 = vpop.f32.mrf.mxu0  ;;  %14586 = vmatprep.subr.bf16.mxu1 %v16087_v58  ;;  %v16096_v5 = vld [vmem:[%s21738_s4 + $0x830] ss:$12 sps:$4 sm:$0xff]   ;;  %v16107_v34 = vld [vmem:[%s21738_s4 + $0x8a8] ss:$12 sps:$4 sm:$0xff]   ;;  %v16114_v53 = vld [vmem:[%s21739_s5 + $0x88c] ss:$12 sps:$4 sm:$0xff]  }
 0x444   :  { %8638 = vmatprep.subr.bf16.mxu0 %v16090_v15  ;;  %v6300_v21 = vpop.f32.mrf.mxu1  ;;  %v16110_v58 = vld [vmem:[%s21739_s5 + $0x964] ss:$12 sps:$4 sm:$0xff]   ;;  %v16108_v15 = vld [vmem:[%s21739_s5 + $0x960] ss:$12 sps:$4 sm:$0xff]   ;;  %v16112_v28 = vld [vmem:[%s21739_s5 + $0x888] ss:$12 sps:$4 sm:$0xff]  }
 0x445   :  { %v6447_v11 = vpop.f32.mrf.mxu0  ;;  %v16117_v55 = vld [vmem:[%s21739_s5 + $0xa6c] ss:$12 sps:$4 sm:$0xff]   ;;  %v16115_v25 = vld [vmem:[%s21739_s5 + $0xa68] ss:$12 sps:$4 sm:$0xff]  }
 0x446   :  { %14587 = vmatpush3.bf16.msra.mxu1 %v16091_v44  ;;  %v16118_v11 = vld [vmem:[%s21739_s5 + $0x870] ss:$12 sps:$4 sm:$0xff]  }
 0x447   :  { %8639 = vmatpush1.bf16.msra.mxu0 %v16088_v41  ;;  %14588 = vmatprep.subr.bf16.mxu1 %v16092_v60  ;;  %v16120_v41 = vld [vmem:[%s21739_s5 + $0x874] ss:$12 sps:$4 sm:$0xff]  }
 0x448   :  { %8640 = vmatprep.subr.bf16.mxu0 %v16095_v30  ;;  %v16123_v60 = vld [vmem:[%s21739_s5 + $0xa54] ss:$12 sps:$4 sm:$0xff]  }
 0x44a   :  { %14589 = vmatpush3.bf16.msra.mxu1 %v16096_v5 }
 0x44b   :  { %8641 = vmatpush1.bf16.msra.mxu0 %v16093_v14  ;;  %14590 = vmatprep.subr.bf16.mxu1 %v16097_v40  ;;  %v16121_v14 = vld [vmem:[%s21739_s5 + $0xa50] ss:$12 sps:$4 sm:$0xff]  }
 0x44c   :  { %8642 = vmatprep.subr.bf16.mxu0 %v16100_v22  ;;  %v16126_v40 = vld [vmem:[%s21739_s5 + $0x85c] ss:$12 sps:$4 sm:$0xff]  }
 0x44e   :  { %14591 = vmatpush3.bf16.msra.mxu1 %v16101_v1  ;;  %v16129_v1 = vld [vmem:[%s21739_s5 + $0xa3c] ss:$12 sps:$4 sm:$0xff]  }
 0x44f   :  { %8643 = vmatpush1.bf16.msra.mxu0 %v16098_v35  ;;  %14592 = vmatprep.subr.bf16.mxu1 %v16102_v57 }
 0x450   :  { %8644 = vmatprep.subr.bf16.mxu0 %v16105_v13 }
 0x452   :  { %14593 = vmatpush3.bf16.msra.mxu1 %v16106_v33  ;;  %v16124_v33 = vld [vmem:[%s21739_s5 + $0x858] ss:$12 sps:$4 sm:$0xff]  }
 0x453   :  { %8645 = vmatpush1.bf16.msra.mxu0 %v16103_v9  ;;  %14594 = vmatprep.subr.bf16.mxu1 %v16107_v34  ;;  %v16132_v34 = vld [vmem:[%s21739_s5 + $0x844] ss:$12 sps:$4 sm:$0xff]  }
 0x454   :  { %8646 = vmatprep.subr.bf16.mxu0 %v16110_v58  ;;  %v16135_v58 = vld [vmem:[%s21739_s5 + $0xa24] ss:$12 sps:$4 sm:$0xff]  }
 0x456   :  { %14595 = vmatpush3.bf16.msra.mxu1 %v16111_v3 }
 0x457   :  { %8647 = vmatpush1.bf16.msra.mxu0 %v16108_v15  ;;  %v14540_v44 = vpop.f32.mrf.mxu1  ;;  %8581 = vmatprep.subr.bf16.mxu1 %v16114_v53 }
 0x458   :  { %8656 = vmatprep.subr.bf16.mxu0 %v16117_v55  ;;  %v16130_v55 = vld [vmem:[%s21739_s5 + $0x840] ss:$12 sps:$4 sm:$0xff]  }
 0x459   :  { %7948 = vmatmul.mubr.bf16.vlgmr.msra.gmra.mxu1 %v20075_v20  ;;  %v14541_v21 = vpop.f32.mrf.mxu1 }
 0x45a   :  { %7955 = vmatprep.mubr.bf16.mxu1 %v20086_v0  ;;  %8582 = vmatpush1.bf16.msra.mxu1 %v16112_v28  ;;  %v14542_v30 = vadd.f32 %v14541_v21, %v14540_v44  ;;  %v16133_v28 = vld [vmem:[%s21739_s5 + $0xa20] ss:$12 sps:$4 sm:$0xff]   ;;  %v16139_v21 = vld [vmem:[%s21739_s5 + $0xa10] ss:$12 sps:$4 sm:$0xff]  }
 0x45b   :  { %8657 = vmatpush2.bf16.msra.mxu0 %v16115_v25  ;;  %v14543_v5 = vpop.f32.mrf.mxu1  ;;  %8583 = vmatprep.subr.bf16.mxu1 %v16120_v41 }
 0x45c   :  { %v6436_v22 = vadd.f32 %v14542_v30, %v20081_v37  ;;  %8658 = vmatprep.subr.bf16.mxu0 %v16123_v60  ;;  %v16127_v37 = vld [vmem:[%s21739_s5 + $0xa38] ss:$12 sps:$4 sm:$0xff]   ;;  %v16136_v60 = vld [vmem:[%s21739_s5 + $0x828] ss:$12 sps:$4 sm:$0xff]  }
 0x45d   :  { %v14544_v35 = vpop.f32.mrf.mxu1 }
 0x45e   :  { %v20243_v57 = vadd.f32 %v6436_v22, %v19213_v56  ;;  %8584 = vmatpush1.bf16.msra.mxu1 %v16118_v11  ;;  %v14545_v13 = vadd.f32 %v14544_v35, %v14543_v5  ;;  %v16140_v11 = vld [vmem:[%s21739_s5 + $0x810] ss:$12 sps:$4 sm:$0xff]   ;;  %v16143_v5 = vld [vmem:[%s21739_s5 + $0x9f8] ss:$12 sps:$4 sm:$0xff]   ;;  %v16147_v35 = vld [vmem:[%s21739_s5 + $0x9e0] ss:$12 sps:$4 sm:$0xff]  }
 0x45f   :  { %8659 = vmatpush2.bf16.msra.mxu0 %v16121_v14  ;;  %v14546_v9 = vpop.f32.mrf.mxu1  ;;  %8585 = vmatprep.subr.bf16.mxu1 %v16126_v40  ;;  %v16146_v14 = vld [vmem:[%s21739_s5 + $0x7fc] ss:$12 sps:$4 sm:$0xff]  }
 0x460   :  { %v6439_v56 = vadd.f32 %v14545_v13, %v20110_v49  ;;  %8660 = vmatprep.subr.bf16.mxu0 %v16129_v1  ;;  %v16144_v1 = vld [vmem:[%s21739_s5 + $0x7f8] ss:$12 sps:$4 sm:$0xff]  }
 0x461   :  { %7956 = vmatmul.mubr.bf16.gmra.mxu1 %v20126_v19  ;;  %v14547_v3 = vpop.f32.mrf.mxu1 }
 0x462   :  { %v20260_v15 = vadd.f32 %v6439_v56, %v19232_v51  ;;  %8586 = vmatpush1.bf16.msra.mxu1 %v16124_v33  ;;  %8613 = vmatprep.mubr.bf16.mxu1 %v19905_v39  ;;  %v14548_v53 = vadd.f32 %v14547_v3, %v14546_v9  ;;  %v16138_v51 = vld [vmem:[%s21739_s5 + $0x82c] ss:$12 sps:$4 sm:$0xff]   ;;  %v16150_v33 = vld [vmem:[%s21739_s5 + $0x7e4] ss:$12 sps:$4 sm:$0xff]  }
 0x463   :  { %8661 = vmatpush2.bf16.msra.mxu0 %v16127_v37  ;;  %v14549_v49 = vpop.f32.mrf.mxu1  ;;  %8587 = vmatprep.subr.bf16.mxu1 %v16132_v34  ;;  %v16148_v37 = vld [vmem:[%s21739_s5 + $0x7e0] ss:$12 sps:$4 sm:$0xff]   ;;  %v16151_v34 = vld [vmem:[%s21739_s5 + $0x9c8] ss:$12 sps:$4 sm:$0xff]  }
 0x464   :  { %v6444_v44 = vadd.f32 %v14548_v53, %v20132_v62  ;;  %8662 = vmatprep.subr.bf16.mxu0 %v16135_v58  ;;  %v16154_v56 = vld [vmem:[%s21739_s5 + $0x94c] ss:$12 sps:$4 sm:$0xff]   ;;  %v16152_v53 = vld [vmem:[%s21739_s5 + $0x948] ss:$12 sps:$4 sm:$0xff]   ;;  %v16156_v49 = vld [vmem:[%s21739_s5 + $0x930] ss:$12 sps:$4 sm:$0xff]  }
 0x465   :  { %v14550_v25 = vpop.f32.mrf.mxu1 }
 0x466   :  { %v20274_v41 = vadd.f32 %v6444_v44, %v19246_v26  ;;  %8588 = vmatpush1.bf16.msra.mxu1 %v16130_v55  ;;  %v16142_v26 = vld [vmem:[%s21739_s5 + $0x814] ss:$12 sps:$4 sm:$0xff]   ;;  %v16160_v44 = vld [vmem:[%s21739_s5 + $0x918] ss:$12 sps:$4 sm:$0xff]  }
 0x467   :  { %8663 = vmatpush2.bf16.msra.mxu0 %v16133_v28  ;;  %8589 = vmatprep.subr.bf16.mxu1 %v16138_v51  ;;  %v16158_v55 = vld [vmem:[%s21739_s5 + $0x934] ss:$12 sps:$4 sm:$0xff]   ;;  %v16159_v28 = vld [vmem:[%s21739_s5 + $0x998] ss:$12 sps:$4 sm:$0xff]   ;;  %v16162_v51 = vld [vmem:[%s21739_s5 + $0x91c] ss:$12 sps:$4 sm:$0xff]  }
 0x468   :  { %v20282_v30 = vpop.f32.mrf.mxu0  ;;  %8731 = vmatprep.subr.bf16.mxu0 %v21754_v63  ;;  %v16163_v25 = vld [vmem:[%s21739_s5 + $0x980] ss:$12 sps:$4 sm:$0xff]  }
 0x46a   :  { %8665 = vmatmul.mubr.bf16.vlgmr.msra.gmra.mxu0 %v19936_v7  ;;  %8590 = vmatpush1.bf16.msra.mxu1 %v16136_v60  ;;  %v20289_v62 = vpop.f32.mrf.mxu0  ;;  %v16166_v60 = vld [vmem:[%s21739_s5 + $0x904] ss:$12 sps:$4 sm:$0xff]  }
 0x46b   :  { %13734 = vmatprep.mubr.msk.bf16.mxu0 %vm2307_vm8, %v19942_v48  ;;  %8732 = vmatpush1.bf16.msra.mxu0 %v16139_v21  ;;  %v16164_v21 = vld [vmem:[%s21739_s5 + $0x900] ss:$12 sps:$4 sm:$0xff]  }
 0x46c   :  { %v20302_v40 = vpop.f32.mrf.mxu0  ;;  %8591 = vmatprep.subr.bf16.mxu1 %v16142_v26  ;;  %8733 = vmatprep.subr.bf16.mxu0 %v21754_v63  ;;  %v16167_v26 = vld [vmem:[%s21739_s5 + $0x968] ss:$12 sps:$4 sm:$0xff]  }
 0x46e   :  { %8592 = vmatpush1.bf16.msra.mxu1 %v16140_v11  ;;  %v20305_v22 = vpop.f32.mrf.mxu0  ;;  %v16170_v11 = vld [vmem:[%s21739_s5 + $0x8ec] ss:$12 sps:$4 sm:$0xff]  }
 0x46f   :  { %8734 = vmatpush1.bf16.msra.mxu0 %v16143_v5  ;;  %8593 = vmatprep.subr.bf16.mxu1 %v16146_v14  ;;  %v16168_v5 = vld [vmem:[%s21739_s5 + $0x8e8] ss:$12 sps:$4 sm:$0xff]   ;;  %v16171_v14 = vld [vmem:[%s21739_s5 + $0xa70] ss:$12 sps:$4 sm:$0xff]  }
 0x470   :  { %v20313_v13 = vpop.f32.mrf.mxu0  ;;  %8735 = vmatprep.subr.bf16.mxu0 %v21754_v63 }
 0x472   :  { %8675 = vmatmul.mubr.bf16.gmra.mxu0 %v19971_v24  ;;  %8594 = vmatpush1.bf16.msra.mxu1 %v16144_v1  ;;  %v20320_v9 = vpop.f32.mrf.mxu0  ;;  %v16174_v1 = vld [vmem:[%s21739_s5 + $0x8d4] ss:$12 sps:$4 sm:$0xff]  }
 0x473   :  { %8736 = vmatpush1.bf16.msra.mxu0 %v16147_v35  ;;  %13735 = vmatprep.mubr.msk.bf16.mxu0 %vm2307_vm8, %v19789_v16  ;;  %v16155_v16 = vld [vmem:[%s21739_s5 + $0x9b0] ss:$12 sps:$4 sm:$0xff]  }
 0x474   :  { %v7118_v58 = vpop.f32.mrf.mxu0  ;;  %8595 = vmatprep.subr.bf16.mxu1 %v16150_v33  ;;  %8737 = vmatprep.subr.bf16.mxu0 %v21754_v63  ;;  %v16172_v35 = vld [vmem:[%s21739_s5 + $0x8d0] ss:$12 sps:$4 sm:$0xff]   ;;  %v16175_v33 = vld [vmem:[%s21739_s5 + $0xa58] ss:$12 sps:$4 sm:$0xff]  }
 0x475   :  { %v16182_v58 = vld [vmem:[%s21739_s5 + $0x8a4] ss:$12 sps:$4 sm:$0xff]  }
 0x476   :  { %8596 = vmatpush1.bf16.msra.mxu1 %v16148_v37  ;;  %v7119_v3 = vpop.f32.mrf.mxu0  ;;  %v16178_v37 = vld [vmem:[%s21739_s5 + $0x8bc] ss:$12 sps:$4 sm:$0xff]  }
 0x477   :  { %8738 = vmatpush1.bf16.msra.mxu0 %v16151_v34  ;;  %8597 = vmatprep.subr.bf16.mxu1 %v16154_v56  ;;  %v16176_v34 = vld [vmem:[%s21739_s5 + $0x8b8] ss:$12 sps:$4 sm:$0xff]   ;;  %v16179_v56 = vld [vmem:[%s21739_s5 + $0xa40] ss:$12 sps:$4 sm:$0xff]  }
 0x478   :  { %8739 = vmatprep.subr.bf16.mxu0 %v21754_v63  ;;  %v16180_v3 = vld [vmem:[%s21739_s5 + $0x8a0] ss:$12 sps:$4 sm:$0xff]  }
 0x47a   :  { %8598 = vmatpush2.bf16.msra.mxu1 %v16152_v53  ;;  %v16183_v53 = vld [vmem:[%s21739_s5 + $0xa28] ss:$12 sps:$4 sm:$0xff]  }
 0x47b   :  { %8740 = vmatpush1.bf16.msra.mxu0 %v16155_v16  ;;  %8599 = vmatprep.subr.bf16.mxu1 %v16158_v55  ;;  %v16184_v16 = vld [vmem:[%s21739_s5 + $0x950] ss:$12 sps:$4 sm:$0xff]   ;;  %v16187_v55 = vld [vmem:[%s21738_s4 + $0xcac] ss:$12 sps:$4 sm:$0xff]  }
 0x47c   :  { %8741 = vmatprep.subr.bf16.mxu0 %v21754_v63 }
 0x47e   :  { %8600 = vmatpush2.bf16.msra.mxu1 %v16156_v49 }
 0x47f   :  { %8742 = vmatpush1.bf16.msra.mxu0 %v16159_v28  ;;  %8601 = vmatprep.subr.bf16.mxu1 %v16162_v51  ;;  %v16188_v28 = vld [vmem:[%s21739_s5 + $0x890] ss:$12 sps:$4 sm:$0xff]  }
 0x480   :  { %8743 = vmatprep.subr.bf16.mxu0 %v21754_v63 }
 0x482   :  { %8602 = vmatpush2.bf16.msra.mxu1 %v16160_v44 }
 0x483   :  { %8744 = vmatpush1.bf16.msra.mxu0 %v16163_v25  ;;  %8603 = vmatprep.subr.bf16.mxu1 %v16166_v60  ;;  %v16185_v25 = vld [vmem:[%s21738_s4 + $0xca8] ss:$12 sps:$4 sm:$0xff]   ;;  %v16189_v60 = vld [vmem:[%s21739_s5 + $0x938] ss:$12 sps:$4 sm:$0xff]  }
 0x484   :  { %8745 = vmatprep.subr.bf16.mxu0 %v21754_v63 }
 0x486   :  { %8604 = vmatpush2.bf16.msra.mxu1 %v16164_v21 }
 0x487   :  { %8746 = vmatpush1.bf16.msra.mxu0 %v16167_v26  ;;  %8605 = vmatprep.subr.bf16.mxu1 %v16170_v11  ;;  %v16192_v26 = vld [vmem:[%s21738_s4 + $0xc94] ss:$12 sps:$4 sm:$0xff]  }
 0x488   :  { %8755 = vmatprep.subr.bf16.mxu0 %v21754_v63 }
 0x48a   :  { %8606 = vmatpush2.bf16.msra.mxu1 %v16168_v5 }
 0x48b   :  { %8756 = vmatpush2.bf16.msra.mxu0 %v16171_v14  ;;  %8607 = vmatprep.subr.bf16.mxu1 %v16174_v1  ;;  %v16193_v1 = vld [vmem:[%s21739_s5 + $0x878] ss:$12 sps:$4 sm:$0xff]  }
 0x48c   :  { %8757 = vmatprep.subr.bf16.mxu0 %v21754_v63 }
 0x48e   :  { %8608 = vmatpush2.bf16.msra.mxu1 %v16172_v35 }
 0x48f   :  { %8758 = vmatpush2.bf16.msra.mxu0 %v16175_v33  ;;  %8609 = vmatprep.subr.bf16.mxu1 %v16178_v37 }
 0x490   :  { %8759 = vmatprep.subr.bf16.mxu0 %v21754_v63 }
 0x492   :  { %8610 = vmatpush2.bf16.msra.mxu1 %v16176_v34 }
 0x493   :  { %8760 = vmatpush2.bf16.msra.mxu0 %v16179_v56  ;;  %8611 = vmatprep.subr.bf16.mxu1 %v16182_v58  ;;  %v8791_v56 = vld [vmem:[#allocation2 + $0x198] sm:$0xff] }
 0x494   :  { %8761 = vmatprep.subr.bf16.mxu0 %v21754_v63  ;;  %v8795_v58 = vld [vmem:[#allocation2 + $0x1b8] sm:$0xff] }
 0x496   :  { %8612 = vmatpush2.bf16.msra.mxu1 %v16180_v3 }
 0x497   :  { %8762 = vmatpush2.bf16.msra.mxu0 %v16183_v53  ;;  %v7053_v49 = vpop.f32.mrf.mxu1  ;;  %14608 = vmatprep.subr.bf16.mxu1 %v16184_v16  ;;  %v16198_v53 = vld [vmem:[%s21739_s5 + $0x860] ss:$12 sps:$4 sm:$0xff]  }
 0x498   :  { %v7105_v51 = vadd.f32 %v20282_v30, %v7053_v49  ;;  %v20421_v44 = vpop.f32.mrf.mxu0  ;;  %9426 = vmatprep.subr.bf16.mxu0 %v16187_v55  ;;  %v20478_v49 = vpack.c.bf16 %v8795_v58, %v8791_v56  ;;  %v16218_v56 = vld [vmem:[%s21739_s5 + $0x800] ss:$12 sps:$4 sm:$0xff]   ;;  %v16215_v58 = vld [vmem:[%s21738_s4 + $0xc18] ss:$12 sps:$4 sm:$0xff]  }
 0x499   :  { %8614 = vmatmul.mubr.bf16.vlgmr.msra.gmra.mxu1 %v20075_v20  ;;  %v7055_v21 = vpop.f32.mrf.mxu1 }
 0x49a   :  { %v20434_v30 = vadd.f32 %v7105_v51, %v19746_v47  ;;  %8764 = vmatmul.mubr.bf16.vlgmr.msra.gmra.mxu0 %v19936_v7  ;;  %8623 = vmatprep.mubr.bf16.mxu1 %v20086_v0  ;;  %v7107_v11 = vadd.f32 %v20289_v62, %v7055_v21  ;;  %v7205_v5 = vpop.f32.mrf.mxu0  ;;  %v16190_v62 = vld [vmem:[%s21738_s4 + $0xc90] ss:$12 sps:$4 sm:$0xff]  }
 0x49b   :  { %14609 = vmatpush3.bf16.msra.mxu1 %v16188_v28  ;;  %13736 = vmatprep.mubr.msk.bf16.mxu0 %vm2307_vm8, %v19942_v48  ;;  %v7057_v14 = vpop.f32.mrf.mxu1  ;;  %v16194_v48 = vld [vmem:[%s21739_s5 + $0x920] ss:$12 sps:$4 sm:$0xff]  }
 0x49c   :  { %9427 = vmatpush1.bf16.msra.mxu0 %v16185_v25  ;;  %v20445_v47 = vadd.f32 %v7107_v11, %v19757_v23  ;;  %v7109_v7 = vadd.f32 %v20302_v40, %v7057_v14  ;;  %v20448_v35 = vpop.f32.mrf.mxu0  ;;  %14610 = vmatprep.subr.bf16.mxu1 %v16189_v60  ;;  %v16197_v23 = vld [vmem:[%s21738_s4 + $0xc7c] ss:$12 sps:$4 sm:$0xff]   ;;  %v16207_v5 = vld [vmem:[%s21738_s4 + $0xc4c] ss:$12 sps:$4 sm:$0xff]  }
 0x49d   :  { %9428 = vmatprep.subr.bf16.mxu0 %v16192_v26  ;;  %v7059_v33 = vpop.f32.mrf.mxu1  ;;  %v16203_v26 = vld [vmem:[%s21739_s5 + $0x848] ss:$12 sps:$4 sm:$0xff]  }
 0x49e   :  { %v20460_v37 = vadd.f32 %v7109_v7, %v19774_v43  ;;  %v20463_v40 = vadd.f32 %v20305_v22, %v7059_v33  ;;  %v7208_v34 = vpop.f32.mrf.mxu0  ;;  %v16195_v43 = vld [vmem:[%s21738_s4 + $0xc78] ss:$12 sps:$4 sm:$0xff]   ;;  %v16199_v22 = vld [vmem:[%s21739_s5 + $0x908] ss:$12 sps:$4 sm:$0xff]   ;;  %v16210_v33 = vld [vmem:[%s21738_s4 + $0xc30] ss:$12 sps:$4 sm:$0xff]  }
 0x49f   :  { %14611 = vmatpush3.bf16.msra.mxu1 %v16193_v1  ;;  %v7063_v3 = vpop.f32.mrf.mxu1  ;;  %v16205_v1 = vld [vmem:[%s21738_s4 + $0xc48] ss:$12 sps:$4 sm:$0xff]   ;;  %v16209_v7 = vld [vmem:[%s21739_s5 + $0x8d8] ss:$12 sps:$4 sm:$0xff]  }
 0x4a0   :  { %9429 = vmatpush1.bf16.msra.mxu0 %v16190_v62  ;;  %v7115_v16 = vadd.f32 %v20313_v13, %v7063_v3  ;;  %v20469_v55 = vpop.f32.mrf.mxu0  ;;  %14612 = vmatprep.subr.bf16.mxu1 %v16194_v48  ;;  %v16202_v13 = vld [vmem:[%s21738_s4 + $0xc64] ss:$12 sps:$4 sm:$0xff]   ;;  %v16212_v62 = vld [vmem:[%s21738_s4 + $0xc34] ss:$12 sps:$4 sm:$0xff]   ;;  %v16217_v34 = vld [vmem:[%s21738_s4 + $0xc1c] ss:$12 sps:$4 sm:$0xff]  }
 0x4a1   :  { %8624 = vmatmul.mubr.bf16.gmra.mxu1 %v20126_v19  ;;  %9430 = vmatprep.subr.bf16.mxu0 %v16197_v23  ;;  %v7065_v28 = vpop.f32.mrf.mxu1  ;;  %v16213_v48 = vld [vmem:[%s21739_s5 + $0x818] ss:$12 sps:$4 sm:$0xff]   ;;  %v16214_v23 = vld [vmem:[%s21739_s5 + $0x8c0] ss:$12 sps:$4 sm:$0xff]   ;;  %v16219_v3 = vld [vmem:[%s21739_s5 + $0x8a8] ss:$12 sps:$4 sm:$0xff]  }
 0x4a2   :  { %v20484_v51 = vadd.f32 %v7115_v16, %v19795_v31  ;;  %8772 = vmatmul.mubr.bf16.gmra.mxu0 %v19971_v24  ;;  %8715 = vmatprep.mubr.bf16.mxu1 %v19905_v39  ;;  %v7117_v25 = vadd.f32 %v20320_v9, %v7065_v28  ;;  %v7213_v60 = vpop.f32.mrf.mxu0  ;;  %v16200_v39 = vld [vmem:[%s21738_s4 + $0xc60] ss:$12 sps:$4 sm:$0xff]   ;;  %v16204_v24 = vld [vmem:[%s21739_s5 + $0x8f0] ss:$12 sps:$4 sm:$0xff]   ;;  %v16223_v16 = vld [vmem:[%s21739_s5 + $0x7e8] ss:$12 sps:$4 sm:$0xff]  }
 0x4a3   :  { %14613 = vmatpush3.bf16.msra.mxu1 %v16198_v53  ;;  %13933 = vmatprep.mubr.msk.bf16.mxu0 %vm2307_vm8, %v20478_v49  ;;  %v7067_v21 = vpop.f32.mrf.mxu1  ;;  %v16222_v53 = vld [vmem:[%s21738_s4 + $0xc04] ss:$12 sps:$4 sm:$0xff]   ;;  %v16229_v28 = vld [vmem:[%s21738_s4 + $0xd0c] ss:$12 sps:$4 sm:$0xff]   ;;  %v16227_v60 = vld [vmem:[%s21738_s4 + $0xd08] ss:$12 sps:$4 sm:$0xff]  }
 0x4a4   :  { %9431 = vmatpush1.bf16.msra.mxu0 %v16195_v43  ;;  %v20495_v31 = vadd.f32 %v7117_v25, %v19806_v27  ;;  %v7214_v11 = vpop.f32.mrf.mxu0  ;;  %14614 = vmatprep.subr.bf16.mxu1 %v16199_v22  ;;  %v16208_v27 = vld [vmem:[%s21739_s5 + $0x830] ss:$12 sps:$4 sm:$0xff]   ;;  %v16220_v43 = vld [vmem:[%s21738_s4 + $0xc00] ss:$12 sps:$4 sm:$0xff]  }
 0x4a5   :  { %9432 = vmatprep.subr.bf16.mxu0 %v16202_v13  ;;  %v7068_v9 = vpop.f32.mrf.mxu1  ;;  %v16226_v22 = vld [vmem:[%s21738_s4 + $0xb2c] ss:$12 sps:$4 sm:$0xff]   ;;  %v16224_v13 = vld [vmem:[%s21738_s4 + $0xb28] ss:$12 sps:$4 sm:$0xff]  }
 0x4a6   :  { %v7215_v14 = vpop.f32.mrf.mxu0  ;;  %v16232_v21 = vld [vmem:[%s21738_s4 + $0xb14] ss:$12 sps:$4 sm:$0xff]  }
 0x4a7   :  { %14615 = vmatpush3.bf16.msra.mxu1 %v16203_v26  ;;  %v16235_v26 = vld [vmem:[%s21738_s4 + $0xcf4] ss:$12 sps:$4 sm:$0xff]  }
 0x4a8   :  { %9433 = vmatpush1.bf16.msra.mxu0 %v16200_v39  ;;  %14616 = vmatprep.subr.bf16.mxu1 %v16204_v24  ;;  %v16230_v24 = vld [vmem:[%s21738_s4 + $0xb10] ss:$12 sps:$4 sm:$0xff]  }
 0x4a9   :  { %9434 = vmatprep.subr.bf16.mxu0 %v16207_v5  ;;  %v16233_v5 = vld [vmem:[%s21738_s4 + $0xcf0] ss:$12 sps:$4 sm:$0xff]  }
 0x4ab   :  { %14617 = vmatpush3.bf16.msra.mxu1 %v16208_v27 }
 0x4ac   :  { %9435 = vmatpush1.bf16.msra.mxu0 %v16205_v1  ;;  %14618 = vmatprep.subr.bf16.mxu1 %v16209_v7  ;;  %v8789_v1 = vld [vmem:[#allocation2 + $0x188] sm:$0xff] }
 0x4ad   :  { %9436 = vmatprep.subr.bf16.mxu0 %v16212_v62  ;;  %v8793_v7 = vld [vmem:[#allocation2 + $0x1a8] sm:$0xff] }
 0x4af   :  { %14619 = vmatpush3.bf16.msra.mxu1 %v16213_v48 }
 0x4b0   :  { %9437 = vmatpush1.bf16.msra.mxu0 %v16210_v33  ;;  %14620 = vmatprep.subr.bf16.mxu1 %v16214_v23  ;;  %v16236_v33 = vld [vmem:[%s21738_s4 + $0xaf8] ss:$12 sps:$4 sm:$0xff]  }
 0x4b1   :  { %9438 = vmatprep.subr.bf16.mxu0 %v16217_v34  ;;  %v16244_v34 = vld [vmem:[%s21738_s4 + $0xae4] ss:$12 sps:$4 sm:$0xff]  }
 0x4b3   :  { %14621 = vmatpush3.bf16.msra.mxu1 %v16218_v56  ;;  %v20594_v56 = vpack.c.bf16 %v8793_v7, %v8789_v1  ;;  %v16256_v7 = vld [vmem:[%s21738_s4 + $0xa98] ss:$12 sps:$4 sm:$0xff]  }
 0x4b4   :  { %9439 = vmatpush1.bf16.msra.mxu0 %v16215_v58  ;;  %14622 = vmatprep.subr.bf16.mxu1 %v16219_v3  ;;  %v16247_v58 = vld [vmem:[%s21738_s4 + $0xcc4] ss:$12 sps:$4 sm:$0xff]  }
 0x4b5   :  { %9440 = vmatprep.subr.bf16.mxu0 %v16222_v53 }
 0x4b7   :  { %14623 = vmatpush3.bf16.msra.mxu1 %v16223_v16 }
 0x4b8   :  { %9441 = vmatpush1.bf16.msra.mxu0 %v16220_v43  ;;  %v14568_v25 = vpop.f32.mrf.mxu1  ;;  %9375 = vmatprep.subr.bf16.mxu1 %v16226_v22  ;;  %v16245_v22 = vld [vmem:[%s21738_s4 + $0xcc0] ss:$12 sps:$4 sm:$0xff]  }
 0x4b9   :  { %9450 = vmatprep.subr.bf16.mxu0 %v16229_v28 }
 0x4ba   :  { %8716 = vmatmul.mubr.bf16.vlgmr.msra.gmra.mxu1 %v20075_v20  ;;  %v14569_v11 = vpop.f32.mrf.mxu1  ;;  %v16238_v20 = vld [vmem:[%s21738_s4 + $0xafc] ss:$12 sps:$4 sm:$0xff]  }
 0x4bb   :  { %8723 = vmatprep.mubr.bf16.mxu1 %v20086_v0  ;;  %9376 = vmatpush1.bf16.msra.mxu1 %v16224_v13  ;;  %v14570_v39 = vadd.f32 %v14569_v11, %v14568_v25  ;;  %v16241_v0 = vld [vmem:[%s21738_s4 + $0xcdc] ss:$12 sps:$4 sm:$0xff]   ;;  %v8790_v13 = vld [vmem:[#allocation2 + $0x190] sm:$0xff] }
 0x4bc   :  { %9451 = vmatpush2.bf16.msra.mxu0 %v16227_v60  ;;  %v14571_v9 = vpop.f32.mrf.mxu1  ;;  %9377 = vmatprep.subr.bf16.mxu1 %v16232_v21  ;;  %v8794_v25 = vld [vmem:[#allocation2 + $0x1b0] sm:$0xff] }
 0x4bd   :  { %v7204_v14 = vadd.f32 %v14570_v39, %v20421_v44  ;;  %9452 = vmatprep.subr.bf16.mxu0 %v16235_v26  ;;  %v16239_v44 = vld [vmem:[%s21738_s4 + $0xcd8] ss:$12 sps:$4 sm:$0xff]   ;;  %v16248_v21 = vld [vmem:[%s21738_s4 + $0xac8] ss:$12 sps:$4 sm:$0xff]   ;;  %v16251_v11 = vld [vmem:[%s21738_s4 + $0xcb0] ss:$12 sps:$4 sm:$0xff]   ;;  %v20625_v39 = vpack.c.bf16 %v8794_v25, %v8790_v13 }
 0x4be   :  { %v14572_v27 = vpop.f32.mrf.mxu1  ;;  %v8799_v26 = vld [vmem:[#allocation2 + $0x1d8] sm:$0xf]  ;;  %v16274_v13 = vld [vmem:[%s21738_s4 + $0xbbc] ss:$12 sps:$4 sm:$0xff]  }
 0x4bf   :  { %v20582_v62 = vadd.f32 %v7204_v14, %v19893_v54  ;;  %9378 = vmatpush1.bf16.msra.mxu1 %v16230_v24  ;;  %v14573_v48 = vadd.f32 %v14572_v27, %v14571_v9  ;;  %v20631_v24 = vpack.c.bf16 %v8799_v26, %v8799_v26  ;;  %v16258_v14 = vld [vmem:[%s21738_s4 + $0xa9c] ss:$12 sps:$4 sm:$0xff]   ;;  %v8798_v27 = vld [vmem:[#allocation2 + $0x1d0] sm:$0xf]  ;;  %v16272_v25 = vld [vmem:[%s21738_s4 + $0xbb8] ss:$12 sps:$4 sm:$0xff]  }
 0x4c0   :  { %9453 = vmatpush2.bf16.msra.mxu0 %v16233_v5  ;;  %v14574_v23 = vpop.f32.mrf.mxu1  ;;  %9379 = vmatprep.subr.bf16.mxu1 %v16238_v20  ;;  %v16252_v5 = vld [vmem:[%s21738_s4 + $0xab0] ss:$12 sps:$4 sm:$0xff]   ;;  %v16255_v20 = vld [vmem:[%s21738_s4 + $0xc98] ss:$12 sps:$4 sm:$0xff]  }
 0x4c1   :  { %v7207_v54 = vadd.f32 %v14573_v48, %v20448_v35  ;;  %9454 = vmatprep.subr.bf16.mxu0 %v16241_v0  ;;  %v16242_v35 = vld [vmem:[%s21738_s4 + $0xae0] ss:$12 sps:$4 sm:$0xff]   ;;  %v16278_v26 = vld [vmem:[%s21738_s4 + $0xba4] ss:$12 sps:$4 sm:$0xff]  }
 0x4c2   :  { %8724 = vmatmul.mubr.bf16.gmra.mxu1 %v20126_v19  ;;  %v14575_v3 = vpop.f32.mrf.mxu1  ;;  %v16259_v48 = vld [vmem:[%s21738_s4 + $0xc80] ss:$12 sps:$4 sm:$0xff]  }
 0x4c3   :  { %v20601_v53 = vadd.f32 %v7207_v54, %v19912_v59  ;;  %9380 = vmatpush1.bf16.msra.mxu1 %v16236_v33  ;;  %9407 = vmatprep.mubr.bf16.mxu1 %v20594_v56  ;;  %v14576_v16 = vadd.f32 %v14575_v3, %v14574_v23  ;;  %v16250_v59 = vld [vmem:[%s21738_s4 + $0xacc] ss:$12 sps:$4 sm:$0xff]   ;;  %v20660_v23 = vpack.c.bf16 %v8798_v27, %v8798_v27  ;;  %v16286_v27 = vld [vmem:[%s21738_s4 + $0xb74] ss:$12 sps:$4 sm:$0xff]  }
 0x4c4   :  { %9455 = vmatpush2.bf16.msra.mxu0 %v16239_v44  ;;  %v14577_v43 = vpop.f32.mrf.mxu1  ;;  %9381 = vmatprep.subr.bf16.mxu1 %v16244_v34  ;;  %v16262_v44 = vld [vmem:[%s21738_s4 + $0xa84] ss:$12 sps:$4 sm:$0xff]   ;;  %v16260_v54 = vld [vmem:[%s21738_s4 + $0xa80] ss:$12 sps:$4 sm:$0xff]  }
 0x4c5   :  { %v7212_v19 = vadd.f32 %v14576_v16, %v20469_v55  ;;  %9456 = vmatprep.subr.bf16.mxu0 %v16247_v58  ;;  %v16263_v58 = vld [vmem:[%s21738_s4 + $0xc68] ss:$12 sps:$4 sm:$0xff]   ;;  %v16266_v3 = vld [vmem:[%s21738_s4 + $0xbec] ss:$12 sps:$4 sm:$0xff]  }
 0x4c6   :  { %v14578_v28 = vpop.f32.mrf.mxu1  ;;  %v16264_v43 = vld [vmem:[%s21738_s4 + $0xbe8] ss:$12 sps:$4 sm:$0xff]  }
 0x4c7   :  { %v20615_v60 = vadd.f32 %v7212_v19, %v19926_v10  ;;  %9382 = vmatpush1.bf16.msra.mxu1 %v16242_v35  ;;  %v16254_v10 = vld [vmem:[%s21738_s4 + $0xab4] ss:$12 sps:$4 sm:$0xff]   ;;  %v16268_v19 = vld [vmem:[%s21738_s4 + $0xbd0] ss:$12 sps:$4 sm:$0xff]   ;;  %v16271_v28 = vld [vmem:[%s21738_s4 + $0xc38] ss:$12 sps:$4 sm:$0xff]  }
 0x4c8   :  { %9457 = vmatpush2.bf16.msra.mxu0 %v16245_v22  ;;  %9383 = vmatprep.subr.bf16.mxu1 %v16250_v59  ;;  %v16267_v22 = vld [vmem:[%s21738_s4 + $0xc50] ss:$12 sps:$4 sm:$0xff]   ;;  %v16270_v59 = vld [vmem:[%s21738_s4 + $0xbd4] ss:$12 sps:$4 sm:$0xff]  }
 0x4c9   :  { %v20623_v55 = vpop.f32.mrf.mxu0  ;;  %9525 = vmatprep.subr.bf16.mxu0 %v21754_v63 }
 0x4cb   :  { %9459 = vmatmul.mubr.bf16.vlgmr.msra.gmra.mxu0 %v20625_v39  ;;  %9384 = vmatpush1.bf16.msra.mxu1 %v16248_v21  ;;  %v20634_v9 = vpop.f32.mrf.mxu0  ;;  %v16275_v21 = vld [vmem:[%s21738_s4 + $0xc20] ss:$12 sps:$4 sm:$0xff]  }
 0x4cc   :  { %13934 = vmatprep.mubr.msk.bf16.mxu0 %vm2307_vm8, %v20631_v24  ;;  %9526 = vmatpush1.bf16.msra.mxu0 %v16251_v11  ;;  %v16276_v11 = vld [vmem:[%s21738_s4 + $0xba0] ss:$12 sps:$4 sm:$0xff]  }
 0x4cd   :  { %v20647_v0 = vpop.f32.mrf.mxu0  ;;  %9385 = vmatprep.subr.bf16.mxu1 %v16254_v10  ;;  %9527 = vmatprep.subr.bf16.mxu0 %v21754_v63  ;;  %v16279_v10 = vld [vmem:[%s21738_s4 + $0xc08] ss:$12 sps:$4 sm:$0xff]  }
 0x4cf   :  { %9386 = vmatpush1.bf16.msra.mxu1 %v16252_v5  ;;  %v20650_v1 = vpop.f32.mrf.mxu0  ;;  %v16282_v5 = vld [vmem:[%s21738_s4 + $0xb8c] ss:$12 sps:$4 sm:$0xff]  }
 0x4d0   :  { %9528 = vmatpush1.bf16.msra.mxu0 %v16255_v20  ;;  %9387 = vmatprep.subr.bf16.mxu1 %v16258_v14  ;;  %v16280_v20 = vld [vmem:[%s21738_s4 + $0xb88] ss:$12 sps:$4 sm:$0xff]   ;;  %v16283_v14 = vld [vmem:[%s21738_s4 + $0xd10] ss:$12 sps:$4 sm:$0xff]  }
 0x4d1   :  { %v20658_v33 = vpop.f32.mrf.mxu0  ;;  %9529 = vmatprep.subr.bf16.mxu0 %v21754_v63 }
 0x4d3   :  { %9469 = vmatmul.mubr.bf16.gmra.mxu0 %v20660_v23  ;;  %9388 = vmatpush1.bf16.msra.mxu1 %v16256_v7  ;;  %v20667_v34 = vpop.f32.mrf.mxu0  ;;  %v16284_v7 = vld [vmem:[%s21738_s4 + $0xb70] ss:$12 sps:$4 sm:$0xff]  }
 0x4d4   :  { %9530 = vmatpush1.bf16.msra.mxu0 %v16259_v48  ;;  %13935 = vmatprep.mubr.msk.bf16.mxu0 %vm2307_vm8, %v20478_v49  ;;  %v16287_v48 = vld [vmem:[%s21738_s4 + $0xcf8] ss:$12 sps:$4 sm:$0xff]  }
 0x4d5   :  { %v7912_v16 = vpop.f32.mrf.mxu0  ;;  %9389 = vmatprep.subr.bf16.mxu1 %v16262_v44  ;;  %9531 = vmatprep.subr.bf16.mxu0 %v21754_v63  ;;  %v16290_v44 = vld [vmem:[%s21738_s4 + $0xb5c] ss:$12 sps:$4 sm:$0xff]  }
 0x4d6   :  { %v16292_v16 = vld [vmem:[%s21738_s4 + $0xb40] ss:$12 sps:$4 sm:$0xff]  }
 0x4d7   :  { %9390 = vmatpush1.bf16.msra.mxu1 %v16260_v54  ;;  %v7913_v35 = vpop.f32.mrf.mxu0  ;;  %v16288_v54 = vld [vmem:[%s21738_s4 + $0xb58] ss:$12 sps:$4 sm:$0xff]  }
 0x4d8   :  { %9532 = vmatpush1.bf16.msra.mxu0 %v16263_v58  ;;  %9391 = vmatprep.subr.bf16.mxu1 %v16266_v3  ;;  %v16291_v58 = vld [vmem:[%s21738_s4 + $0xce0] ss:$12 sps:$4 sm:$0xff]   ;;  %v16294_v3 = vld [vmem:[%s21738_s4 + $0xb44] ss:$12 sps:$4 sm:$0xff]   ;;  %v16295_v35 = vld [vmem:[%s21738_s4 + $0xcc8] ss:$12 sps:$4 sm:$0xff]  }
 0x4d9   :  { %9533 = vmatprep.subr.bf16.mxu0 %v21754_v63 }
 0x4db   :  { %9392 = vmatpush2.bf16.msra.mxu1 %v16264_v43  ;;  %v16296_v43 = vld [vmem:[%s21738_s4 + $0xbf0] ss:$12 sps:$4 sm:$0xff]  }
 0x4dc   :  { %9534 = vmatpush1.bf16.msra.mxu0 %v16267_v22  ;;  %9393 = vmatprep.subr.bf16.mxu1 %v16270_v59  ;;  %v8788_v22 = vld [vmem:[#allocation2 + $0x180] sm:$0xff] }
 0x4dd   :  { %9535 = vmatprep.subr.bf16.mxu0 %v21754_v63  ;;  %v8792_v59 = vld [vmem:[#allocation2 + $0x1a0] sm:$0xff] }
 0x4df   :  { %9394 = vmatpush2.bf16.msra.mxu1 %v16268_v19  ;;  %v16299_v19 = vld [vmem:[%s21739_s5 + $0xcac] ss:$12 sps:$4 sm:$0xff]  }
 0x4e0   :  { %9536 = vmatpush1.bf16.msra.mxu0 %v16271_v28  ;;  %9395 = vmatprep.subr.bf16.mxu1 %v16274_v13  ;;  %v8797_v28 = vld [vmem:[#allocation2 + $0x1c8] sm:$0xf] }
 0x4e1   :  { %9537 = vmatprep.subr.bf16.mxu0 %v21754_v63 }
 0x4e3   :  { %9396 = vmatpush2.bf16.msra.mxu1 %v16272_v25  ;;  %v20764_v25 = vpack.c.bf16 %v8792_v59, %v8788_v22 }
 0x4e4   :  { %9538 = vmatpush1.bf16.msra.mxu0 %v16275_v21  ;;  %9397 = vmatprep.subr.bf16.mxu1 %v16278_v26  ;;  %v16300_v21 = vld [vmem:[%s21738_s4 + $0xb30] ss:$12 sps:$4 sm:$0xff]  }
 0x4e5   :  { %9539 = vmatprep.subr.bf16.mxu0 %v21754_v63 }
 0x4e7   :  { %9398 = vmatpush2.bf16.msra.mxu1 %v16276_v11 }
 0x4e8   :  { %9540 = vmatpush1.bf16.msra.mxu0 %v16279_v10  ;;  %9399 = vmatprep.subr.bf16.mxu1 %v16282_v5  ;;  %v16297_v10 = vld [vmem:[%s21739_s5 + $0xca8] ss:$12 sps:$4 sm:$0xff]   ;;  %v20775_v5 = vpack.c.bf16 %v8797_v28, %v8797_v28 }
 0x4e9   :  { %9549 = vmatprep.subr.bf16.mxu0 %v21754_v63 }
 0x4eb   :  { %9400 = vmatpush2.bf16.msra.mxu1 %v16280_v20  ;;  %v16301_v20 = vld [vmem:[%s21738_s4 + $0xbd8] ss:$12 sps:$4 sm:$0xff]  }
 0x4ec   :  { %9550 = vmatpush2.bf16.msra.mxu0 %v16283_v14  ;;  %9401 = vmatprep.subr.bf16.mxu1 %v16286_v27 }
 0x4ed   :  { %9551 = vmatprep.subr.bf16.mxu0 %v21754_v63 }
 0x4ef   :  { %9402 = vmatpush2.bf16.msra.mxu1 %v16284_v7 }
 0x4f0   :  { %9552 = vmatpush2.bf16.msra.mxu0 %v16287_v48  ;;  %9403 = vmatprep.subr.bf16.mxu1 %v16290_v44 }
 0x4f1   :  { %9553 = vmatprep.subr.bf16.mxu0 %v21754_v63 }
 0x4f3   :  { %9404 = vmatpush2.bf16.msra.mxu1 %v16288_v54  ;;  %v16305_v54 = vld [vmem:[%s21738_s4 + $0xb18] ss:$12 sps:$4 sm:$0xff]  }
 0x4f4   :  { %9554 = vmatpush2.bf16.msra.mxu0 %v16291_v58  ;;  %9405 = vmatprep.subr.bf16.mxu1 %v16294_v3 }
 0x4f5   :  { %9555 = vmatprep.subr.bf16.mxu0 %v21754_v63 }
 0x4f7   :  { %9406 = vmatpush2.bf16.msra.mxu1 %v16292_v16  ;;  %v8796_v16 = vld [vmem:[#allocation2 + $0x1c0] sm:$0xf] }
 0x4f8   :  { %9556 = vmatpush2.bf16.msra.mxu0 %v16295_v35  ;;  %v7847_v13 = vpop.f32.mrf.mxu1  ;;  %14636 = vmatprep.subr.bf16.mxu1 %v16296_v43  ;;  %v16306_v35 = vld [vmem:[%s21738_s4 + $0xbc0] ss:$12 sps:$4 sm:$0xff]   ;;  %v20816_v28 = vpack.c.bf16 %v8796_v16, %v8796_v16 }
 0x4f9   :  { %v7899_v26 = vadd.f32 %v20623_v55, %v7847_v13  ;;  %v20770_v11 = vpop.f32.mrf.mxu0  ;;  %10194 = vmatprep.subr.bf16.mxu0 %v16299_v19  ;;  %v16304_v55 = vld [vmem:[%s21739_s5 + $0xc94] ss:$12 sps:$4 sm:$0xff]  }
 0x4fa   :  { %9408 = vmatmul.mubr.bf16.vlgmr.msra.gmra.mxu1 %v20764_v25  ;;  %v7849_v14 = vpop.f32.mrf.mxu1  ;;  %v16310_v13 = vld [vmem:[%s21738_s4 + $0xb00] ss:$12 sps:$4 sm:$0xff]  }
 0x4fb   :  { %v20785_v27 = vadd.f32 %v7899_v26, %v20096_v6  ;;  %9558 = vmatmul.mubr.bf16.vlgmr.msra.gmra.mxu0 %v20625_v39  ;;  %9417 = vmatprep.mubr.bf16.mxu1 %v20775_v5  ;;  %v7901_v7 = vadd.f32 %v20634_v9, %v7849_v14  ;;  %v7999_v48 = vpop.f32.mrf.mxu0  ;;  %v16302_v9 = vld [vmem:[%s21739_s5 + $0xc90] ss:$12 sps:$4 sm:$0xff]  }
 0x4fc   :  { %14637 = vmatpush3.bf16.msra.mxu1 %v16300_v21  ;;  %13936 = vmatprep.mubr.msk.bf16.mxu0 %vm2307_vm8, %v20631_v24  ;;  %v7851_v44 = vpop.f32.mrf.mxu1  ;;  %v16315_v48 = vld [vmem:[%s21738_s4 + $0xae8] ss:$12 sps:$4 sm:$0xff]  }
 0x4fd   :  { %10195 = vmatpush1.bf16.msra.mxu0 %v16297_v10  ;;  %v20796_v6 = vadd.f32 %v7901_v7, %v20107_v2  ;;  %v7903_v58 = vadd.f32 %v20647_v0, %v7851_v44  ;;  %v20799_v3 = vpop.f32.mrf.mxu0  ;;  %14638 = vmatprep.subr.bf16.mxu1 %v16301_v20  ;;  %v16309_v2 = vld [vmem:[%s21739_s5 + $0xc7c] ss:$12 sps:$4 sm:$0xff]   ;;  %v16314_v20 = vld [vmem:[%s21739_s5 + $0xc64] ss:$12 sps:$4 sm:$0xff]  }
 0x4fe   :  { %10196 = vmatprep.subr.bf16.mxu0 %v16304_v55  ;;  %v7853_v43 = vpop.f32.mrf.mxu1 }
 0x4ff   :  { %v20811_v0 = vadd.f32 %v7903_v58, %v20124_v4  ;;  %v20814_v22 = vadd.f32 %v20650_v1, %v7853_v43  ;;  %v8002_v59 = vpop.f32.mrf.mxu0  ;;  %v16307_v4 = vld [vmem:[%s21739_s5 + $0xc78] ss:$12 sps:$4 sm:$0xff]   ;;  %v16311_v1 = vld [vmem:[%s21738_s4 + $0xba8] ss:$12 sps:$4 sm:$0xff]  }
 0x500   :  { %14639 = vmatpush3.bf16.msra.mxu1 %v16305_v54  ;;  %v7857_v19 = vpop.f32.mrf.mxu1  ;;  %v16316_v54 = vld [vmem:[%s21738_s4 + $0xb90] ss:$12 sps:$4 sm:$0xff]   ;;  %v16321_v43 = vld [vmem:[%s21738_s4 + $0xb78] ss:$12 sps:$4 sm:$0xff]  }
 0x501   :  { %10197 = vmatpush1.bf16.msra.mxu0 %v16302_v9  ;;  %v7909_v21 = vadd.f32 %v20658_v33, %v7857_v19  ;;  %v20822_v26 = vpop.f32.mrf.mxu0  ;;  %14640 = vmatprep.subr.bf16.mxu1 %v16306_v35  ;;  %v16319_v9 = vld [vmem:[%s21739_s5 + $0xc4c] ss:$12 sps:$4 sm:$0xff]   ;;  %v16317_v35 = vld [vmem:[%s21739_s5 + $0xc48] ss:$12 sps:$4 sm:$0xff]   ;;  %v16322_v19 = vld [vmem:[%s21739_s5 + $0xc30] ss:$12 sps:$4 sm:$0xff]  }
 0x502   :  { %9418 = vmatmul.mubr.bf16.gmra.mxu1 %v20816_v28  ;;  %10198 = vmatprep.subr.bf16.mxu0 %v16309_v2  ;;  %v7859_v10 = vpop.f32.mrf.mxu1  ;;  %v16324_v2 = vld [vmem:[%s21739_s5 + $0xc34] ss:$12 sps:$4 sm:$0xff]   ;;  %v16325_v59 = vld [vmem:[%s21738_s4 + $0xab8] ss:$12 sps:$4 sm:$0xff]  }
 0x503   :  { %v20835_v33 = vadd.f32 %v7909_v21, %v20145_v32  ;;  %9566 = vmatmul.mubr.bf16.gmra.mxu0 %v20660_v23  ;;  %9509 = vmatprep.mubr.bf16.mxu1 %v20594_v56  ;;  %v7911_v14 = vadd.f32 %v20667_v34, %v7859_v10  ;;  %v8007_v55 = vpop.f32.mrf.mxu0  ;;  %v16312_v34 = vld [vmem:[%s21739_s5 + $0xc60] ss:$12 sps:$4 sm:$0xff]   ;;  %v16329_v21 = vld [vmem:[%s21739_s5 + $0xc1c] ss:$12 sps:$4 sm:$0xff]  }
 0x504   :  { %14641 = vmatpush3.bf16.msra.mxu1 %v16310_v13  ;;  %14133 = vmatprep.mubr.msk.bf16.mxu0 %vm2307_vm8, %v20478_v49  ;;  %v7861_v7 = vpop.f32.mrf.mxu1  ;;  %v16326_v13 = vld [vmem:[%s21738_s4 + $0xb60] ss:$12 sps:$4 sm:$0xff]   ;;  %v16331_v10 = vld [vmem:[%s21738_s4 + $0xb48] ss:$12 sps:$4 sm:$0xff]  }
 0x505   :  { %10199 = vmatpush1.bf16.msra.mxu0 %v16307_v4  ;;  %v20846_v32 = vadd.f32 %v7911_v14, %v20156_v46  ;;  %v8008_v44 = vpop.f32.mrf.mxu0  ;;  %14642 = vmatprep.subr.bf16.mxu1 %v16311_v1  ;;  %v16320_v46 = vld [vmem:[%s21738_s4 + $0xad0] ss:$12 sps:$4 sm:$0xff]   ;;  %v16330_v4 = vld [vmem:[%s21738_s4 + $0xaa0] ss:$12 sps:$4 sm:$0xff]   ;;  %v16327_v1 = vld [vmem:[%s21739_s5 + $0xc18] ss:$12 sps:$4 sm:$0xff]  }
 0x506   :  { %10200 = vmatprep.subr.bf16.mxu0 %v16314_v20  ;;  %v7862_v58 = vpop.f32.mrf.mxu1  ;;  %v16334_v20 = vld [vmem:[%s21739_s5 + $0xc04] ss:$12 sps:$4 sm:$0xff]   ;;  %v16335_v14 = vld [vmem:[%s21738_s4 + $0xa88] ss:$12 sps:$4 sm:$0xff]   ;;  %v16332_v55 = vld [vmem:[%s21739_s5 + $0xc00] ss:$12 sps:$4 sm:$0xff]  }
 0x507   :  { %v8009_v16 = vpop.f32.mrf.mxu0  ;;  %v16338_v7 = vld [vmem:[%s21739_s5 + $0xb2c] ss:$12 sps:$4 sm:$0xff]   ;;  %v16336_v44 = vld [vmem:[%s21739_s5 + $0xb28] ss:$12 sps:$4 sm:$0xff]  }
 0x508   :  { %14643 = vmatpush3.bf16.msra.mxu1 %v16315_v48  ;;  %v16341_v48 = vld [vmem:[%s21739_s5 + $0xd0c] ss:$12 sps:$4 sm:$0xff]   ;;  %v16344_v58 = vld [vmem:[%s21739_s5 + $0xb14] ss:$12 sps:$4 sm:$0xff]  }
 0x509   :  { %10201 = vmatpush1.bf16.msra.mxu0 %v16312_v34  ;;  %14644 = vmatprep.subr.bf16.mxu1 %v16316_v54  ;;  %v16339_v54 = vld [vmem:[%s21739_s5 + $0xd08] ss:$12 sps:$4 sm:$0xff]  }
 0x50a   :  { %10202 = vmatprep.subr.bf16.mxu0 %v16319_v9  ;;  %v16347_v9 = vld [vmem:[%s21739_s5 + $0xcf4] ss:$12 sps:$4 sm:$0xff]  }
 0x50c   :  { %14645 = vmatpush3.bf16.msra.mxu1 %v16320_v46 }
 0x50d   :  { %10203 = vmatpush1.bf16.msra.mxu0 %v16317_v35  ;;  %14646 = vmatprep.subr.bf16.mxu1 %v16321_v43  ;;  %v16342_v35 = vld [vmem:[%s21739_s5 + $0xb10] ss:$12 sps:$4 sm:$0xff]  }
 0x50e   :  { %10204 = vmatprep.subr.bf16.mxu0 %v16324_v2  ;;  %v16345_v2 = vld [vmem:[%s21739_s5 + $0xcf0] ss:$12 sps:$4 sm:$0xff]  }
 0x510   :  { %14647 = vmatpush3.bf16.msra.mxu1 %v16325_v59  ;;  %v16350_v59 = vld [vmem:[%s21739_s5 + $0xafc] ss:$12 sps:$4 sm:$0xff]  }
 0x511   :  { %10205 = vmatpush1.bf16.msra.mxu0 %v16322_v19  ;;  %14648 = vmatprep.subr.bf16.mxu1 %v16326_v13  ;;  %v16353_v13 = vld [vmem:[%s21739_s5 + $0xcdc] ss:$12 sps:$4 sm:$0xff]  }
 0x512   :  { %10206 = vmatprep.subr.bf16.mxu0 %v16329_v21 }
 0x514   :  { %14649 = vmatpush3.bf16.msra.mxu1 %v16330_v4 }
 0x515   :  { %10207 = vmatpush1.bf16.msra.mxu0 %v16327_v1  ;;  %14650 = vmatprep.subr.bf16.mxu1 %v16331_v10  ;;  %v16348_v10 = vld [vmem:[%s21739_s5 + $0xaf8] ss:$12 sps:$4 sm:$0xff]  }
 0x516   :  { %10208 = vmatprep.subr.bf16.mxu0 %v16334_v20 }
 0x518   :  { %14651 = vmatpush3.bf16.msra.mxu1 %v16335_v14  ;;  %v16356_v14 = vld [vmem:[%s21739_s5 + $0xae4] ss:$12 sps:$4 sm:$0xff]  }
 0x519   :  { %10209 = vmatpush1.bf16.msra.mxu0 %v16332_v55  ;;  %v14596_v34 = vpop.f32.mrf.mxu1  ;;  %10143 = vmatprep.subr.bf16.mxu1 %v16338_v7  ;;  %v16359_v55 = vld [vmem:[%s21739_s5 + $0xcc4] ss:$12 sps:$4 sm:$0xff]  }
 0x51a   :  { %10218 = vmatprep.subr.bf16.mxu0 %v16341_v48 }
 0x51b   :  { %9510 = vmatmul.mubr.bf16.vlgmr.msra.gmra.mxu1 %v20764_v25  ;;  %v14597_v16 = vpop.f32.mrf.mxu1 }
 0x51c   :  { %9517 = vmatprep.mubr.bf16.mxu1 %v20775_v5  ;;  %10144 = vmatpush1.bf16.msra.mxu1 %v16336_v44  ;;  %v14598_v46 = vadd.f32 %v14597_v16, %v14596_v34  ;;  %v16354_v34 = vld [vmem:[%s21739_s5 + $0xae0] ss:$12 sps:$4 sm:$0xff]  }
 0x51d   :  { %10219 = vmatpush2.bf16.msra.mxu0 %v16339_v54  ;;  %v14599_v43 = vpop.f32.mrf.mxu1  ;;  %10145 = vmatprep.subr.bf16.mxu1 %v16344_v58  ;;  %v16357_v54 = vld [vmem:[%s21739_s5 + $0xcc0] ss:$12 sps:$4 sm:$0xff]  }
 0x51e   :  { %v7998_v19 = vadd.f32 %v14598_v46, %v20770_v11  ;;  %10220 = vmatprep.subr.bf16.mxu0 %v16347_v9  ;;  %v16351_v11 = vld [vmem:[%s21739_s5 + $0xcd8] ss:$12 sps:$4 sm:$0xff]   ;;  %v16360_v46 = vld [vmem:[%s21739_s5 + $0xac8] ss:$12 sps:$4 sm:$0xff]  }
 0x51f   :  { %v14600_v21 = vpop.f32.mrf.mxu1 }
 0x520   :  { %v20933_v4 = vadd.f32 %v7998_v19, %v20243_v57  ;;  %10146 = vmatpush1.bf16.msra.mxu1 %v16342_v35  ;;  %v14601_v1 = vadd.f32 %v14600_v21, %v14599_v43  ;;  %v16363_v35 = vld [vmem:[%s21739_s5 + $0xcb0] ss:$12 sps:$4 sm:$0xff]  }
 0x521   :  { %10221 = vmatpush2.bf16.msra.mxu0 %v16345_v2  ;;  %v14602_v20 = vpop.f32.mrf.mxu1  ;;  %10147 = vmatprep.subr.bf16.mxu1 %v16350_v59  ;;  %v16364_v2 = vld [vmem:[%s21739_s5 + $0xab0] ss:$12 sps:$4 sm:$0xff]   ;;  %v16367_v59 = vld [vmem:[%s21739_s5 + $0xc98] ss:$12 sps:$4 sm:$0xff]  }
 0x522   :  { %v8001_v57 = vadd.f32 %v14601_v1, %v20799_v3  ;;  %10222 = vmatprep.subr.bf16.mxu0 %v16353_v13  ;;  %v16370_v19 = vld [vmem:[%s21739_s5 + $0xa9c] ss:$12 sps:$4 sm:$0xff]   ;;  %v16368_v1 = vld [vmem:[%s21739_s5 + $0xa98] ss:$12 sps:$4 sm:$0xff]  }
 0x523   :  { %9518 = vmatmul.mubr.bf16.gmra.mxu1 %v20816_v28  ;;  %v14603_v7 = vpop.f32.mrf.mxu1 }
 0x524   :  { %v20950_v48 = vadd.f32 %v8001_v57, %v20260_v15  ;;  %10148 = vmatpush1.bf16.msra.mxu1 %v16348_v10  ;;  %10175 = vmatprep.mubr.bf16.mxu1 %v20594_v56  ;;  %v14604_v44 = vadd.f32 %v14603_v7, %v14602_v20  ;;  %v16362_v15 = vld [vmem:[%s21739_s5 + $0xacc] ss:$12 sps:$4 sm:$0xff]  }
 0x525   :  { %10223 = vmatpush2.bf16.msra.mxu0 %v16351_v11  ;;  %v14605_v3 = vpop.f32.mrf.mxu1  ;;  %10149 = vmatprep.subr.bf16.mxu1 %v16356_v14  ;;  %v16371_v10 = vld [vmem:[%s21739_s5 + $0xc80] ss:$12 sps:$4 sm:$0xff]   ;;  %v16374_v11 = vld [vmem:[%s21739_s5 + $0xa84] ss:$12 sps:$4 sm:$0xff]  }
 0x526   :  { %v8006_v58 = vadd.f32 %v14604_v44, %v20822_v26  ;;  %10224 = vmatprep.subr.bf16.mxu0 %v16359_v55  ;;  %v16372_v57 = vld [vmem:[%s21739_s5 + $0xa80] ss:$12 sps:$4 sm:$0xff]   ;;  %v16375_v55 = vld [vmem:[%s21739_s5 + $0xc68] ss:$12 sps:$4 sm:$0xff]  }
 0x527   :  { %v14606_v9 = vpop.f32.mrf.mxu1  ;;  %v16378_v7 = vld [vmem:[%s21739_s5 + $0xbec] ss:$12 sps:$4 sm:$0xff]   ;;  %v16376_v3 = vld [vmem:[%s21739_s5 + $0xbe8] ss:$12 sps:$4 sm:$0xff]  }
 0x528   :  { %v20964_v16 = vadd.f32 %v8006_v58, %v20274_v41  ;;  %10150 = vmatpush1.bf16.msra.mxu1 %v16354_v34  ;;  %v16366_v41 = vld [vmem:[%s21739_s5 + $0xab4] ss:$12 sps:$4 sm:$0xff]   ;;  %v16383_v58 = vld [vmem:[%s21739_s5 + $0xc38] ss:$12 sps:$4 sm:$0xff]   ;;  %v16386_v9 = vld [vmem:[%s21739_s5 + $0xbbc] ss:$12 sps:$4 sm:$0xff]  }
 0x529   :  { %10225 = vmatpush2.bf16.msra.mxu0 %v16357_v54  ;;  %10151 = vmatprep.subr.bf16.mxu1 %v16362_v15  ;;  %v16382_v54 = vld [vmem:[%s21739_s5 + $0xbd4] ss:$12 sps:$4 sm:$0xff]   ;;  %v16380_v15 = vld [vmem:[%s21739_s5 + $0xbd0] ss:$12 sps:$4 sm:$0xff]  }
 0x52a   :  { %v20972_v43 = vpop.f32.mrf.mxu0  ;;  %10293 = vmatprep.subr.bf16.mxu0 %v21754_v63 }
 0x52c   :  { %10227 = vmatmul.mubr.bf16.vlgmr.msra.gmra.mxu0 %v20625_v39  ;;  %10152 = vmatpush1.bf16.msra.mxu1 %v16360_v46  ;;  %v20979_v26 = vpop.f32.mrf.mxu0  ;;  %v16384_v46 = vld [vmem:[%s21739_s5 + $0xbb8] ss:$12 sps:$4 sm:$0xff]  }
 0x52d   :  { %14134 = vmatprep.mubr.msk.bf16.mxu0 %vm2307_vm8, %v20631_v24  ;;  %10294 = vmatpush1.bf16.msra.mxu0 %v16363_v35  ;;  %v16387_v35 = vld [vmem:[%s21739_s5 + $0xc20] ss:$12 sps:$4 sm:$0xff]  }
 0x52e   :  { %v20992_v13 = vpop.f32.mrf.mxu0  ;;  %10153 = vmatprep.subr.bf16.mxu1 %v16366_v41  ;;  %10295 = vmatprep.subr.bf16.mxu0 %v21754_v63  ;;  %v16390_v41 = vld [vmem:[%s21739_s5 + $0xba4] ss:$12 sps:$4 sm:$0xff]  }
 0x530   :  { %10154 = vmatpush1.bf16.msra.mxu1 %v16364_v2  ;;  %v20995_v21 = vpop.f32.mrf.mxu0  ;;  %v16388_v2 = vld [vmem:[%s21739_s5 + $0xba0] ss:$12 sps:$4 sm:$0xff]  }
 0x531   :  { %10296 = vmatpush1.bf16.msra.mxu0 %v16367_v59  ;;  %10155 = vmatprep.subr.bf16.mxu1 %v16370_v19  ;;  %v16391_v59 = vld [vmem:[%s21739_s5 + $0xc08] ss:$12 sps:$4 sm:$0xff]   ;;  %v16394_v19 = vld [vmem:[%s21739_s5 + $0xb8c] ss:$12 sps:$4 sm:$0xff]  }
 0x532   :  { %v21003_v20 = vpop.f32.mrf.mxu0  ;;  %10297 = vmatprep.subr.bf16.mxu0 %v21754_v63 }
 0x534   :  { %10237 = vmatmul.mubr.bf16.gmra.mxu0 %v20660_v23  ;;  %10156 = vmatpush1.bf16.msra.mxu1 %v16368_v1  ;;  %v21010_v14 = vpop.f32.mrf.mxu0  ;;  %v16392_v1 = vld [vmem:[%s21739_s5 + $0xb88] ss:$12 sps:$4 sm:$0xff]  }
 0x535   :  { %10298 = vmatpush1.bf16.msra.mxu0 %v16371_v10  ;;  %14135 = vmatprep.mubr.msk.bf16.mxu0 %vm2307_vm8, %v20478_v49  ;;  %v16379_v49 = vld [vmem:[%s21739_s5 + $0xc50] ss:$12 sps:$4 sm:$0xff]  }
 0x536   :  { %v8680_v44 = vpop.f32.mrf.mxu0  ;;  %10157 = vmatprep.subr.bf16.mxu1 %v16374_v11  ;;  %10299 = vmatprep.subr.bf16.mxu0 %v21754_v63  ;;  %v16395_v10 = vld [vmem:[%s21739_s5 + $0xd10] ss:$12 sps:$4 sm:$0xff]   ;;  %v16398_v11 = vld [vmem:[%s21739_s5 + $0xb74] ss:$12 sps:$4 sm:$0xff]  }
 0x537   :  { %v16400_v44 = vld [vmem:[%s21739_s5 + $0xb58] ss:$12 sps:$4 sm:$0xff]  }
 0x538   :  { %10158 = vmatpush1.bf16.msra.mxu1 %v16372_v57  ;;  %v8681_v34 = vpop.f32.mrf.mxu0  ;;  %v16396_v57 = vld [vmem:[%s21739_s5 + $0xb70] ss:$12 sps:$4 sm:$0xff]  }
 0x539   :  { %10300 = vmatpush1.bf16.msra.mxu0 %v16375_v55  ;;  %10159 = vmatprep.subr.bf16.mxu1 %v16378_v7  ;;  %v16399_v55 = vld [vmem:[%s21739_s5 + $0xcf8] ss:$12 sps:$4 sm:$0xff]   ;;  %v16402_v7 = vld [vmem:[%s21739_s5 + $0xb5c] ss:$12 sps:$4 sm:$0xff]   ;;  %v16403_v34 = vld [vmem:[%s21739_s5 + $0xce0] ss:$12 sps:$4 sm:$0xff]  }
 0x53a   :  { %10301 = vmatprep.subr.bf16.mxu0 %v21754_v63 }
 0x53c   :  { %10160 = vmatpush2.bf16.msra.mxu1 %v16376_v3  ;;  %v16406_v3 = vld [vmem:[%s21739_s5 + $0xb44] ss:$12 sps:$4 sm:$0xff]  }
 0x53d   :  { %10302 = vmatpush1.bf16.msra.mxu0 %v16379_v49  ;;  %10161 = vmatprep.subr.bf16.mxu1 %v16382_v54  ;;  %v16404_v49 = vld [vmem:[%s21739_s5 + $0xb40] ss:$12 sps:$4 sm:$0xff]   ;;  %v16407_v54 = vld [vmem:[%s21739_s5 + $0xcc8] ss:$12 sps:$4 sm:$0xff]  }
 0x53e   :  { %10303 = vmatprep.subr.bf16.mxu0 %v21754_v63 }
 0x540   :  { %10162 = vmatpush2.bf16.msra.mxu1 %v16380_v15  ;;  %v16408_v15 = vld [vmem:[%s21739_s5 + $0xbf0] ss:$12 sps:$4 sm:$0xff]  }
 0x541   :  { %10304 = vmatpush1.bf16.msra.mxu0 %v16383_v58  ;;  %10163 = vmatprep.subr.bf16.mxu1 %v16386_v9  ;;  %v4912_v58 = vadd.f32 %v19281_v8, %v19438_v17 }
 0x542   :  { %10305 = vmatprep.subr.bf16.mxu0 %v21754_v63 }
 0x544   :  { %10164 = vmatpush2.bf16.msra.mxu1 %v16384_v46  ;;  %v16409_v46 = vld [vmem:[%s21739_s5 + $0xb30] ss:$12 sps:$4 sm:$0xff]  }
 0x545   :  { %10306 = vmatpush1.bf16.msra.mxu0 %v16387_v35  ;;  %10165 = vmatprep.subr.bf16.mxu1 %v16390_v41  ;;  %v5507_v35 = vadd.f32 %v19768_v50, %v4912_v58 }
 0x546   :  { %10307 = vmatprep.subr.bf16.mxu0 %v21754_v63 }
 0x548   :  { %10166 = vmatpush2.bf16.msra.mxu1 %v16388_v2 }
 0x549   :  { %10308 = vmatpush1.bf16.msra.mxu0 %v16391_v59  ;;  %10167 = vmatprep.subr.bf16.mxu1 %v16394_v19  ;;  %v16411_v19 = vld [vmem:[%s21739_s5 + $0xb18] ss:$12 sps:$4 sm:$0xff]  }
 0x54a   :  { %10317 = vmatprep.subr.bf16.mxu0 %v21754_v63 }
 0x54c   :  { %10168 = vmatpush2.bf16.msra.mxu1 %v16392_v1  ;;  %v5558_v1 = vadd.f32 %v19617_v61, %v5507_v35  ;;  %v16421_v35 = vld [vmem:[%s21739_s5 + $0xaa0] ss:$12 sps:$4 sm:$0xff]  }
 0x54d   :  { %10318 = vmatpush2.bf16.msra.mxu0 %v16395_v10  ;;  %10169 = vmatprep.subr.bf16.mxu1 %v16398_v11 }
 0x54e   :  { %10319 = vmatprep.subr.bf16.mxu0 %v21754_v63 }
 0x550   :  { %10170 = vmatpush2.bf16.msra.mxu1 %v16396_v57 }
 0x551   :  { %10320 = vmatpush2.bf16.msra.mxu0 %v16399_v55  ;;  %10171 = vmatprep.subr.bf16.mxu1 %v16402_v7 }
 0x552   :  { %10321 = vmatprep.subr.bf16.mxu0 %v21754_v63 }
 0x554   :  { %10172 = vmatpush2.bf16.msra.mxu1 %v16400_v44 }
 0x555   :  { %10322 = vmatpush2.bf16.msra.mxu0 %v16403_v34  ;;  %10173 = vmatprep.subr.bf16.mxu1 %v16406_v3 }
 0x556   :  { %10323 = vmatprep.subr.bf16.mxu0 %v21754_v63  ;;  %v16410_v63 = vld [vmem:[%s21739_s5 + $0xbd8] ss:$12 sps:$4 sm:$0xff]  }
 0x558   :  { %10174 = vmatpush2.bf16.msra.mxu1 %v16404_v49 }
 0x559   :  { %10324 = vmatpush2.bf16.msra.mxu0 %v16407_v54  ;;  %v8615_v9 = vpop.f32.mrf.mxu1  ;;  %14664 = vmatprep.subr.bf16.mxu1 %v16408_v15  ;;  %v16415_v54 = vld [vmem:[%s21739_s5 + $0xae8] ss:$12 sps:$4 sm:$0xff]  }
 0x55a   :  { %v8667_v41 = vadd.f32 %v20972_v43, %v8615_v9  ;;  %v21111_v2 = vpop.f32.mrf.mxu0  ;;  %v16418_v9 = vld [vmem:[%s21739_s5 + $0xb78] ss:$12 sps:$4 sm:$0xff]  }
 0x55b   :  { %10176 = vmatmul.mubr.bf16.vlgmr.msra.gmra.mxu1 %v20764_v25  ;;  %v8617_v8 = vpop.f32.mrf.mxu1 }
 0x55c   :  { %v21118_v17 = vadd.f32 %v8667_v41, %v20434_v30  ;;  %10326 = vmatmul.mubr.bf16.vlgmr.msra.gmra.mxu0 %v20625_v39  ;;  %10185 = vmatprep.mubr.bf16.mxu1 %v20775_v5  ;;  %v8669_v50 = vadd.f32 %v20979_v26, %v8617_v8  ;;  %v8767_v59 = vpop.f32.mrf.mxu0  ;;  %v16412_v26 = vld [vmem:[%s21739_s5 + $0xbc0] ss:$12 sps:$4 sm:$0xff]   ;;  %v16422_v41 = vld [vmem:[%s21739_s5 + $0xb48] ss:$12 sps:$4 sm:$0xff]  }
 0x55d   :  { %14665 = vmatpush3.bf16.msra.mxu1 %v16409_v46  ;;  %14136 = vmatprep.mubr.msk.bf16.mxu0 %vm2307_vm8, %v20631_v24  ;;  %v8619_v43 = vpop.f32.mrf.mxu1  ;;  %v7221_v24 = vadd.f32 %v20463_v40, %v5558_v1  ;;  %v16420_v46 = vld [vmem:[%s21739_s5 + $0xb60] ss:$12 sps:$4 sm:$0xff]  }
 0x55e   :  { %v21130_v30 = vadd.f32 %v8669_v50, %v20445_v47  ;;  %v8671_v39 = vadd.f32 %v20992_v13, %v8619_v43  ;;  %v8768_v10 = vpop.f32.mrf.mxu0  ;;  %14666 = vmatprep.subr.bf16.mxu1 %v16410_v63  ;;  %v16413_v13 = vld [vmem:[%s21739_s5 + $0xb00] ss:$12 sps:$4 sm:$0xff]   ;;  %v16423_v63 = vld [vmem:[%s21739_s5 + $0xa88] ss:$12 sps:$4 sm:$0xff]  }
 0x55f   :  { %v8621_v11 = vpop.f32.mrf.mxu1 }
 0x560   :  { %v21138_v57 = vadd.f32 %v8671_v39, %v20460_v37  ;;  %v8673_v55 = vadd.f32 %v20995_v21, %v8621_v11  ;;  %v8770_v61 = vpop.f32.mrf.mxu0  ;;  %v16414_v37 = vld [vmem:[%s21739_s5 + $0xba8] ss:$12 sps:$4 sm:$0xff]  }
 0x561   :  { %14667 = vmatpush3.bf16.msra.mxu1 %v16411_v19  ;;  %v8625_v47 = vpop.f32.mrf.mxu1 }
 0x562   :  { %v21144_v7 = vadd.f32 %v8673_v55, %v7221_v24  ;;  %v8677_v44 = vadd.f32 %v21003_v20, %v8625_v47  ;;  %v8773_v34 = vpop.f32.mrf.mxu0  ;;  %14668 = vmatprep.subr.bf16.mxu1 %v16412_v26 }
 0x563   :  { %10186 = vmatmul.mubr.bf16.gmra.mxu1 %v20816_v28  ;;  %v8627_v40 = vpop.f32.mrf.mxu1 }
 0x564   :  { %v21152_v21 = vadd.f32 %v8677_v44, %v20484_v51  ;;  %10334 = vmatmul.mubr.bf16.gmra.mxu0 %v20660_v23  ;;  %10277 = vmatprep.mubr.bf16.mxu1 %v20594_v56  ;;  %v8679_v3 = vadd.f32 %v21010_v14, %v8627_v40  ;;  %v8775_v49 = vpop.f32.mrf.mxu0  ;;  %v16416_v51 = vld [vmem:[%s21739_s5 + $0xb90] ss:$12 sps:$4 sm:$0xff]  }
 0x565   :  { %14669 = vmatpush3.bf16.msra.mxu1 %v16413_v13  ;;  %v8629_v20 = vpop.f32.mrf.mxu1  ;;  %v16417_v14 = vld [vmem:[%s21739_s5 + $0xad0] ss:$12 sps:$4 sm:$0xff]  }
 0x566   :  { %v21161_v15 = vadd.f32 %v8679_v3, %v20495_v31  ;;  %v8776_v58 = vpop.f32.mrf.mxu0  ;;  %14670 = vmatprep.subr.bf16.mxu1 %v16414_v37  ;;  %v16419_v31 = vld [vmem:[%s21739_s5 + $0xab8] ss:$12 sps:$4 sm:$0xff]  }
 0x567   :  { %v8630_v23 = vpop.f32.mrf.mxu1 }
 0x568   :  { %v8777_v56 = vpop.f32.mrf.mxu0 }
 0x569   :  { %14671 = vmatpush3.bf16.msra.mxu1 %v16415_v54 }
 0x56a   :  { %14672 = vmatprep.subr.bf16.mxu1 %v16416_v51 }
 0x56d   :  { %14673 = vmatpush3.bf16.msra.mxu1 %v16417_v14 }
 0x56e   :  { %14674 = vmatprep.subr.bf16.mxu1 %v16418_v9 }
 0x571   :  { %14675 = vmatpush3.bf16.msra.mxu1 %v16419_v31 }
 0x572   :  { %14676 = vmatprep.subr.bf16.mxu1 %v16420_v46 }
 0x575   :  { %14677 = vmatpush3.bf16.msra.mxu1 %v16421_v35 }
 0x576   :  { %14678 = vmatprep.subr.bf16.mxu1 %v16422_v41 }
 0x579   :  { %14679 = vmatpush3.bf16.msra.mxu1 %v16423_v63 }
 0x57a   :  { %v14624_v8 = vpop.f32.mrf.mxu1 }
 0x57c   :  { %10278 = vmatmul.mubr.bf16.vlgmr.msra.gmra.mxu1 %v20764_v25  ;;  %v14625_v50 = vpop.f32.mrf.mxu1 }
 0x57d   :  { %10285 = vmatprep.mubr.bf16.mxu1 %v20775_v5  ;;  %v14626_v59 = vadd.f32 %v14625_v50, %v14624_v8 }
 0x57e   :  { %v14627_v43 = vpop.f32.mrf.mxu1 }
 0x57f   :  { %v8766_v19 = vadd.f32 %v14626_v59, %v21111_v2 }
 0x580   :  { %v14628_v1 = vpop.f32.mrf.mxu1 }
 0x581   :  { %v21191_v39 = vadd.f32 %v8766_v19, %v20582_v62  ;;  %v14629_v26 = vadd.f32 %v14628_v1, %v14627_v43 }
 0x582   :  { %v14630_v11 = vpop.f32.mrf.mxu1 }
 0x583   :  { %v8769_v24 = vadd.f32 %v14629_v26, %v8768_v10 }
 0x584   :  { %10286 = vmatmul.mubr.bf16.gmra.mxu1 %v20816_v28  ;;  %v14631_v55 = vpop.f32.mrf.mxu1  ;;  %v3501_v28 = vadd.f32 %v18763_v42, %v18589_v18 }
 0x585   :  { %v21195_v61 = vadd.f32 %v8769_v24, %v20601_v53  ;;  %v14632_v25 = vadd.f32 %v14631_v55, %v14630_v11 }
 0x586   :  { %v14633_v47 = vpop.f32.mrf.mxu1  ;;  %v4102_v53 = vadd.f32 %v19088_v29, %v3501_v28  ;;  %v16428_v28 = vld [vmem:[%s21741_s7 + $0x108] sm:$0xff]  }
 0x587   :  { %v8774_v5 = vadd.f32 %v14632_v25, %v8773_v34  ;;  %v6343_v34 = vadd.f32 %v19961_v45, %v20118_v12 }
 0x588   :  { %v14634_v13 = vpop.f32.mrf.mxu1  ;;  %v4153_v23 = vadd.f32 %v18940_v36, %v4102_v53  ;;  %v16436_v53 = vld [vmem:[%s21741_s7 + $0x130] sm:$0xff]  }
 0x589   :  { %v21198_v44 = vadd.f32 %v8774_v5, %v20615_v60  ;;  %v16424_v13 = vld [vmem:[%s21741_s7 + $0x118] sm:$0xff]  }
 0x58a   :  { %v6453_v46 = vadd.f32 %v6343_v34, %v4153_v23  ;;  %14692 = vmatprep.subr.bf16.mxu1 %v16424_v13  ;;  %v16430_v23 = vld [vmem:[%s21741_s7 + $0x100] sm:$0xff]  }
 0x58b   :  { %v9460_v2 = vpop.f32.mrf.mxu0 }
 0x58c   :  { %v8015_v45 = vadd.f32 %v20814_v22, %v6453_v46 }
 0x58d   :  { %v9462_v37 = vpop.f32.mrf.mxu0 }
 0x58f   :  { %v9464_v62 = vpop.f32.mrf.mxu0 }
 0x591   :  { %v9466_v40 = vpop.f32.mrf.mxu0 }
 0x593   :  { %v9470_v3 = vpop.f32.mrf.mxu0 }
 0x595   :  { %v9472_v49 = vpop.f32.mrf.mxu0 }
 0x597   :  { %v9474_v10 = vpop.f32.mrf.mxu0 }
 0x598   :  { %v16433_v10 = vld [vmem:[%s21741_s7 + $0x138] sm:$0xff]  }
 0x599   :  { %v9475_v20 = vpop.f32.mrf.mxu0 }
 0x5ba   :  { %v9409_v54 = vpop.f32.mrf.mxu1 }
 0x5bb   :  { %v9461_v58 = vadd.f32 %v9460_v2, %v9409_v54  ;;  %v9559_v60 = vpop.f32.mrf.mxu0 }
 0x5bc   :  { %v9411_v51 = vpop.f32.mrf.mxu1 }
 0x5bd   :  { %v21207_v56 = vadd.f32 %v9461_v58, %v20785_v27  ;;  %v9463_v14 = vadd.f32 %v9462_v37, %v9411_v51  ;;  %v9561_v9 = vpop.f32.mrf.mxu0  ;;  %v16576_v37 = vmov 0.0  }
 0x5be   :  { %v9413_v31 = vpop.f32.mrf.mxu1  ;;  %14836 = vmatprep.subr.bf16.mxu0 %v16576_v37  ;;  %14844 = vmatprep.mubr.msk.bf16.mxu0 %vm16577_vm12, %v16576_v37 }
 0x5bf   :  { %v21210_v18 = vadd.f32 %v9463_v14, %v20796_v6  ;;  %v9465_v42 = vadd.f32 %v9464_v62, %v9413_v31  ;;  %v9562_v29 = vpop.f32.mrf.mxu0  ;;  %14837 = vmatpush3.bf16.msra.mxu0 %v16433_v10  ;;  %v16431_v31 = vld [vmem:[%s21741_s7 + $0xc0] sm:$0xff]  }
 0x5c0   :  { %v9415_v35 = vpop.f32.mrf.mxu1  ;;  %14838 = vmatprep.subr.bf16.mxu0 %v16576_v37 }
 0x5c1   :  { %v21214_v12 = vadd.f32 %v9465_v42, %v20811_v0  ;;  %v9467_v41 = vadd.f32 %v9466_v40, %v9415_v35  ;;  %v9564_v36 = vpop.f32.mrf.mxu0  ;;  %v16432_v42 = vld [vmem:[%s21741_s7 + $0xf8] sm:$0xff]  }
 0x5c2   :  { %v9419_v63 = vpop.f32.mrf.mxu1  ;;  %v16434_v35 = vld [vmem:[%s21741_s7 + $0xb8] sm:$0xff]  }
 0x5c3   :  { %v21216_v27 = vadd.f32 %v9467_v41, %v8015_v45  ;;  %v9471_v8 = vadd.f32 %v9470_v3, %v9419_v63  ;;  %v9567_v50 = vpop.f32.mrf.mxu0  ;;  %14839 = vmatpush3.bf16.msra.mxu0 %v16436_v53  ;;  %v16435_v41 = vld [vmem:[%s21741_s7 + $0xf0] sm:$0xff]  }
 0x5c4   :  { %v9421_v59 = vpop.f32.mrf.mxu1  ;;  %14840 = vmatprep.subr.bf16.mxu0 %v16576_v37  ;;  %v16437_v63 = vld [vmem:[%s21741_s7 + $0xb0] sm:$0xff]  }
 0x5c5   :  { %v21219_v43 = vadd.f32 %v9471_v8, %v20835_v33  ;;  %v9473_v6 = vadd.f32 %v9472_v49, %v9421_v59  ;;  %v9569_v19 = vpop.f32.mrf.mxu0  ;;  %v16425_v33 = vld [vmem:[%s21741_s7 + $0xd8] sm:$0xff]   ;;  %v16427_v49 = vld [vmem:[%s21741_s7 + $0xd0] sm:$0xff]  }
 0x5c6   :  { %v9423_v1 = vpop.f32.mrf.mxu1  ;;  %14693 = vmatpush3.bf16.msra.mxu1 %v16425_v33  ;;  %v21757_v33 = vsub.s32 0, %v17794_v38 }
 0x5c7   :  { %v21222_v26 = vadd.f32 %v9473_v6, %v20846_v32  ;;  %v9570_v22 = vpop.f32.mrf.mxu0  ;;  %v16426_v32 = vld [vmem:[%s21741_s7 + $0x110] sm:$0xff]   ;;  %v16440_v6 = vld [vmem:[%s21741_s7 + $0xa8] sm:$0xff]   ;;  %v16441_v1 = vld [vmem:[%s21741_s7 + $0xe0] sm:$0xff]  }
 0x5c8   :  { %v9424_v0 = vpop.f32.mrf.mxu1  ;;  %14694 = vmatprep.subr.bf16.mxu1 %v16426_v32 }
 0x5c9   :  { %v9571_v11 = vpop.f32.mrf.mxu0  ;;  %v16443_v0 = vld [vmem:[%s21741_s7 + $0xa0] sm:$0xff]  }
 0x5ca   :  { %14695 = vmatpush3.bf16.msra.mxu1 %v16427_v49  ;;  %v16445_v11 = vld [vmem:[%s21741_s7 + $0x78] sm:$0xff]  }
 0x5cb   :  { %14696 = vmatprep.subr.bf16.mxu1 %v16428_v28 }
 0x5db   :  { %v14652_v24 = vpop.f32.mrf.mxu1 }
 0x5dd   :  { %v14653_v55 = vpop.f32.mrf.mxu1 }
 0x5de   :  { %v14654_v25 = vadd.f32 %v14653_v55, %v14652_v24  ;;  %v21306_v55 = vld [vmem:[%s21740_s6] sm:$0x7] }
 0x5df   :  { %v14655_v47 = vpop.f32.mrf.mxu1  ;;  %v10364_v32 = vrot.slane %v21306_v55, %v21757_v33 }
 0x5e0   :  { %v9560_v5 = vadd.f32 %v14654_v25, %v9559_v60  ;;  %v16429_v60 = vld [vmem:[%s21741_s7 + $0xc8] sm:$0xff]  }
 0x5e1   :  { %v14656_v2 = vpop.f32.mrf.mxu1  ;;  %14697 = vmatpush3.bf16.msra.mxu1 %v16429_v60 }
 0x5e2   :  { %v21237_v62 = vadd.f32 %v9560_v5, %v20933_v4  ;;  %v14657_v40 = vadd.f32 %v14656_v2, %v14655_v47  ;;  %14698 = vmatprep.subr.bf16.mxu1 %v16430_v23 }
 0x5e3   :  { %v14658_v3 = vpop.f32.mrf.mxu1 }
 0x5e4   :  { %v9563_v20 = vadd.f32 %v14657_v40, %v9562_v29  ;;  %v16442_v29 = vld [vmem:[%s21741_s7 + $0x120] sm:$0xff]  }
 0x5e5   :  { %v14659_v4 = vpop.f32.mrf.mxu1  ;;  %14699 = vmatpush3.bf16.msra.mxu1 %v16431_v31 }
 0x5e6   :  { %v21252_v54 = vadd.f32 %v9563_v20, %v20950_v48  ;;  %v14660_v34 = vadd.f32 %v14659_v4, %v14658_v3  ;;  %v16439_v48 = vld [vmem:[%s21741_s7 + $0x128] sm:$0xff]   ;;  %14700 = vmatprep.subr.bf16.mxu1 %v16432_v42  ;;  %v21758_v20 = vsub.s32 1, %v17794_v38 }
 0x5e7   :  { %v14661_v58 = vpop.f32.mrf.mxu1  ;;  %14841 = vmatpush3.bf16.msra.mxu0 %v16439_v48 }
 0x5e8   :  { %v9568_v51 = vadd.f32 %v14660_v34, %v9567_v50  ;;  %14842 = vmatprep.subr.bf16.mxu0 %v16576_v37  ;;  %v16438_v50 = vld [vmem:[%s21741_s7 + $0xe8] sm:$0xff]   ;;  %v10368_v28 = vrot.slane %v21306_v55, %v21758_v20 }
 0x5e9   :  { %v14662_v14 = vpop.f32.mrf.mxu1  ;;  %14701 = vmatpush3.bf16.msra.mxu1 %v16434_v35 }
 0x5ea   :  { %v21265_v9 = vadd.f32 %v9568_v51, %v20964_v16  ;;  %14702 = vmatprep.subr.bf16.mxu1 %v16435_v41 }
 0x5eb   :  { %14843 = vmatpush3.bf16.msra.mxu0 %v16442_v29 }
 0x5ec   :  { %v10228_v46 = vpop.f32.mrf.mxu0  ;;  %14848 = vmatprep.subr.bf16.mxu0 %v16576_v37 }
 0x5ed   :  { %14703 = vmatpush3.bf16.msra.mxu1 %v16437_v63 }
 0x5ee   :  { %v10230_v16 = vpop.f32.mrf.mxu0  ;;  %14704 = vmatprep.subr.bf16.mxu1 %v16438_v50 }
 0x5f0   :  { %v10232_v45 = vpop.f32.mrf.mxu0 }
 0x5f1   :  { %14705 = vmatpush3.bf16.msra.mxu1 %v16440_v6 }
 0x5f2   :  { %v10234_v36 = vpop.f32.mrf.mxu0  ;;  %14706 = vmatprep.subr.bf16.mxu1 %v16441_v1 }
 0x5f4   :  { %v10238_v8 = vpop.f32.mrf.mxu0 }
 0x5f5   :  { %14707 = vmatpush3.bf16.msra.mxu1 %v16443_v0 }
 0x5f6   :  { %v10240_v59 = vpop.f32.mrf.mxu0  ;;  %14719 = vmatprep.subr.bf16.mxu1 %v16445_v11 }
 0x5f8   :  { %v10242_v19 = vpop.f32.mrf.mxu0 }
 0x5fa   :  { %v10243_v22 = vpop.f32.mrf.mxu0 }
 0x61b   :  { %v10177_v24 = vpop.f32.mrf.mxu1 }
 0x61c   :  { %v10229_v25 = vadd.f32 %v10228_v46, %v10177_v24  ;;  %v21308_v47 = vpop.f32.mrf.mxu0 }
 0x61d   :  { %v10179_v5 = vpop.f32.mrf.mxu1 }
 0x61e   :  { %v10341_v13 = vadd.f32 %v10229_v25, %v21118_v17  ;;  %v10231_v2 = vadd.f32 %v10230_v16, %v10179_v5  ;;  %v10329_v40 = vpop.f32.mrf.mxu0 }
 0x61f   :  { %v10181_v3 = vpop.f32.mrf.mxu1 }
 0x620   :  { %v10350_v49 = vmax.f32 %v21207_v56, %v10341_v13  ;;  %v10342_v10 = vadd.f32 %v10231_v2, %v21130_v30  ;;  %v10233_v4 = vadd.f32 %v10232_v45, %v10181_v3  ;;  %v21319_v53 = vpop.f32.mrf.mxu0 }
 0x621   :  { %v10183_v34 = vpop.f32.mrf.mxu1 }
 0x622   :  { %v10376_v17 = vadd.f32 %v10364_v32, %v10350_v49  ;;  %v10351_v58 = vmax.f32 %v21210_v18, %v10342_v10  ;;  %v10344_v60 = vadd.f32 %v10233_v4, %v21138_v57  ;;  %v10235_v51 = vadd.f32 %v10234_v36, %v10183_v34  ;;  %v10332_v23 = vpop.f32.mrf.mxu0 }
 0x623   :  { %v10187_v14 = vpop.f32.mrf.mxu1 }
 0x624   :  { %v10385_v48 = vmax.f32 %v10376_v17, 0.0  ;;  %v10377_v56 = vadd.f32 %v10368_v28, %v10351_v58  ;;  %v10353_v30 = vmax.f32 %v21214_v12, %v10344_v60  ;;  %v10345_v31 = vadd.f32 %v10235_v51, %v21144_v7  ;;  %v10335_v46 = vpop.f32.mrf.mxu0 }
 0x625   :  { %v10239_v42 = vadd.f32 %v10238_v8, %v10187_v14  ;;  %v10189_v29 = vpop.f32.mrf.mxu1  ;;  %v16578_v51 = vmov 1966171168  }
 0x626   :  { %v10397_v16 = vrot.slane %v10385_v48, 1  ;;  %v10386_v35 = vmax.f32 %v10377_v56, 0.0  ;;  %v10379_v45 = vadd.f32 %v10364_v32, %v10353_v30  ;;  %v10354_v41 = vmax.f32 %v21216_v27, %v10345_v31  ;;  %v10337_v18 = vpop.f32.mrf.mxu0 }
 0x627   :  { %v10347_v57 = vadd.f32 %v10239_v42, %v21152_v21  ;;  %v10241_v36 = vadd.f32 %v10240_v59, %v10189_v29  ;;  %v10191_v63 = vpop.f32.mrf.mxu1  ;;  %v10411_v23 = vunpack.c.l.s4 %v16578_v51  ;;  %v10372_v56 = vrot.slane %v21306_v55, %v2262_v52 }
 0x628   :  { %v10398_v50 = vrot.slane %v10386_v35, 1  ;;  %v10388_v6 = vmax.f32 %v10379_v45, 0.0  ;;  %v10380_v19 = vadd.f32 %v10368_v28, %v10354_v41  ;;  %v10338_v1 = vpop.f32.mrf.mxu0  ;;  %v10403_v22 = vmax.f32 %v10385_v48, %v10397_v16 }
 0x629   :  { %v10356_v12 = vmax.f32 %v21219_v43, %v10347_v57  ;;  %v10348_v7 = vadd.f32 %v10241_v36, %v21161_v15  ;;  %v10192_v8 = vpop.f32.mrf.mxu1  ;;  %v10412_v16 = vunpack.c.0.s8 %v10411_v23 }
 0x62a   :  { %v10404_v0 = vmax.f32 %v10386_v35, %v10398_v50  ;;  %v10476_v11 = vrot.slane %v10388_v6, 1  ;;  %v10389_v24 = vmax.f32 %v10380_v19, 0.0  ;;  %v10339_v25 = vpop.f32.mrf.mxu0 }
 0x62b   :  { %v10382_v27 = vadd.f32 %v10364_v32, %v10356_v12  ;;  %v10357_v5 = vmax.f32 %v21222_v26, %v10348_v7  ;;  %v10415_v63 = vsub.s32 %v10412_v16, %v17794_v38  ;;  %v16464_v25 = vld [vmem:[%s21741_s7 + $0x50] sm:$0xff]  }
 0x62c   :  { %v10409_v21 = vcombine.low %v10403_v22, %v10404_v0  ;;  %v10442_v59 = vcombine.high %v10403_v22, %v10404_v0  ;;  %v10477_v13 = vrot.slane %v10389_v24, 1  ;;  %v10482_v40 = vmax.f32 %v10388_v6, %v10476_v11 }
 0x62d   :  { %v10391_v33 = vmax.f32 %v10382_v27, 0.0  ;;  %v10383_v2 = vadd.f32 %v10368_v28, %v10357_v5 }
 0x62e   :  { %v10483_v3 = vmax.f32 %v10389_v24, %v10477_v13  ;;  %v10416_v1 = vrot.slane %v10409_v21, %v10415_v63  ;;  %v10450_v22 = vrot.slane %v10442_v59, %v10415_v63  ;;  %v21759_v24 = vlaneseq }
 0x62f   :  { %v10552_v49 = vrot.slane %v10391_v33, 1  ;;  %v10392_v43 = vmax.f32 %v10383_v2, 0.0 }
 0x630   :  { %v10488_v10 = vcombine.low %v10482_v40, %v10483_v3  ;;  %v10518_v15 = vcombine.high %v10482_v40, %v10483_v3  ;;  %vm21349_vm13 = vcmp.lt.s32.totalorder %v21759_v24, 320 }
 0x631   :  { %v10553_v20 = vrot.slane %v10392_v43, 1  ;;  %v21330_v4 = vmax.f32 %v10391_v33, %v10552_v49 }
 0x632   :  { %v10526_v21 = vrot.slane %v10518_v15, %v10415_v63 }
 0x633   :  { %v21332_v34 = vmax.f32 %v10392_v43, %v10553_v20 }
 0x635   :  { %v10564_v32 = vcombine.low %v21330_v4, %v21332_v34 }
 0x63c   :  { %v14680_v26 = vpop.f32.mrf.mxu1 }
 0x63e   :  { %v14681_v17 = vpop.f32.mrf.mxu1 }
 0x63f   :  { %v14682_v58 = vadd.f32 %v14681_v17, %v14680_v26  ;;  %v16579_v26 = vmov 1983009808   ;;  %v10571_v17 = vrot.slane %v10564_v32, %v10415_v63 }
 0x640   :  { %v14683_v60 = vpop.f32.mrf.mxu1  ;;  %v10598_v15 = vunpack.c.l.s4 %v16579_v26  ;;  %v16479_v26 = vld [vmem:[%s21741_s7 + $0x150] sm:$0xff]  }
 0x641   :  { %v10328_v28 = vadd.f32 %v14682_v58, %v21308_v47 }
 0x642   :  { %v14684_v14 = vpop.f32.mrf.mxu1 }
 0x643   :  { %v10343_v48 = vadd.f32 %v10328_v28, %v21191_v39  ;;  %v14685_v30 = vadd.f32 %v14684_v14, %v14683_v60  ;;  %v10599_v14 = vunpack.c.0.s8 %v10598_v15  ;;  %v16480_v15 = vld [vmem:[%s21741_s7 + $0x1d0] sm:$0xff]  }
 0x644   :  { %v14686_v31 = vpop.f32.mrf.mxu1 }
 0x645   :  { %v10352_v42 = vmax.f32 %v21237_v62, %v10343_v48  ;;  %v10331_v29 = vadd.f32 %v14685_v30, %v21319_v53  ;;  %v21375_v32 = vsub.s32 %v10599_v14, %v17794_v38 }
 0x646   :  { %v14687_v35 = vpop.f32.mrf.mxu1 }
 0x647   :  { %v10378_v45 = vadd.f32 %v10372_v56, %v10352_v42  ;;  %v10346_v47 = vadd.f32 %v10331_v29, %v21195_v61  ;;  %v14688_v41 = vadd.f32 %v14687_v35, %v14686_v31  ;;  %v16446_v35 = vld [vmem:[%s21741_s7 + $0x98] sm:$0xff]  }
 0x648   :  { %v14689_v18 = vpop.f32.mrf.mxu1 }
 0x649   :  { %v10387_v57 = vmax.f32 %v10378_v45, 0.0  ;;  %v10355_v39 = vmax.f32 %v21252_v54, %v10346_v47  ;;  %v10336_v36 = vadd.f32 %v14688_v41, %v10335_v46  ;;  %v16447_v41 = vld [vmem:[%s21741_s7 + $0x38] sm:$0xff]  }
 0x64a   :  { %v14690_v52 = vpop.f32.mrf.mxu1 }
 0x64b   :  { %v10399_v55 = vrot.slane %v10387_v57, 1  ;;  %v10381_v50 = vadd.f32 %v10372_v56, %v10355_v39  ;;  %v10349_v62 = vadd.f32 %v10336_v36, %v21198_v44  ;;  %v10495_v44 = vrot.slane %v10488_v10, %v10415_v63  ;;  %v16450_v36 = vld [vmem:[%s21741_s7 + $0x90] sm:$0xff]   ;;  %v16452_v52 = vld [vmem:[%s21741_s7 + $0x68] sm:$0xff]  }
 0x64d   :  { %v10405_v6 = vmax.f32 %v10387_v57, %v10399_v55  ;;  %v10390_v53 = vmax.f32 %v10381_v50, 0.0  ;;  %v10358_v19 = vmax.f32 %v21265_v9, %v10349_v62  ;;  %v16449_v57 = vld [vmem:[%s21741_s7 + $0x70] sm:$0xff]   ;;  %v16453_v50 = vld [vmem:[%s21741_s7 + $0x88] sm:$0xff]  }
 0x64f   :  { %v10423_v12 = vrot.slane %v10405_v6, %v10415_v63  ;;  %v10443_v61 = vcombine.high %v10405_v6, %v10405_v6  ;;  %v10478_v7 = vrot.slane %v10390_v53, 1  ;;  %v10384_v8 = vadd.f32 %v10372_v56, %v10358_v19  ;;  %v16454_v6 = vld [vmem:[%s21741_s7 + $0x28] sm:$0xff]  }
 0x651   :  { %v10424_v0 = vcombine.low %v10416_v1, %v10423_v12  ;;  %v10457_v54 = vrot.slane %v10443_v61, %v10415_v63  ;;  %v10484_v46 = vmax.f32 %v10390_v53, %v10478_v7  ;;  %v10393_v11 = vmax.f32 %v10384_v8, 0.0  ;;  %v16455_v53 = vld [vmem:[%s21741_s7 + $0x60] sm:$0xff]   ;;  %v16458_v7 = vld [vmem:[%s21741_s7 + $0x1b8] sm:$0xff]  }
 0x652   :  { %v16456_v1 = vld [vmem:[%s21741_s7 + $0x80] sm:$0xff]   ;;  %v16459_v8 = vld [vmem:[%s21741_s7 + $0x58] sm:$0xff]  }
 0x653   :  { %v10431_v27 = vrot.slane %v10424_v0, %v10415_v63  ;;  %v10458_v5 = vcombine.low %v10450_v22, %v10457_v54  ;;  %v10502_v13 = vrot.slane %v10484_v46, %v10415_v63  ;;  %v10519_v9 = vcombine.high %v10484_v46, %v10484_v46  ;;  %v16457_v61 = vld [vmem:[%s21741_s7 + $0x20] sm:$0xff]   ;;  %v16460_v0 = vld [vmem:[%s21741_s7 + $0x178] sm:$0xff]  }
 0x654   :  { %v10554_v33 = vrot.slane %v10393_v11, 1  ;;  %v16462_v46 = vld [vmem:[%s21741_s7 + $0x18] sm:$0xff]  }
 0x655   :  { %10437 = vst.msk [vmem:[#allocation3] ss:$2 sm:$0x7] %vm21349_vm13, %v10431_v27  ;;  %v10438_v59 = vcombine.high %v10431_v27, %v10431_v27  ;;  %v10465_v2 = vrot.slane %v10458_v5, %v10415_v63  ;;  %v10503_v40 = vcombine.low %v10495_v44, %v10502_v13  ;;  %v10533_v3 = vrot.slane %v10519_v9, %v10415_v63  ;;  %v16465_v44 = vld [vmem:[%s21741_s7 + $0x170] sm:$0xff]   ;;  %v16467_v5 = vld [vmem:[%s21741_s7 + $0x1a8] sm:$0xff]  }
 0x656   :  { %v10560_v49 = vmax.f32 %v10393_v11, %v10554_v33  ;;  %v16463_v11 = vld [vmem:[%s21741_s7 + $0x1b0] sm:$0xff]   ;;  %v16468_v13 = vld [vmem:[%s21741_s7 + $0x48] sm:$0xff]   ;;  %v16471_v33 = vld [vmem:[%s21741_s7 + $0x1a0] sm:$0xff]  }
 0x657   :  { %10441 = vst.msk [vmem:[#allocation3 + $0x6] ss:$2 sm:$0x7] %vm21349_vm13, %v10438_v59  ;;  %10468 = vst.msk [vmem:[#allocation3 + $0xc] ss:$2 sm:$0x7] %vm21349_vm13, %v10465_v2  ;;  %v10469_v43 = vcombine.high %v10465_v2, %v10465_v2  ;;  %v10510_v10 = vrot.slane %v10503_v40, %v10415_v63  ;;  %v10534_v20 = vcombine.low %v10526_v21, %v10533_v3 }
 0x658   :  { %v10578_v58 = vrot.slane %v10560_v49, %v10415_v63  ;;  %v16466_v27 = vld [vmem:[%s21741_s7 + $0x10] sm:$0xff]   ;;  %v16469_v9 = vld [vmem:[%s21741_s7 + $0x168] sm:$0xff]   ;;  %v16472_v59 = vld [vmem:[%s21741_s7 + $0x40] sm:$0xff]  }
 0x659   :  { %10472 = vst.msk [vmem:[#allocation3 + $0x12] ss:$2 sm:$0x7] %vm21349_vm13, %v10469_v43  ;;  %10513 = vst.msk [vmem:[#allocation3 + $0x18] ss:$2 sm:$0x7] %vm21349_vm13, %v10510_v10  ;;  %v10514_v60 = vcombine.high %v10510_v10, %v10510_v10  ;;  %v10541_v28 = vrot.slane %v10534_v20, %v10415_v63 }
 0x65a   :  { %v10579_v51 = vcombine.low %v10571_v17, %v10578_v58  ;;  %v16470_v21 = vld [vmem:[%s21741_s7 + $0x8] sm:$0xff]   ;;  %v16473_v2 = vld [vmem:[%s21741_s7 + $0x160] sm:$0xff]   ;;  %v16475_v3 = vld [vmem:[%s21741_s7 + $0x198] sm:$0xff]  }
 0x65b   :  { %10517 = vst.msk [vmem:[#allocation3 + $0x1] ss:$2 sm:$0x7] %vm21349_vm13, %v10514_v60  ;;  %10544 = vst.msk [vmem:[#allocation3 + $0x7] ss:$2 sm:$0x7] %vm21349_vm13, %v10541_v28  ;;  %v10545_v23 = vcombine.high %v10541_v28, %v10541_v28 }
 0x65c   :  { %v10586_v4 = vrot.slane %v10579_v51, %v10415_v63  ;;  %v16451_v63 = vld [vmem:[%s21741_s7 + $0x30] sm:$0xff]   ;;  %v16474_v40 = vld [vmem:[%s21741_s7] sm:$0xff]   ;;  %v16476_v49 = vld [vmem:[%s21741_s7 + $0x158] sm:$0xff]  }
 0x65d   :  { %10548 = vst.msk [vmem:[#allocation3 + $0xd] ss:$2 sm:$0x7] %vm21349_vm13, %v10545_v23  ;;  %v16477_v43 = vld [vmem:[%s21741_s7 + $0x1d8] sm:$0xff]   ;;  %v16478_v10 = vld [vmem:[%s21741_s7 + $0x190] sm:$0xff]   ;;  %v16481_v17 = vld [vmem:[%s21741_s7 + $0x188] sm:$0xff]  }
 0x65e   :  { %10589 = vst.msk [vmem:[#allocation3 + $0x13] ss:$2 sm:$0x7] %vm21349_vm13, %v10586_v4  ;;  %v10590_v34 = vcombine.high %v10586_v4, %v10586_v4  ;;  %v16482_v58 = vld [vmem:[%s21741_s7 + $0x148] sm:$0xff]   ;;  %v16484_v51 = vld [vmem:[%s21741_s7 + $0x180] sm:$0xff]  }
 0x65f   :  { %v16483_v28 = vld [vmem:[%s21741_s7 + $0x1c8] sm:$0xff]   ;;  %v16485_v4 = vld [vmem:[%s21741_s7 + $0x140] sm:$0xff]  }
 0x660   :  { %10593 = vst.msk [vmem:[#allocation3 + $0x19] ss:$2 sm:$0x7] %vm21349_vm13, %v10590_v34  ;;  %v16486_v34 = vld [vmem:[%s21741_s7 + $0x1c0] sm:$0xff]  }
 0x662   :  { %v10658_v48 = vld [vmem:[#allocation3 + $0x6] sm:$0x3f]  ;;  %v10594_v56 = vld [vmem:[#allocation3] sm:$0x3f] }
 0x663   :  { %v10660_v30 = vcombine.high %v10658_v48, %v10658_v48  ;;  %v10667_v31 = vrot.slane %v10658_v48, %v21375_v32  ;;  %v21381_v42 = vrot.slane %v10594_v56, %v21375_v32  ;;  %v10596_v62 = vcombine.high %v10594_v56, %v10594_v56  ;;  %v16487_v56 = vld [vmem:[%s21741_s7 + $0x258] sm:$0xff]  }
 0x664   :  { %v21408_v55 = vld [vmem:[#allocation3 + $0xc] sm:$0x3f] }
 0x665   :  { %v10674_v29 = vrot.slane %v10660_v30, %v21375_v32  ;;  %v10675_v16 = vcombine.high %v10667_v31, %v10667_v31  ;;  %v10611_v38 = vcombine.high %v21381_v42, %v21381_v42  ;;  %v10679_v18 = vpack.c.bf16 %v10667_v31, %v10667_v31  ;;  %v11398_v60 = vld [vmem:[#allocation3 + $0x12] sm:$0x3f]  ;;  %v16488_v31 = vld [vmem:[%s21741_s7 + $0x278] sm:$0xff]  }
 0x666   :  { %v21422_v19 = vrot.slane %v21408_v55, %v21375_v32  ;;  %v10610_v12 = vrot.slane %v10596_v62, %v21375_v32  ;;  %v10615_v20 = vpack.c.bf16 %v21381_v42, %v21381_v42  ;;  %v11131_v23 = vcombine.high %v21408_v55, %v21408_v55  ;;  %v16498_v55 = vld [vmem:[%s21741_s7 + $0x260] sm:$0xff]  }
 0x667   :  { %v10680_v45 = vpack.c.bf16 %v10675_v16, %v10675_v16  ;;  %v10681_v47 = vpack.c.bf16 %v10674_v29, %v10674_v29  ;;  %v10616_v39 = vpack.c.bf16 %v10611_v38, %v10611_v38  ;;  %v21523_v14 = vrot.slane %v11398_v60, %v21375_v32  ;;  %v16489_v29 = vld [vmem:[%s21741_s7 + $0x218] sm:$0xff]   ;;  %v16499_v62 = vld [vmem:[%s21741_s7 + $0x200] sm:$0xff]  }
 0x668   :  { %v11146_v22 = vcombine.high %v21422_v19, %v21422_v19  ;;  %v10617_v54 = vpack.c.bf16 %v10610_v12, %v10610_v12  ;;  %v11145_v48 = vrot.slane %v11131_v23, %v21375_v32  ;;  %v11150_v42 = vpack.c.bf16 %v21422_v19, %v21422_v19  ;;  %v16531_v23 = vld [vmem:[%s21743_s9 + $0x28] sm:$0xff]  }
 0x669   :  { %10878 = vmatprep.mubr.bf16.mxu1 %v10680_v45  ;;  %14845 = vmatmul.mubr.msk.bf16.vlgmr.msra.gmra.mxu0 %vm2307_vm8, %v10681_v47  ;;  %v11415_v30 = vcombine.high %v21523_v14, %v21523_v14  ;;  %v16492_v45 = vld [vmem:[%s21741_s7 + $0x270] sm:$0xff]  }
 0x66a   :  { %14849 = vmatpush3.bf16.msra.mxu0 %v16446_v35  ;;  %10879 = vmatmul.mubr.bf16.vlgmr.msra.gmra.mxu1 %v10679_v18  ;;  %v11151_v24 = vpack.c.bf16 %v11146_v22, %v11146_v22  ;;  %v11152_v16 = vpack.c.bf16 %v11145_v48, %v11145_v48  ;;  %v16491_v35 = vld [vmem:[%s21741_s7 + $0x250] sm:$0xff]   ;;  %v21563_v18 = vld [vmem:[#allocation3 + $0x18] sm:$0x3f]  ;;  %v16535_v48 = vld [vmem:[%s21743_s9 + $0x8] sm:$0xff]  }
 0x66b   :  { %14720 = vmatpush3.bf16.msra.mxu1 %v16447_v41  ;;  %11081 = vmatprep.mubr.bf16.mxu1 %v10616_v39  ;;  %v11420_v38 = vpack.c.bf16 %v11415_v30, %v11415_v30  ;;  %v16493_v47 = vld [vmem:[%s21741_s7 + $0x210] sm:$0xff]   ;;  %v16494_v41 = vld [vmem:[%s21741_s7 + $0x248] sm:$0xff]   ;;  %v11400_v39 = vcombine.high %v11398_v60, %v11398_v60 }
 0x66c   :  { %14850 = vmatprep.subr.bf16.mxu0 %v16576_v37  ;;  %14721 = vmatprep.subr.bf16.mxu1 %v16449_v57  ;;  %v16495_v57 = vld [vmem:[%s21741_s7 + $0x268] sm:$0xff]   ;;  %v16506_v22 = vld [vmem:[%s21741_s7 + $0x230] sm:$0xff]  }
 0x66d   :  { %14856 = vmatprep.mubr.msk.bf16.mxu0 %vm16577_vm12, %v16576_v37 }
 0x66e   :  { %14851 = vmatpush3.bf16.msra.mxu0 %v16450_v36  ;;  %v16496_v36 = vld [vmem:[%s21741_s7 + $0x208] sm:$0xff]  }
 0x66f   :  { %14722 = vmatpush3.bf16.msra.mxu1 %v16451_v63  ;;  %14852 = vmatprep.subr.bf16.mxu0 %v16576_v37  ;;  %v16497_v63 = vld [vmem:[%s21741_s7 + $0x240] sm:$0xff]  }
 0x670   :  { %14723 = vmatprep.subr.bf16.mxu1 %v16452_v52  ;;  %v21577_v52 = vrot.slane %v21563_v18, %v21375_v32 }
 0x672   :  { %14853 = vmatpush3.bf16.msra.mxu0 %v16453_v50  ;;  %v11414_v50 = vrot.slane %v11400_v39, %v21375_v32  ;;  %v11684_v19 = vcombine.high %v21577_v52, %v21577_v52  ;;  %v11688_v60 = vpack.c.bf16 %v21577_v52, %v21577_v52 }
 0x673   :  { %14724 = vmatpush3.bf16.msra.mxu1 %v16454_v6  ;;  %14854 = vmatprep.subr.bf16.mxu0 %v16576_v37  ;;  %v16500_v6 = vld [vmem:[%s21741_s7 + $0x2f8] sm:$0xff]  }
 0x674   :  { %14725 = vmatprep.subr.bf16.mxu1 %v16455_v53  ;;  %v16501_v53 = vld [vmem:[%s21741_s7 + $0x238] sm:$0xff]   ;;  %v11421_v12 = vpack.c.bf16 %v11414_v50, %v11414_v50 }
 0x676   :  { %14855 = vmatpush3.bf16.msra.mxu0 %v16456_v1  ;;  %v16502_v1 = vld [vmem:[%s21741_s7 + $0x2b8] sm:$0xff]  }
 0x677   :  { %14726 = vmatpush3.bf16.msra.mxu1 %v16457_v61  ;;  %14746 = vmatprep.subr.bf16.mxu0 %v16458_v7  ;;  %v16504_v61 = vld [vmem:[%s21741_s7 + $0x1f8] sm:$0xff]   ;;  %v16505_v7 = vld [vmem:[%s21741_s7 + $0x2f0] sm:$0xff]  }
 0x678   :  { %14727 = vmatprep.subr.bf16.mxu1 %v16459_v8  ;;  %v11689_v8 = vpack.c.bf16 %v11684_v19, %v11684_v19 }
 0x679   :  { %14857 = vmatmul.mubr.msk.bf16.vlgmr.msra.gmra.mxu0 %vm2307_vm8, %v10617_v54  ;;  %v16508_v54 = vld [vmem:[%s21741_s7 + $0x1f0] sm:$0xff]  }
 0x67a   :  { %14747 = vmatpush3.bf16.msra.mxu0 %v16460_v0  ;;  %11349 = vmatprep.mubr.bf16.mxu0 %v11151_v24  ;;  %v16507_v0 = vld [vmem:[%s21741_s7 + $0x2b0] sm:$0xff]   ;;  %v16511_v24 = vld [vmem:[%s21741_s7 + $0x2a8] sm:$0xff]  }
 0x67b   :  { %14728 = vmatpush3.bf16.msra.mxu1 %v16462_v46  ;;  %14748 = vmatprep.subr.bf16.mxu0 %v16463_v11  ;;  %v16509_v46 = vld [vmem:[%s21741_s7 + $0x2e8] sm:$0xff]  }
 0x67c   :  { %14729 = vmatprep.subr.bf16.mxu1 %v16464_v25  ;;  %v16510_v11 = vld [vmem:[%s21741_s7 + $0x228] sm:$0xff]  }
 0x67d   :  { %v16512_v25 = vld [vmem:[%s21741_s7 + $0x1e8] sm:$0xff]  }
 0x67e   :  { %14749 = vmatpush3.bf16.msra.mxu0 %v16465_v44  ;;  %v16513_v44 = vld [vmem:[%s21741_s7 + $0x2e0] sm:$0xff]  }
 0x67f   :  { %14730 = vmatpush3.bf16.msra.mxu1 %v16466_v27  ;;  %14750 = vmatprep.subr.bf16.mxu0 %v16467_v5  ;;  %v16514_v27 = vld [vmem:[%s21741_s7 + $0x220] sm:$0xff]  }
 0x680   :  { %14731 = vmatprep.subr.bf16.mxu1 %v16468_v13  ;;  %v16515_v5 = vld [vmem:[%s21741_s7 + $0x2a0] sm:$0xff]  }
 0x681   :  { %v16516_v13 = vld [vmem:[%s21741_s7 + $0x1e0] sm:$0xff]  }
 0x682   :  { %14751 = vmatpush3.bf16.msra.mxu0 %v16469_v9  ;;  %v16517_v9 = vld [vmem:[%s21741_s7 + $0x2d8] sm:$0xff]  }
 0x683   :  { %14732 = vmatpush3.bf16.msra.mxu1 %v16470_v21  ;;  %14752 = vmatprep.subr.bf16.mxu0 %v16471_v33  ;;  %v16518_v21 = vld [vmem:[%s21741_s7 + $0x298] sm:$0xff]  }
 0x684   :  { %14733 = vmatprep.subr.bf16.mxu1 %v16472_v59  ;;  %v16519_v33 = vld [vmem:[%s21741_s7 + $0x318] sm:$0xff]   ;;  %v16520_v59 = vld [vmem:[%s21741_s7 + $0x2d0] sm:$0xff]  }
 0x686   :  { %14753 = vmatpush3.bf16.msra.mxu0 %v16473_v2  ;;  %v11419_v2 = vpack.c.bf16 %v21523_v14, %v21523_v14  ;;  %v16532_v14 = vld [vmem:[%s21743_s9 + $0x20] sm:$0xff]  }
 0x687   :  { %14734 = vmatpush3.bf16.msra.mxu1 %v16474_v40  ;;  %14754 = vmatprep.subr.bf16.mxu0 %v16475_v3  ;;  %v16521_v40 = vld [vmem:[%s21741_s7 + $0x290] sm:$0xff]  }
 0x688   :  { %14860 = vmatprep.subr.bf16.mxu1 %v16576_v37  ;;  %v16522_v3 = vld [vmem:[%s21741_s7 + $0x310] sm:$0xff]  }
 0x68a   :  { %11082 = vmatmul.mubr.bf16.vlgmr.msra.gmra.mxu1 %v10615_v20  ;;  %14755 = vmatpush3.bf16.msra.mxu0 %v16476_v49  ;;  %v16523_v49 = vld [vmem:[%s21741_s7 + $0x2c8] sm:$0xff]   ;;  %v16526_v20 = vld [vmem:[%s21741_s7 + $0x2c0] sm:$0xff]  }
 0x68b   :  { %14861 = vmatpush3.bf16.msra.mxu1 %v16477_v43  ;;  %14756 = vmatprep.subr.bf16.mxu0 %v16478_v10  ;;  %v16524_v43 = vld [vmem:[%s21741_s7 + $0x288] sm:$0xff]  }
 0x68c   :  { %14862 = vmatprep.subr.bf16.mxu1 %v16576_v37  ;;  %14868 = vmatprep.mubr.msk.bf16.mxu1 %vm16577_vm12, %v16576_v37  ;;  %v16525_v10 = vld [vmem:[%s21741_s7 + $0x308] sm:$0xff]  }
 0x68e   :  { %14757 = vmatpush3.bf16.msra.mxu0 %v16479_v26  ;;  %v11669_v26 = vcombine.high %v21563_v18, %v21563_v18 }
 0x68f   :  { %14863 = vmatpush3.bf16.msra.mxu1 %v16480_v15  ;;  %14758 = vmatprep.subr.bf16.mxu0 %v16481_v17  ;;  %v16527_v15 = vld [vmem:[%s21741_s7 + $0x280] sm:$0xff]  }
 0x690   :  { %14864 = vmatprep.subr.bf16.mxu1 %v16576_v37  ;;  %v16528_v17 = vld [vmem:[%s21741_s7 + $0x300] sm:$0xff]  }
 0x692   :  { %14759 = vmatpush3.bf16.msra.mxu0 %v16482_v58  ;;  %v11683_v58 = vrot.slane %v11669_v26, %v21375_v32  ;;  %v16529_v32 = vld [vmem:[%s21743_s9 + $0x38] sm:$0xff]  }
 0x693   :  { %14865 = vmatpush3.bf16.msra.mxu1 %v16483_v28  ;;  %14760 = vmatprep.subr.bf16.mxu0 %v16484_v51  ;;  %v16530_v51 = vld [vmem:[%s21743_s9 + $0x30] sm:$0xff]  }
 0x694   :  { %14866 = vmatprep.subr.bf16.mxu1 %v16576_v37  ;;  %v11690_v28 = vpack.c.bf16 %v11683_v58, %v11683_v58 }
 0x696   :  { %14761 = vmatpush3.bf16.msra.mxu0 %v16485_v4  ;;  %v16533_v4 = vld [vmem:[%s21743_s9 + $0x18] sm:$0xff]  }
 0x697   :  { %14867 = vmatpush3.bf16.msra.mxu1 %v16486_v34  ;;  %14872 = vmatprep.subr.bf16.mxu0 %v16576_v37  ;;  %v16534_v34 = vld [vmem:[%s21743_s9 + $0x10] sm:$0xff]  }
 0x698   :  { %14773 = vmatprep.subr.bf16.mxu1 %v16487_v56  ;;  %v16536_v56 = vld [vmem:[%s21743_s9] sm:$0xff]  }
 0x699   :  { %11350 = vmatmul.mubr.bf16.vlgmr.msra.gmra.mxu0 %v11150_v42 }
 0x69a   :  { %14869 = vmatmul.mubr.msk.bf16.vlgmr.msra.gmra.mxu1 %vm2307_vm8, %v11152_v16  ;;  %14873 = vmatpush3.bf16.msra.mxu0 %v16488_v31 }
 0x69b   :  { %14774 = vmatpush3.bf16.msra.mxu1 %v16489_v29  ;;  %11618 = vmatprep.mubr.bf16.mxu1 %v11420_v38 }
 0x69c   :  { %14874 = vmatprep.subr.bf16.mxu0 %v16576_v37  ;;  %14775 = vmatprep.subr.bf16.mxu1 %v16491_v35 }
 0x69d   :  { %14880 = vmatprep.mubr.msk.bf16.mxu0 %vm16577_vm12, %v16576_v37 }
 0x69e   :  { %14875 = vmatpush3.bf16.msra.mxu0 %v16492_v45 }
 0x69f   :  { %14776 = vmatpush3.bf16.msra.mxu1 %v16493_v47  ;;  %14876 = vmatprep.subr.bf16.mxu0 %v16576_v37 }
 0x6a0   :  { %14777 = vmatprep.subr.bf16.mxu1 %v16494_v41 }
 0x6a2   :  { %14877 = vmatpush3.bf16.msra.mxu0 %v16495_v57 }
 0x6a3   :  { %14778 = vmatpush3.bf16.msra.mxu1 %v16496_v36  ;;  %14878 = vmatprep.subr.bf16.mxu0 %v16576_v37 }
 0x6a4   :  { %14779 = vmatprep.subr.bf16.mxu1 %v16497_v63 }
 0x6a6   :  { %14879 = vmatpush3.bf16.msra.mxu0 %v16498_v55 }
 0x6a7   :  { %14780 = vmatpush3.bf16.msra.mxu1 %v16499_v62  ;;  %14800 = vmatprep.subr.bf16.mxu0 %v16500_v6 }
 0x6a8   :  { %14781 = vmatprep.subr.bf16.mxu1 %v16501_v53 }
 0x6a9   :  { %14881 = vmatmul.mubr.msk.bf16.vlgmr.msra.gmra.mxu0 %vm2307_vm8, %v11421_v12 }
 0x6aa   :  { %14801 = vmatpush3.bf16.msra.mxu0 %v16502_v1  ;;  %11887 = vmatprep.mubr.bf16.mxu0 %v11689_v8 }
 0x6ab   :  { %14782 = vmatpush3.bf16.msra.mxu1 %v16504_v61  ;;  %14802 = vmatprep.subr.bf16.mxu0 %v16505_v7 }
 0x6ac   :  { %14783 = vmatprep.subr.bf16.mxu1 %v16506_v22 }
 0x6ae   :  { %14803 = vmatpush3.bf16.msra.mxu0 %v16507_v0 }
 0x6af   :  { %14784 = vmatpush3.bf16.msra.mxu1 %v16508_v54  ;;  %14804 = vmatprep.subr.bf16.mxu0 %v16509_v46 }
 0x6b0   :  { %14785 = vmatprep.subr.bf16.mxu1 %v16510_v11 }
 0x6b2   :  { %14805 = vmatpush3.bf16.msra.mxu0 %v16511_v24 }
 0x6b3   :  { %14786 = vmatpush3.bf16.msra.mxu1 %v16512_v25  ;;  %14806 = vmatprep.subr.bf16.mxu0 %v16513_v44 }
 0x6b4   :  { %14787 = vmatprep.subr.bf16.mxu1 %v16514_v27 }
 0x6b6   :  { %14807 = vmatpush3.bf16.msra.mxu0 %v16515_v5 }
 0x6b7   :  { %14788 = vmatpush3.bf16.msra.mxu1 %v16516_v13  ;;  %14808 = vmatprep.subr.bf16.mxu0 %v16517_v9 }
 0x6b8   :  { %14884 = vmatprep.subr.bf16.mxu1 %v16576_v37 }
 0x6ba   :  { %11619 = vmatmul.mubr.bf16.vlgmr.msra.gmra.mxu1 %v11419_v2  ;;  %14809 = vmatpush3.bf16.msra.mxu0 %v16518_v21 }
 0x6bb   :  { %14885 = vmatpush3.bf16.msra.mxu1 %v16519_v33  ;;  %14810 = vmatprep.subr.bf16.mxu0 %v16520_v59 }
 0x6bc   :  { %14886 = vmatprep.subr.bf16.mxu1 %v16576_v37  ;;  %14892 = vmatprep.mubr.msk.bf16.mxu1 %vm16577_vm12, %v16576_v37 }
 0x6be   :  { %14811 = vmatpush3.bf16.msra.mxu0 %v16521_v40 }
 0x6bf   :  { %14887 = vmatpush3.bf16.msra.mxu1 %v16522_v3  ;;  %14812 = vmatprep.subr.bf16.mxu0 %v16523_v49 }
 0x6c0   :  { %14888 = vmatprep.subr.bf16.mxu1 %v16576_v37 }
 0x6c2   :  { %14813 = vmatpush3.bf16.msra.mxu0 %v16524_v43 }
 0x6c3   :  { %14889 = vmatpush3.bf16.msra.mxu1 %v16525_v10  ;;  %14814 = vmatprep.subr.bf16.mxu0 %v16526_v20 }
 0x6c4   :  { %14890 = vmatprep.subr.bf16.mxu1 %v16576_v37 }
 0x6c6   :  { %14815 = vmatpush3.bf16.msra.mxu0 %v16527_v15  ;;  %v14402_v15 = vld [vmem:[%s21742_s8] ss:$0 sm:$0xff]  ;;  %s16580_s8 = smov [#allocation4]  }
 0x6c7   :  { %14891 = vmatpush3.bf16.msra.mxu1 %v16528_v17 }
 0x6c8   :  { %14896 = vmatprep.subr.bf16.mxu1 %v16576_v37 }
 0x6c9   :  { %11888 = vmatmul.mubr.bf16.vlgmr.msra.gmra.mxu0 %v11688_v60 }
 0x6ca   :  { %14893 = vmatmul.mubr.msk.bf16.vlgmr.msra.gmra.mxu1 %vm2307_vm8, %v11690_v28 }
 0x6cb   :  { %14912 = vmatprep.mubr.msk.bf16.mxu1 %vm16577_vm12, %v16576_v37  ;;  %14897 = vmatpush3.bf16.msra.mxu1 %v16529_v32 }
 0x6cc   :  { %14898 = vmatprep.subr.bf16.mxu1 %v16576_v37 }
 0x6cf   :  { %14899 = vmatpush3.bf16.msra.mxu1 %v16530_v51 }
 0x6d0   :  { %14900 = vmatprep.subr.bf16.mxu1 %v16576_v37 }
 0x6d3   :  { %14901 = vmatpush3.bf16.msra.mxu1 %v16531_v23  ;;  %v14403_v23 = vld [vmem:[%s21744_s10] ss:$0 sm:$0xff]  ;;  %s12077_s10 = sshll.u32 %s16580_s8, 4  ;;  %s12078_s10 = int_to_ptr.vmem [resolvable:$true] %s12077_s10 }
 0x6d4   :  { %14902 = vmatprep.subr.bf16.mxu1 %v16576_v37  ;;  %s16553_s15 = scalar_lea.vmem %s12078_s10, 32  ;;  %p16558_p1 = scmp.lt.s32.totalorder %s12078_s10, %s12078_s10 }
 0x6d5   :  { %p16554_p0 = scmp.ne.s32.totalorder %s12078_s10, %s16553_s15  ;;  %p16559_p2 = scmp.lt.s32.totalorder %s16553_s15, %s16553_s15 }
 0x6d7   :  { %14903 = vmatpush3.bf16.msra.mxu1 %v16532_v14  ;;  %p16560_p3 = por %p16559_p2, %p16558_p1 }
 0x6d8   :  { %14904 = vmatprep.subr.bf16.mxu1 %v16576_v37 }
 0x6d9   :  { %p16561_p4 = pnand %p16560_p3, %p16554_p0 }
 0x6db   :  { %14905 = vmatpush3.bf16.msra.mxu1 %v16533_v4 }
 0x6dc   :  { %14906 = vmatprep.subr.bf16.mxu1 %v16576_v37 }
 0x6df   :  { %14907 = vmatpush3.bf16.msra.mxu1 %v16534_v34 }
 0x6e0   :  { %14908 = vmatprep.subr.bf16.mxu1 %v16576_v37 }
 0x6e3   :  { %14909 = vmatpush3.bf16.msra.mxu1 %v16535_v48 }
 0x6e4   :  { %14910 = vmatprep.subr.bf16.mxu1 %v16576_v37 }
 0x6e7   :  { %14911 = vmatpush3.bf16.msra.mxu1 %v16536_v56 }
 0x729   :  { %v10920_v30 = vpop.f32.mrf.mxu0 }
 0x72a   :  { %v14708_v31 = vpop.f32.mrf.mxu1 }
 0x72b   :  { %v14846_v42 = vpop.f32.mrf.mxu0 }
 0x72c   :  { %v14709_v29 = vpop.f32.mrf.mxu1 }
 0x72d   :  { %v14710_v16 = vadd.f32 %v14709_v29, %v14708_v31  ;;  %v10923_v35 = vpop.f32.mrf.mxu0 }
 0x72e   :  { %v14711_v38 = vpop.f32.mrf.mxu1 }
 0x72f   :  { %v10921_v45 = vadd.f32 %v14710_v16, %v10920_v30  ;;  %v14847_v47 = vpop.f32.mrf.mxu0 }
 0x730   :  { %v14712_v41 = vpop.f32.mrf.mxu1 }
 0x739   :  { %v11123_v18 = vpop.f32.mrf.mxu0 }
 0x73b   :  { %v14858_v57 = vpop.f32.mrf.mxu0 }
 0x73d   :  { %v11126_v39 = vpop.f32.mrf.mxu0 }
 0x73f   :  { %v14859_v36 = vpop.f32.mrf.mxu0 }
 0x74a   :  { %v14735_v63 = vpop.f32.mrf.mxu1 }
 0x74c   :  { %v14736_v52 = vpop.f32.mrf.mxu1 }
 0x74d   :  { %v14737_v55 = vadd.f32 %v14736_v52, %v14735_v63 }
 0x74e   :  { %v14738_v50 = vpop.f32.mrf.mxu1 }
 0x74f   :  { %v11084_v37 = vadd.f32 %v14737_v55, %v10921_v45 }
 0x750   :  { %v14739_v62 = vpop.f32.mrf.mxu1 }
 0x751   :  { %v11124_v6 = vadd.f32 %v11123_v18, %v11084_v37 }
 0x759   :  { %v14762_v53 = vpop.f32.mrf.mxu0 }
 0x75a   :  { %v11391_v19 = vpop.f32.mrf.mxu1 }
 0x75b   :  { %v14763_v1 = vpop.f32.mrf.mxu0 }
 0x75c   :  { %v14870_v12 = vpop.f32.mrf.mxu1  ;;  %v14764_v5 = vadd.f32 %v14763_v1, %v14762_v53 }
 0x75d   :  { %v14765_v61 = vpop.f32.mrf.mxu0 }
 0x75e   :  { %v11394_v7 = vpop.f32.mrf.mxu1  ;;  %v11392_v9 = vadd.f32 %v14764_v5, %v11391_v19 }
 0x75f   :  { %v14766_v8 = vpop.f32.mrf.mxu0 }
 0x760   :  { %v14871_v22 = vpop.f32.mrf.mxu1  ;;  %v11397_v40 = vadd.f32 %v11392_v9, %v11124_v6 }
 0x769   :  { %v11660_v0 = vpop.f32.mrf.mxu0 }
 0x76b   :  { %v14882_v54 = vpop.f32.mrf.mxu0 }
 0x76d   :  { %v11663_v46 = vpop.f32.mrf.mxu0 }
 0x76f   :  { %v14883_v11 = vpop.f32.mrf.mxu0 }
 0x77a   :  { %v14789_v24 = vpop.f32.mrf.mxu1 }
 0x77c   :  { %v14790_v25 = vpop.f32.mrf.mxu1 }
 0x77d   :  { %v14791_v13 = vadd.f32 %v14790_v25, %v14789_v24 }
 0x77e   :  { %v14792_v44 = vpop.f32.mrf.mxu1 }
 0x77f   :  { %v11661_v33 = vadd.f32 %v14791_v13, %v11660_v0 }
 0x780   :  { %v14793_v27 = vpop.f32.mrf.mxu1 }
 0x781   :  { %v11666_v10 = vadd.f32 %v11661_v33, %v11397_v40 }
 0x789   :  { %v14816_v21 = vpop.f32.mrf.mxu0 }
 0x78a   :  { %v11929_v59 = vpop.f32.mrf.mxu1 }
 0x78b   :  { %v14817_v2 = vpop.f32.mrf.mxu0 }
 0x78c   :  { %v14818_v3 = vadd.f32 %v14817_v2, %v14816_v21  ;;  %v14894_v49 = vpop.f32.mrf.mxu1 }
 0x78d   :  { %v14819_v43 = vpop.f32.mrf.mxu0 }
 0x78e   :  { %v11930_v20 = vadd.f32 %v14818_v3, %v11929_v59  ;;  %v11932_v26 = vpop.f32.mrf.mxu1 }
 0x78f   :  { %v14820_v17 = vpop.f32.mrf.mxu0 }
 0x790   :  { %v11935_v58 = vadd.f32 %v11930_v20, %v11666_v10  ;;  %v14895_v60 = vpop.f32.mrf.mxu1 }
 0x792   :  { %v11943_v28 = vadd.f32 %v14402_v15, %v11935_v58 }
 0x794   :  { %v11944_v32 = vmax.f32 %v11943_v28, 0.0 }
 0x796   :  { %v11945_v51 = vpack.c.bf16 %v11944_v32, %v11944_v32 }
 0x798   :  { %14913 = vmatmul.mubr.bf16.vlgmr.msra.gmra.mxu1 %v11945_v51 }
 0x858   :  { %v12051_v14 = vpop.f32.mrf.mxu1 }
 0x859   :  { %v12052_v4 = vadd.f32 %v14403_v23, %v12051_v14 }
 0x85a   :  { %v14914_v34 = vpop.f32.mrf.mxu1 }
 0x85b   :  { %v12058_v48 = vsel %vm12057_vm14, %v12052_v4, -inf }
 0x85c   :  { %12059 = vmax.xlane.f32.xlu0 %v12058_v48  ;;  %v12054_v56 = vpop.f32.mrf.mxu1 }
 0x85e   :  { %v14915_v30 = vpop.f32.mrf.mxu1 }
 0x8e5   :  { %v12060_v31 = vpop.xlane.xlu0 %12059 }
 0x8e6   :  { %v12061_v42 = vsub.f32 %v12052_v4, %v12060_v31 }
 0x8e8   :  { %v12062_v29 = vmul.f32 1.442695, %v12061_v42 }
 0x8ea   :  { %16537 = vpow2.f32 %v12062_v29 }
 0x8f7   :  { %v16538_v16 = vpop.eup %16537 }
 0x8f8   :  { %v12064_v35 = vsel %vm12057_vm14, %v16538_v16, 0.0 }
 0x8f9   :  { %12065 = vadd.xlane.f32.xlu0 %v12064_v35 }
 0x982   :  { %v12066_v38 = vpop.xlane.xlu0 %12065 }
 0x983   :  { %16539 = vlog2.f32 %v12066_v38 }
 0x990   :  { %v16540_v45 = vpop.eup %16539 }
 0x991   :  { %v12068_v47 = vmul.f32 0.6931472, %v16540_v45 }
 0x993   :  { %v12069_v41 = vsub.f32 %v12061_v42, %v12068_v47 }
 0x995   :  { %12070 = vst.msk [vmem:[#allocation4] sm:$0x3] %vm12057_vm14, %v12069_v41 }
 0x996   :  { %16564 = shalt.err (!%p16561_p4)
}
 0x997   :  { %12080 = dma.vmem_to_hbm [thread:$0]  %s12078_s10, 32, %s21745_s11, [#allocation5]  }
 0x998   :  { %16573 = dma.done.wait [#allocation5], 32  }
 0x999   :  { %16574 = vsyncadd [#allocation5], 4294967264 }
 0x99a   :  { %12084 = vsyncpa [#allocation5], 1 }

</bundles_post_ra>
